<compile_context>
chip_gen: v5e
topology: v5e:2x2
jax: 0.10.0
libtpu: 0.0.40
codegen_flags: <defaults>
</compile_context>

<pallas_src>
import functools

import jax
import jax.numpy as jnp
from jax.experimental import pallas as pl
from jax.experimental.pallas import tpu as pltpu


# ----------------------------------------------------------------------------
# Kernel factory: whole forward for ONE batch element per grid step.
# ----------------------------------------------------------------------------
def _make_kernel(*, n_layers, nheads, nhid, embed_dim, num_patches, n_tok,
                 alpha, cls_pool):
    P, E, n = num_patches, embed_dim, n_tok

    def kernel(*refs):
        (xp_ref, adjb_ref, g1_ref, b1_ref, pew_ref, peb_ref, g2_ref, b2_ref,
         cls_ref, pos_ref) = refs[:10]
        idx = 10
        layer_refs = []
        for _ in range(n_layers):
            layer_refs.append(tuple(refs[idx:idx + 3]))
            idx += 3
        out_layer = tuple(refs[idx:idx + 3]); idx += 3
        linw_ref, linb_ref = refs[idx], refs[idx + 1]; idx += 2
        out_ref = refs[idx]; idx += 1
        slab_ref = refs[idx]                       # (n, slab_w) f32 scratch

        # ---------------- patch embedding: LN -> Linear -> LN ---------------
        xp = xp_ref[0].astype(jnp.float32)                       # (P, Dp)
        mu = jnp.mean(xp, axis=-1, keepdims=True)
        var = jnp.mean(jnp.square(xp - mu), axis=-1, keepdims=True)
        xn = (xp - mu) * jax.lax.rsqrt(var + 1e-5)
        xn = xn * g1_ref[...] + b1_ref[...]
        emb = jnp.dot(xn.astype(jnp.bfloat16), pew_ref[...],
                      preferred_element_type=jnp.float32) + peb_ref[...]
        mu2 = jnp.mean(emb, axis=-1, keepdims=True)
        var2 = jnp.mean(jnp.square(emb - mu2), axis=-1, keepdims=True)
        emb = (emb - mu2) * jax.lax.rsqrt(var2 + 1e-5)
        emb = emb * g2_ref[...] + b2_ref[...]                     # (P, E)

        # ------------- tokens = [cls ; emb] + pos, into the slab ------------
        tokens = jnp.concatenate([cls_ref[...], emb], axis=0) + pos_ref[...]
        slab_ref[...] = jnp.zeros_like(slab_ref)
        slab_ref[:, 0:E] = tokens                                 # (n, E)

        adj_bias = adjb_ref[...]                                  # (n, n) f32

        # ------------------------- one GAT layer -----------------------------
        def gat_layer(w_ref, asrc_ref, adstt_ref, heads, dout, concat):
            h_in = slab_ref[...].astype(jnp.bfloat16)             # (n, slab_w)
            wh = jnp.dot(h_in, w_ref[...],
                         preferred_element_type=jnp.float32)      # (n, H*dout)
            wh_b = wh.astype(jnp.bfloat16)
            # Source scores, column-major: (n, H)
            src = jnp.dot(wh_b, asrc_ref[...],
                          preferred_element_type=jnp.float32)
            # Target scores, lane-major via NT matmul: (H, n) — no transposes.
            dst_t = jax.lax.dot_general(
                adstt_ref[...], wh_b, (((1,), (1,)), ((), ())),
                preferred_element_type=jnp.float32)

            slab_ref[...] = jnp.zeros_like(slab_ref)              # reset slab
            acc = None
            for hh in range(heads):                                # static
                e = src[:, hh:hh + 1] + dst_t[hh:hh + 1, :]        # (n, n)
                e = jnp.where(e > 0, e, alpha * e)                 # LeakyReLU
                e = e + adj_bias                                   # mask
                e = e - jnp.max(e, axis=-1, keepdims=True)
                p = jnp.exp(e)
                inv = pl.reciprocal(jnp.sum(p, axis=-1, keepdims=True),
                                    approx=True)
                out_h = jnp.dot(p.astype(jnp.bfloat16),
                                wh_b[:, hh * dout:(hh + 1) * dout],
                                preferred_element_type=jnp.float32) * inv
                if concat:
                    slab_ref[:, hh * dout:(hh + 1) * dout] = out_h
                else:
                    acc = out_h if acc is None else acc + out_h
            if concat:
                s = slab_ref[...]
                slab_ref[...] = jnp.where(s > 0, s, jnp.exp(s) - 1.0)   # ELU
            else:
                slab_ref[:, 0:dout] = acc * (1.0 / heads)          # avg, no ELU

        for (w_ref, asrc_ref, adstt_ref) in layer_refs:
            gat_layer(w_ref, asrc_ref, adstt_ref, nheads, nhid, True)
        gat_layer(*out_layer, 1, nhid, False)                      # out_att

        # ---------------- pooling + final linear + log_softmax ---------------
        if cls_pool:
            pooled = slab_ref[0:1, :]                              # cls token
        else:
            pooled = jnp.mean(slab_ref[...], axis=0, keepdims=True)
        logits = jnp.dot(pooled, linw_ref[...],
                         preferred_element_type=jnp.float32) + linb_ref[...]
        m = jnp.max(logits, axis=-1, keepdims=True)
        lse = m + jnp.log(jnp.sum(jnp.exp(logits - m), axis=-1, keepdims=True))
        out_ref[0] = logits - lse

    return kernel


# ----------------------------------------------------------------------------
# pallas_call wrapper: grid = (batch,), "parallel".
# ----------------------------------------------------------------------------
def gat_pos_fused(xp, adj_bias, packed, *, alpha, cls_pool):
    B, num_patches, Dp = xp.shape
    n_tok, embed_dim = packed["pos"].shape
    slab_w, nclass = packed["lin_w"].shape
    n_layers = len(packed["layers"])
    nheads = packed["layers"][0][1].shape[1]
    nhid = packed["out"][0].shape[1]

    def fb(shape):      # full-block spec, broadcast across the grid
        return pl.BlockSpec(shape, lambda i: (0,) * len(shape))

    in_specs = [
        pl.BlockSpec((1, num_patches, Dp), lambda i: (i, 0, 0)),
        fb((n_tok, n_tok)),
        fb(packed["g1"].shape), fb(packed["b1"].shape),
        fb(packed["pe_w"].shape), fb(packed["pe_b"].shape),
        fb(packed["g2"].shape), fb(packed["b2"].shape),
        fb(packed["cls"].shape), fb(packed["pos"].shape),
    ]
    args = [xp, adj_bias, packed["g1"], packed["b1"], packed["pe_w"],
            packed["pe_b"], packed["g2"], packed["b2"], packed["cls"],
            packed["pos"]]
    for (w, a_src, a_dst_t) in packed["layers"]:
        in_specs += [fb(w.shape), fb(a_src.shape), fb(a_dst_t.shape)]
        args += [w, a_src, a_dst_t]
    w_o, a_src_o, a_dst_t_o = packed["out"]
    in_specs += [fb(w_o.shape), fb(a_src_o.shape), fb(a_dst_t_o.shape)]
    args += [w_o, a_src_o, a_dst_t_o]
    in_specs += [fb(packed["lin_w"].shape), fb(packed["lin_b"].shape)]
    args += [packed["lin_w"], packed["lin_b"]]

    kernel = _make_kernel(n_layers=n_layers, nheads=nheads, nhid=nhid,
                          embed_dim=embed_dim, num_patches=num_patches,
                          n_tok=n_tok, alpha=alpha, cls_pool=cls_pool)

    out = pl.pallas_call(
        kernel,
        out_shape=jax.ShapeDtypeStruct((B, 1, nclass), jnp.float32),
        grid=(B,),
        in_specs=in_specs,
        out_specs=pl.BlockSpec((1, 1, nclass), lambda i: (i, 0, 0)),
        scratch_shapes=[pltpu.VMEM((n_tok, slab_w), jnp.float32)],
        compiler_params=pltpu.CompilerParams(
            dimension_semantics=("parallel",)),
    )(*args)
    return out[:, 0, :]                                    # (B, nclass)


# ----------------------------------------------------------------------------
# Full forward pass (jitted): rearrange -> adj bias -> one fused kernel.
# ----------------------------------------------------------------------------
def gat_pos_forward(x, adj, packed, *, patch=28, alpha=0.2, cls=False):
    b, c, H, W = x.shape
    ph, pw = H // patch, W // patch
    num_patches = ph * pw

    # Rearrange 'b c (h p1) (w p2) -> b (h w) (p1 p2 c)'
    # TODO(synk): fold this rearrange into the kernel DMA (strided copy from
    # pl.ANY) so the raw image is only read once from HBM.
    xp = x.reshape(b, c, ph, patch, pw, patch)
    xp = jnp.transpose(xp, (0, 2, 4, 3, 5, 1))
    xp = xp.reshape(b, num_patches, patch * patch * c)

    # Adjacency as additive softmax bias, computed once per forward.
    adj_bias = jnp.where(adj > 0, 0.0, -9e15).astype(jnp.float32)

    return gat_pos_fused(xp, adj_bias, packed, alpha=alpha, cls_pool=cls)


# ----------------------------------------------------------------------------
# Host-side weight packing (run ONCE, outside jit).
# ----------------------------------------------------------------------------
def _slab_width(embed_dim, nheads, nhid):
    m = max(embed_dim, nheads * nhid, nhid)
    return max(128, ((m + 127) // 128) * 128)


def _pack_w(w, in_pad):
    # (heads, din, dout) -> (in_pad, heads*dout) bf16, input rows zero-padded.
    heads, din, dout = w.shape
    w2 = jnp.transpose(w, (1, 0, 2)).reshape(din, heads * dout)
    w2 = jnp.pad(w2, ((0, in_pad - din), (0, 0)))
    return w2.astype(jnp.bfloat16)


def _pack_a(a):
    # (heads, 2, dout) -> a_src (heads*dout, heads) block-diag (source scores),
    #                     a_dst_t (heads, heads*dout) block-diag (target scores,
    #                     pre-transposed so the kernel uses an NT matmul).
    heads, _, dout = a.shape
    a_src = jnp.zeros((heads * dout, heads), jnp.float32)
    a_dst_t = jnp.zeros((heads, heads * dout), jnp.float32)
    for h in range(heads):
        a_src = a_src.at[h * dout:(h + 1) * dout, h].set(a[h, 0])
        a_dst_t = a_dst_t.at[h, h * dout:(h + 1) * dout].set(a[h, 1])
    return a_src.astype(jnp.bfloat16), a_dst_t.astype(jnp.bfloat16)


def pack_params(params):
    embed_dim = params["pe_w"].shape[1]
    nheads, _, nhid = params["gat_layers"][0][1].shape
    slab_w = _slab_width(embed_dim, nheads, nhid)

    packed = {
        "g1": params["ln1_g"], "b1": params["ln1_b"],
        "pe_w": params["pe_w"].astype(jnp.bfloat16),
        "pe_b": params["pe_b"],
        "g2": params["ln2_g"], "b2": params["ln2_b"],
        "cls": params["cls_token"][0],                 # (1, E)
        "pos": params["pos_embedding"][0],             # (n_tok, E)
    }
    packed["layers"] = [(_pack_w(w, slab_w),) + _pack_a(a)
                        for (w, a) in params["gat_layers"]]
    ow, oa = params["out_att"]
    packed["out"] = (_pack_w(ow, slab_w),) + _pack_a(oa)
    lw = params["lin_w"]
    packed["lin_w"] = jnp.pad(lw, ((0, slab_w - lw.shape[0]), (0, 0)))
    packed["lin_b"] = params["lin_b"].reshape(1, -1)
    return packed


# ----------------------------------------------------------------------------
# Deterministic parameter construction + smoke test.
# ----------------------------------------------------------------------------
def make_params(key, *, embed_dim, nhid, nclass, nheads, n_layers, patch_dim_c,
                num_patches):
    ks = jax.random.split(key, 16)
    params = {
        "cls_token": jax.random.normal(ks[0], (1, 1, embed_dim), jnp.float32),
        "pos_embedding": jax.random.normal(
            ks[1], (1, num_patches + 1, embed_dim), jnp.float32),
        "ln1_g": jnp.ones((1, patch_dim_c), jnp.float32),
        "ln1_b": jnp.zeros((1, patch_dim_c), jnp.float32),
        "pe_w": 0.02 * jax.random.normal(ks[2], (patch_dim_c, embed_dim),
                                         jnp.float32),
        "pe_b": jnp.zeros((1, embed_dim), jnp.float32),
        "ln2_g": jnp.ones((1, embed_dim), jnp.float32),
        "ln2_b": jnp.zeros((1, embed_dim), jnp.float32),
    }
    gat_layers = []
    din = embed_dim
    for li in range(n_layers):
        kw, ka = jax.random.split(ks[3 + li], 2)
        gat_layers.append((
            0.1 * jax.random.normal(kw, (nheads, din, nhid), jnp.float32),
            0.1 * jax.random.normal(ka, (nheads, 2, nhid), jnp.float32),
        ))
        din = nheads * nhid                           # concat=True
    params["gat_layers"] = gat_layers
    kw, ka = jax.random.split(ks[10], 2)
    params["out_att"] = (
        0.1 * jax.random.normal(kw, (1, din, nhid), jnp.float32),
        0.1 * jax.random.normal(ka, (1, 2, nhid), jnp.float32),
    )
    params["lin_w"] = 0.1 * jax.random.normal(ks[11], (nhid, nclass),
                                              jnp.float32)
    params["lin_b"] = jnp.zeros((nclass,), jnp.float32)
    return params


if __name__ == "__main__":
    # Module-implied shapes: image 224x224x3, patch 28 -> 64 patches,
    # patch_dim*channels = 2352, tokens n = 65 (with cls token).
    B = 2
    IMG, PATCH, C = 224, 28, 3
    NUM_PATCHES = (IMG // PATCH) ** 2          # 64
    PATCH_DIM_C = PATCH * PATCH * C            # 2352
    EMBED_DIM, NHID, NCLASS, NHEADS, N_LAYERS = 32, 16, 10, 4, 2
    N_TOK = NUM_PATCHES + 1                    # 65

    key = jax.random.PRNGKey(0)
    kx, kadj, kp = jax.random.split(key, 3)

    x = jax.random.normal(kx, (B, C, IMG, IMG), jnp.float32)
    adj = (jax.random.uniform(kadj, (N_TOK, N_TOK)) < 0.3).astype(jnp.float32)
    adj = jnp.maximum(adj, jnp.eye(N_TOK, dtype=jnp.float32))  # self loops

    raw_params = make_params(kp, embed_dim=EMBED_DIM, nhid=NHID, nclass=NCLASS,
                             nheads=NHEADS, n_layers=N_LAYERS,
                             patch_dim_c=PATCH_DIM_C, num_patches=NUM_PATCHES)
    packed = pack_params(raw_params)           # once, outside jit

    fwd = jax.jit(functools.partial(gat_pos_forward, patch=PATCH, alpha=0.2,
                                    cls=False))
    out = fwd(x, adj, packed)
    out = jax.block_until_ready(out)
    assert out.shape == (B, NCLASS)
    assert bool(jnp.all(jnp.isfinite(out)))
    print("KERNEL_OK")
</pallas_src>

<mosaic_0001>
module attributes {stable_mosaic.version = 11 : i64} {
  func.func @kernel(%arg0: i32, %arg1: memref<1x64x2352xf32, #tpu.memory_space<vmem>>, %arg2: memref<65x65xf32, #tpu.memory_space<vmem>>, %arg3: memref<1x2352xf32, #tpu.memory_space<vmem>>, %arg4: memref<1x2352xf32, #tpu.memory_space<vmem>>, %arg5: memref<2352x32xbf16, #tpu.memory_space<vmem>>, %arg6: memref<1x32xf32, #tpu.memory_space<vmem>>, %arg7: memref<1x32xf32, #tpu.memory_space<vmem>>, %arg8: memref<1x32xf32, #tpu.memory_space<vmem>>, %arg9: memref<1x32xf32, #tpu.memory_space<vmem>>, %arg10: memref<65x32xf32, #tpu.memory_space<vmem>>, %arg11: memref<128x64xbf16, #tpu.memory_space<vmem>>, %arg12: memref<64x4xbf16, #tpu.memory_space<vmem>>, %arg13: memref<4x64xbf16, #tpu.memory_space<vmem>>, %arg14: memref<128x64xbf16, #tpu.memory_space<vmem>>, %arg15: memref<64x4xbf16, #tpu.memory_space<vmem>>, %arg16: memref<4x64xbf16, #tpu.memory_space<vmem>>, %arg17: memref<128x16xbf16, #tpu.memory_space<vmem>>, %arg18: memref<16x1xbf16, #tpu.memory_space<vmem>>, %arg19: memref<1x16xbf16, #tpu.memory_space<vmem>>, %arg20: memref<128x10xf32, #tpu.memory_space<vmem>>, %arg21: memref<1x10xf32, #tpu.memory_space<vmem>>, %arg22: memref<1x1x10xf32, #tpu.memory_space<vmem>>, %arg23: memref<65x128xf32, #tpu.memory_space<vmem>>) attributes {dimension_semantics = [#tpu.dimension_semantics<parallel>], iteration_bounds = array<i64: 2>, scalar_prefetch = 0 : i64, scratch_operands = 1 : i64, tpu.core_type = #tpu.core_type<tc>, window_params = [{transform_indices = @transform_0, window_bounds = array<i64: 1, 64, 2352>}, {pipeline_mode = #tpu.pipeline_mode<synchronous>, transform_indices = @transform_1, window_bounds = array<i64: 65, 65>}, {pipeline_mode = #tpu.pipeline_mode<synchronous>, transform_indices = @transform_2, window_bounds = array<i64: 1, 2352>}, {pipeline_mode = #tpu.pipeline_mode<synchronous>, transform_indices = @transform_3, window_bounds = array<i64: 1, 2352>}, {pipeline_mode = #tpu.pipeline_mode<synchronous>, transform_indices = @transform_4, window_bounds = array<i64: 2352, 32>}, {pipeline_mode = #tpu.pipeline_mode<synchronous>, transform_indices = @transform_5, window_bounds = array<i64: 1, 32>}, {pipeline_mode = #tpu.pipeline_mode<synchronous>, transform_indices = @transform_6, window_bounds = array<i64: 1, 32>}, {pipeline_mode = #tpu.pipeline_mode<synchronous>, transform_indices = @transform_7, window_bounds = array<i64: 1, 32>}, {pipeline_mode = #tpu.pipeline_mode<synchronous>, transform_indices = @transform_8, window_bounds = array<i64: 1, 32>}, {pipeline_mode = #tpu.pipeline_mode<synchronous>, transform_indices = @transform_9, window_bounds = array<i64: 65, 32>}, {pipeline_mode = #tpu.pipeline_mode<synchronous>, transform_indices = @transform_10, window_bounds = array<i64: 128, 64>}, {pipeline_mode = #tpu.pipeline_mode<synchronous>, transform_indices = @transform_11, window_bounds = array<i64: 64, 4>}, {pipeline_mode = #tpu.pipeline_mode<synchronous>, transform_indices = @transform_12, window_bounds = array<i64: 4, 64>}, {pipeline_mode = #tpu.pipeline_mode<synchronous>, transform_indices = @transform_13, window_bounds = array<i64: 128, 64>}, {pipeline_mode = #tpu.pipeline_mode<synchronous>, transform_indices = @transform_14, window_bounds = array<i64: 64, 4>}, {pipeline_mode = #tpu.pipeline_mode<synchronous>, transform_indices = @transform_15, window_bounds = array<i64: 4, 64>}, {pipeline_mode = #tpu.pipeline_mode<synchronous>, transform_indices = @transform_16, window_bounds = array<i64: 128, 16>}, {pipeline_mode = #tpu.pipeline_mode<synchronous>, transform_indices = @transform_17, window_bounds = array<i64: 16, 1>}, {pipeline_mode = #tpu.pipeline_mode<synchronous>, transform_indices = @transform_18, window_bounds = array<i64: 1, 16>}, {pipeline_mode = #tpu.pipeline_mode<synchronous>, transform_indices = @transform_19, window_bounds = array<i64: 128, 10>}, {pipeline_mode = #tpu.pipeline_mode<synchronous>, transform_indices = @transform_20, window_bounds = array<i64: 1, 10>}, {transform_indices = @transform_21, window_bounds = array<i64: 1, 1, 10>}]} {
    %c0 = arith.constant 0 : index
    %c0_0 = arith.constant 0 : index
    %c0_1 = arith.constant 0 : index
    %0 = vector.load %arg1[%c0, %c0_0, %c0_1] : memref<1x64x2352xf32, #tpu.memory_space<vmem>>, vector<1x64x2352xf32>
    %1 = vector.shape_cast %0 : vector<1x64x2352xf32> to vector<64x2352xf32>
    %cst = arith.constant dense<0.000000e+00> : vector<64xf32>
    %2 = vector.multi_reduction <add>, %1, %cst [1] : vector<64x2352xf32> to vector<64xf32>
    %3 = vector.shape_cast %2 : vector<64xf32> to vector<64x1xf32>
    %cst_2 = arith.constant 2.352000e+03 : f32
    %4 = vector.broadcast %cst_2 : f32 to vector<64x1xf32>
    %5 = arith.divf %3, %4 : vector<64x1xf32>
    %6 = vector.broadcast %5 : vector<64x1xf32> to vector<64x2352xf32>
    %7 = arith.subf %1, %6 : vector<64x2352xf32>
    %8 = arith.mulf %7, %7 : vector<64x2352xf32>
    %cst_3 = arith.constant dense<0.000000e+00> : vector<64xf32>
    %9 = vector.multi_reduction <add>, %8, %cst_3 [1] : vector<64x2352xf32> to vector<64xf32>
    %10 = vector.shape_cast %9 : vector<64xf32> to vector<64x1xf32>
    %cst_4 = arith.constant 2.352000e+03 : f32
    %11 = vector.broadcast %cst_4 : f32 to vector<64x1xf32>
    %12 = arith.divf %10, %11 : vector<64x1xf32>
    %13 = vector.broadcast %5 : vector<64x1xf32> to vector<64x2352xf32>
    %14 = arith.subf %1, %13 : vector<64x2352xf32>
    %cst_5 = arith.constant 9.99999974E-6 : f32
    %15 = vector.broadcast %cst_5 : f32 to vector<64x1xf32>
    %16 = arith.addf %12, %15 : vector<64x1xf32>
    %17 = math.rsqrt %16 : vector<64x1xf32>
    %18 = vector.broadcast %17 : vector<64x1xf32> to vector<64x2352xf32>
    %19 = arith.mulf %14, %18 : vector<64x2352xf32>
    %c0_6 = arith.constant 0 : index
    %c0_7 = arith.constant 0 : index
    %20 = vector.load %arg3[%c0_6, %c0_7] : memref<1x2352xf32, #tpu.memory_space<vmem>>, vector<1x2352xf32>
    %21 = vector.broadcast %20 : vector<1x2352xf32> to vector<64x2352xf32>
    %22 = arith.mulf %19, %21 : vector<64x2352xf32>
    %c0_8 = arith.constant 0 : index
    %c0_9 = arith.constant 0 : index
    %23 = vector.load %arg4[%c0_8, %c0_9] : memref<1x2352xf32, #tpu.memory_space<vmem>>, vector<1x2352xf32>
    %24 = vector.broadcast %23 : vector<1x2352xf32> to vector<64x2352xf32>
    %25 = arith.addf %22, %24 : vector<64x2352xf32>
    %26 = arith.truncf %25 : vector<64x2352xf32> to vector<64x2352xbf16>
    %c0_10 = arith.constant 0 : index
    %c0_11 = arith.constant 0 : index
    %27 = vector.load %arg5[%c0_10, %c0_11] : memref<2352x32xbf16, #tpu.memory_space<vmem>>, vector<2352x32xbf16>
    %cst_12 = arith.constant dense<0.000000e+00> : vector<64x32xf32>
    %28 = tpu.matmul %26, %27, %cst_12 {dimension_numbers = #tpu.dot_dimension_numbers<[1], [0], [0], [1], [0, 0, 1, 1], [], []>} : vector<64x2352xbf16>, vector<2352x32xbf16>, vector<64x32xf32> -> vector<64x32xf32>
    %c0_13 = arith.constant 0 : index
    %c0_14 = arith.constant 0 : index
    %29 = vector.load %arg6[%c0_13, %c0_14] : memref<1x32xf32, #tpu.memory_space<vmem>>, vector<1x32xf32>
    %30 = vector.broadcast %29 : vector<1x32xf32> to vector<64x32xf32>
    %31 = arith.addf %28, %30 : vector<64x32xf32>
    %cst_15 = arith.constant dense<0.000000e+00> : vector<64xf32>
    %32 = vector.multi_reduction <add>, %31, %cst_15 [1] : vector<64x32xf32> to vector<64xf32>
    %33 = vector.shape_cast %32 : vector<64xf32> to vector<64x1xf32>
    %cst_16 = arith.constant 3.200000e+01 : f32
    %34 = vector.broadcast %cst_16 : f32 to vector<64x1xf32>
    %35 = arith.divf %33, %34 : vector<64x1xf32>
    %36 = vector.broadcast %35 : vector<64x1xf32> to vector<64x32xf32>
    %37 = arith.subf %31, %36 : vector<64x32xf32>
    %38 = arith.mulf %37, %37 : vector<64x32xf32>
    %cst_17 = arith.constant dense<0.000000e+00> : vector<64xf32>
    %39 = vector.multi_reduction <add>, %38, %cst_17 [1] : vector<64x32xf32> to vector<64xf32>
    %40 = vector.shape_cast %39 : vector<64xf32> to vector<64x1xf32>
    %cst_18 = arith.constant 3.200000e+01 : f32
    %41 = vector.broadcast %cst_18 : f32 to vector<64x1xf32>
    %42 = arith.divf %40, %41 : vector<64x1xf32>
    %43 = vector.broadcast %35 : vector<64x1xf32> to vector<64x32xf32>
    %44 = arith.subf %31, %43 : vector<64x32xf32>
    %cst_19 = arith.constant 9.99999974E-6 : f32
    %45 = vector.broadcast %cst_19 : f32 to vector<64x1xf32>
    %46 = arith.addf %42, %45 : vector<64x1xf32>
    %47 = math.rsqrt %46 : vector<64x1xf32>
    %48 = vector.broadcast %47 : vector<64x1xf32> to vector<64x32xf32>
    %49 = arith.mulf %44, %48 : vector<64x32xf32>
    %c0_20 = arith.constant 0 : index
    %c0_21 = arith.constant 0 : index
    %50 = vector.load %arg7[%c0_20, %c0_21] : memref<1x32xf32, #tpu.memory_space<vmem>>, vector<1x32xf32>
    %51 = vector.broadcast %50 : vector<1x32xf32> to vector<64x32xf32>
    %52 = arith.mulf %49, %51 : vector<64x32xf32>
    %c0_22 = arith.constant 0 : index
    %c0_23 = arith.constant 0 : index
    %53 = vector.load %arg8[%c0_22, %c0_23] : memref<1x32xf32, #tpu.memory_space<vmem>>, vector<1x32xf32>
    %54 = vector.broadcast %53 : vector<1x32xf32> to vector<64x32xf32>
    %55 = arith.addf %52, %54 : vector<64x32xf32>
    %c0_24 = arith.constant 0 : index
    %c0_25 = arith.constant 0 : index
    %56 = vector.load %arg9[%c0_24, %c0_25] : memref<1x32xf32, #tpu.memory_space<vmem>>, vector<1x32xf32>
    %57 = tpu.concatenate %56, %55 in 0 : vector<1x32xf32>, vector<64x32xf32> -> vector<65x32xf32>
    %c0_26 = arith.constant 0 : index
    %c0_27 = arith.constant 0 : index
    %58 = vector.load %arg10[%c0_26, %c0_27] : memref<65x32xf32, #tpu.memory_space<vmem>>, vector<65x32xf32>
    %59 = arith.addf %57, %58 : vector<65x32xf32>
    %cst_28 = arith.constant 0.000000e+00 : f32
    %60 = vector.broadcast %cst_28 : f32 to vector<65x128xf32>
    %c0_29 = arith.constant 0 : index
    %c0_30 = arith.constant 0 : index
    %61 = vector.load %arg23[%c0_29, %c0_30] : memref<65x128xf32, #tpu.memory_space<vmem>>, vector<65x128xf32>
    tpu.vector_store %arg23[%c0_29, %c0_30], %60 {strides = array<i32>} : memref<65x128xf32, #tpu.memory_space<vmem>>, vector<65x128xf32>,
    %c0_31 = arith.constant 0 : index
    %c0_32 = arith.constant 0 : index
    %62 = vector.load %arg23[%c0_31, %c0_32] : memref<65x128xf32, #tpu.memory_space<vmem>>, vector<65x32xf32>
    tpu.vector_store %arg23[%c0_31, %c0_32], %59 {strides = array<i32>} : memref<65x128xf32, #tpu.memory_space<vmem>>, vector<65x32xf32>,
    %c0_33 = arith.constant 0 : index
    %c0_34 = arith.constant 0 : index
    %63 = vector.load %arg2[%c0_33, %c0_34] : memref<65x65xf32, #tpu.memory_space<vmem>>, vector<65x65xf32>
    %c0_35 = arith.constant 0 : index
    %c0_36 = arith.constant 0 : index
    %64 = vector.load %arg23[%c0_35, %c0_36] : memref<65x128xf32, #tpu.memory_space<vmem>>, vector<65x128xf32>
    %65 = arith.truncf %64 : vector<65x128xf32> to vector<65x128xbf16>
    %c0_37 = arith.constant 0 : index
    %c0_38 = arith.constant 0 : index
    %66 = vector.load %arg11[%c0_37, %c0_38] : memref<128x64xbf16, #tpu.memory_space<vmem>>, vector<128x64xbf16>
    %cst_39 = arith.constant dense<0.000000e+00> : vector<65x64xf32>
    %67 = tpu.matmul %65, %66, %cst_39 {dimension_numbers = #tpu.dot_dimension_numbers<[1], [0], [0], [1], [0, 0, 1, 1], [], []>} : vector<65x128xbf16>, vector<128x64xbf16>, vector<65x64xf32> -> vector<65x64xf32>
    %68 = arith.truncf %67 : vector<65x64xf32> to vector<65x64xbf16>
    %c0_40 = arith.constant 0 : index
    %c0_41 = arith.constant 0 : index
    %69 = vector.load %arg12[%c0_40, %c0_41] : memref<64x4xbf16, #tpu.memory_space<vmem>>, vector<64x4xbf16>
    %cst_42 = arith.constant dense<0.000000e+00> : vector<65x4xf32>
    %70 = tpu.matmul %68, %69, %cst_42 {dimension_numbers = #tpu.dot_dimension_numbers<[1], [0], [0], [1], [0, 0, 1, 1], [], []>} : vector<65x64xbf16>, vector<64x4xbf16>, vector<65x4xf32> -> vector<65x4xf32>
    %c0_43 = arith.constant 0 : index
    %c0_44 = arith.constant 0 : index
    %71 = vector.load %arg13[%c0_43, %c0_44] : memref<4x64xbf16, #tpu.memory_space<vmem>>, vector<4x64xbf16>
    %cst_45 = arith.constant dense<0.000000e+00> : vector<4x65xf32>
    %72 = tpu.matmul %71, %68, %cst_45 {dimension_numbers = #tpu.dot_dimension_numbers<[1], [1], [0], [0], [0, 0, 1, 0], [], []>} : vector<4x64xbf16>, vector<65x64xbf16>, vector<4x65xf32> -> vector<4x65xf32>
    %cst_46 = arith.constant 0.000000e+00 : f32
    %73 = vector.broadcast %cst_46 : f32 to vector<65x128xf32>
    %c0_47 = arith.constant 0 : index
    %c0_48 = arith.constant 0 : index
    %74 = vector.load %arg23[%c0_47, %c0_48] : memref<65x128xf32, #tpu.memory_space<vmem>>, vector<65x128xf32>
    tpu.vector_store %arg23[%c0_47, %c0_48], %73 {strides = array<i32>} : memref<65x128xf32, #tpu.memory_space<vmem>>, vector<65x128xf32>,
    %75 = vector.extract_strided_slice %70 {offsets = [0, 0], sizes = [65, 1], strides = [1, 1]} : vector<65x4xf32> to vector<65x1xf32>
    %76 = vector.extract_strided_slice %72 {offsets = [0, 0], sizes = [1, 65], strides = [1, 1]} : vector<4x65xf32> to vector<1x65xf32>
    %77 = vector.broadcast %75 : vector<65x1xf32> to vector<65x65xf32>
    %78 = vector.broadcast %76 : vector<1x65xf32> to vector<65x65xf32>
    %79 = arith.addf %77, %78 : vector<65x65xf32>
    %cst_49 = arith.constant 0.000000e+00 : f32
    %80 = vector.broadcast %cst_49 : f32 to vector<65x65xf32>
    %81 = arith.cmpf ogt, %79, %80 : vector<65x65xf32>
    %cst_50 = arith.constant 2.000000e-01 : f32
    %82 = vector.broadcast %cst_50 : f32 to vector<65x65xf32>
    %83 = arith.mulf %82, %79 : vector<65x65xf32>
    %84 = arith.select %81, %79, %83 : vector<65x65xi1>, vector<65x65xf32>
    %85 = arith.addf %84, %63 : vector<65x65xf32>
    %cst_51 = arith.constant dense<0xFF800000> : vector<65xf32>
    %86 = vector.multi_reduction <maximumf>, %85, %cst_51 [1] : vector<65x65xf32> to vector<65xf32>
    %87 = vector.shape_cast %86 : vector<65xf32> to vector<65x1xf32>
    %88 = vector.broadcast %87 : vector<65x1xf32> to vector<65x65xf32>
    %89 = arith.subf %85, %88 : vector<65x65xf32>
    %90 = math.exp %89 : vector<65x65xf32>
    %cst_52 = arith.constant dense<0.000000e+00> : vector<65xf32>
    %91 = vector.multi_reduction <add>, %90, %cst_52 [1] : vector<65x65xf32> to vector<65xf32>
    %92 = vector.shape_cast %91 : vector<65xf32> to vector<65x1xf32>
    %93 = tpu.reciprocal %92 {approx = true} : vector<65x1xf32> -> vector<65x1xf32>
    %94 = arith.truncf %90 : vector<65x65xf32> to vector<65x65xbf16>
    %95 = vector.extract_strided_slice %68 {offsets = [0, 0], sizes = [65, 16], strides = [1, 1]} : vector<65x64xbf16> to vector<65x16xbf16>
    %cst_53 = arith.constant dense<0.000000e+00> : vector<65x16xf32>
    %96 = tpu.matmul %94, %95, %cst_53 {dimension_numbers = #tpu.dot_dimension_numbers<[1], [0], [0], [1], [0, 0, 1, 1], [], []>} : vector<65x65xbf16>, vector<65x16xbf16>, vector<65x16xf32> -> vector<65x16xf32>
    %97 = vector.broadcast %93 : vector<65x1xf32> to vector<65x16xf32>
    %98 = arith.mulf %96, %97 : vector<65x16xf32>
    %c0_54 = arith.constant 0 : index
    %c0_55 = arith.constant 0 : index
    %99 = vector.load %arg23[%c0_54, %c0_55] : memref<65x128xf32, #tpu.memory_space<vmem>>, vector<65x16xf32>
    tpu.vector_store %arg23[%c0_54, %c0_55], %98 {strides = array<i32>} : memref<65x128xf32, #tpu.memory_space<vmem>>, vector<65x16xf32>,
    %100 = vector.extract_strided_slice %70 {offsets = [0, 1], sizes = [65, 1], strides = [1, 1]} : vector<65x4xf32> to vector<65x1xf32>
    %101 = vector.extract_strided_slice %72 {offsets = [1, 0], sizes = [1, 65], strides = [1, 1]} : vector<4x65xf32> to vector<1x65xf32>
    %102 = vector.broadcast %100 : vector<65x1xf32> to vector<65x65xf32>
    %103 = vector.broadcast %101 : vector<1x65xf32> to vector<65x65xf32>
    %104 = arith.addf %102, %103 : vector<65x65xf32>
    %cst_56 = arith.constant 0.000000e+00 : f32
    %105 = vector.broadcast %cst_56 : f32 to vector<65x65xf32>
    %106 = arith.cmpf ogt, %104, %105 : vector<65x65xf32>
    %cst_57 = arith.constant 2.000000e-01 : f32
    %107 = vector.broadcast %cst_57 : f32 to vector<65x65xf32>
    %108 = arith.mulf %107, %104 : vector<65x65xf32>
    %109 = arith.select %106, %104, %108 : vector<65x65xi1>, vector<65x65xf32>
    %110 = arith.addf %109, %63 : vector<65x65xf32>
    %cst_58 = arith.constant dense<0xFF800000> : vector<65xf32>
    %111 = vector.multi_reduction <maximumf>, %110, %cst_58 [1] : vector<65x65xf32> to vector<65xf32>
    %112 = vector.shape_cast %111 : vector<65xf32> to vector<65x1xf32>
    %113 = vector.broadcast %112 : vector<65x1xf32> to vector<65x65xf32>
    %114 = arith.subf %110, %113 : vector<65x65xf32>
    %115 = math.exp %114 : vector<65x65xf32>
    %cst_59 = arith.constant dense<0.000000e+00> : vector<65xf32>
    %116 = vector.multi_reduction <add>, %115, %cst_59 [1] : vector<65x65xf32> to vector<65xf32>
    %117 = vector.shape_cast %116 : vector<65xf32> to vector<65x1xf32>
    %118 = tpu.reciprocal %117 {approx = true} : vector<65x1xf32> -> vector<65x1xf32>
    %119 = arith.truncf %115 : vector<65x65xf32> to vector<65x65xbf16>
    %120 = vector.extract_strided_slice %68 {offsets = [0, 16], sizes = [65, 16], strides = [1, 1]} : vector<65x64xbf16> to vector<65x16xbf16>
    %cst_60 = arith.constant dense<0.000000e+00> : vector<65x16xf32>
    %121 = tpu.matmul %119, %120, %cst_60 {dimension_numbers = #tpu.dot_dimension_numbers<[1], [0], [0], [1], [0, 0, 1, 1], [], []>} : vector<65x65xbf16>, vector<65x16xbf16>, vector<65x16xf32> -> vector<65x16xf32>
    %122 = vector.broadcast %118 : vector<65x1xf32> to vector<65x16xf32>
    %123 = arith.mulf %121, %122 : vector<65x16xf32>
    %c0_61 = arith.constant 0 : index
    %c16 = arith.constant 16 : index
    %124 = vector.load %arg23[%c0_61, %c16] : memref<65x128xf32, #tpu.memory_space<vmem>>, vector<65x16xf32>
    tpu.vector_store %arg23[%c0_61, %c16], %123 {strides = array<i32>} : memref<65x128xf32, #tpu.memory_space<vmem>>, vector<65x16xf32>,
    %125 = vector.extract_strided_slice %70 {offsets = [0, 2], sizes = [65, 1], strides = [1, 1]} : vector<65x4xf32> to vector<65x1xf32>
    %126 = vector.extract_strided_slice %72 {offsets = [2, 0], sizes = [1, 65], strides = [1, 1]} : vector<4x65xf32> to vector<1x65xf32>
    %127 = vector.broadcast %125 : vector<65x1xf32> to vector<65x65xf32>
    %128 = vector.broadcast %126 : vector<1x65xf32> to vector<65x65xf32>
    %129 = arith.addf %127, %128 : vector<65x65xf32>
    %cst_62 = arith.constant 0.000000e+00 : f32
    %130 = vector.broadcast %cst_62 : f32 to vector<65x65xf32>
    %131 = arith.cmpf ogt, %129, %130 : vector<65x65xf32>
    %cst_63 = arith.constant 2.000000e-01 : f32
    %132 = vector.broadcast %cst_63 : f32 to vector<65x65xf32>
    %133 = arith.mulf %132, %129 : vector<65x65xf32>
    %134 = arith.select %131, %129, %133 : vector<65x65xi1>, vector<65x65xf32>
    %135 = arith.addf %134, %63 : vector<65x65xf32>
    %cst_64 = arith.constant dense<0xFF800000> : vector<65xf32>
    %136 = vector.multi_reduction <maximumf>, %135, %cst_64 [1] : vector<65x65xf32> to vector<65xf32>
    %137 = vector.shape_cast %136 : vector<65xf32> to vector<65x1xf32>
    %138 = vector.broadcast %137 : vector<65x1xf32> to vector<65x65xf32>
    %139 = arith.subf %135, %138 : vector<65x65xf32>
    %140 = math.exp %139 : vector<65x65xf32>
    %cst_65 = arith.constant dense<0.000000e+00> : vector<65xf32>
    %141 = vector.multi_reduction <add>, %140, %cst_65 [1] : vector<65x65xf32> to vector<65xf32>
    %142 = vector.shape_cast %141 : vector<65xf32> to vector<65x1xf32>
    %143 = tpu.reciprocal %142 {approx = true} : vector<65x1xf32> -> vector<65x1xf32>
    %144 = arith.truncf %140 : vector<65x65xf32> to vector<65x65xbf16>
    %145 = vector.extract_strided_slice %68 {offsets = [0, 32], sizes = [65, 16], strides = [1, 1]} : vector<65x64xbf16> to vector<65x16xbf16>
    %cst_66 = arith.constant dense<0.000000e+00> : vector<65x16xf32>
    %146 = tpu.matmul %144, %145, %cst_66 {dimension_numbers = #tpu.dot_dimension_numbers<[1], [0], [0], [1], [0, 0, 1, 1], [], []>} : vector<65x65xbf16>, vector<65x16xbf16>, vector<65x16xf32> -> vector<65x16xf32>
    %147 = vector.broadcast %143 : vector<65x1xf32> to vector<65x16xf32>
    %148 = arith.mulf %146, %147 : vector<65x16xf32>
    %c0_67 = arith.constant 0 : index
    %c32 = arith.constant 32 : index
    %149 = vector.load %arg23[%c0_67, %c32] : memref<65x128xf32, #tpu.memory_space<vmem>>, vector<65x16xf32>
    tpu.vector_store %arg23[%c0_67, %c32], %148 {strides = array<i32>} : memref<65x128xf32, #tpu.memory_space<vmem>>, vector<65x16xf32>,
    %150 = vector.extract_strided_slice %70 {offsets = [0, 3], sizes = [65, 1], strides = [1, 1]} : vector<65x4xf32> to vector<65x1xf32>
    %151 = vector.extract_strided_slice %72 {offsets = [3, 0], sizes = [1, 65], strides = [1, 1]} : vector<4x65xf32> to vector<1x65xf32>
    %152 = vector.broadcast %150 : vector<65x1xf32> to vector<65x65xf32>
    %153 = vector.broadcast %151 : vector<1x65xf32> to vector<65x65xf32>
    %154 = arith.addf %152, %153 : vector<65x65xf32>
    %cst_68 = arith.constant 0.000000e+00 : f32
    %155 = vector.broadcast %cst_68 : f32 to vector<65x65xf32>
    %156 = arith.cmpf ogt, %154, %155 : vector<65x65xf32>
    %cst_69 = arith.constant 2.000000e-01 : f32
    %157 = vector.broadcast %cst_69 : f32 to vector<65x65xf32>
    %158 = arith.mulf %157, %154 : vector<65x65xf32>
    %159 = arith.select %156, %154, %158 : vector<65x65xi1>, vector<65x65xf32>
    %160 = arith.addf %159, %63 : vector<65x65xf32>
    %cst_70 = arith.constant dense<0xFF800000> : vector<65xf32>
    %161 = vector.multi_reduction <maximumf>, %160, %cst_70 [1] : vector<65x65xf32> to vector<65xf32>
    %162 = vector.shape_cast %161 : vector<65xf32> to vector<65x1xf32>
    %163 = vector.broadcast %162 : vector<65x1xf32> to vector<65x65xf32>
    %164 = arith.subf %160, %163 : vector<65x65xf32>
    %165 = math.exp %164 : vector<65x65xf32>
    %cst_71 = arith.constant dense<0.000000e+00> : vector<65xf32>
    %166 = vector.multi_reduction <add>, %165, %cst_71 [1] : vector<65x65xf32> to vector<65xf32>
    %167 = vector.shape_cast %166 : vector<65xf32> to vector<65x1xf32>
    %168 = tpu.reciprocal %167 {approx = true} : vector<65x1xf32> -> vector<65x1xf32>
    %169 = arith.truncf %165 : vector<65x65xf32> to vector<65x65xbf16>
    %170 = vector.extract_strided_slice %68 {offsets = [0, 48], sizes = [65, 16], strides = [1, 1]} : vector<65x64xbf16> to vector<65x16xbf16>
    %cst_72 = arith.constant dense<0.000000e+00> : vector<65x16xf32>
    %171 = tpu.matmul %169, %170, %cst_72 {dimension_numbers = #tpu.dot_dimension_numbers<[1], [0], [0], [1], [0, 0, 1, 1], [], []>} : vector<65x65xbf16>, vector<65x16xbf16>, vector<65x16xf32> -> vector<65x16xf32>
    %172 = vector.broadcast %168 : vector<65x1xf32> to vector<65x16xf32>
    %173 = arith.mulf %171, %172 : vector<65x16xf32>
    %c0_73 = arith.constant 0 : index
    %c48 = arith.constant 48 : index
    %174 = vector.load %arg23[%c0_73, %c48] : memref<65x128xf32, #tpu.memory_space<vmem>>, vector<65x16xf32>
    tpu.vector_store %arg23[%c0_73, %c48], %173 {strides = array<i32>} : memref<65x128xf32, #tpu.memory_space<vmem>>, vector<65x16xf32>,
    %c0_74 = arith.constant 0 : index
    %c0_75 = arith.constant 0 : index
    %175 = vector.load %arg23[%c0_74, %c0_75] : memref<65x128xf32, #tpu.memory_space<vmem>>, vector<65x128xf32>
    %cst_76 = arith.constant 0.000000e+00 : f32
    %176 = vector.broadcast %cst_76 : f32 to vector<65x128xf32>
    %177 = arith.cmpf ogt, %175, %176 : vector<65x128xf32>
    %178 = math.exp %175 : vector<65x128xf32>
    %cst_77 = arith.constant 1.000000e+00 : f32
    %179 = vector.broadcast %cst_77 : f32 to vector<65x128xf32>
    %180 = arith.subf %178, %179 : vector<65x128xf32>
    %181 = arith.select %177, %175, %180 : vector<65x128xi1>, vector<65x128xf32>
    %c0_78 = arith.constant 0 : index
    %c0_79 = arith.constant 0 : index
    %182 = vector.load %arg23[%c0_78, %c0_79] : memref<65x128xf32, #tpu.memory_space<vmem>>, vector<65x128xf32>
    tpu.vector_store %arg23[%c0_78, %c0_79], %181 {strides = array<i32>} : memref<65x128xf32, #tpu.memory_space<vmem>>, vector<65x128xf32>,
    %c0_80 = arith.constant 0 : index
    %c0_81 = arith.constant 0 : index
    %183 = vector.load %arg23[%c0_80, %c0_81] : memref<65x128xf32, #tpu.memory_space<vmem>>, vector<65x128xf32>
    %184 = arith.truncf %183 : vector<65x128xf32> to vector<65x128xbf16>
    %c0_82 = arith.constant 0 : index
    %c0_83 = arith.constant 0 : index
    %185 = vector.load %arg14[%c0_82, %c0_83] : memref<128x64xbf16, #tpu.memory_space<vmem>>, vector<128x64xbf16>
    %cst_84 = arith.constant dense<0.000000e+00> : vector<65x64xf32>
    %186 = tpu.matmul %184, %185, %cst_84 {dimension_numbers = #tpu.dot_dimension_numbers<[1], [0], [0], [1], [0, 0, 1, 1], [], []>} : vector<65x128xbf16>, vector<128x64xbf16>, vector<65x64xf32> -> vector<65x64xf32>
    %187 = arith.truncf %186 : vector<65x64xf32> to vector<65x64xbf16>
    %c0_85 = arith.constant 0 : index
    %c0_86 = arith.constant 0 : index
    %188 = vector.load %arg15[%c0_85, %c0_86] : memref<64x4xbf16, #tpu.memory_space<vmem>>, vector<64x4xbf16>
    %cst_87 = arith.constant dense<0.000000e+00> : vector<65x4xf32>
    %189 = tpu.matmul %187, %188, %cst_87 {dimension_numbers = #tpu.dot_dimension_numbers<[1], [0], [0], [1], [0, 0, 1, 1], [], []>} : vector<65x64xbf16>, vector<64x4xbf16>, vector<65x4xf32> -> vector<65x4xf32>
    %c0_88 = arith.constant 0 : index
    %c0_89 = arith.constant 0 : index
    %190 = vector.load %arg16[%c0_88, %c0_89] : memref<4x64xbf16, #tpu.memory_space<vmem>>, vector<4x64xbf16>
    %cst_90 = arith.constant dense<0.000000e+00> : vector<4x65xf32>
    %191 = tpu.matmul %190, %187, %cst_90 {dimension_numbers = #tpu.dot_dimension_numbers<[1], [1], [0], [0], [0, 0, 1, 0], [], []>} : vector<4x64xbf16>, vector<65x64xbf16>, vector<4x65xf32> -> vector<4x65xf32>
    %cst_91 = arith.constant 0.000000e+00 : f32
    %192 = vector.broadcast %cst_91 : f32 to vector<65x128xf32>
    %c0_92 = arith.constant 0 : index
    %c0_93 = arith.constant 0 : index
    %193 = vector.load %arg23[%c0_92, %c0_93] : memref<65x128xf32, #tpu.memory_space<vmem>>, vector<65x128xf32>
    tpu.vector_store %arg23[%c0_92, %c0_93], %192 {strides = array<i32>} : memref<65x128xf32, #tpu.memory_space<vmem>>, vector<65x128xf32>,
    %194 = vector.extract_strided_slice %189 {offsets = [0, 0], sizes = [65, 1], strides = [1, 1]} : vector<65x4xf32> to vector<65x1xf32>
    %195 = vector.extract_strided_slice %191 {offsets = [0, 0], sizes = [1, 65], strides = [1, 1]} : vector<4x65xf32> to vector<1x65xf32>
    %196 = vector.broadcast %194 : vector<65x1xf32> to vector<65x65xf32>
    %197 = vector.broadcast %195 : vector<1x65xf32> to vector<65x65xf32>
    %198 = arith.addf %196, %197 : vector<65x65xf32>
    %cst_94 = arith.constant 0.000000e+00 : f32
    %199 = vector.broadcast %cst_94 : f32 to vector<65x65xf32>
    %200 = arith.cmpf ogt, %198, %199 : vector<65x65xf32>
    %cst_95 = arith.constant 2.000000e-01 : f32
    %201 = vector.broadcast %cst_95 : f32 to vector<65x65xf32>
    %202 = arith.mulf %201, %198 : vector<65x65xf32>
    %203 = arith.select %200, %198, %202 : vector<65x65xi1>, vector<65x65xf32>
    %204 = arith.addf %203, %63 : vector<65x65xf32>
    %cst_96 = arith.constant dense<0xFF800000> : vector<65xf32>
    %205 = vector.multi_reduction <maximumf>, %204, %cst_96 [1] : vector<65x65xf32> to vector<65xf32>
    %206 = vector.shape_cast %205 : vector<65xf32> to vector<65x1xf32>
    %207 = vector.broadcast %206 : vector<65x1xf32> to vector<65x65xf32>
    %208 = arith.subf %204, %207 : vector<65x65xf32>
    %209 = math.exp %208 : vector<65x65xf32>
    %cst_97 = arith.constant dense<0.000000e+00> : vector<65xf32>
    %210 = vector.multi_reduction <add>, %209, %cst_97 [1] : vector<65x65xf32> to vector<65xf32>
    %211 = vector.shape_cast %210 : vector<65xf32> to vector<65x1xf32>
    %212 = tpu.reciprocal %211 {approx = true} : vector<65x1xf32> -> vector<65x1xf32>
    %213 = arith.truncf %209 : vector<65x65xf32> to vector<65x65xbf16>
    %214 = vector.extract_strided_slice %187 {offsets = [0, 0], sizes = [65, 16], strides = [1, 1]} : vector<65x64xbf16> to vector<65x16xbf16>
    %cst_98 = arith.constant dense<0.000000e+00> : vector<65x16xf32>
    %215 = tpu.matmul %213, %214, %cst_98 {dimension_numbers = #tpu.dot_dimension_numbers<[1], [0], [0], [1], [0, 0, 1, 1], [], []>} : vector<65x65xbf16>, vector<65x16xbf16>, vector<65x16xf32> -> vector<65x16xf32>
    %216 = vector.broadcast %212 : vector<65x1xf32> to vector<65x16xf32>
    %217 = arith.mulf %215, %216 : vector<65x16xf32>
    %c0_99 = arith.constant 0 : index
    %c0_100 = arith.constant 0 : index
    %218 = vector.load %arg23[%c0_99, %c0_100] : memref<65x128xf32, #tpu.memory_space<vmem>>, vector<65x16xf32>
    tpu.vector_store %arg23[%c0_99, %c0_100], %217 {strides = array<i32>} : memref<65x128xf32, #tpu.memory_space<vmem>>, vector<65x16xf32>,
    %219 = vector.extract_strided_slice %189 {offsets = [0, 1], sizes = [65, 1], strides = [1, 1]} : vector<65x4xf32> to vector<65x1xf32>
    %220 = vector.extract_strided_slice %191 {offsets = [1, 0], sizes = [1, 65], strides = [1, 1]} : vector<4x65xf32> to vector<1x65xf32>
    %221 = vector.broadcast %219 : vector<65x1xf32> to vector<65x65xf32>
    %222 = vector.broadcast %220 : vector<1x65xf32> to vector<65x65xf32>
    %223 = arith.addf %221, %222 : vector<65x65xf32>
    %cst_101 = arith.constant 0.000000e+00 : f32
    %224 = vector.broadcast %cst_101 : f32 to vector<65x65xf32>
    %225 = arith.cmpf ogt, %223, %224 : vector<65x65xf32>
    %cst_102 = arith.constant 2.000000e-01 : f32
    %226 = vector.broadcast %cst_102 : f32 to vector<65x65xf32>
    %227 = arith.mulf %226, %223 : vector<65x65xf32>
    %228 = arith.select %225, %223, %227 : vector<65x65xi1>, vector<65x65xf32>
    %229 = arith.addf %228, %63 : vector<65x65xf32>
    %cst_103 = arith.constant dense<0xFF800000> : vector<65xf32>
    %230 = vector.multi_reduction <maximumf>, %229, %cst_103 [1] : vector<65x65xf32> to vector<65xf32>
    %231 = vector.shape_cast %230 : vector<65xf32> to vector<65x1xf32>
    %232 = vector.broadcast %231 : vector<65x1xf32> to vector<65x65xf32>
    %233 = arith.subf %229, %232 : vector<65x65xf32>
    %234 = math.exp %233 : vector<65x65xf32>
    %cst_104 = arith.constant dense<0.000000e+00> : vector<65xf32>
    %235 = vector.multi_reduction <add>, %234, %cst_104 [1] : vector<65x65xf32> to vector<65xf32>
    %236 = vector.shape_cast %235 : vector<65xf32> to vector<65x1xf32>
    %237 = tpu.reciprocal %236 {approx = true} : vector<65x1xf32> -> vector<65x1xf32>
    %238 = arith.truncf %234 : vector<65x65xf32> to vector<65x65xbf16>
    %239 = vector.extract_strided_slice %187 {offsets = [0, 16], sizes = [65, 16], strides = [1, 1]} : vector<65x64xbf16> to vector<65x16xbf16>
    %cst_105 = arith.constant dense<0.000000e+00> : vector<65x16xf32>
    %240 = tpu.matmul %238, %239, %cst_105 {dimension_numbers = #tpu.dot_dimension_numbers<[1], [0], [0], [1], [0, 0, 1, 1], [], []>} : vector<65x65xbf16>, vector<65x16xbf16>, vector<65x16xf32> -> vector<65x16xf32>
    %241 = vector.broadcast %237 : vector<65x1xf32> to vector<65x16xf32>
    %242 = arith.mulf %240, %241 : vector<65x16xf32>
    %c0_106 = arith.constant 0 : index
    %c16_107 = arith.constant 16 : index
    %243 = vector.load %arg23[%c0_106, %c16_107] : memref<65x128xf32, #tpu.memory_space<vmem>>, vector<65x16xf32>
    tpu.vector_store %arg23[%c0_106, %c16_107], %242 {strides = array<i32>} : memref<65x128xf32, #tpu.memory_space<vmem>>, vector<65x16xf32>,
    %244 = vector.extract_strided_slice %189 {offsets = [0, 2], sizes = [65, 1], strides = [1, 1]} : vector<65x4xf32> to vector<65x1xf32>
    %245 = vector.extract_strided_slice %191 {offsets = [2, 0], sizes = [1, 65], strides = [1, 1]} : vector<4x65xf32> to vector<1x65xf32>
    %246 = vector.broadcast %244 : vector<65x1xf32> to vector<65x65xf32>
    %247 = vector.broadcast %245 : vector<1x65xf32> to vector<65x65xf32>
    %248 = arith.addf %246, %247 : vector<65x65xf32>
    %cst_108 = arith.constant 0.000000e+00 : f32
    %249 = vector.broadcast %cst_108 : f32 to vector<65x65xf32>
    %250 = arith.cmpf ogt, %248, %249 : vector<65x65xf32>
    %cst_109 = arith.constant 2.000000e-01 : f32
    %251 = vector.broadcast %cst_109 : f32 to vector<65x65xf32>
    %252 = arith.mulf %251, %248 : vector<65x65xf32>
    %253 = arith.select %250, %248, %252 : vector<65x65xi1>, vector<65x65xf32>
    %254 = arith.addf %253, %63 : vector<65x65xf32>
    %cst_110 = arith.constant dense<0xFF800000> : vector<65xf32>
    %255 = vector.multi_reduction <maximumf>, %254, %cst_110 [1] : vector<65x65xf32> to vector<65xf32>
    %256 = vector.shape_cast %255 : vector<65xf32> to vector<65x1xf32>
    %257 = vector.broadcast %256 : vector<65x1xf32> to vector<65x65xf32>
    %258 = arith.subf %254, %257 : vector<65x65xf32>
    %259 = math.exp %258 : vector<65x65xf32>
    %cst_111 = arith.constant dense<0.000000e+00> : vector<65xf32>
    %260 = vector.multi_reduction <add>, %259, %cst_111 [1] : vector<65x65xf32> to vector<65xf32>
    %261 = vector.shape_cast %260 : vector<65xf32> to vector<65x1xf32>
    %262 = tpu.reciprocal %261 {approx = true} : vector<65x1xf32> -> vector<65x1xf32>
    %263 = arith.truncf %259 : vector<65x65xf32> to vector<65x65xbf16>
    %264 = vector.extract_strided_slice %187 {offsets = [0, 32], sizes = [65, 16], strides = [1, 1]} : vector<65x64xbf16> to vector<65x16xbf16>
    %cst_112 = arith.constant dense<0.000000e+00> : vector<65x16xf32>
    %265 = tpu.matmul %263, %264, %cst_112 {dimension_numbers = #tpu.dot_dimension_numbers<[1], [0], [0], [1], [0, 0, 1, 1], [], []>} : vector<65x65xbf16>, vector<65x16xbf16>, vector<65x16xf32> -> vector<65x16xf32>
    %266 = vector.broadcast %262 : vector<65x1xf32> to vector<65x16xf32>
    %267 = arith.mulf %265, %266 : vector<65x16xf32>
    %c0_113 = arith.constant 0 : index
    %c32_114 = arith.constant 32 : index
    %268 = vector.load %arg23[%c0_113, %c32_114] : memref<65x128xf32, #tpu.memory_space<vmem>>, vector<65x16xf32>
    tpu.vector_store %arg23[%c0_113, %c32_114], %267 {strides = array<i32>} : memref<65x128xf32, #tpu.memory_space<vmem>>, vector<65x16xf32>,
    %269 = vector.extract_strided_slice %189 {offsets = [0, 3], sizes = [65, 1], strides = [1, 1]} : vector<65x4xf32> to vector<65x1xf32>
    %270 = vector.extract_strided_slice %191 {offsets = [3, 0], sizes = [1, 65], strides = [1, 1]} : vector<4x65xf32> to vector<1x65xf32>
    %271 = vector.broadcast %269 : vector<65x1xf32> to vector<65x65xf32>
    %272 = vector.broadcast %270 : vector<1x65xf32> to vector<65x65xf32>
    %273 = arith.addf %271, %272 : vector<65x65xf32>
    %cst_115 = arith.constant 0.000000e+00 : f32
    %274 = vector.broadcast %cst_115 : f32 to vector<65x65xf32>
    %275 = arith.cmpf ogt, %273, %274 : vector<65x65xf32>
    %cst_116 = arith.constant 2.000000e-01 : f32
    %276 = vector.broadcast %cst_116 : f32 to vector<65x65xf32>
    %277 = arith.mulf %276, %273 : vector<65x65xf32>
    %278 = arith.select %275, %273, %277 : vector<65x65xi1>, vector<65x65xf32>
    %279 = arith.addf %278, %63 : vector<65x65xf32>
    %cst_117 = arith.constant dense<0xFF800000> : vector<65xf32>
    %280 = vector.multi_reduction <maximumf>, %279, %cst_117 [1] : vector<65x65xf32> to vector<65xf32>
    %281 = vector.shape_cast %280 : vector<65xf32> to vector<65x1xf32>
    %282 = vector.broadcast %281 : vector<65x1xf32> to vector<65x65xf32>
    %283 = arith.subf %279, %282 : vector<65x65xf32>
    %284 = math.exp %283 : vector<65x65xf32>
    %cst_118 = arith.constant dense<0.000000e+00> : vector<65xf32>
    %285 = vector.multi_reduction <add>, %284, %cst_118 [1] : vector<65x65xf32> to vector<65xf32>
    %286 = vector.shape_cast %285 : vector<65xf32> to vector<65x1xf32>
    %287 = tpu.reciprocal %286 {approx = true} : vector<65x1xf32> -> vector<65x1xf32>
    %288 = arith.truncf %284 : vector<65x65xf32> to vector<65x65xbf16>
    %289 = vector.extract_strided_slice %187 {offsets = [0, 48], sizes = [65, 16], strides = [1, 1]} : vector<65x64xbf16> to vector<65x16xbf16>
    %cst_119 = arith.constant dense<0.000000e+00> : vector<65x16xf32>
    %290 = tpu.matmul %288, %289, %cst_119 {dimension_numbers = #tpu.dot_dimension_numbers<[1], [0], [0], [1], [0, 0, 1, 1], [], []>} : vector<65x65xbf16>, vector<65x16xbf16>, vector<65x16xf32> -> vector<65x16xf32>
    %291 = vector.broadcast %287 : vector<65x1xf32> to vector<65x16xf32>
    %292 = arith.mulf %290, %291 : vector<65x16xf32>
    %c0_120 = arith.constant 0 : index
    %c48_121 = arith.constant 48 : index
    %293 = vector.load %arg23[%c0_120, %c48_121] : memref<65x128xf32, #tpu.memory_space<vmem>>, vector<65x16xf32>
    tpu.vector_store %arg23[%c0_120, %c48_121], %292 {strides = array<i32>} : memref<65x128xf32, #tpu.memory_space<vmem>>, vector<65x16xf32>,
    %c0_122 = arith.constant 0 : index
    %c0_123 = arith.constant 0 : index
    %294 = vector.load %arg23[%c0_122, %c0_123] : memref<65x128xf32, #tpu.memory_space<vmem>>, vector<65x128xf32>
    %cst_124 = arith.constant 0.000000e+00 : f32
    %295 = vector.broadcast %cst_124 : f32 to vector<65x128xf32>
    %296 = arith.cmpf ogt, %294, %295 : vector<65x128xf32>
    %297 = math.exp %294 : vector<65x128xf32>
    %cst_125 = arith.constant 1.000000e+00 : f32
    %298 = vector.broadcast %cst_125 : f32 to vector<65x128xf32>
    %299 = arith.subf %297, %298 : vector<65x128xf32>
    %300 = arith.select %296, %294, %299 : vector<65x128xi1>, vector<65x128xf32>
    %c0_126 = arith.constant 0 : index
    %c0_127 = arith.constant 0 : index
    %301 = vector.load %arg23[%c0_126, %c0_127] : memref<65x128xf32, #tpu.memory_space<vmem>>, vector<65x128xf32>
    tpu.vector_store %arg23[%c0_126, %c0_127], %300 {strides = array<i32>} : memref<65x128xf32, #tpu.memory_space<vmem>>, vector<65x128xf32>,
    %c0_128 = arith.constant 0 : index
    %c0_129 = arith.constant 0 : index
    %302 = vector.load %arg23[%c0_128, %c0_129] : memref<65x128xf32, #tpu.memory_space<vmem>>, vector<65x128xf32>
    %303 = arith.truncf %302 : vector<65x128xf32> to vector<65x128xbf16>
    %c0_130 = arith.constant 0 : index
    %c0_131 = arith.constant 0 : index
    %304 = vector.load %arg17[%c0_130, %c0_131] : memref<128x16xbf16, #tpu.memory_space<vmem>>, vector<128x16xbf16>
    %cst_132 = arith.constant dense<0.000000e+00> : vector<65x16xf32>
    %305 = tpu.matmul %303, %304, %cst_132 {dimension_numbers = #tpu.dot_dimension_numbers<[1], [0], [0], [1], [0, 0, 1, 1], [], []>} : vector<65x128xbf16>, vector<128x16xbf16>, vector<65x16xf32> -> vector<65x16xf32>
    %306 = arith.truncf %305 : vector<65x16xf32> to vector<65x16xbf16>
    %c0_133 = arith.constant 0 : index
    %c0_134 = arith.constant 0 : index
    %307 = vector.load %arg18[%c0_133, %c0_134] : memref<16x1xbf16, #tpu.memory_space<vmem>>, vector<16x1xbf16>
    %cst_135 = arith.constant dense<0.000000e+00> : vector<65x1xf32>
    %308 = tpu.matmul %306, %307, %cst_135 {dimension_numbers = #tpu.dot_dimension_numbers<[1], [0], [0], [1], [0, 0, 1, 1], [], []>} : vector<65x16xbf16>, vector<16x1xbf16>, vector<65x1xf32> -> vector<65x1xf32>
    %c0_136 = arith.constant 0 : index
    %c0_137 = arith.constant 0 : index
    %309 = vector.load %arg19[%c0_136, %c0_137] : memref<1x16xbf16, #tpu.memory_space<vmem>>, vector<1x16xbf16>
    %cst_138 = arith.constant dense<0.000000e+00> : vector<1x65xf32>
    %310 = tpu.matmul %309, %306, %cst_138 {dimension_numbers = #tpu.dot_dimension_numbers<[1], [1], [0], [0], [0, 0, 1, 0], [], []>} : vector<1x16xbf16>, vector<65x16xbf16>, vector<1x65xf32> -> vector<1x65xf32>
    %cst_139 = arith.constant 0.000000e+00 : f32
    %311 = vector.broadcast %cst_139 : f32 to vector<65x128xf32>
    %c0_140 = arith.constant 0 : index
    %c0_141 = arith.constant 0 : index
    %312 = vector.load %arg23[%c0_140, %c0_141] : memref<65x128xf32, #tpu.memory_space<vmem>>, vector<65x128xf32>
    tpu.vector_store %arg23[%c0_140, %c0_141], %311 {strides = array<i32>} : memref<65x128xf32, #tpu.memory_space<vmem>>, vector<65x128xf32>,
    %313 = vector.broadcast %308 : vector<65x1xf32> to vector<65x65xf32>
    %314 = vector.broadcast %310 : vector<1x65xf32> to vector<65x65xf32>
    %315 = arith.addf %313, %314 : vector<65x65xf32>
    %cst_142 = arith.constant 0.000000e+00 : f32
    %316 = vector.broadcast %cst_142 : f32 to vector<65x65xf32>
    %317 = arith.cmpf ogt, %315, %316 : vector<65x65xf32>
    %cst_143 = arith.constant 2.000000e-01 : f32
    %318 = vector.broadcast %cst_143 : f32 to vector<65x65xf32>
    %319 = arith.mulf %318, %315 : vector<65x65xf32>
    %320 = arith.select %317, %315, %319 : vector<65x65xi1>, vector<65x65xf32>
    %321 = arith.addf %320, %63 : vector<65x65xf32>
    %cst_144 = arith.constant dense<0xFF800000> : vector<65xf32>
    %322 = vector.multi_reduction <maximumf>, %321, %cst_144 [1] : vector<65x65xf32> to vector<65xf32>
    %323 = vector.shape_cast %322 : vector<65xf32> to vector<65x1xf32>
    %324 = vector.broadcast %323 : vector<65x1xf32> to vector<65x65xf32>
    %325 = arith.subf %321, %324 : vector<65x65xf32>
    %326 = math.exp %325 : vector<65x65xf32>
    %cst_145 = arith.constant dense<0.000000e+00> : vector<65xf32>
    %327 = vector.multi_reduction <add>, %326, %cst_145 [1] : vector<65x65xf32> to vector<65xf32>
    %328 = vector.shape_cast %327 : vector<65xf32> to vector<65x1xf32>
    %329 = tpu.reciprocal %328 {approx = true} : vector<65x1xf32> -> vector<65x1xf32>
    %330 = arith.truncf %326 : vector<65x65xf32> to vector<65x65xbf16>
    %cst_146 = arith.constant dense<0.000000e+00> : vector<65x16xf32>
    %331 = tpu.matmul %330, %306, %cst_146 {dimension_numbers = #tpu.dot_dimension_numbers<[1], [0], [0], [1], [0, 0, 1, 1], [], []>} : vector<65x65xbf16>, vector<65x16xbf16>, vector<65x16xf32> -> vector<65x16xf32>
    %332 = vector.broadcast %329 : vector<65x1xf32> to vector<65x16xf32>
    %333 = arith.mulf %331, %332 : vector<65x16xf32>
    %cst_147 = arith.constant 1.000000e+00 : f32
    %334 = vector.broadcast %cst_147 : f32 to vector<65x16xf32>
    %335 = arith.mulf %333, %334 : vector<65x16xf32>
    %c0_148 = arith.constant 0 : index
    %c0_149 = arith.constant 0 : index
    %336 = vector.load %arg23[%c0_148, %c0_149] : memref<65x128xf32, #tpu.memory_space<vmem>>, vector<65x16xf32>
    tpu.vector_store %arg23[%c0_148, %c0_149], %335 {strides = array<i32>} : memref<65x128xf32, #tpu.memory_space<vmem>>, vector<65x16xf32>,
    %c0_150 = arith.constant 0 : index
    %c0_151 = arith.constant 0 : index
    %337 = vector.load %arg23[%c0_150, %c0_151] : memref<65x128xf32, #tpu.memory_space<vmem>>, vector<65x128xf32>
    %cst_152 = arith.constant dense<0.000000e+00> : vector<128xf32>
    %338 = vector.multi_reduction <add>, %337, %cst_152 [0] : vector<65x128xf32> to vector<128xf32>
    %339 = vector.shape_cast %338 : vector<128xf32> to vector<1x128xf32>
    %cst_153 = arith.constant 6.500000e+01 : f32
    %340 = vector.broadcast %cst_153 : f32 to vector<1x128xf32>
    %341 = arith.divf %339, %340 : vector<1x128xf32>
    %c0_154 = arith.constant 0 : index
    %c0_155 = arith.constant 0 : index
    %342 = vector.load %arg20[%c0_154, %c0_155] : memref<128x10xf32, #tpu.memory_space<vmem>>, vector<128x10xf32>
    %cst_156 = arith.constant dense<0.000000e+00> : vector<1x10xf32>
    %343 = tpu.matmul %341, %342, %cst_156 {dimension_numbers = #tpu.dot_dimension_numbers<[1], [0], [0], [1], [0, 0, 1, 1], [], []>} : vector<1x128xf32>, vector<128x10xf32>, vector<1x10xf32> -> vector<1x10xf32>
    %c0_157 = arith.constant 0 : index
    %c0_158 = arith.constant 0 : index
    %344 = vector.load %arg21[%c0_157, %c0_158] : memref<1x10xf32, #tpu.memory_space<vmem>>, vector<1x10xf32>
    %345 = arith.addf %343, %344 : vector<1x10xf32>
    %cst_159 = arith.constant dense<0xFF800000> : vector<1xf32>
    %346 = vector.multi_reduction <maximumf>, %345, %cst_159 [1] : vector<1x10xf32> to vector<1xf32>
    %347 = vector.shape_cast %346 : vector<1xf32> to vector<1x1xf32>
    %348 = vector.broadcast %347 : vector<1x1xf32> to vector<1x10xf32>
    %349 = arith.subf %345, %348 : vector<1x10xf32>
    %350 = math.exp %349 : vector<1x10xf32>
    %cst_160 = arith.constant dense<0.000000e+00> : vector<1xf32>
    %351 = vector.multi_reduction <add>, %350, %cst_160 [1] : vector<1x10xf32> to vector<1xf32>
    %352 = vector.shape_cast %351 : vector<1xf32> to vector<1x1xf32>
    %353 = math.log %352 : vector<1x1xf32>
    %354 = arith.addf %347, %353 : vector<1x1xf32>
    %355 = vector.broadcast %354 : vector<1x1xf32> to vector<1x10xf32>
    %356 = arith.subf %345, %355 : vector<1x10xf32>
    %c0_161 = arith.constant 0 : index
    %c0_162 = arith.constant 0 : index
    %c0_163 = arith.constant 0 : index
    %357 = vector.load %arg22[%c0_161, %c0_162, %c0_163] : memref<1x1x10xf32, #tpu.memory_space<vmem>>, vector<1x1x10xf32>
    %358 = vector.shape_cast %357 : vector<1x1x10xf32> to vector<1x10xf32>
    %359 = vector.shape_cast %356 : vector<1x10xf32> to vector<1x1x10xf32>
    tpu.vector_store %arg22[%c0_161, %c0_162, %c0_163], %359 {strides = array<i32>} : memref<1x1x10xf32, #tpu.memory_space<vmem>>, vector<1x1x10xf32>,
    return
  }
  func.func @transform_0(%arg0: i32) -> (i32, i32, i32) {
    %c0_i32 = arith.constant 0 : i32
    %c0_i32_0 = arith.constant 0 : i32
    %c0_i32_1 = arith.constant 0 : i32
    return %arg0, %c0_i32, %c0_i32_0 : i32, i32, i32
  }
  func.func @transform_1(%arg0: i32) -> (i32, i32) {
    %c0_i32 = arith.constant 0 : i32
    %c0_i32_0 = arith.constant 0 : i32
    %c0_i32_1 = arith.constant 0 : i32
    return %c0_i32, %c0_i32_0 : i32, i32
  }
  func.func @transform_2(%arg0: i32) -> (i32, i32) {
    %c0_i32 = arith.constant 0 : i32
    %c0_i32_0 = arith.constant 0 : i32
    %c0_i32_1 = arith.constant 0 : i32
    return %c0_i32, %c0_i32_0 : i32, i32
  }
  func.func @transform_3(%arg0: i32) -> (i32, i32) {
    %c0_i32 = arith.constant 0 : i32
    %c0_i32_0 = arith.constant 0 : i32
    %c0_i32_1 = arith.constant 0 : i32
    return %c0_i32, %c0_i32_0 : i32, i32
  }
  func.func @transform_4(%arg0: i32) -> (i32, i32) {
    %c0_i32 = arith.constant 0 : i32
    %c0_i32_0 = arith.constant 0 : i32
    %c0_i32_1 = arith.constant 0 : i32
    return %c0_i32, %c0_i32_0 : i32, i32
  }
  func.func @transform_5(%arg0: i32) -> (i32, i32) {
    %c0_i32 = arith.constant 0 : i32
    %c0_i32_0 = arith.constant 0 : i32
    %c0_i32_1 = arith.constant 0 : i32
    return %c0_i32, %c0_i32_0 : i32, i32
  }
  func.func @transform_6(%arg0: i32) -> (i32, i32) {
    %c0_i32 = arith.constant 0 : i32
    %c0_i32_0 = arith.constant 0 : i32
    %c0_i32_1 = arith.constant 0 : i32
    return %c0_i32, %c0_i32_0 : i32, i32
  }
  func.func @transform_7(%arg0: i32) -> (i32, i32) {
    %c0_i32 = arith.constant 0 : i32
    %c0_i32_0 = arith.constant 0 : i32
    %c0_i32_1 = arith.constant 0 : i32
    return %c0_i32, %c0_i32_0 : i32, i32
  }
  func.func @transform_8(%arg0: i32) -> (i32, i32) {
    %c0_i32 = arith.constant 0 : i32
    %c0_i32_0 = arith.constant 0 : i32
    %c0_i32_1 = arith.constant 0 : i32
    return %c0_i32, %c0_i32_0 : i32, i32
  }
  func.func @transform_9(%arg0: i32) -> (i32, i32) {
    %c0_i32 = arith.constant 0 : i32
    %c0_i32_0 = arith.constant 0 : i32
    %c0_i32_1 = arith.constant 0 : i32
    return %c0_i32, %c0_i32_0 : i32, i32
  }
  func.func @transform_10(%arg0: i32) -> (i32, i32) {
    %c0_i32 = arith.constant 0 : i32
    %c0_i32_0 = arith.constant 0 : i32
    %c0_i32_1 = arith.constant 0 : i32
    return %c0_i32, %c0_i32_0 : i32, i32
  }
  func.func @transform_11(%arg0: i32) -> (i32, i32) {
    %c0_i32 = arith.constant 0 : i32
    %c0_i32_0 = arith.constant 0 : i32
    %c0_i32_1 = arith.constant 0 : i32
    return %c0_i32, %c0_i32_0 : i32, i32
  }
  func.func @transform_12(%arg0: i32) -> (i32, i32) {
    %c0_i32 = arith.constant 0 : i32
    %c0_i32_0 = arith.constant 0 : i32
    %c0_i32_1 = arith.constant 0 : i32
    return %c0_i32, %c0_i32_0 : i32, i32
  }
  func.func @transform_13(%arg0: i32) -> (i32, i32) {
    %c0_i32 = arith.constant 0 : i32
    %c0_i32_0 = arith.constant 0 : i32
    %c0_i32_1 = arith.constant 0 : i32
    return %c0_i32, %c0_i32_0 : i32, i32
  }
  func.func @transform_14(%arg0: i32) -> (i32, i32) {
    %c0_i32 = arith.constant 0 : i32
    %c0_i32_0 = arith.constant 0 : i32
    %c0_i32_1 = arith.constant 0 : i32
    return %c0_i32, %c0_i32_0 : i32, i32
  }
  func.func @transform_15(%arg0: i32) -> (i32, i32) {
    %c0_i32 = arith.constant 0 : i32
    %c0_i32_0 = arith.constant 0 : i32
    %c0_i32_1 = arith.constant 0 : i32
    return %c0_i32, %c0_i32_0 : i32, i32
  }
  func.func @transform_16(%arg0: i32) -> (i32, i32) {
    %c0_i32 = arith.constant 0 : i32
    %c0_i32_0 = arith.constant 0 : i32
    %c0_i32_1 = arith.constant 0 : i32
    return %c0_i32, %c0_i32_0 : i32, i32
  }
  func.func @transform_17(%arg0: i32) -> (i32, i32) {
    %c0_i32 = arith.constant 0 : i32
    %c0_i32_0 = arith.constant 0 : i32
    %c0_i32_1 = arith.constant 0 : i32
    return %c0_i32, %c0_i32_0 : i32, i32
  }
  func.func @transform_18(%arg0: i32) -> (i32, i32) {
    %c0_i32 = arith.constant 0 : i32
    %c0_i32_0 = arith.constant 0 : i32
    %c0_i32_1 = arith.constant 0 : i32
    return %c0_i32, %c0_i32_0 : i32, i32
  }
  func.func @transform_19(%arg0: i32) -> (i32, i32) {
    %c0_i32 = arith.constant 0 : i32
    %c0_i32_0 = arith.constant 0 : i32
    %c0_i32_1 = arith.constant 0 : i32
    return %c0_i32, %c0_i32_0 : i32, i32
  }
  func.func @transform_20(%arg0: i32) -> (i32, i32) {
    %c0_i32 = arith.constant 0 : i32
    %c0_i32_0 = arith.constant 0 : i32
    %c0_i32_1 = arith.constant 0 : i32
    return %c0_i32, %c0_i32_0 : i32, i32
  }
  func.func @transform_21(%arg0: i32) -> (i32, i32, i32) {
    %c0_i32 = arith.constant 0 : i32
    %c0_i32_0 = arith.constant 0 : i32
    %c0_i32_1 = arith.constant 0 : i32
    return %arg0, %c0_i32, %c0_i32_0 : i32, i32, i32
  }
}

</mosaic_0001>

<bundles_post_ra>
// kernel: gat_pos_forward.1
= control target key start
LH: loop header
LB: loop body
LE: loop exit
PB: predicated region body
PF: predicated region fallthrough
CT: control target
= control target key end

     0   :  { %s14522_s0 = inlined_call_operand.vmem [shape: f32[2,64,2352], index: 0, kind: input, shape index: {}]   ;;  %s14523_s1 = inlined_call_operand.vmem [shape: f32[65,65], index: 1, kind: input, shape index: {}]   ;;  %s14524_s2 = inlined_call_operand.vmem [shape: f32[1,2352], index: 2, kind: input, shape index: {}]   ;;  %s14525_s3 = inlined_call_operand.vmem [shape: f32[1,2352], index: 3, kind: input, shape index: {}]   ;;  %s14526_s4 = inlined_call_operand.vmem [shape: bf16[2352,32], index: 4, kind: input, shape index: {}]   ;;  %s14527_s5 = inlined_call_operand.vmem [shape: f32[1,32], index: 5, kind: input, shape index: {}]   ;;  %s14528_s6 = inlined_call_operand.vmem [shape: f32[1,32], index: 6, kind: input, shape index: {}]   ;;  %s14529_s7 = inlined_call_operand.vmem [shape: f32[1,32], index: 7, kind: input, shape index: {}]   ;;  %s14530_s8 = inlined_call_operand.vmem [shape: f32[1,32], index: 8, kind: input, shape index: {}]   ;;  %s14531_s9 = inlined_call_operand.vmem [shape: f32[65,32], index: 9, kind: input, shape index: {}]   ;;  %s14532_s10 = inlined_call_operand.vmem [shape: bf16[128,64], index: 10, kind: input, shape index: {}]   ;;  %s14533_s11 = inlined_call_operand.vmem [shape: bf16[64,4], index: 11, kind: input, shape index: {}]   ;;  %s14534_s12 = inlined_call_operand.vmem [shape: bf16[4,64], index: 12, kind: input, shape index: {}]   ;;  %s14535_s13 = inlined_call_operand.vmem [shape: bf16[128,64], index: 13, kind: input, shape index: {}]   ;;  %s14536_s14 = inlined_call_operand.vmem [shape: bf16[64,4], index: 14, kind: input, shape index: {}]   ;;  %s14537_s15 = inlined_call_operand.vmem [shape: bf16[4,64], index: 15, kind: input, shape index: {}]   ;;  %s14538_s16 = inlined_call_operand.vmem [shape: bf16[128,16], index: 16, kind: input, shape index: {}]   ;;  %s14539_s17 = inlined_call_operand.vmem [shape: bf16[16,1], index: 17, kind: input, shape index: {}]   ;;  %s14540_s18 = inlined_call_operand.vmem [shape: bf16[1,16], index: 18, kind: input, shape index: {}]   ;;  %s14541_s19 = inlined_call_operand.vmem [shape: f32[128,10], index: 19, kind: input, shape index: {}]   ;;  %s14542_s20 = inlined_call_operand.vmem [shape: f32[1,10], index: 20, kind: input, shape index: {}]   ;;  %s14543_s21 = inlined_call_operand.hbm [shape: f32[2,1,10], index: 21, kind: output, shape index: {}]  }
   0x1   :  { %14783 = sst [smem:[#allocation135_spill]] %s14522_s0 }
   0x2   :  { %14784 = sst [smem:[#allocation136_spill]] %s14523_s1 }
   0x3   :  { %14785 = sst [smem:[#allocation137_spill]] %s14524_s2 }
   0x4   :  { %14786 = sst [smem:[#allocation138_spill]] %s14525_s3 }
   0x5   :  { %14787 = sst [smem:[#allocation139_spill]] %s14526_s4 }
   0x6   :  { %14788 = sst [smem:[#allocation140_spill]] %s14527_s5 }
   0x7   :  { %14789 = sst [smem:[#allocation141_spill]] %s14528_s6 }
   0x8   :  { %14790 = sst [smem:[#allocation142_spill]] %s14529_s7 }
   0x9   :  { %14791 = sst [smem:[#allocation143_spill]] %s14530_s8 }
   0xa   :  { %14792 = sst [smem:[#allocation144_spill]] %s14531_s9 }
   0xb   :  { %26 = vsyncpa [#allocation4], 0 }
   0xc   :  { %28 = vsyncpa [#allocation4 + $0x1], 0  ;;  %s9503_s2 = smov 0   ;;  %s9505_s25 = smov 0  }
   0xd   :  { %s9507_s26 = smov 0   ;;  %s9509_s27 = smov 0  }
   0xe LB: > { %14793 = sst [smem:[#allocation6_spill]] %s9365_s2  ;;  %s9524_s3 = sadd.s32 4294967295, %s9377_s27   ;;  %s9377_s27 = sphi %s9509_s27, %s15276_s27   ;;  %s9373_s26 = sphi %s9507_s26, %s15278_s26   ;;  %s9369_s25 = sphi %s9505_s25, %s15280_s25   ;;  %s9365_s2 = sphi %s9503_s2, %s15279_s2  }
   0xf   : > { %14794 = sst [smem:[#allocation7_spill]] %s9373_s26  ;;  %s7744_s28 = sadd.s32 4294967294, %s9377_s27  }
  0x10   : > { %s9528_s29 = sadd.s32 1, %s9377_s27   ;;  %s487_s0 = sadd.s32 1, %s9373_s26 }
  0x11   : > { %14795 = sst [smem:[#allocation8_spill]] %s9528_s29  ;;  %s484_s4 = ssub.s32 %s9377_s27, %s9528_s29 }
  0x12   : > { %p497_p0 = scmp.ne.s32.totalorder %s9373_s26, %s9369_s25  ;;  %p485_p1 = scmp.eq.s32.totalorder %s484_s4, 0 }
  0x13   : > { %p498_p2 = scmp.eq.s32.totalorder %s9524_s3, 1  ;;  %p503_p3 = scmp.ne.s32.totalorder %s9369_s25, %s9365_s2 }
  0x14   : > { %p504_p4 = scmp.eq.s32.totalorder %s7744_s28, 1  ;;  %p7747_p7 = scmp.ge.s32.totalorder %s9377_s27, 1 }
  0x15   : > { %s9539_s30 = scalar_select %p485_p1, %s9373_s26, %s487_s0  }
  0x16   : > { %p9541_p5 = por %p498_p2, %p497_p0  ;;  %p9545_p6 = por %p504_p4, %p503_p3 }
  0x17   : > { %14796 = sst [smem:[#allocation9_spill]] %s9539_s30  ;;  %p590_p8 = scmp.lt.s32.totalorder %s9377_s27, 3 }
  0x18   : > { %s14798_s22 = scalar_select %p9545_p6, 1, 0 }
  0x19   : > { %p591_p9 = pnand %p7747_p7, %p590_p8 }
  0x1a   : > { %14799 = sst [smem:[#allocation10_spill]] %s14798_s22 }
  0x1b   : > { %594 = sbr.rel (%p591_p9) target bundleno = 4273 (0x10b1), region = 104 }
  0x20   : > { %p649_p10 = scmp.lt.s32.totalorder %s9524_s3, 1  ;;  %s14800_s0 = sld [smem:[#allocation135_spill]]  ;;  %vm824_vm0 = vcmask 392192  }
  0x21   : > { %s15091_s24 = sld [smem:[#allocation139_spill]]  ;;  %s14778_s26 = smov 32  }
  0x22   : > { %s650_s23 = scalar_select %p649_p10, %s9524_s3, 1 }
  0x23   : > { %s15092_s30 = sld [smem:[#allocation137_spill]]  ;;  %s9390_s29 = smov 16  }
  0x24   : > { %s8752_s1 = smul.u32 1216, %s650_s23  ;;  %s15184_s2 = sld [smem:[#allocation140_spill]] }
  0x25   : > { %s15264_s6 = sld [smem:[#allocation141_spill]]  ;;  %s14780_s22 = smov 48  }
  0x26   : > { %s9556_s4 = scalar_lea.vmem %s14800_s0, %s8752_s1  ;;  %s15094_s1 = sld [smem:[#allocation138_spill]] }
  0x27   : > { %v731_v0 = vld [vmem:[%s9556_s4 + $0x260] sm:$0xff]  ;;  %v732_v1 = vld [vmem:[%s9556_s4 + $0x268] sm:$0xff]  ;;  %v733_v2 = vld [vmem:[%s9556_s4 + $0x270] sm:$0xff]  ;;  %s15265_s7 = sld [smem:[#allocation142_spill]]  ;;  %s14776_s0 = smov 112  }
  0x28   : > { %v892_v3 = vadd.f32 %v732_v1, %v731_v0  ;;  %v734_v4 = vld [vmem:[%s9556_s4 + $0x278] sm:$0xff]  ;;  %v735_v6 = vld [vmem:[%s9556_s4 + $0x280] sm:$0xff]  ;;  %v736_v8 = vld [vmem:[%s9556_s4 + $0x288] sm:$0xff]  ;;  %s15266_s8 = sld [smem:[#allocation143_spill]]  ;;  %s15272_s23 = smov 48  }
  0x29   : > { %v9565_v9 = vld [vmem:[%s9556_s4 + $0x130] sm:$0xff]  ;;  %v9568_v10 = vld [vmem:[%s9556_s4 + $0x138] sm:$0xff]  ;;  %v9571_v12 = vld [vmem:[%s9556_s4 + $0x140] sm:$0xff]  ;;  %s15267_s9 = sld [smem:[#allocation144_spill]] }
  0x2a   : > { %v893_v5 = vadd.f32 %v892_v3, %v733_v2  ;;  %v850_v13 = vadd.f32 %v9568_v10, %v9565_v9  ;;  %v737_v14 = vld [vmem:[%s9556_s4 + $0x290] sm:$0xff]  ;;  %v9577_v15 = vld [vmem:[%s9556_s4 + $0x148] sm:$0xff]  ;;  %v738_v18 = vld [vmem:[%s9556_s4 + $0x298] sm:$0xff]  ;;  %s15268_s28 = sld [smem:[#allocation136_spill]] }
  0x2b   : > { %v9582_v19 = vld [vmem:[%s9556_s4 + $0x150] sm:$0xff]  ;;  %v739_v22 = vld [vmem:[%s9556_s4 + $0x2a0] sm:$0xff]  ;;  %v9587_v23 = vld [vmem:[%s9556_s4 + $0x158] sm:$0xff] }
  0x2c   : > { %v894_v7 = vadd.f32 %v893_v5, %v734_v4  ;;  %v851_v17 = vadd.f32 %v850_v13, %v9571_v12  ;;  %v9590_v24 = vld [vmem:[%s9556_s4] sm:$0xff]  ;;  %v9594_v27 = vld [vmem:[%s9556_s4 + $0x8] sm:$0xff]  ;;  %v9597_v28 = vld [vmem:[%s9556_s4 + $0x10] sm:$0xff] }
  0x2d   : > { %v740_v29 = vld [vmem:[%s9556_s4 + $0x2a8] sm:$0xff]  ;;  %v9601_v30 = vld [vmem:[%s9556_s4 + $0x160] sm:$0xff]  ;;  %v807_v31 = vadd.f32 %v9594_v27, %v9590_v24  ;;  %v9607_v34 = vld [vmem:[%s9556_s4 + $0x18] sm:$0xff] }
  0x2e   : > { %v895_v11 = vadd.f32 %v894_v7, %v735_v6  ;;  %v852_v21 = vadd.f32 %v851_v17, %v9577_v15  ;;  %v741_v35 = vld [vmem:[%s9556_s4 + $0x2b0] sm:$0xff]  ;;  %v9611_v36 = vld [vmem:[%s9556_s4 + $0x168] sm:$0xff]  ;;  %v9616_v40 = vld [vmem:[%s9556_s4 + $0x20] sm:$0xff] }
  0x2f   : > { %v808_v37 = vadd.f32 %v807_v31, %v9597_v28  ;;  %v742_v41 = vld [vmem:[%s9556_s4 + $0x2b8] sm:$0xff]  ;;  %v9620_v42 = vld [vmem:[%s9556_s4 + $0x170] sm:$0xff]  ;;  %v9623_v43 = vld [vmem:[%s9556_s4 + $0x28] sm:$0xff] }
  0x30   : > { %v896_v16 = vadd.f32 %v895_v11, %v736_v8  ;;  %v853_v26 = vadd.f32 %v852_v21, %v9582_v19  ;;  %v9628_v47 = vld [vmem:[%s9556_s4 + $0x2f8] sm:$0xff]  ;;  %v9631_v48 = vld [vmem:[%s9556_s4 + $0x300] sm:$0xff]  ;;  %v9634_v49 = vld [vmem:[%s9556_s4 + $0x308] sm:$0xff] }
  0x31   : > { %v809_v44 = vadd.f32 %v808_v37, %v9607_v34  ;;  %v743_v50 = vld [vmem:[%s9556_s4 + $0x2c0] sm:$0xff]  ;;  %v9638_v51 = vld [vmem:[%s9556_s4 + $0x178] sm:$0xff]  ;;  %v913_v53 = vadd.f32 %v9631_v48, %v9628_v47  ;;  %v9645_v56 = vld [vmem:[%s9556_s4 + $0x30] sm:$0xff] }
  0x32   : > { %v897_v20 = vadd.f32 %v896_v16, %v737_v14  ;;  %v854_v33 = vadd.f32 %v853_v26, %v9587_v23  ;;  %v9648_v57 = vld [vmem:[%s9556_s4 + $0x310] sm:$0xff]  ;;  %v744_v58 = vld [vmem:[%s9556_s4 + $0x2c8] sm:$0xff]  ;;  %v9652_v59 = vld [vmem:[%s9556_s4 + $0x180] sm:$0xff] }
  0x33   : > { %v810_v52 = vadd.f32 %v809_v44, %v9616_v40  ;;  %v914_v61 = vadd.f32 %v913_v53, %v9634_v49  ;;  %v9658_v0 = vld [vmem:[%s9556_s4 + $0x38] sm:$0xff]  ;;  %v745_v2 = vld [vmem:[%s9556_s4 + $0x2d0] sm:$0xff]  ;;  %v9665_v3 = vld [vmem:[%s9556_s4 + $0x188] sm:$0xff] }
  0x34   : > { %v898_v25 = vadd.f32 %v897_v20, %v738_v18  ;;  %v855_v39 = vadd.f32 %v854_v33, %v9601_v30  ;;  %v9661_v1 = vld [vmem:[%s9556_s4 + $0x318] sm:$0xff]  ;;  %v9668_v4 = vld [vmem:[%s9556_s4 + $0x40] sm:$0xff]  ;;  %v9677_v13 = vld [vmem:[%s9556_s4 + $0x1c8] sm:$0xff] }
  0x35   : > { %v811_v60 = vadd.f32 %v810_v52, %v9623_v43  ;;  %v915_v6 = vadd.f32 %v914_v61, %v9648_v57  ;;  %v9674_v11 = vld [vmem:[%s9556_s4 + $0x320] sm:$0xff]  ;;  %14802 = vst [vmem:[#allocation12_spill] sm:$0xff] %v9677_v13  ;;  %v9680_v14 = vld [vmem:[%s9556_s4 + $0x1d0] sm:$0xff]  ;;  %v746_v16 = vld [vmem:[%s9556_s4 + $0x2d8] sm:$0xff] }
  0x36   : > { %v899_v32 = vadd.f32 %v898_v25, %v739_v22  ;;  %v856_v46 = vadd.f32 %v855_v39, %v9611_v36  ;;  %14801 = vst [vmem:[#allocation11_spill] sm:$0xff] %v9674_v11  ;;  %v9684_v17 = vld [vmem:[%s9556_s4 + $0x190] sm:$0xff]  ;;  %v9689_v21 = vld [vmem:[%s9556_s4 + $0x1d8] sm:$0xff]  ;;  %v871_v22 = vadd.f32 %v9680_v14, %v9677_v13  ;;  %v9698_v31 = vld [vmem:[%s9556_s4 + $0x328] sm:$0xff] }
  0x37   : > { %v812_v5 = vadd.f32 %v811_v60, %v9645_v56  ;;  %14803 = vst [vmem:[#allocation13_spill] sm:$0xff] %v9680_v14  ;;  %v916_v20 = vadd.f32 %v915_v6, %v9661_v1  ;;  %v747_v33 = vld [vmem:[%s9556_s4 + $0x2e0] sm:$0xff]  ;;  %v9706_v37 = vld [vmem:[%s9556_s4 + $0x198] sm:$0xff]  ;;  %v9719_v52 = vld [vmem:[%s9556_s4 + $0x1e8] sm:$0xff] }
  0x38   : > { %v900_v38 = vadd.f32 %v899_v32, %v740_v29  ;;  %v857_v55 = vadd.f32 %v856_v46, %v9620_v42  ;;  %14804 = vst [vmem:[#allocation14_spill] sm:$0xff] %v9689_v21  ;;  %v9695_v29 = vld [vmem:[%s9556_s4 + $0x48] sm:$0xff]  ;;  %v9701_v32 = vld [vmem:[%s9556_s4 + $0x1e0] sm:$0xff]  ;;  %v9713_v46 = vld [vmem:[%s9556_s4 + $0x50] sm:$0xff] }
  0x39   : > { %v813_v18 = vadd.f32 %v812_v5, %v9658_v0  ;;  %14805 = vst [vmem:[#allocation15_spill] sm:$0xff] %v9698_v31  ;;  %v917_v39 = vadd.f32 %v916_v20, %v9674_v11  ;;  %v748_v53 = vld [vmem:[%s9556_s4 + $0x2e8] sm:$0xff]  ;;  %v9736_v5 = vld [vmem:[%s9556_s4 + $0x1f0] sm:$0xff]  ;;  %v9739_v6 = vld [vmem:[%s9556_s4 + $0x98] sm:$0xff] }
  0x3a   : > { %v901_v45 = vadd.f32 %v900_v38, %v741_v35  ;;  %v858_v63 = vadd.f32 %v857_v55, %v9638_v51  ;;  %14806 = vst [vmem:[#allocation16_spill] sm:$0xff] %v9701_v32  ;;  %v749_v35 = vld [vmem:[%s9556_s4 + $0x2f0] sm:$0xff]  ;;  %v9726_v55 = vld [vmem:[%s9556_s4 + $0x58] sm:$0xff]  ;;  %v9824_v13 = vld [vmem:[%s9556_s4 + $0x3a0] sm:$0xff] }
  0x3b   : > { %v814_v38 = vadd.f32 %v813_v18, %v9668_v4  ;;  %14808 = vst [vmem:[#allocation18_spill] sm:$0xff] %v9719_v52  ;;  %v918_v60 = vadd.f32 %v917_v39, %v9698_v31  ;;  %v9762_v39 = vld [vmem:[%s9556_s4 + $0x1f8] sm:$0xff]  ;;  %v9849_v31 = vld [vmem:[%s9556_s4 + $0x3a8] sm:$0xff]  ;;  %v9872_v11 = vld [vmem:[%s9556_s4 + $0x3b0] sm:$0xff] }
  0x3c   : > { %v902_v54 = vadd.f32 %v901_v45, %v742_v41  ;;  %v859_v8 = vadd.f32 %v858_v63, %v9652_v59  ;;  %v872_v41 = vadd.f32 %v871_v22, %v9689_v21  ;;  %14810 = vst [vmem:[#allocation20_spill] sm:$0xff] %v9736_v5  ;;  %v9749_v22 = vld [vmem:[%s9556_s4 + $0xa0] sm:$0xff]  ;;  %v9821_v14 = vld [vmem:[%s9556_s4 + $0x398] sm:$0xff] }
  0x3d   : > { %14811 = vst [vmem:[#allocation21_spill] sm:$0xff] %v9739_v6  ;;  %v9809_v21 = vld [vmem:[%s9556_s4 + $0xc0] sm:$0xff] }
  0x3e   : > { %v903_v62 = vadd.f32 %v902_v54, %v743_v50  ;;  %v860_v26 = vadd.f32 %v859_v8, %v9665_v3  ;;  %v9716_v50 = vld [vmem:[%s9556_s4 + $0x330] sm:$0xff]  ;;  %v9723_v54 = vld [vmem:[%s9556_s4 + $0x1a0] sm:$0xff]  ;;  %v873_v61 = vadd.f32 %v872_v41, %v9701_v32  ;;  %v9743_v8 = vld [vmem:[%s9556_s4 + $0x1a8] sm:$0xff]  ;;  %14812 = vst [vmem:[#allocation22_spill] sm:$0xff] %v9749_v22  ;;  %v829_v41 = vadd.f32 %v9749_v22, %v9739_v6 }
  0x3f   : > { %14807 = vst [vmem:[#allocation17_spill] sm:$0xff] %v9716_v50  ;;  %v919_v18 = vadd.f32 %v918_v60, %v9716_v50  ;;  %v9780_v22 = vld [vmem:[%s9556_s4 + $0x68] sm:$0xff]  ;;  %v9790_v32 = vld [vmem:[%s9556_s4 + $0x1b8] sm:$0xff] }
  0x40   : > { %v904_v7 = vadd.f32 %v903_v62, %v744_v58  ;;  %v861_v45 = vadd.f32 %v860_v26, %v9684_v17  ;;  %v815_v58 = vadd.f32 %v814_v38, %v9695_v29  ;;  %v874_v20 = vadd.f32 %v873_v61, %v9719_v52  ;;  %v9759_v38 = vld [vmem:[%s9556_s4 + $0x340] sm:$0xff]  ;;  %14815 = vst [vmem:[#allocation25_spill] sm:$0xff] %v9762_v39  ;;  %v9776_v61 = vld [vmem:[%s9556_s4 + $0xb0] sm:$0xff]  ;;  %v9783_v6 = vld [vmem:[%s9556_s4 + $0x348] sm:$0xff] }
  0x41   : > { %14814 = vst [vmem:[#allocation24_spill] sm:$0xff] %v9759_v38  ;;  %v9786_v52 = vld [vmem:[%s9556_s4 + $0x200] sm:$0xff]  ;;  %v9846_v50 = vld [vmem:[%s9556_s4 + $0xc8] sm:$0xff] }
  0x42   : > { %v905_v25 = vadd.f32 %v904_v7, %v745_v2  ;;  %v862_v63 = vadd.f32 %v861_v45, %v9706_v37  ;;  %v9733_v2 = vld [vmem:[%s9556_s4 + $0x338] sm:$0xff]  ;;  %v909_v7 = vsel %vm824_vm0, %v749_v35, 0.0  ;;  %v9756_v35 = vld [vmem:[%s9556_s4 + $0x60] sm:$0xff]  ;;  %v875_v60 = vadd.f32 %v874_v20, %v9736_v5  ;;  %14816 = vst [vmem:[#allocation26_spill] sm:$0xff] %v9776_v61  ;;  %v9806_v5 = vld [vmem:[%s9556_s4 + $0x208] sm:$0xff] }
  0x43   : > { %14809 = vst [vmem:[#allocation19_spill] sm:$0xff] %v9733_v2  ;;  %v9770_v45 = vld [vmem:[%s9556_s4 + $0x1c0] sm:$0xff] }
  0x44   : > { %v906_v44 = vadd.f32 %v905_v25, %v746_v16  ;;  %v816_v16 = vadd.f32 %v815_v58, %v9713_v46  ;;  %v9752_v25 = vld [vmem:[%s9556_s4 + $0xa8] sm:$0xff]  ;;  %v920_v58 = vadd.f32 %v919_v18, %v9733_v2  ;;  %14817 = vst [vmem:[#allocation27_spill] sm:$0xff] %v9780_v22  ;;  %v9793_v18 = vld [vmem:[%s9556_s4 + $0x70] sm:$0xff] }
  0x45   : > { %14813 = vst [vmem:[#allocation23_spill] sm:$0xff] %v9752_v25 }
  0x46   : > { %v907_v62 = vadd.f32 %v906_v44, %v747_v33  ;;  %v863_v33 = vadd.f32 %v862_v63, %v9723_v54  ;;  %v9767_v44 = vld [vmem:[%s9556_s4 + $0x1b0] sm:$0xff]  ;;  %14818 = vst [vmem:[#allocation28_spill] sm:$0xff] %v9783_v6 }
  0x47   : > { %14819 = vst [vmem:[#allocation29_spill] sm:$0xff] %v9786_v52 }
  0x48   : > { %v908_v26 = vadd.f32 %v907_v62, %v748_v53  ;;  %v817_v53 = vadd.f32 %v816_v16, %v9726_v55  ;;  %v864_v63 = vadd.f32 %v863_v33, %v9743_v8  ;;  %v830_v16 = vadd.f32 %v829_v41, %v9752_v25  ;;  %14820 = vst [vmem:[#allocation30_spill] sm:$0xff] %v9793_v18  ;;  %v9799_v33 = vld [vmem:[%s9556_s4 + $0xb8] sm:$0xff]  ;;  %v9803_v25 = vld [vmem:[%s9556_s4 + $0x350] sm:$0xff] }
  0x49   : > { %14821 = vst [vmem:[#allocation31_spill] sm:$0xff] %v9799_v33 }
  0x4a   : > { %v910_v62 = vadd.f32 %v909_v7, %v908_v26  ;;  %v818_v20 = vadd.f32 %v817_v53, %v9756_v35  ;;  %v921_v7 = vadd.f32 %v920_v58, %v9759_v38  ;;  %v876_v26 = vadd.f32 %v875_v60, %v9762_v39  ;;  %14822 = vst [vmem:[#allocation32_spill] sm:$0xff] %v9803_v25  ;;  %v9818_v39 = vld [vmem:[%s9556_s4 + $0x390] sm:$0xff] }
  0x4b   : > { %v865_v41 = vadd.f32 %v864_v63, %v9767_v44  ;;  %14823 = vst [vmem:[#allocation33_spill] sm:$0xff] %v9806_v5  ;;  %v831_v53 = vadd.f32 %v830_v16, %v9776_v61  ;;  %v867_v58 = vsel %vm824_vm0, %v9770_v45, 0.0  ;;  %v9828_v61 = vld [vmem:[%s9556_s4 + $0x78] sm:$0xff] }
  0x4c   : > { %911 = vadd.xlane.f32.xlu2 %v910_v62  ;;  %14824 = vst [vmem:[#allocation34_spill] sm:$0xff] %v9809_v21  ;;  %v819_v60 = vadd.f32 %v818_v20, %v9780_v22  ;;  %v922_v62 = vadd.f32 %v921_v7, %v9783_v6  ;;  %v877_v63 = vadd.f32 %v876_v26, %v9786_v52  ;;  %v9831_v20 = vld [vmem:[%s9556_s4 + $0x358] sm:$0xff]  ;;  %v9834_v7 = vld [vmem:[%s9556_s4 + $0x210] sm:$0xff]  ;;  %v9840_v6 = vld [vmem:[%s9556_s4 + $0x80] sm:$0xff] }
  0x4d   : > { %14825 = vst [vmem:[#allocation35_spill] sm:$0xff] %v9818_v39  ;;  %v866_v16 = vadd.f32 %v865_v41, %v9790_v32  ;;  %v832_v26 = vadd.f32 %v831_v53, %v9799_v33  ;;  %v934_v52 = vadd.f32 %v9821_v14, %v9818_v39  ;;  %v9852_v33 = vld [vmem:[%s9556_s4 + $0x88] sm:$0xff]  ;;  %v9858_v39 = vld [vmem:[%s9556_s4 + $0x218] sm:$0xff] }
  0x4e   : > { %14826 = vst [vmem:[#allocation36_spill] sm:$0xff] %v9821_v14  ;;  %v820_v38 = vadd.f32 %v819_v60, %v9793_v18  ;;  %v923_v41 = vadd.f32 %v922_v62, %v9803_v25  ;;  %v878_v2 = vadd.f32 %v877_v63, %v9806_v5  ;;  %v9855_v14 = vld [vmem:[%s9556_s4 + $0x360] sm:$0xff]  ;;  %v9863_v63 = vld [vmem:[%s9556_s4 + $0x90] sm:$0xff]  ;;  %v9942_v18 = vld [vmem:[%s9556_s4 + $0x3c8] sm:$0xff] }
  0x4f   : > { %14827 = vst [vmem:[#allocation37_spill] sm:$0xff] %v9824_v13  ;;  %v868_v53 = vadd.f32 %v867_v58, %v866_v16  ;;  %v833_v60 = vadd.f32 %v832_v26, %v9809_v21  ;;  %v935_v62 = vadd.f32 %v934_v52, %v9824_v13  ;;  %v9869_v16 = vld [vmem:[%s9556_s4 + $0xd0] sm:$0xff]  ;;  %v9875_v26 = vld [vmem:[%s9556_s4 + $0x368] sm:$0xff]  ;;  %v9878_v52 = vld [vmem:[%s9556_s4 + $0x220] sm:$0xff] }
  0x50   : > { %14828 = vst [vmem:[#allocation38_spill] sm:$0xff] %v9828_v61  ;;  %v821_v5 = vadd.f32 %v820_v38, %v9828_v61  ;;  %v924_v25 = vadd.f32 %v923_v41, %v9831_v20  ;;  %v879_v58 = vadd.f32 %v878_v2, %v9834_v7  ;;  %v9881_v13 = vld [vmem:[%s9556_s4 + $0xd8] sm:$0xff]  ;;  %v9895_v61 = vld [vmem:[%s9556_s4 + $0x430] sm:$0xff]  ;;  %v9945_v22 = vld [vmem:[%s9556_s4 + $0x448] sm:$0xff] }
  0x51   : > { %14829 = vst [vmem:[#allocation39_spill] sm:$0xff] %v9831_v20  ;;  %869 = vadd.xlane.f32.xlu1 %v868_v53  ;;  %v834_v38 = vadd.f32 %v833_v60, %v9846_v50  ;;  %v936_v41 = vadd.f32 %v935_v62, %v9849_v31  ;;  %v9889_v53 = vld [vmem:[%s9556_s4 + $0x3b8] sm:$0xff]  ;;  %v9892_v20 = vld [vmem:[%s9556_s4 + $0x428] sm:$0xff]  ;;  %v825_v60 = vsel %vm824_vm0, %v9863_v63, 0.0 }
  0x52   : > { %14830 = vst [vmem:[#allocation40_spill] sm:$0xff] %v9834_v7  ;;  %v822_v2 = vadd.f32 %v821_v5, %v9840_v6  ;;  %v925_v21 = vadd.f32 %v924_v25, %v9855_v14  ;;  %v880_v7 = vadd.f32 %v879_v58, %v9858_v39  ;;  %v9900_v5 = vld [vmem:[%s9556_s4 + $0x370] sm:$0xff]  ;;  %v9903_v62 = vld [vmem:[%s9556_s4 + $0x228] sm:$0xff] }
  0x53   : > { %14831 = vst [vmem:[#allocation41_spill] sm:$0xff] %v9840_v6  ;;  %v835_v25 = vadd.f32 %v834_v38, %v9869_v16  ;;  %v937_v58 = vadd.f32 %v936_v41, %v9872_v11  ;;  %v9916_v6 = vld [vmem:[%s9556_s4 + $0xe0] sm:$0xff] }
  0x54   : > { %14832 = vst [vmem:[#allocation42_spill] sm:$0xff] %v9846_v50  ;;  %v955_v50 = vadd.f32 %v9895_v61, %v9892_v20  ;;  %v9919_v38 = vld [vmem:[%s9556_s4 + $0x3c0] sm:$0xff] }
  0x55   : > { %14833 = vst [vmem:[#allocation43_spill] sm:$0xff] %v9849_v31  ;;  %v9908_v31 = vld [vmem:[%s9556_s4 + $0x438] sm:$0xff]  ;;  %v9922_v41 = vld [vmem:[%s9556_s4 + $0x440] sm:$0xff] }
  0x56   : > { %14834 = vst [vmem:[#allocation44_spill] sm:$0xff] %v9852_v33 }
  0x57   : > { %14835 = vst [vmem:[#allocation45_spill] sm:$0xff] %v9855_v14  ;;  %v926_v14 = vadd.f32 %v925_v21, %v9875_v26  ;;  %v938_v21 = vadd.f32 %v937_v58, %v9889_v53  ;;  %v9951_v58 = vld [vmem:[%s9556_s4 + $0x238] sm:$0xff] }
  0x58   : > { %14836 = vst [vmem:[#allocation46_spill] sm:$0xff] %v9858_v39  ;;  %v823_v39 = vadd.f32 %v822_v2, %v9852_v33  ;;  %v836_v2 = vadd.f32 %v835_v25, %v9881_v13  ;;  %v9939_v33 = vld [vmem:[%s9556_s4 + $0xe8] sm:$0xff]  ;;  %v9948_v25 = vld [vmem:[%s9556_s4 + $0x380] sm:$0xff] }
  0x59   : > { %14837 = vst [vmem:[#allocation47_spill] sm:$0xff] %v9863_v63  ;;  %v881_v63 = vadd.f32 %v880_v7, %v9878_v52  ;;  %v956_v7 = vadd.f32 %v955_v50, %v9908_v31 }
  0x5a   : > { %14838 = vst [vmem:[#allocation48_spill] sm:$0xff] %v9869_v16  ;;  %v826_v16 = vadd.f32 %v825_v60, %v823_v39  ;;  %v837_v50 = vadd.f32 %v836_v2, %v9916_v6  ;;  %v939_v39 = vadd.f32 %v938_v21, %v9919_v38  ;;  %v9970_v21 = vld [vmem:[%s9556_s4 + $0x240] sm:$0xff] }
  0x5b   : > { %14839 = vst [vmem:[#allocation49_spill] sm:$0xff] %v9872_v11  ;;  %v9925_v11 = vld [vmem:[%s9556_s4 + $0x378] sm:$0xff] }
  0x5c   : > { %14840 = vst [vmem:[#allocation50_spill] sm:$0xff] %v9875_v26  ;;  %v882_v26 = vadd.f32 %v881_v63, %v9903_v62  ;;  %827 = vadd.xlane.f32.xlu0 %v826_v16  ;;  %v838_v16 = vadd.f32 %v837_v50, %v9939_v33  ;;  %v9990_v50 = vld [vmem:[%s9556_s4 + $0x258] sm:$0xff] }
  0x5d   : > { %14841 = vst [vmem:[#allocation51_spill] sm:$0xff] %v9878_v52  ;;  %v927_v52 = vadd.f32 %v926_v14, %v9900_v5  ;;  %v957_v14 = vadd.f32 %v956_v7, %v9922_v41 }
  0x5e   : > { %14842 = vst [vmem:[#allocation52_spill] sm:$0xff] %v9881_v13  ;;  %v9965_v13 = vld [vmem:[%s9556_s4 + $0x450] sm:$0xff] }
  0x5f   : > { %14843 = vst [vmem:[#allocation53_spill] sm:$0xff] %v9889_v53  ;;  %v928_v63 = vadd.f32 %v927_v52, %v9925_v11  ;;  %v9962_v53 = vld [vmem:[%s9556_s4 + $0x3d0] sm:$0xff]  ;;  %v940_v52 = vadd.f32 %v939_v39, %v9942_v18 }
  0x60   : > { %14844 = vst [vmem:[#allocation54_spill] sm:$0xff] %v9892_v20  ;;  %v9931_v20 = vld [vmem:[%s9556_s4 + $0x230] sm:$0xff] }
  0x61   : > { %14845 = vst [vmem:[#allocation55_spill] sm:$0xff] %v9895_v61  ;;  %v9928_v61 = vld [vmem:[%s9556_s4 + $0x388] sm:$0xff]  ;;  %v883_v60 = vadd.f32 %v882_v26, %v9931_v20  ;;  %v958_v26 = vadd.f32 %v957_v14, %v9945_v22  ;;  %v929_v7 = vadd.f32 %v928_v63, %v9948_v25  ;;  %v941_v14 = vadd.f32 %v940_v52, %v9962_v53 }
  0x62   : > { %14846 = vst [vmem:[#allocation56_spill] sm:$0xff] %v9903_v62  ;;  %v930_v2 = vsel %vm824_vm0, %v9928_v61, 0.0  ;;  %v9987_v62 = vld [vmem:[%s9556_s4 + $0x248] sm:$0xff] }
  0x63   : > { %14847 = vst [vmem:[#allocation57_spill] sm:$0xff] %v9908_v31  ;;  %v9959_v31 = vld [vmem:[%s9556_s4 + $0xf0] sm:$0xff]  ;;  %v959_v63 = vadd.f32 %v958_v26, %v9965_v13 }
  0x64   : > { %14848 = vst [vmem:[#allocation58_spill] sm:$0xff] %v9916_v6  ;;  %v9981_v6 = vld [vmem:[%s9556_s4 + $0x3d8] sm:$0xff]  ;;  %v839_v39 = vadd.f32 %v838_v16, %v9959_v31 }
  0x65   : > { %14849 = vst [vmem:[#allocation59_spill] sm:$0xff] %v9919_v38  ;;  %v9978_v38 = vld [vmem:[%s9556_s4 + $0xf8] sm:$0xff]  ;;  %v942_v52 = vadd.f32 %v941_v14, %v9981_v6 }
  0x66   : > { %14850 = vst [vmem:[#allocation60_spill] sm:$0xff] %v9922_v41  ;;  %v884_v41 = vadd.f32 %v883_v60, %v9951_v58  ;;  %v931_v60 = vadd.f32 %v930_v2, %v929_v7  ;;  %v840_v16 = vadd.f32 %v839_v39, %v9978_v38  ;;  %v10013_v2 = vld [vmem:[%s9556_s4 + $0x108] sm:$0xff]  ;;  %v888_v39 = vsel %vm824_vm0, %v9990_v50, 0.0 }
  0x67   : > { %14851 = vst [vmem:[#allocation61_spill] sm:$0xff] %v9931_v20  ;;  %v9984_v20 = vld [vmem:[%s9556_s4 + $0x458] sm:$0xff]  ;;  %v10016_v7 = vld [vmem:[%s9556_s4 + $0x3e8] sm:$0xff] }
  0x68   : > { %14852 = vst [vmem:[#allocation62_spill] sm:$0xff] %v9939_v33  ;;  %v10000_v33 = vld [vmem:[%s9556_s4 + $0x3e0] sm:$0xff]  ;;  %v960_v26 = vadd.f32 %v959_v63, %v9984_v20  ;;  %932 = vadd.xlane.f32.xlu2 %v931_v60 }
  0x69   : > { %14853 = vst [vmem:[#allocation63_spill] sm:$0xff] %v9942_v18  ;;  %v9997_v18 = vld [vmem:[%s9556_s4 + $0x100] sm:$0xff]  ;;  %v943_v63 = vadd.f32 %v942_v52, %v10000_v33 }
  0x6a   : > { %14854 = vst [vmem:[#allocation64_spill] sm:$0xff] %v9945_v22  ;;  %v885_v22 = vadd.f32 %v884_v41, %v9970_v21  ;;  %v841_v14 = vadd.f32 %v840_v16, %v9997_v18 }
  0x6b   : > { %14855 = vst [vmem:[#allocation65_spill] sm:$0xff] %v9948_v25  ;;  %v10006_v25 = vld [vmem:[%s9556_s4 + $0x250] sm:$0xff] }
  0x6c   : > { %14856 = vst [vmem:[#allocation66_spill] sm:$0xff] %v9951_v58  ;;  %v10003_v58 = vld [vmem:[%s9556_s4 + $0x460] sm:$0xff]  ;;  %v886_v41 = vadd.f32 %v885_v22, %v9987_v62 }
  0x6d   : > { %14857 = vst [vmem:[#allocation67_spill] sm:$0xff] %v9959_v31  ;;  %v961_v60 = vadd.f32 %v960_v26, %v10003_v58  ;;  %v944_v31 = vadd.f32 %v943_v63, %v10016_v7  ;;  %v10040_v26 = vld [vmem:[%s9556_s4 + $0x118] sm:$0xff] }
  0x6e   : > { %14858 = vst [vmem:[#allocation68_spill] sm:$0xff] %v9962_v53  ;;  %v887_v22 = vadd.f32 %v886_v41, %v10006_v25  ;;  %v10034_v53 = vld [vmem:[%s9556_s4 + $0x470] sm:$0xff]  ;;  %v10043_v41 = vld [vmem:[%s9556_s4 + $0x3f8] sm:$0xff] }
  0x6f   : > { %14859 = vst [vmem:[#allocation69_spill] sm:$0xff] %v9965_v13  ;;  %v10019_v13 = vld [vmem:[%s9556_s4 + $0x468] sm:$0xff] }
  0x70   : > { %14860 = vst [vmem:[#allocation70_spill] sm:$0xff] %v9978_v38  ;;  %v842_v38 = vadd.f32 %v841_v14, %v10013_v2  ;;  %v962_v16 = vadd.f32 %v961_v60, %v10019_v13  ;;  %v889_v52 = vadd.f32 %v888_v39, %v887_v22  ;;  %v10055_v39 = vld [vmem:[%s9556_s4 + $0x120] sm:$0xff] }
  0x71   : > { %14861 = vst [vmem:[#allocation71_spill] sm:$0xff] %v9981_v6  ;;  %v10031_v6 = vld [vmem:[%s9556_s4 + $0x3f0] sm:$0xff]  ;;  %v10058_v60 = vld [vmem:[%s9556_s4 + $0x400] sm:$0xff] }
  0x72   : > { %14862 = vst [vmem:[#allocation72_spill] sm:$0xff] %v9984_v20  ;;  %v10028_v20 = vld [vmem:[%s9556_s4 + $0x110] sm:$0xff]  ;;  %v945_v14 = vadd.f32 %v944_v31, %v10031_v6  ;;  %v963_v63 = vadd.f32 %v962_v16, %v10034_v53  ;;  %890 = vadd.xlane.f32.xlu1 %v889_v52  ;;  %v10061_v22 = vld [vmem:[%s9556_s4 + $0x480] sm:$0xff]  ;;  %v10069_v16 = vld [vmem:[%s9556_s4 + $0x408] sm:$0xff] }
  0x73   : > { %14863 = vst [vmem:[#allocation73_spill] sm:$0xff] %v9997_v18  ;;  %v843_v18 = vadd.f32 %v842_v38, %v10028_v20  ;;  %v10072_v52 = vld [vmem:[%s9556_s4 + $0x488] sm:$0xff] }
  0x74   : > { %14864 = vst [vmem:[#allocation74_spill] sm:$0xff] %v10000_v33  ;;  %v10049_v33 = vld [vmem:[%s9556_s4 + $0x128] sm:$0xff]  ;;  %v946_v38 = vadd.f32 %v945_v14, %v10043_v41  ;;  %v10081_v14 = vld [vmem:[%s9556_s4 + $0x490] sm:$0xff] }
  0x75   : > { %14865 = vst [vmem:[#allocation75_spill] sm:$0xff] %v10003_v58  ;;  %v10046_v58 = vld [vmem:[%s9556_s4 + $0x478] sm:$0xff]  ;;  %v846_v31 = vsel %vm824_vm0, %v10049_v33, 0.0 }
  0x76   : > { %14866 = vst [vmem:[#allocation76_spill] sm:$0xff] %v10016_v7  ;;  %v964_v7 = vadd.f32 %v963_v63, %v10046_v58 }
  0x77   : > { %14867 = vst [vmem:[#allocation77_spill] sm:$0xff] %v10019_v13  ;;  %v844_v13 = vadd.f32 %v843_v18, %v10040_v26  ;;  %v10078_v18 = vld [vmem:[%s9556_s4 + $0x410] sm:$0xff] }
  0x78   : > { %14868 = vst [vmem:[#allocation78_spill] sm:$0xff] %v10028_v20  ;;  %v965_v20 = vadd.f32 %v964_v7, %v10061_v22 }
  0x79   : > { %14869 = vst [vmem:[#allocation79_spill] sm:$0xff] %v10031_v6  ;;  %v947_v6 = vadd.f32 %v946_v38, %v10058_v60 }
  0x7a   : > { %14870 = vst [vmem:[#allocation80_spill] sm:$0xff] %v10034_v53  ;;  %v845_v53 = vadd.f32 %v844_v13, %v10055_v39  ;;  %v10092_v13 = vld [vmem:[%s9556_s4 + $0x498] sm:$0xff] }
  0x7b   : > { %14871 = vst [vmem:[#allocation81_spill] sm:$0xff] %v10040_v26  ;;  %v10089_v26 = vld [vmem:[%s9556_s4 + $0x418] sm:$0xff] }
  0x7c   : > { %14872 = vst [vmem:[#allocation82_spill] sm:$0xff] %v10043_v41  ;;  %v847_v63 = vadd.f32 %v846_v31, %v845_v53  ;;  %v948_v41 = vadd.f32 %v947_v6, %v10069_v16  ;;  %v10099_v53 = vld [vmem:[%s9556_s4 + $0x4a0] sm:$0xff] }
  0x7d   : > { %14873 = vst [vmem:[#allocation83_spill] sm:$0xff] %v10046_v58  ;;  %v10084_v58 = vld [vmem:[%s9556_s4 + $0x420] sm:$0xff] }
  0x7e   : > { %14874 = vst [vmem:[#allocation84_spill] sm:$0xff] %v10049_v33  ;;  %v966_v33 = vadd.f32 %v965_v20, %v10072_v52  ;;  %848 = vadd.xlane.f32.xlu0 %v847_v63  ;;  %v949_v7 = vadd.f32 %v948_v41, %v10078_v18 }
  0x7f   : > { %14875 = vst [vmem:[#allocation85_spill] sm:$0xff] %v10058_v60  ;;  %v10111_v60 = vld [vmem:[%s9556_s4 + $0x4b0] sm:$0xff] }
  0x80   : > { %14876 = vst [vmem:[#allocation86_spill] sm:$0xff] %v10061_v22  ;;  %v967_v38 = vadd.f32 %v966_v33, %v10081_v14  ;;  %v951_v22 = vsel %vm824_vm0, %v10084_v58, 0.0  ;;  %v950_v31 = vadd.f32 %v949_v7, %v10089_v26 }
  0x81   : > { %14877 = vst [vmem:[#allocation87_spill] sm:$0xff] %v10069_v16  ;;  %v10104_v16 = vld [vmem:[%s9556_s4 + $0x4a8] sm:$0xff] }
  0x82   : > { %14878 = vst [vmem:[#allocation88_spill] sm:$0xff] %v10072_v52  ;;  %v968_v6 = vadd.f32 %v967_v38, %v10092_v13  ;;  %v952_v20 = vadd.f32 %v951_v22, %v950_v31  ;;  %v10107_v52 = vld [vmem:[%s9556_s4 + $0x4b8] sm:$0xff]  ;;  %v9379_v38 = vmov 2352.0  }
  0x83   : > { %14879 = vst [vmem:[#allocation89_spill] sm:$0xff] %v10081_v14  ;;  %v972_v41 = vsel %vm824_vm0, %v10107_v52, 0.0  ;;  %8874 = vrcp.f32 %v9379_v38 }
  0x84   : > { %14880 = vst [vmem:[#allocation90_spill] sm:$0xff] %v10084_v58  ;;  %v969_v63 = vadd.f32 %v968_v6, %v10099_v53 }
  0x85   : > { %14881 = vst [vmem:[#allocation91_spill] sm:$0xff] %v10089_v26 }
  0x86   : > { %14882 = vst [vmem:[#allocation92_spill] sm:$0xff] %v10092_v13  ;;  %v970_v33 = vadd.f32 %v969_v63, %v10104_v16  ;;  %953 = vadd.xlane.f32.xlu0 %v952_v20 }
  0x87   : > { %14883 = vst [vmem:[#allocation93_spill] sm:$0xff] %v10099_v53 }
  0x88   : > { %14884 = vst [vmem:[#allocation94_spill] sm:$0xff] %v10107_v52  ;;  %v971_v14 = vadd.f32 %v970_v33, %v10111_v60 }
  0x89   : > { %v8875_v13 = vpop.eup %8874 }
  0x8a   : > { %v973_v7 = vadd.f32 %v972_v41, %v971_v14  ;;  %v977_v22 = vmul.f32 2352.0, %v8875_v13  ;;  %vm981_vm1 = vweird.f32 %v8875_v13 }
  0x8c   : > { %974 = vadd.xlane.f32.xlu1 %v973_v7  ;;  %v978_v31 = vsub.f32 1.0, %v977_v22 }
  0x8e   : > { %v979_v58 = vmul.f32 %v8875_v13, %v978_v31 }
  0x90   : > { %v980_v26 = vadd.f32 %v8875_v13, %v979_v58 }
  0x92   : > { %v10117_v6 = vsel %vm981_vm1, %v8875_v13, %v980_v26 }
  0xbf   : > { %v912_v7 = vpop.xlane.xlu2 %911 }
  0xc4   : > { %v870_v53 = vpop.xlane.xlu1 %869 }
  0xc5   : > { %v985_v63 = vmul.f32 %v10117_v6, %v870_v53 }
  0xc7   : > { %v10121_v52 = vsub.f32 %v9565_v9, %v985_v63  ;;  %v10124_v20 = vsub.f32 %v9568_v10, %v985_v63  ;;  %v10127_v14 = vsub.f32 %v9571_v12, %v985_v63  ;;  %v10130_v33 = vsub.f32 %v9577_v15, %v985_v63 }
  0xc8   : > { %v10137_v53 = vsub.f32 %v9582_v19, %v985_v63  ;;  %v10145_v12 = vsub.f32 %v9587_v23, %v985_v63  ;;  %v10150_v38 = vsub.f32 %v9601_v30, %v985_v63  ;;  %v10155_v31 = vsub.f32 %v9611_v36, %v985_v63 }
  0xc9   : > { %14885 = vst [vmem:[#allocation95_spill] sm:$0xff] %v10127_v14  ;;  %v1181_v58 = vmul.f32 %v10121_v52, %v10121_v52  ;;  %v1182_v26 = vmul.f32 %v10124_v20, %v10124_v20  ;;  %v1183_v9 = vmul.f32 %v10127_v14, %v10127_v14  ;;  %v1184_v15 = vmul.f32 %v10130_v33, %v10130_v33 }
  0xca   : > { %14886 = vst [vmem:[#allocation96_spill] sm:$0xff] %v10145_v12  ;;  %v1185_v19 = vmul.f32 %v10137_v53, %v10137_v53  ;;  %v10168_v30 = vsub.f32 %v9620_v42, %v985_v63 }
  0xcb   : > { %v1337_v41 = vadd.f32 %v1182_v26, %v1181_v58  ;;  %14887 = vst [vmem:[#allocation97_spill] sm:$0xff] %v10150_v38  ;;  %v1187_v26 = vmul.f32 %v10150_v38, %v10150_v38  ;;  %v9292_v38 = vld [vmem:[%s9556_s4 + $0x2e0] sm:$0xff] }
  0xcc   : > { %14888 = vst [vmem:[#allocation98_spill] sm:$0xff] %v10155_v31 }
  0xcd   : > { %v1338_v22 = vadd.f32 %v1337_v41, %v1183_v9  ;;  %14889 = vst [vmem:[#allocation99_spill] sm:$0xff] %v10168_v30  ;;  %v10173_v9 = vsub.f32 %v9638_v51, %v985_v63  ;;  %v10189_v51 = vsub.f32 %v9652_v59, %v985_v63  ;;  %v10207_v59 = vsub.f32 %v9723_v54, %v985_v63 }
  0xce   : > { %v10224_v54 = vsub.f32 %v9790_v32, %v985_v63 }
  0xcf   : > { %v828_v13 = vpop.xlane.xlu0 %827  ;;  %v1339_v23 = vadd.f32 %v1338_v22, %v1184_v15  ;;  %14890 = vst [vmem:[#allocation100_spill] sm:$0xff] %v10173_v9  ;;  %v1188_v15 = vmul.f32 %v10155_v31, %v10155_v31  ;;  %v10186_v22 = vmul.f32 %v10117_v6, %v912_v7  ;;  %v10204_v7 = vsub.f32 %v9706_v37, %v985_v63 }
  0xd0   : > { %v10142_v10 = vmul.f32 %v10117_v6, %v828_v13  ;;  %v1186_v13 = vmul.f32 %v10145_v12, %v10145_v12  ;;  %14891 = vst [vmem:[#allocation101_spill] sm:$0xff] %v10189_v51  ;;  %v10221_v37 = vsub.f32 %v9767_v44, %v985_v63  ;;  %v1191_v44 = vmul.f32 %v10189_v51, %v10189_v51 }
  0xd1   : > { %v1340_v36 = vadd.f32 %v1339_v23, %v1185_v19  ;;  %v10192_v19 = vsub.f32 %v9665_v3, %v985_v63  ;;  %14895 = vst [vmem:[#allocation105_spill] sm:$0xff] %v10204_v7  ;;  %v10210_v3 = vsub.f32 %v9743_v8, %v985_v63  ;;  %v10227_v8 = vsub.f32 %v9770_v45, %v985_v63 }
  0xd2   : > { %v10161_v14 = vsub.f32 %v9590_v24, %v10142_v10  ;;  %v10165_v58 = vsub.f32 %v9594_v27, %v10142_v10  ;;  %v10179_v24 = vsub.f32 %v9597_v28, %v10142_v10  ;;  %v1189_v28 = vmul.f32 %v10168_v30, %v10168_v30  ;;  %14896 = vst [vmem:[#allocation106_spill] sm:$0xff] %v10207_v59  ;;  %v14911_v30 = vld [vmem:[#allocation30_spill] sm:$0xff] }
  0xd3   : > { %v1341_v41 = vadd.f32 %v1340_v36, %v1186_v13  ;;  %14892 = vst [vmem:[#allocation102_spill] sm:$0xff] %v10192_v19  ;;  %v10195_v13 = vsub.f32 %v9684_v17, %v985_v63  ;;  %v10201_v36 = vsub.f32 %v9607_v34, %v10142_v10  ;;  %v1190_v17 = vmul.f32 %v10173_v9, %v10173_v9 }
  0xd4   : > { %v1143_v27 = vmul.f32 %v10161_v14, %v10161_v14  ;;  %v1144_v42 = vmul.f32 %v10165_v58, %v10165_v58  ;;  %14897 = vst [vmem:[#allocation107_spill] sm:$0xff] %v10210_v3  ;;  %v1145_v34 = vmul.f32 %v10179_v24, %v10179_v24  ;;  %v1192_v32 = vmul.f32 %v10192_v19, %v10192_v19 }
  0xd5   : > { %14893 = vst [vmem:[#allocation103_spill] sm:$0xff] %v10195_v13  ;;  %v1342_v23 = vadd.f32 %v1341_v41, %v1187_v26  ;;  %v10216_v26 = vsub.f32 %v9616_v40, %v10142_v10  ;;  %v1193_v45 = vmul.f32 %v10195_v13, %v10195_v13  ;;  %v10258_v9 = vsub.f32 %v9658_v0, %v10142_v10 }
  0xd6   : > { %14894 = vst [vmem:[#allocation104_spill] sm:$0xff] %v10201_v36  ;;  %v1295_v41 = vadd.f32 %v1144_v42, %v1143_v27  ;;  %v1146_v27 = vmul.f32 %v10201_v36, %v10201_v36  ;;  %v1197_v0 = vmul.f32 %v10221_v37, %v10221_v37 }
  0xd7   : > { %v1343_v12 = vadd.f32 %v1342_v23, %v1188_v15  ;;  %14898 = vst [vmem:[#allocation108_spill] sm:$0xff] %v10221_v37  ;;  %v10231_v15 = vsub.f32 %v9623_v43, %v10142_v10  ;;  %v1194_v43 = vmul.f32 %v10204_v7, %v10204_v7  ;;  %v10289_v37 = vsub.f32 %v9695_v29, %v10142_v10 }
  0xd8   : > { %14899 = vst [vmem:[#allocation109_spill] sm:$0xff] %v10224_v54  ;;  %v1296_v42 = vadd.f32 %v1295_v41, %v1145_v34  ;;  %v1195_v34 = vmul.f32 %v10207_v59, %v10207_v59  ;;  %v1199_v41 = vmul.f32 %v10227_v8, %v10227_v8  ;;  %v10307_v29 = vsub.f32 %v9726_v55, %v10142_v10 }
  0xd9   : > { %14900 = vst [vmem:[#allocation110_spill] sm:$0xff] %v10227_v8  ;;  %v1344_v23 = vadd.f32 %v1343_v12, %v1189_v28  ;;  %v10248_v12 = vsub.f32 %v9645_v56, %v10142_v10  ;;  %v1198_v8 = vmul.f32 %v10224_v54, %v10224_v54  ;;  %v1150_v54 = vmul.f32 %v10258_v9, %v10258_v9 }
  0xda   : > { %14901 = vst [vmem:[#allocation111_spill] sm:$0xff] %v10231_v15  ;;  %v1297_v28 = vadd.f32 %v1296_v42, %v1146_v27  ;;  %v1196_v42 = vmul.f32 %v10210_v3, %v10210_v3  ;;  %v1152_v19 = vmul.f32 %v10289_v37, %v10289_v37 }
  0xdb   : > { %v933_v31 = vpop.xlane.xlu2 %932  ;;  %v1345_v63 = vadd.f32 %v1344_v23, %v1190_v17  ;;  %14902 = vst [vmem:[#allocation112_spill] sm:$0xff] %v10258_v9  ;;  %v1148_v17 = vmul.f32 %v10231_v15, %v10231_v15 }
  0xdc   : > { %v10234_v40 = vmul.f32 %v10117_v6, %v933_v31  ;;  %v1147_v31 = vmul.f32 %v10216_v26, %v10216_v26  ;;  %14904 = vst [vmem:[#allocation114_spill] sm:$0xff] %v10289_v37 }
  0xdd   : > { %v1346_v23 = vadd.f32 %v1345_v63, %v1191_v44  ;;  %v10278_v44 = vsub.f32 %v9668_v4, %v10142_v10  ;;  %14906 = vst [vmem:[#allocation116_spill] sm:$0xff] %v10307_v29 }
  0xde   : > { %v1298_v56 = vadd.f32 %v1297_v28, %v1147_v31  ;;  %v10264_v51 = vsub.f32 %v9628_v47, %v10234_v40  ;;  %v10268_v27 = vsub.f32 %v9631_v48, %v10234_v40  ;;  %v1149_v47 = vmul.f32 %v10248_v12, %v10248_v12 }
  0xdf   : > { %14903 = vst [vmem:[#allocation113_spill] sm:$0xff] %v10278_v44  ;;  %v1347_v63 = vadd.f32 %v1346_v23, %v1192_v32  ;;  %v10284_v48 = vsub.f32 %v9634_v49, %v10234_v40  ;;  %v1354_v28 = vsel %vm824_vm0, %v1199_v41, 0.0  ;;  %v10295_v4 = vsub.f32 %v9648_v57, %v10234_v40 }
  0xe0   : > { %v1299_v31 = vadd.f32 %v1298_v56, %v1148_v17  ;;  %v1238_v17 = vmul.f32 %v10264_v51, %v10264_v51  ;;  %v1239_v49 = vmul.f32 %v10268_v27, %v10268_v27  ;;  %v10303_v41 = vsub.f32 %v9713_v46, %v10142_v10 }
  0xe1   : > { %v1348_v32 = vadd.f32 %v1347_v63, %v1193_v45  ;;  %v10311_v57 = vsub.f32 %v9756_v35, %v10142_v10  ;;  %v1151_v45 = vmul.f32 %v10278_v44, %v10278_v44  ;;  %v1240_v46 = vmul.f32 %v10284_v48, %v10284_v48 }
  0xe2   : > { %v1300_v23 = vadd.f32 %v1299_v31, %v1149_v47  ;;  %14905 = vst [vmem:[#allocation115_spill] sm:$0xff] %v10303_v41  ;;  %v10317_v47 = vsub.f32 %v9661_v1, %v10234_v40  ;;  %v14909_v31 = vld [vmem:[#allocation27_spill] sm:$0xff]  ;;  %v10327_v35 = vsub.f32 %v14911_v30, %v10142_v10  ;;  %v1241_v44 = vmul.f32 %v10295_v4, %v10295_v4  ;;  %v14917_v30 = vld [vmem:[#allocation41_spill] sm:$0xff] }
  0xe3   : > { %14907 = vst [vmem:[#allocation117_spill] sm:$0xff] %v10311_v57  ;;  %v1349_v56 = vadd.f32 %v1348_v32, %v1194_v43  ;;  %v10323_v55 = vsub.f32 %v14909_v31, %v10142_v10  ;;  %v1400_v7 = vadd.f32 %v1239_v49, %v1238_v17  ;;  %v14915_v31 = vld [vmem:[#allocation38_spill] sm:$0xff]  ;;  %v10343_v13 = vsub.f32 %v14917_v30, %v10142_v10 }
  0xe4   : > { %v1301_v63 = vadd.f32 %v1300_v23, %v1150_v54  ;;  %14908 = vst [vmem:[#allocation118_spill] sm:$0xff] %v10317_v47  ;;  %v14913_v54 = vld [vmem:[#allocation11_spill] sm:$0xff]  ;;  %v10339_v59 = vsub.f32 %v14915_v31, %v10142_v10  ;;  %v1153_v37 = vmul.f32 %v10303_v41, %v10303_v41  ;;  %v1242_v17 = vmul.f32 %v10317_v47, %v10317_v47  ;;  %v14923_v41 = vld [vmem:[#allocation17_spill] sm:$0xff] }
  0xe5   : > { %14910 = vst [vmem:[#allocation27_spill] sm:$0xff] %v10323_v55  ;;  %v10333_v43 = vsub.f32 %v14913_v54, %v10234_v40  ;;  %v891_v1 = vpop.xlane.xlu1 %890  ;;  %v1350_v32 = vadd.f32 %v1349_v56, %v1195_v34  ;;  %v14919_v54 = vld [vmem:[#allocation15_spill] sm:$0xff]  ;;  %v1401_v49 = vadd.f32 %v1400_v7, %v1240_v46  ;;  %v1154_v30 = vmul.f32 %v10307_v29, %v10307_v29 }
  0xe6   : > { %14912 = vst [vmem:[#allocation30_spill] sm:$0xff] %v10327_v35  ;;  %v1302_v23 = vadd.f32 %v1301_v63, %v1151_v45  ;;  %v10349_v3 = vsub.f32 %v14919_v54, %v10234_v40  ;;  %v10354_v56 = vmul.f32 %v10117_v6, %v891_v1  ;;  %v14921_v63 = vld [vmem:[#allocation44_spill] sm:$0xff]  ;;  %v10364_v54 = vsub.f32 %v14923_v41, %v10234_v40  ;;  %v14925_v46 = vld [vmem:[#allocation47_spill] sm:$0xff] }
  0xe7   : > { %14914 = vst [vmem:[#allocation11_spill] sm:$0xff] %v10333_v43  ;;  %v1351_v34 = vadd.f32 %v1350_v32, %v1196_v42  ;;  %v10358_v31 = vsub.f32 %v14921_v63, %v10142_v10  ;;  %v1243_v32 = vmul.f32 %v10333_v43, %v10333_v43  ;;  %v1402_v7 = vadd.f32 %v1401_v49, %v1241_v44  ;;  %v14927_v29 = vld [vmem:[#allocation19_spill] sm:$0xff] }
  0xe8   : > { %14916 = vst [vmem:[#allocation38_spill] sm:$0xff] %v10339_v59  ;;  %v1303_v45 = vadd.f32 %v1302_v23, %v1152_v19  ;;  %v10370_v1 = vsub.f32 %v14925_v46, %v10142_v10  ;;  %v1155_v23 = vmul.f32 %v10311_v57, %v10311_v57  ;;  %v1156_v63 = vmul.f32 %v10323_v55, %v10323_v55  ;;  %v14931_v46 = vld [vmem:[#allocation12_spill] sm:$0xff] }
  0xe9   : > { %14918 = vst [vmem:[#allocation41_spill] sm:$0xff] %v10343_v13  ;;  %v1352_v42 = vadd.f32 %v1351_v34, %v1197_v0  ;;  %v10378_v41 = vsub.f32 %v14927_v29, %v10234_v40  ;;  %v1244_v34 = vmul.f32 %v10349_v3, %v10349_v3  ;;  %v1403_v44 = vadd.f32 %v1402_v7, %v1242_v17  ;;  %v14932_v29 = vld [vmem:[#allocation13_spill] sm:$0xff] }
  0xea   : > { %14920 = vst [vmem:[#allocation15_spill] sm:$0xff] %v10349_v3  ;;  %v1304_v19 = vadd.f32 %v1303_v45, %v1153_v37  ;;  %v1157_v10 = vmul.f32 %v10327_v35, %v10327_v35  ;;  %v14929_v45 = vld [vmem:[#allocation24_spill] sm:$0xff]  ;;  %v10390_v55 = vsub.f32 %v14931_v46, %v10354_v56  ;;  %v10394_v57 = vsub.f32 %v14932_v29, %v10354_v56  ;;  %v14933_v35 = vld [vmem:[#allocation14_spill] sm:$0xff] }
  0xeb   : > { %14922 = vst [vmem:[#allocation44_spill] sm:$0xff] %v10358_v31  ;;  %v1353_v0 = vadd.f32 %v1352_v42, %v1198_v8  ;;  %v10386_v49 = vsub.f32 %v14929_v45, %v10234_v40  ;;  %v1245_v17 = vmul.f32 %v10364_v54, %v10364_v54  ;;  %v1404_v42 = vadd.f32 %v1403_v44, %v1243_v32 }
  0xec   : > { %14924 = vst [vmem:[#allocation17_spill] sm:$0xff] %v10364_v54  ;;  %v1305_v37 = vadd.f32 %v1304_v19, %v1154_v30  ;;  %v1158_v7 = vmul.f32 %v10339_v59, %v10339_v59  ;;  %v1159_v45 = vmul.f32 %v10343_v13, %v10343_v13  ;;  %v1161_v46 = vmul.f32 %v10370_v1, %v10370_v1  ;;  %v14936_v13 = vld [vmem:[#allocation16_spill] sm:$0xff] }
  0xed   : > { %14926 = vst [vmem:[#allocation47_spill] sm:$0xff] %v10370_v1  ;;  %v1355_v8 = vadd.f32 %v1354_v28, %v1353_v0  ;;  %v10406_v29 = vsub.f32 %v14933_v35, %v10354_v56  ;;  %v1246_v32 = vmul.f32 %v10378_v41, %v10378_v41  ;;  %v1160_v44 = vmul.f32 %v10358_v31, %v10358_v31 }
  0xee   : > { %14928 = vst [vmem:[#allocation19_spill] sm:$0xff] %v10378_v41  ;;  %v1306_v30 = vadd.f32 %v1305_v37, %v1155_v23  ;;  %v14934_v23 = vld [vmem:[#allocation28_spill] sm:$0xff]  ;;  %v1405_v37 = vadd.f32 %v1404_v42, %v1244_v34  ;;  %v10418_v1 = vsub.f32 %v14936_v13, %v10354_v56  ;;  %v1200_v35 = vmul.f32 %v10390_v55, %v10390_v55  ;;  %v14939_v41 = vld [vmem:[#allocation18_spill] sm:$0xff] }
  0xef   : > { %14930 = vst [vmem:[#allocation24_spill] sm:$0xff] %v10386_v49  ;;  %1356 = vadd.xlane.f32.xlu1 %v1355_v8  ;;  %v10410_v0 = vsub.f32 %v14934_v23, %v10234_v40  ;;  %v1247_v34 = vmul.f32 %v10386_v49, %v10386_v49  ;;  %v1312_v13 = vsel %vm824_vm0, %v1161_v46, 0.0  ;;  %v10436_v54 = vsub.f32 %v14939_v41, %v10354_v56  ;;  %v14944_v46 = vld [vmem:[#allocation20_spill] sm:$0xff] }
  0xf0   : > { %v1307_v28 = vadd.f32 %v1306_v30, %v1156_v63  ;;  %v1201_v63 = vmul.f32 %v10394_v57, %v10394_v57  ;;  %v14937_v30 = vld [vmem:[#allocation32_spill] sm:$0xff]  ;;  %v1406_v42 = vadd.f32 %v1405_v37, %v1245_v17  ;;  %v10452_v41 = vsub.f32 %v14944_v46, %v10354_v56  ;;  %v14949_v46 = vld [vmem:[#allocation25_spill] sm:$0xff] }
  0xf1   : > { %v849_v19 = vpop.xlane.xlu0 %848  ;;  %14935 = vst [vmem:[#allocation12_spill] sm:$0xff] %v10410_v0  ;;  %v10426_v23 = vsub.f32 %v14937_v30, %v10234_v40  ;;  %v14940_v30 = vld [vmem:[#allocation39_spill] sm:$0xff]  ;;  %v1248_v17 = vmul.f32 %v10410_v0, %v10410_v0  ;;  %v1203_v36 = vmul.f32 %v10418_v1, %v10418_v1  ;;  %v10468_v0 = vsub.f32 %v14949_v46, %v10354_v56  ;;  %v14953_v46 = vld [vmem:[#allocation29_spill] sm:$0xff] }
  0xf2   : > { %v1308_v8 = vadd.f32 %v1307_v28, %v1157_v10  ;;  %v10431_v31 = vmul.f32 %v10117_v6, %v849_v19  ;;  %v1202_v10 = vmul.f32 %v10406_v29, %v10406_v29  ;;  %v10442_v59 = vsub.f32 %v14940_v30, %v10234_v40  ;;  %v14942_v19 = vld [vmem:[#allocation45_spill] sm:$0xff]  ;;  %14945 = vst [vmem:[#allocation16_spill] sm:$0xff] %v10452_v41  ;;  %v14946_v30 = vld [vmem:[#allocation50_spill] sm:$0xff] }
  0xf3   : > { %14938 = vst [vmem:[#allocation13_spill] sm:$0xff] %v10426_v23  ;;  %v1407_v37 = vadd.f32 %v1406_v42, %v1246_v32  ;;  %v10448_v49 = vsub.f32 %v14942_v19, %v10234_v40  ;;  %v10458_v43 = vsub.f32 %v14946_v30, %v10234_v40  ;;  %v1249_v32 = vmul.f32 %v10426_v23, %v10426_v23 }
  0xf4   : > { %v1309_v28 = vadd.f32 %v1308_v8, %v1158_v7  ;;  %14941 = vst [vmem:[#allocation14_spill] sm:$0xff] %v10442_v59  ;;  %v1358_v7 = vadd.f32 %v1201_v63, %v1200_v35  ;;  %v10464_v19 = vsub.f32 %v9900_v5, %v10234_v40  ;;  %v1204_v35 = vmul.f32 %v10436_v54, %v10436_v54 }
  0xf5   : > { %14943 = vst [vmem:[#allocation28_spill] sm:$0xff] %v10448_v49  ;;  %v1408_v42 = vadd.f32 %v1407_v37, %v1247_v34  ;;  %v1250_v34 = vmul.f32 %v10442_v59, %v10442_v59  ;;  %v10480_v5 = vsub.f32 %v9928_v61, %v10234_v40  ;;  %v10484_v23 = vsub.f32 %v14953_v46, %v10354_v56  ;;  %v14957_v46 = vld [vmem:[#allocation21_spill] sm:$0xff] }
  0xf6   : > { %v1310_v8 = vadd.f32 %v1309_v28, %v1159_v45  ;;  %14947 = vst [vmem:[#allocation32_spill] sm:$0xff] %v10458_v43  ;;  %v1359_v45 = vadd.f32 %v1358_v7, %v1202_v10  ;;  %v10474_v28 = vsub.f32 %v9925_v11, %v10234_v40  ;;  %v1251_v11 = vmul.f32 %v10448_v49, %v10448_v49 }
  0xf7   : > { %14948 = vst [vmem:[#allocation18_spill] sm:$0xff] %v10464_v19  ;;  %v1409_v37 = vadd.f32 %v1408_v42, %v1248_v17  ;;  %v14955_v17 = vld [vmem:[#allocation33_spill] sm:$0xff]  ;;  %v1206_v61 = vmul.f32 %v10468_v0, %v10468_v0  ;;  %v10498_v9 = vsub.f32 %v14957_v46, %v10431_v31 }
  0xf8   : > { %14950 = vst [vmem:[#allocation39_spill] sm:$0xff] %v10468_v0  ;;  %v1311_v63 = vadd.f32 %v1310_v8, %v1160_v44  ;;  %v1205_v44 = vmul.f32 %v10452_v41, %v10452_v41  ;;  %v1360_v10 = vadd.f32 %v1359_v45, %v1203_v36  ;;  %v10492_v42 = vsub.f32 %v14955_v17, %v10354_v56  ;;  %v14958_v41 = vld [vmem:[#allocation22_spill] sm:$0xff]  ;;  %v14961_v17 = vld [vmem:[#allocation40_spill] sm:$0xff] }
  0xf9   : > { %14951 = vst [vmem:[#allocation45_spill] sm:$0xff] %v10474_v28  ;;  %v954_v30 = vpop.xlane.xlu0 %953  ;;  %v1410_v8 = vadd.f32 %v1409_v37, %v1249_v32  ;;  %v10502_v36 = vsub.f32 %v14958_v41, %v10431_v31  ;;  %v14959_v32 = vld [vmem:[#allocation65_spill] sm:$0xff]  ;;  %v10517_v41 = vsub.f32 %v14961_v17, %v10354_v56  ;;  %v1254_v46 = vmul.f32 %v10474_v28, %v10474_v28  ;;  %v14964_v28 = vld [vmem:[#allocation46_spill] sm:$0xff] }
  0xfa   : > { %14952 = vst [vmem:[#allocation20_spill] sm:$0xff] %v10480_v5  ;;  %v1313_v7 = vadd.f32 %v1312_v13, %v1311_v63  ;;  %v1361_v59 = vadd.f32 %v1360_v10, %v1204_v35  ;;  %v10505_v13 = vmul.f32 %v10117_v6, %v954_v30  ;;  %v10509_v45 = vsub.f32 %v14959_v32, %v10234_v40 }
  0xfb   : > { %14954 = vst [vmem:[#allocation50_spill] sm:$0xff] %v10484_v23  ;;  %v1252_v63 = vmul.f32 %v10458_v43, %v10458_v43  ;;  %v1411_v35 = vadd.f32 %v1410_v8, %v1250_v34  ;;  %v1256_v10 = vmul.f32 %v10480_v5, %v10480_v5  ;;  %v1207_v30 = vmul.f32 %v10484_v23, %v10484_v23  ;;  %v14963_v5 = vld [vmem:[#allocation23_spill] sm:$0xff]  ;;  %v14966_v43 = vld [vmem:[#allocation26_spill] sm:$0xff] }
  0xfc   : > { %14956 = vst [vmem:[#allocation25_spill] sm:$0xff] %v10492_v42  ;;  %1314 = vadd.xlane.f32.xlu2 %v1313_v7  ;;  %v1362_v7 = vadd.f32 %v1361_v59, %v1205_v44  ;;  %v1253_v40 = vmul.f32 %v10464_v19, %v10464_v19  ;;  %v1208_v34 = vmul.f32 %v10492_v42, %v10492_v42  ;;  %v14968_v23 = vld [vmem:[#allocation51_spill] sm:$0xff] }
  0xfd   : > { %14960 = vst [vmem:[#allocation29_spill] sm:$0xff] %v10509_v45  ;;  %v1412_v32 = vadd.f32 %v1411_v35, %v1251_v11  ;;  %v10529_v49 = vsub.f32 %v14963_v5, %v10431_v31  ;;  %v1162_v17 = vmul.f32 %v10498_v9, %v10498_v9  ;;  %v1163_v59 = vmul.f32 %v10502_v36, %v10502_v36 }
  0xfe   : > { %14962 = vst [vmem:[#allocation33_spill] sm:$0xff] %v10517_v41  ;;  %v1363_v8 = vadd.f32 %v1362_v7, %v1206_v61  ;;  %v1255_v11 = vmul.f32 %v10509_v45, %v10509_v45  ;;  %v10542_v61 = vsub.f32 %v14964_v28, %v10354_v56  ;;  %v1417_v5 = vsel %vm824_vm0, %v1256_v10, 0.0  ;;  %v14972_v28 = vld [vmem:[#allocation61_spill] sm:$0xff] }
  0xff   : > { %v975_v37 = vpop.xlane.xlu1 %974  ;;  %v1413_v35 = vadd.f32 %v1412_v32, %v1252_v63  ;;  %v1209_v7 = vmul.f32 %v10517_v41, %v10517_v41  ;;  %v10549_v19 = vsub.f32 %v14966_v43, %v10431_v31  ;;  %v10553_v3 = vsub.f32 %v14968_v23, %v10354_v56  ;;  %v14970_v63 = vld [vmem:[#allocation56_spill] sm:$0xff]  ;;  %v14975_v23 = vld [vmem:[#allocation66_spill] sm:$0xff] }
 0x100   : > { %v10536_v44 = vmul.f32 %v10117_v6, %v975_v37  ;;  %14965 = vst [vmem:[#allocation21_spill] sm:$0xff] %v10542_v61  ;;  %v1364_v42 = vadd.f32 %v1363_v8, %v1207_v30  ;;  %v10557_v32 = vsub.f32 %v14970_v63, %v10354_v56  ;;  %v10561_v10 = vsub.f32 %v14972_v28, %v10354_v56  ;;  %v14974_v30 = vld [vmem:[#allocation31_spill] sm:$0xff]  ;;  %v14978_v28 = vld [vmem:[#allocation34_spill] sm:$0xff] }
 0x101   : > { %14967 = vst [vmem:[#allocation22_spill] sm:$0xff] %v10549_v19  ;;  %v1414_v37 = vadd.f32 %v1413_v35, %v1253_v40  ;;  %v10565_v8 = vsub.f32 %v14974_v30, %v10431_v31  ;;  %v1164_v43 = vmul.f32 %v10529_v49, %v10529_v49  ;;  %v1316_v40 = vadd.f32 %v1163_v59, %v1162_v17 }
 0x102   : > { %14969 = vst [vmem:[#allocation65_spill] sm:$0xff] %v10553_v3  ;;  %v1365_v45 = vadd.f32 %v1364_v42, %v1208_v34  ;;  %v10571_v41 = vsub.f32 %v14975_v23, %v10354_v56  ;;  %v10575_v63 = vsub.f32 %v9970_v21, %v10354_v56  ;;  %v1210_v42 = vmul.f32 %v10542_v61, %v10542_v61  ;;  %v14982_v23 = vld [vmem:[#allocation42_spill] sm:$0xff] }
 0x103   : > { %14971 = vst [vmem:[#allocation40_spill] sm:$0xff] %v10557_v32  ;;  %v1415_v35 = vadd.f32 %v1414_v37, %v1254_v46  ;;  %v10581_v30 = vsub.f32 %v14978_v28, %v10431_v31  ;;  %v1165_v17 = vmul.f32 %v10549_v19, %v10549_v19  ;;  %v1317_v46 = vadd.f32 %v1316_v40, %v1164_v43 }
 0x104   : > { %14973 = vst [vmem:[#allocation23_spill] sm:$0xff] %v10561_v10  ;;  %v1366_v34 = vadd.f32 %v1365_v45, %v1209_v7  ;;  %v10587_v37 = vsub.f32 %v9987_v62, %v10354_v56  ;;  %v10591_v21 = vsub.f32 %v9990_v50, %v10354_v56  ;;  %v1211_v45 = vmul.f32 %v10553_v3, %v10553_v3 }
 0x105   : > { %14976 = vst [vmem:[#allocation46_spill] sm:$0xff] %v10571_v41  ;;  %v1416_v59 = vadd.f32 %v1415_v35, %v1255_v11  ;;  %v10597_v28 = vsub.f32 %v14982_v23, %v10431_v31  ;;  %v1166_v11 = vmul.f32 %v10565_v8, %v10565_v8  ;;  %v1318_v43 = vadd.f32 %v1317_v46, %v1165_v17  ;;  %v9276_v17 = vld [vmem:[%s9556_s4 + $0x260] sm:$0xff] }
 0x106   : > { %14977 = vst [vmem:[#allocation26_spill] sm:$0xff] %v10575_v63  ;;  %v1367_v7 = vadd.f32 %v1366_v34, %v1210_v42  ;;  %v10603_v40 = vsub.f32 %v10006_v25, %v10354_v56  ;;  %v1212_v50 = vmul.f32 %v10557_v32, %v10557_v32  ;;  %v1213_v35 = vmul.f32 %v10561_v10, %v10561_v10  ;;  %v14984_v34 = vld [vmem:[#allocation48_spill] sm:$0xff] }
 0x107   : > { %14979 = vst [vmem:[#allocation51_spill] sm:$0xff] %v10581_v30  ;;  %v1418_v62 = vadd.f32 %v1417_v5, %v1416_v59  ;;  %v10611_v23 = vsub.f32 %v14984_v34, %v10431_v31  ;;  %v1167_v61 = vmul.f32 %v10581_v30, %v10581_v30  ;;  %v1319_v5 = vadd.f32 %v1318_v43, %v1166_v11  ;;  %v9277_v59 = vld [vmem:[%s9556_s4 + $0x268] sm:$0xff]  ;;  %v14986_v34 = vld [vmem:[#allocation52_spill] sm:$0xff] }
 0x108   : > { %14980 = vst [vmem:[#allocation56_spill] sm:$0xff] %v10587_v37  ;;  %v1368_v42 = vadd.f32 %v1367_v7, %v1211_v45  ;;  %v1214_v25 = vmul.f32 %v10571_v41, %v10571_v41  ;;  %v1218_v56 = vmul.f32 %v10591_v21, %v10591_v21  ;;  %v10621_v46 = vsub.f32 %v9276_v17, %v10186_v22 }
 0x109   : > { %14981 = vst [vmem:[#allocation61_spill] sm:$0xff] %v10591_v21  ;;  %1419 = vadd.xlane.f32.xlu1 %v1418_v62  ;;  %v10625_v45 = vsub.f32 %v9277_v59, %v10186_v22  ;;  %v10629_v11 = vsub.f32 %v14986_v34, %v10431_v31  ;;  %v1168_v43 = vmul.f32 %v10597_v28, %v10597_v28  ;;  %v9278_v59 = vld [vmem:[%s9556_s4 + $0x270] sm:$0xff]  ;;  %v14988_v34 = vld [vmem:[#allocation58_spill] sm:$0xff] }
 0x10a   : > { %14983 = vst [vmem:[#allocation31_spill] sm:$0xff] %v10603_v40  ;;  %v1369_v7 = vadd.f32 %v1368_v42, %v1212_v50  ;;  %v1320_v62 = vadd.f32 %v1319_v5, %v1167_v61  ;;  %v1215_v21 = vmul.f32 %v10575_v63, %v10575_v63  ;;  %v1216_v17 = vmul.f32 %v10587_v37, %v10587_v37  ;;  %v9279_v37 = vld [vmem:[%s9556_s4 + $0x278] sm:$0xff]  ;;  %v14994_v63 = vld [vmem:[#allocation70_spill] sm:$0xff] }
 0x10b   : > { %14985 = vst [vmem:[#allocation66_spill] sm:$0xff] %v10611_v23  ;;  %v1217_v3 = vmul.f32 %v10603_v40, %v10603_v40  ;;  %v10641_v50 = vsub.f32 %v9278_v59, %v10186_v22  ;;  %v10645_v10 = vsub.f32 %v14988_v34, %v10431_v31  ;;  %v1169_v61 = vmul.f32 %v10611_v23, %v10611_v23  ;;  %v14990_v34 = vld [vmem:[#allocation62_spill] sm:$0xff] }
 0x10c   : > { %14987 = vst [vmem:[#allocation34_spill] sm:$0xff] %v10629_v11  ;;  %v1370_v42 = vadd.f32 %v1369_v7, %v1213_v35  ;;  %v1321_v5 = vadd.f32 %v1320_v62, %v1168_v43  ;;  %v1375_v41 = vsel %vm824_vm0, %v1218_v56, 0.0  ;;  %v10652_v32 = vsub.f32 %v9279_v37, %v10186_v22  ;;  %v14992_v62 = vld [vmem:[#allocation67_spill] sm:$0xff]  ;;  %v9280_v23 = vld [vmem:[%s9556_s4 + $0x280] sm:$0xff] }
 0x10d   : > { %14989 = vst [vmem:[#allocation42_spill] sm:$0xff] %v10645_v10  ;;  %v1219_v59 = vmul.f32 %v10621_v46, %v10621_v46  ;;  %v1220_v35 = vmul.f32 %v10625_v45, %v10625_v45  ;;  %v10660_v40 = vsub.f32 %v14990_v34, %v10431_v31  ;;  %v1170_v43 = vmul.f32 %v10629_v11, %v10629_v11  ;;  %v14997_v34 = vld [vmem:[#allocation73_spill] sm:$0xff]  ;;  %v9281_v11 = vld [vmem:[%s9556_s4 + $0x288] sm:$0xff] }
 0x10e   : > { %v1371_v7 = vadd.f32 %v1370_v42, %v1214_v25  ;;  %v1322_v56 = vadd.f32 %v1321_v5, %v1169_v61  ;;  %v10666_v37 = vsub.f32 %v14992_v62, %v10431_v31  ;;  %v10670_v19 = vsub.f32 %v14994_v63, %v10431_v31 }
 0x10f   : > { %14991 = vst [vmem:[#allocation48_spill] sm:$0xff] %v10660_v40  ;;  %v10674_v30 = vsub.f32 %v9280_v23, %v10186_v22  ;;  %v1221_v25 = vmul.f32 %v10641_v50, %v10641_v50  ;;  %v10680_v61 = vsub.f32 %v14997_v34, %v10431_v31  ;;  %v1171_v5 = vmul.f32 %v10645_v10, %v10645_v10  ;;  %v15001_v34 = vld [vmem:[#allocation78_spill] sm:$0xff] }
 0x110   : > { %14993 = vst [vmem:[#allocation52_spill] sm:$0xff] %v10666_v37  ;;  %v1372_v42 = vadd.f32 %v1371_v7, %v1215_v21  ;;  %v1323_v62 = vadd.f32 %v1322_v56, %v1170_v43  ;;  %v10686_v63 = vsub.f32 %v10013_v2, %v10431_v31  ;;  %v10690_v23 = vsub.f32 %v9281_v11, %v10186_v22  ;;  %v15003_v2 = vld [vmem:[#allocation81_spill] sm:$0xff]  ;;  %v9282_v11 = vld [vmem:[%s9556_s4 + $0x290] sm:$0xff] }
 0x111   : > { %14995 = vst [vmem:[#allocation58_spill] sm:$0xff] %v10670_v19  ;;  %v1222_v15 = vmul.f32 %v10652_v32, %v10652_v32  ;;  %v1379_v21 = vadd.f32 %v1220_v35, %v1219_v59  ;;  %v10696_v47 = vsub.f32 %v15001_v34, %v10431_v31  ;;  %v1172_v43 = vmul.f32 %v10660_v40, %v10660_v40  ;;  %v15007_v34 = vld [vmem:[#allocation84_spill] sm:$0xff] }
 0x112   : > { %14996 = vst [vmem:[#allocation62_spill] sm:$0xff] %v10674_v30  ;;  %v1373_v7 = vadd.f32 %v1372_v42, %v1216_v17  ;;  %v1324_v56 = vadd.f32 %v1323_v62, %v1171_v5  ;;  %v10702_v10 = vsub.f32 %v15003_v2, %v10431_v31  ;;  %v10706_v0 = vsub.f32 %v9282_v11, %v10186_v22  ;;  %v9283_v40 = vld [vmem:[%s9556_s4 + $0x298] sm:$0xff] }
 0x113   : > { %14998 = vst [vmem:[#allocation67_spill] sm:$0xff] %v10680_v61  ;;  %v1223_v17 = vmul.f32 %v10674_v30, %v10674_v30  ;;  %v1380_v59 = vadd.f32 %v1379_v21, %v1221_v25  ;;  %v10712_v42 = vsub.f32 %v10055_v39, %v10431_v31  ;;  %v1173_v5 = vmul.f32 %v10666_v37, %v10666_v37  ;;  %v9284_v37 = vld [vmem:[%s9556_s4 + $0x2a0] sm:$0xff] }
 0x114   : > { %14999 = vst [vmem:[#allocation70_spill] sm:$0xff] %v10686_v63  ;;  %v1374_v35 = vadd.f32 %v1373_v7, %v1217_v3  ;;  %v1325_v62 = vadd.f32 %v1324_v56, %v1172_v43  ;;  %v10718_v2 = vsub.f32 %v15007_v34, %v10431_v31  ;;  %v10722_v11 = vsub.f32 %v9283_v40, %v10186_v22  ;;  %v15011_v56 = vld [vmem:[#allocation35_spill] sm:$0xff] }
 0x115   : > { %15000 = vst [vmem:[#allocation73_spill] sm:$0xff] %v10690_v23  ;;  %v1224_v25 = vmul.f32 %v10690_v23, %v10690_v23  ;;  %v1381_v3 = vadd.f32 %v1380_v59, %v1222_v15  ;;  %v1174_v39 = vmul.f32 %v10670_v19, %v10670_v19  ;;  %v10730_v43 = vsub.f32 %v9284_v37, %v10186_v22  ;;  %v15012_v15 = vld [vmem:[#allocation36_spill] sm:$0xff] }
 0x116   : > { %15002 = vst [vmem:[#allocation78_spill] sm:$0xff] %v10696_v47  ;;  %v1376_v21 = vadd.f32 %v1375_v41, %v1374_v35  ;;  %v1326_v7 = vadd.f32 %v1325_v62, %v1173_v5  ;;  %v1225_v31 = vmul.f32 %v10706_v0, %v10706_v0  ;;  %v10736_v34 = vsub.f32 %v15011_v56, %v10505_v13  ;;  %v9286_v19 = vld [vmem:[%s9556_s4 + $0x2b0] sm:$0xff] }
 0x117   : > { %15004 = vst [vmem:[#allocation81_spill] sm:$0xff] %v10702_v10  ;;  %v1382_v40 = vadd.f32 %v1381_v3, %v1223_v17  ;;  %v10740_v41 = vsub.f32 %v15012_v15, %v10505_v13  ;;  %v1175_v59 = vmul.f32 %v10680_v61, %v10680_v61  ;;  %v1176_v37 = vmul.f32 %v10686_v63, %v10686_v63  ;;  %v9285_v17 = vld [vmem:[%s9556_s4 + $0x2a8] sm:$0xff] }
 0x118   : > { %15005 = vst [vmem:[#allocation119_spill] sm:$0xff] %v10706_v0  ;;  %1377 = vadd.xlane.f32.xlu2 %v1376_v21  ;;  %v1177_v35 = vmul.f32 %v10696_v47, %v10696_v47  ;;  %v1327_v5 = vadd.f32 %v1326_v7, %v1174_v39  ;;  %v10750_v62 = vsub.f32 %v9285_v17, %v10186_v22  ;;  %v15014_v21 = vld [vmem:[#allocation37_spill] sm:$0xff] }
 0x119   : > { %15006 = vst [vmem:[#allocation120_spill] sm:$0xff] %v10712_v42  ;;  %v1226_v3 = vmul.f32 %v10722_v11, %v10722_v11  ;;  %v1383_v56 = vadd.f32 %v1382_v40, %v1224_v25  ;;  %v10756_v15 = vsub.f32 %v15014_v21, %v10505_v13  ;;  %v1180_v61 = vmul.f32 %v10718_v2, %v10718_v2 }
 0x11a   : > { %15008 = vst [vmem:[#allocation84_spill] sm:$0xff] %v10718_v2  ;;  %v1328_v63 = vadd.f32 %v1327_v5, %v1175_v59  ;;  %v10762_v39 = vsub.f32 %v9286_v19, %v10186_v22  ;;  %v1227_v7 = vmul.f32 %v10730_v43, %v10730_v43  ;;  %v1257_v40 = vmul.f32 %v10736_v34, %v10736_v34  ;;  %v9287_v2 = vld [vmem:[%s9556_s4 + $0x2b8] sm:$0xff] }
 0x11b   : > { %15009 = vst [vmem:[#allocation121_spill] sm:$0xff] %v10722_v11  ;;  %v1384_v17 = vadd.f32 %v1383_v56, %v1225_v31  ;;  %v15017_v11 = vld [vmem:[#allocation43_spill] sm:$0xff]  ;;  %v1258_v21 = vmul.f32 %v10740_v41, %v10740_v41  ;;  %v1178_v59 = vmul.f32 %v10702_v10, %v10702_v10  ;;  %v1179_v19 = vmul.f32 %v10712_v42, %v10712_v42 }
 0x11c   : > { %15010 = vst [vmem:[#allocation122_spill] sm:$0xff] %v10730_v43  ;;  %v10768_v25 = vsub.f32 %v15017_v11, %v10505_v13  ;;  %v1329_v5 = vadd.f32 %v1328_v63, %v1176_v37  ;;  %v10780_v31 = vsub.f32 %v9287_v2, %v10186_v22  ;;  %v1228_v11 = vmul.f32 %v10750_v62, %v10750_v62  ;;  %v15019_v43 = vld [vmem:[#allocation49_spill] sm:$0xff] }
 0x11d   : > { %15013 = vst [vmem:[#allocation35_spill] sm:$0xff] %v10750_v62  ;;  %v1385_v56 = vadd.f32 %v1384_v17, %v1226_v3  ;;  %v10786_v47 = vsub.f32 %v15019_v43, %v10505_v13  ;;  %v1259_v10 = vmul.f32 %v10756_v15, %v10756_v15  ;;  %v1333_v63 = vsel %vm824_vm0, %v1180_v61, 0.0  ;;  %v9288_v37 = vld [vmem:[%s9556_s4 + $0x2c0] sm:$0xff]  ;;  %v9289_v61 = vld [vmem:[%s9556_s4 + $0x2c8] sm:$0xff] }
 0x11e   : > { %15015 = vst [vmem:[#allocation36_spill] sm:$0xff] %v10756_v15  ;;  %v1330_v23 = vadd.f32 %v1329_v5, %v1177_v35  ;;  %v10793_v42 = vsub.f32 %v9288_v37, %v10186_v22  ;;  %v1229_v2 = vmul.f32 %v10762_v39, %v10762_v39  ;;  %v15022_v3 = vld [vmem:[#allocation53_spill] sm:$0xff]  ;;  %v1260_v43 = vmul.f32 %v10768_v25, %v10768_v25  ;;  %v9290_v37 = vld [vmem:[%s9556_s4 + $0x2d0] sm:$0xff] }
 0x11f   : > { %15016 = vst [vmem:[#allocation37_spill] sm:$0xff] %v10762_v39  ;;  %v1386_v62 = vadd.f32 %v1385_v56, %v1227_v7  ;;  %v10799_v17 = vsub.f32 %v15022_v3, %v10505_v13  ;;  %v1421_v35 = vadd.f32 %v1258_v21, %v1257_v40  ;;  %v10805_v0 = vsub.f32 %v9289_v61, %v10186_v22  ;;  %v15026_v7 = vld [vmem:[#allocation59_spill] sm:$0xff] }
 0x120   : > { %15018 = vst [vmem:[#allocation43_spill] sm:$0xff] %v10780_v31  ;;  %v1331_v5 = vadd.f32 %v1330_v23, %v1178_v59  ;;  %v10809_v30 = vsub.f32 %v9290_v37, %v10186_v22  ;;  %v10813_v56 = vsub.f32 %v15026_v7, %v10505_v13  ;;  %v1230_v3 = vmul.f32 %v10780_v31, %v10780_v31  ;;  %v9291_v59 = vld [vmem:[%s9556_s4 + $0x2d8] sm:$0xff] }
 0x121   : > { %15020 = vst [vmem:[#allocation49_spill] sm:$0xff] %v10786_v47  ;;  %v1387_v39 = vadd.f32 %v1386_v62, %v1228_v11  ;;  %v1261_v40 = vmul.f32 %v10786_v47, %v10786_v47  ;;  %v1422_v23 = vadd.f32 %v1421_v35, %v1259_v10  ;;  %v10821_v61 = vsub.f32 %v9291_v59, %v10186_v22  ;;  %v15030_v62 = vld [vmem:[#allocation63_spill] sm:$0xff] }
 0x122   : > { %15021 = vst [vmem:[#allocation123_spill] sm:$0xff] %v10793_v42  ;;  %v1332_v21 = vadd.f32 %v1331_v5, %v1179_v19  ;;  %v10825_v37 = vsub.f32 %v9292_v38, %v10186_v22  ;;  %v1231_v7 = vmul.f32 %v10793_v42, %v10793_v42  ;;  %v10831_v11 = vsub.f32 %v15030_v62, %v10505_v13  ;;  %v15032_v38 = vld [vmem:[#allocation68_spill] sm:$0xff]  ;;  %v15034_v62 = vld [vmem:[#allocation54_spill] sm:$0xff] }
 0x123   : > { %15023 = vst [vmem:[#allocation53_spill] sm:$0xff] %v10799_v17  ;;  %v1388_v31 = vadd.f32 %v1387_v39, %v1229_v2  ;;  %v1262_v10 = vmul.f32 %v10799_v17, %v10799_v17  ;;  %v1423_v19 = vadd.f32 %v1422_v23, %v1260_v43  ;;  %v1232_v5 = vmul.f32 %v10805_v0, %v10805_v0  ;;  %v15036_v17 = vld [vmem:[#allocation55_spill] sm:$0xff] }
 0x124   : > { %15024 = vst [vmem:[#allocation124_spill] sm:$0xff] %v10805_v0  ;;  %v1334_v35 = vadd.f32 %v1333_v63, %v1332_v21  ;;  %v10839_v59 = vsub.f32 %v15032_v38, %v10505_v13  ;;  %v1263_v42 = vmul.f32 %v10813_v56, %v10813_v56  ;;  %v10845_v47 = vsub.f32 %v15034_v62, %v10536_v44  ;;  %v9293_v63 = vld [vmem:[%s9556_s4 + $0x2e8] sm:$0xff]  ;;  %v9294_v21 = vld [vmem:[%s9556_s4 + $0x2f0] sm:$0xff]  ;;  %v15042_v62 = vld [vmem:[#allocation57_spill] sm:$0xff]  ;;  %s14772_s4 = smov 80  }
 0x125   : > { %15025 = vst [vmem:[#allocation125_spill] sm:$0xff] %v10809_v30  ;;  %v1389_v39 = vadd.f32 %v1388_v31, %v1230_v3  ;;  %v1424_v2 = vadd.f32 %v1423_v19, %v1261_v40  ;;  %v10849_v43 = vsub.f32 %v15036_v17, %v10536_v44  ;;  %v10853_v23 = vsub.f32 %v9293_v63, %v10186_v22  ;;  %v15040_v3 = vld [vmem:[#allocation71_spill] sm:$0xff] }
 0x126   : > { %15027 = vst [vmem:[#allocation59_spill] sm:$0xff] %v10813_v56  ;;  %1335 = vadd.xlane.f32.xlu0 %v1334_v35  ;;  %v10857_v38 = vsub.f32 %v9294_v21, %v10186_v22  ;;  %v1233_v31 = vmul.f32 %v10809_v30, %v10809_v30  ;;  %v10863_v40 = vsub.f32 %v15040_v3, %v10505_v13  ;;  %v15044_v21 = vld [vmem:[#allocation74_spill] sm:$0xff] }
 0x127   : > { %15028 = vst [vmem:[#allocation126_spill] sm:$0xff] %v10821_v61  ;;  %v1390_v19 = vadd.f32 %v1389_v39, %v1231_v7  ;;  %v1264_v17 = vmul.f32 %v10831_v11, %v10831_v11  ;;  %v1425_v35 = vadd.f32 %v1424_v2, %v1262_v10  ;;  %v10869_v63 = vsub.f32 %v15042_v62, %v10536_v44  ;;  %v15046_v7 = vld [vmem:[#allocation60_spill] sm:$0xff] }
 0x128   : > { %15029 = vst [vmem:[#allocation127_spill] sm:$0xff] %v10825_v37  ;;  %v1234_v22 = vmul.f32 %v10821_v61, %v10821_v61  ;;  %v10875_v0 = vsub.f32 %v15044_v21, %v10505_v13  ;;  %v1265_v3 = vmul.f32 %v10839_v59, %v10839_v59  ;;  %v10881_v39 = vsub.f32 %v15046_v7, %v10536_v44 }
 0x129   : > { %15031 = vst [vmem:[#allocation63_spill] sm:$0xff] %v10831_v11  ;;  %v1391_v30 = vadd.f32 %v1390_v19, %v1232_v5  ;;  %v1426_v10 = vadd.f32 %v1425_v35, %v1263_v42  ;;  %v1276_v2 = vmul.f32 %v10845_v47, %v10845_v47  ;;  %v1277_v62 = vmul.f32 %v10849_v43, %v10849_v43  ;;  %v15050_v35 = vld [vmem:[#allocation64_spill] sm:$0xff] }
 0x12a   : > { %15033 = vst [vmem:[#allocation68_spill] sm:$0xff] %v10839_v59  ;;  %v1235_v61 = vmul.f32 %v10825_v37, %v10825_v37  ;;  %v1236_v21 = vmul.f32 %v10853_v23, %v10853_v23  ;;  %v15048_v59 = vld [vmem:[#allocation76_spill] sm:$0xff]  ;;  %v1266_v5 = vmul.f32 %v10863_v40, %v10863_v40  ;;  %v10899_v7 = vsub.f32 %v15050_v35, %v10536_v44 }
 0x12b   : > { %15035 = vst [vmem:[#allocation54_spill] sm:$0xff] %v10845_v47  ;;  %v10893_v11 = vsub.f32 %v15048_v59, %v10505_v13  ;;  %v1392_v42 = vadd.f32 %v1391_v30, %v1233_v31  ;;  %v1427_v19 = vadd.f32 %v1426_v10, %v1264_v17  ;;  %v1278_v56 = vmul.f32 %v10869_v63, %v10869_v63  ;;  %v15054_v30 = vld [vmem:[#allocation69_spill] sm:$0xff]  ;;  %v15058_v47 = vld [vmem:[#allocation72_spill] sm:$0xff] }
 0x12c   : > { %15037 = vst [vmem:[#allocation55_spill] sm:$0xff] %v10849_v43  ;;  %v1237_v37 = vmul.f32 %v10857_v38, %v10857_v38  ;;  %v1267_v59 = vmul.f32 %v10875_v0, %v10875_v0  ;;  %v10913_v31 = vsub.f32 %v15054_v30, %v10536_v44  ;;  %v1279_v35 = vmul.f32 %v10881_v39, %v10881_v39 }
 0x12d   : > { %15038 = vst [vmem:[#allocation128_spill] sm:$0xff] %v10853_v23  ;;  %v15052_v23 = vld [vmem:[#allocation79_spill] sm:$0xff]  ;;  %v1393_v17 = vadd.f32 %v1392_v42, %v1234_v22  ;;  %v1428_v10 = vadd.f32 %v1427_v19, %v1265_v3  ;;  %v1280_v22 = vmul.f32 %v10899_v7, %v10899_v7 }
 0x12e   : > { %15039 = vst [vmem:[#allocation129_spill] sm:$0xff] %v10857_v38  ;;  %v10907_v43 = vsub.f32 %v15052_v23, %v10505_v13  ;;  %v1268_v23 = vmul.f32 %v10893_v11, %v10893_v11  ;;  %v1396_v42 = vsel %vm824_vm0, %v1237_v37, 0.0  ;;  %v15062_v19 = vld [vmem:[#allocation75_spill] sm:$0xff] }
 0x12f   : > { %15041 = vst [vmem:[#allocation71_spill] sm:$0xff] %v10863_v40  ;;  %v1442_v40 = vadd.f32 %v1277_v62, %v1276_v2  ;;  %v1394_v15 = vadd.f32 %v1393_v17, %v1235_v61  ;;  %v1429_v30 = vadd.f32 %v1428_v10, %v1266_v5  ;;  %v15060_v2 = vld [vmem:[#allocation85_spill] sm:$0xff]  ;;  %v1281_v5 = vmul.f32 %v10913_v31, %v10913_v31 }
 0x130   : > { %15043 = vst [vmem:[#allocation57_spill] sm:$0xff] %v10869_v63  ;;  %v15056_v63 = vld [vmem:[#allocation82_spill] sm:$0xff]  ;;  %v10932_v62 = vsub.f32 %v15060_v2, %v10505_v13  ;;  %v15066_v10 = vld [vmem:[#allocation77_spill] sm:$0xff] }
 0x131   : > { %15045 = vst [vmem:[#allocation74_spill] sm:$0xff] %v10875_v0  ;;  %v10919_v38 = vsub.f32 %v15056_v63, %v10505_v13  ;;  %v10925_v0 = vsub.f32 %v15058_v47, %v10536_v44  ;;  %v1443_v3 = vadd.f32 %v1442_v40, %v1278_v56  ;;  %v1269_v63 = vmul.f32 %v10907_v43, %v10907_v43  ;;  %v15064_v56 = vld [vmem:[#allocation87_spill] sm:$0xff] }
 0x132   : > { %15047 = vst [vmem:[#allocation60_spill] sm:$0xff] %v10881_v39  ;;  %v1395_v47 = vadd.f32 %v1394_v15, %v1236_v21  ;;  %v1430_v61 = vadd.f32 %v1429_v30, %v1267_v59  ;;  %v10944_v37 = vsub.f32 %v15064_v56, %v10505_v13  ;;  %v10950_v2 = vsub.f32 %v15066_v10, %v10536_v44 }
 0x133   : > { %15049 = vst [vmem:[#allocation76_spill] sm:$0xff] %v10893_v11  ;;  %v10938_v11 = vsub.f32 %v15062_v19, %v10536_v44  ;;  %v1444_v17 = vadd.f32 %v1443_v3, %v1279_v35  ;;  %v1270_v40 = vmul.f32 %v10919_v38, %v10919_v38  ;;  %v1282_v15 = vmul.f32 %v10925_v0, %v10925_v0  ;;  %v15069_v3 = vld [vmem:[#allocation80_spill] sm:$0xff] }
 0x134   : > { %15051 = vst [vmem:[#allocation64_spill] sm:$0xff] %v10899_v7  ;;  %v1431_v19 = vadd.f32 %v1430_v61, %v1268_v23  ;;  %v10956_v59 = vsub.f32 %v10078_v18, %v10505_v13  ;;  %v1271_v35 = vmul.f32 %v10932_v62, %v10932_v62  ;;  %v10962_v56 = vsub.f32 %v15069_v3, %v10536_v44  ;;  %v15073_v18 = vld [vmem:[#allocation90_spill] sm:$0xff] }
 0x135   : > { %15053 = vst [vmem:[#allocation79_spill] sm:$0xff] %v10907_v43  ;;  %v1397_v43 = vadd.f32 %v1396_v42, %v1395_v47  ;;  %v1445_v21 = vadd.f32 %v1444_v17, %v1280_v22  ;;  %v1283_v23 = vmul.f32 %v10938_v11, %v10938_v11  ;;  %v15071_v47 = vld [vmem:[#allocation91_spill] sm:$0xff]  ;;  %v10972_v61 = vsub.f32 %v15073_v18, %v10505_v13 }
 0x136   : > { %15055 = vst [vmem:[#allocation69_spill] sm:$0xff] %v10913_v31  ;;  %v1432_v30 = vadd.f32 %v1431_v19, %v1269_v63  ;;  %v10968_v22 = vsub.f32 %v15071_v47, %v10505_v13  ;;  %v15075_v17 = vld [vmem:[#allocation83_spill] sm:$0xff]  ;;  %v1284_v19 = vmul.f32 %v10950_v2, %v10950_v2  ;;  %v15077_v47 = vld [vmem:[#allocation86_spill] sm:$0xff]  ;;  %v1285_v18 = vmul.f32 %v10962_v56, %v10962_v56 }
 0x137   : > { %15057 = vst [vmem:[#allocation82_spill] sm:$0xff] %v10919_v38  ;;  %1398 = vadd.xlane.f32.xlu0 %v1397_v43  ;;  %v1446_v42 = vadd.f32 %v1445_v21, %v1281_v5  ;;  %v1272_v43 = vmul.f32 %v10944_v37, %v10944_v37  ;;  %v10978_v10 = vsub.f32 %v15075_v17, %v10536_v44 }
 0x138   : > { %15059 = vst [vmem:[#allocation72_spill] sm:$0xff] %v10925_v0  ;;  %v1433_v63 = vadd.f32 %v1432_v30, %v1270_v40  ;;  %v1273_v21 = vmul.f32 %v10956_v59, %v10956_v59  ;;  %v10986_v13 = vsub.f32 %v15077_v47, %v10536_v44  ;;  %v1274_v30 = vmul.f32 %v10968_v22, %v10968_v22 }
 0x139   : > { %15061 = vst [vmem:[#allocation85_spill] sm:$0xff] %v10932_v62  ;;  %v1447_v5 = vadd.f32 %v1446_v42, %v1282_v15  ;;  %v1275_v17 = vmul.f32 %v10972_v61, %v10972_v61  ;;  %v15079_v15 = vld [vmem:[#allocation88_spill] sm:$0xff] }
 0x13a   : > { %15063 = vst [vmem:[#allocation75_spill] sm:$0xff] %v10938_v11  ;;  %v1434_v3 = vadd.f32 %v1433_v63, %v1271_v35  ;;  %v10996_v42 = vsub.f32 %v15079_v15, %v10536_v44  ;;  %v1286_v35 = vmul.f32 %v10978_v10, %v10978_v10 }
 0x13b   : > { %15065 = vst [vmem:[#allocation87_spill] sm:$0xff] %v10944_v37  ;;  %v1448_v40 = vadd.f32 %v1447_v5, %v1283_v23  ;;  %v1287_v23 = vmul.f32 %v10986_v13, %v10986_v13 }
 0x13c   : > { %15067 = vst [vmem:[#allocation77_spill] sm:$0xff] %v10950_v2  ;;  %v1435_v2 = vadd.f32 %v1434_v3, %v1272_v43  ;;  %v15083_v3 = vld [vmem:[#allocation92_spill] sm:$0xff] }
 0x13d   : > { %15068 = vst [vmem:[#allocation130_spill] sm:$0xff] %v10956_v59  ;;  %v1449_v63 = vadd.f32 %v1448_v40, %v1284_v19  ;;  %v15081_v59 = vld [vmem:[#allocation89_spill] sm:$0xff]  ;;  %v11009_v15 = vsub.f32 %v15083_v3, %v10536_v44 }
 0x13e   : > { %15070 = vst [vmem:[#allocation80_spill] sm:$0xff] %v10962_v56  ;;  %v1436_v47 = vadd.f32 %v1435_v2, %v1273_v21  ;;  %v11002_v56 = vsub.f32 %v15081_v59, %v10536_v44  ;;  %v15085_v21 = vld [vmem:[#allocation93_spill] sm:$0xff] }
 0x13f   : > { %15072 = vst [vmem:[#allocation91_spill] sm:$0xff] %v10968_v22  ;;  %v1450_v5 = vadd.f32 %v1449_v63, %v1285_v18  ;;  %v1438_v22 = vsel %vm824_vm0, %v1275_v17, 0.0  ;;  %v11015_v59 = vsub.f32 %v15085_v21, %v10536_v44  ;;  %v1290_v17 = vmul.f32 %v11009_v15, %v11009_v15 }
 0x140   : > { %15074 = vst [vmem:[#allocation90_spill] sm:$0xff] %v10972_v61  ;;  %v1437_v43 = vadd.f32 %v1436_v47, %v1274_v30  ;;  %v1288_v61 = vmul.f32 %v10996_v42, %v10996_v42  ;;  %v1289_v40 = vmul.f32 %v11002_v56, %v11002_v56  ;;  %v11021_v30 = vsub.f32 %v10104_v16, %v10536_v44 }
 0x141   : > { %15076 = vst [vmem:[#allocation83_spill] sm:$0xff] %v10978_v10  ;;  %v1451_v19 = vadd.f32 %v1450_v5, %v1286_v35  ;;  %v15088_v35 = vld [vmem:[#allocation94_spill] sm:$0xff]  ;;  %v11031_v47 = vsub.f32 %v10111_v60, %v10536_v44  ;;  %v11125_v10 = vld [vmem:[%s15091_s24 + $0xf0] sm:$0xff] }
 0x142   : > { %15078 = vst [vmem:[#allocation86_spill] sm:$0xff] %v10986_v13  ;;  %v1439_v2 = vadd.f32 %v1438_v22, %v1437_v43  ;;  %v11027_v22 = vsub.f32 %v15088_v35, %v10536_v44  ;;  %v1292_v16 = vmul.f32 %v11021_v30, %v11021_v30 }
 0x143   : > { %15080 = vst [vmem:[#allocation88_spill] sm:$0xff] %v10996_v42  ;;  %v1452_v18 = vadd.f32 %v1451_v19, %v1287_v23  ;;  %v1291_v23 = vmul.f32 %v11015_v59, %v11015_v59 }
 0x144   : > { %15082 = vst [vmem:[#allocation89_spill] sm:$0xff] %v11002_v56  ;;  %1440 = vadd.xlane.f32.xlu2 %v1439_v2  ;;  %v1294_v3 = vmul.f32 %v11027_v22, %v11027_v22 }
 0x145   : > { %15084 = vst [vmem:[#allocation92_spill] sm:$0xff] %v11009_v15  ;;  %v1453_v63 = vadd.f32 %v1452_v18, %v1288_v61  ;;  %v1293_v61 = vmul.f32 %v11031_v47, %v11031_v47  ;;  %v8571_v18 = vld [vmem:[%s15091_s24 + $0x78] sm:$0xff] }
 0x146   : > { %15086 = vst [vmem:[#allocation93_spill] sm:$0xff] %v11015_v59  ;;  %v1459_v21 = vsel %vm824_vm0, %v1294_v3, 0.0  ;;  %3400 = vmatpush.bf16.msra.mxu1 %v8571_v18 }
 0x147   : > { %15087 = vst [vmem:[#allocation131_spill] sm:$0xff] %v11021_v30  ;;  %v1454_v5 = vadd.f32 %v1453_v63, %v1289_v40  ;;  %v8563_v40 = vld [vmem:[%s15091_s24 + $0x38] sm:$0xff] }
 0x148   : > { %15089 = vst [vmem:[#allocation94_spill] sm:$0xff] %v11027_v22  ;;  %3371 = vmatpush.bf16.msra.mxu0 %v8563_v40 }
 0x149   : > { %15090 = vst [vmem:[#allocation132_spill] sm:$0xff] %v11031_v47  ;;  %v1455_v43 = vadd.f32 %v1454_v5, %v1290_v17  ;;  %v8579_v17 = vld [vmem:[%s15091_s24 + $0xb8] sm:$0xff] }
 0x14a   : > { %3429 = vmatpush.bf16.msra.mxu2 %v8579_v17 }
 0x14b   : > { %v1456_v19 = vadd.f32 %v1455_v43, %v1291_v23 }
 0x14d   : > { %v1457_v2 = vadd.f32 %v1456_v19, %v1292_v16 }
 0x14f   : > { %v1458_v60 = vadd.f32 %v1457_v2, %v1293_v61 }
 0x151   : > { %v1460_v44 = vadd.f32 %v1459_v21, %v1458_v60  ;;  %v8562_v21 = vld [vmem:[%s15091_s24 + $0x30] sm:$0xff] }
 0x152   : > { %v8570_v60 = vld [vmem:[%s15091_s24 + $0x70] sm:$0xff]  ;;  %3372 = vmatpush.bf16.msra.mxu0 %v8562_v21 }
 0x153   : > { %1461 = vadd.xlane.f32.xlu0 %v1460_v44  ;;  %v8578_v44 = vld [vmem:[%s15091_s24 + $0xb0] sm:$0xff]  ;;  %3401 = vmatpush.bf16.msra.mxu1 %v8570_v60 }
 0x154   : > { %3430 = vmatpush.bf16.msra.mxu2 %v8578_v44 }
 0x162   : > { %v1357_v63 = vpop.xlane.xlu1 %1356 }
 0x163   : > { %v1465_v3 = vmul.f32 %v1357_v63, %v10117_v6  ;;  %v8561_v63 = vld [vmem:[%s15091_s24 + $0x28] sm:$0xff] }
 0x164   : > { %3373 = vmatpush.bf16.msra.mxu0 %v8561_v63 }
 0x165   : > { %v11069_v40 = vadd.f32 1e-05, %v1465_v3 }
 0x167   : > { %vm1505_vm5 = vweird.f32 %v11069_v40 }
 0x16f   : > { %v1315_v35 = vpop.xlane.xlu2 %1314 }
 0x170   : > { %v1463_v23 = vmul.f32 %v1315_v35, %v10117_v6  ;;  %v8569_v35 = vld [vmem:[%s15091_s24 + $0x68] sm:$0xff] }
 0x171   : > { %3402 = vmatpush.bf16.msra.mxu1 %v8569_v35 }
 0x172   : > { %v11052_v5 = vadd.f32 1e-05, %v1463_v23  ;;  %v11084_v23 = vld [vmem:[%s15091_s24 + $0xf8] sm:$0xff] }
 0x173   : > { %8736 = vmatpush.bf16.msra.mxu3 %v11084_v23 }
 0x174   : > { %8876 = vrsqrt.f32 %v11052_v5  ;;  %vm1485_vm3 = vweird.f32 %v11052_v5 }
 0x177   : > { %8737 = vmatpush.bf16.msra.mxu3 %v11125_v10 }
 0x17a   : > { %v11071_v18 = vpop.eup %8876 }
 0x17b   : > { %vm1486_vm2 = vweird.f32 %v11071_v18 }
 0x17c   : > { %v1420_v16 = vpop.xlane.xlu1 %1419  ;;  %vm1487_vm4 = vmor %vm1485_vm3, %vm1486_vm2 }
 0x17d   : > { %v1468_v19 = vmul.f32 %v1420_v16, %v10117_v6  ;;  %v8577_v16 = vld [vmem:[%s15091_s24 + $0xa8] sm:$0xff] }
 0x17e   : > { %3431 = vmatpush.bf16.msra.mxu2 %v8577_v16  ;;  %v8560_v16 = vld [vmem:[%s15091_s24 + $0x20] sm:$0xff] }
 0x17f   : > { %v11073_v17 = vadd.f32 1e-05, %v1468_v19  ;;  %3374 = vmatpush.bf16.msra.mxu0 %v8560_v16  ;;  %v8575_v16 = vld [vmem:[%s15091_s24 + $0x98] sm:$0xff] }
 0x181   : > { %vm1535_vm15 = vweird.f32 %v11073_v17 }
 0x18b   : > { %v1378_v43 = vpop.xlane.xlu2 %1377 }
 0x18c   : > { %v1466_v61 = vmul.f32 %v1378_v43, %v10117_v6  ;;  %v1480_v43 = vmul.f32 %v11071_v18, %v11052_v5  ;;  %v8558_v5 = vld [vmem:[%s15091_s24 + $0x10] sm:$0xff] }
 0x18e   : > { %v11058_v2 = vadd.f32 1e-05, %v1466_v61  ;;  %v1481_v3 = vmul.f32 %v11071_v18, %v1480_v43  ;;  %v8568_v43 = vld [vmem:[%s15091_s24 + $0x60] sm:$0xff] }
 0x18f   : > { %3403 = vmatpush.bf16.msra.mxu1 %v8568_v43 }
 0x190   : > { %8878 = vrsqrt.f32 %v11058_v2  ;;  %v1482_v47 = vmul.f32 0.5, %v1481_v3  ;;  %v8576_v3 = vld [vmem:[%s15091_s24 + $0xa0] sm:$0xff]  ;;  %vm1515_vm11 = vweird.f32 %v11058_v2 }
 0x191   : > { %8880 = vrsqrt.f32 %v11069_v40  ;;  %3432 = vmatpush.bf16.msra.mxu2 %v8576_v3  ;;  %v11144_v3 = vld [vmem:[%s15091_s24 + $0xe8] sm:$0xff] }
 0x192   : > { %8882 = vrsqrt.f32 %v11073_v17  ;;  %8738 = vmatpush.bf16.msra.mxu3 %v11144_v3 }
 0x195   : > { %3433 = vmatpush.bf16.msra.mxu2 %v8575_v16 }
 0x196   : > { %v11096_v61 = vpop.eup %8878 }
 0x197   : > { %v11098_v21 = vpop.eup %8880  ;;  %v1510_v22 = vmul.f32 %v11096_v61, %v11058_v2  ;;  %vm1516_vm7 = vweird.f32 %v11096_v61 }
 0x198   : > { %v11101_v44 = vpop.eup %8882  ;;  %v1500_v63 = vmul.f32 %v11098_v21, %v11069_v40  ;;  %vm1506_vm6 = vweird.f32 %v11098_v21  ;;  %vm1517_vm13 = vmor %vm1515_vm11, %vm1516_vm7 }
 0x199   : > { %v1336_v19 = vpop.xlane.xlu0 %1335  ;;  %v1530_v35 = vmul.f32 %v11101_v44, %v11073_v17  ;;  %vm1536_vm10 = vweird.f32 %v11101_v44  ;;  %vm1507_vm14 = vmor %vm1505_vm5, %vm1506_vm6 }
 0x19a   : > { %v1464_v60 = vmul.f32 %v1336_v19, %v10117_v6  ;;  %v1483_v19 = vsub.f32 1.5, %v1482_v47  ;;  %v1501_v13 = vmul.f32 %v11098_v21, %v1500_v63  ;;  %v8567_v47 = vld [vmem:[%s15091_s24 + $0x58] sm:$0xff]  ;;  %vm1537_vm1 = vmor %vm1535_vm15, %vm1536_vm10 }
 0x19b   : > { %v1531_v56 = vmul.f32 %v11101_v44, %v1530_v35  ;;  %3404 = vmatpush.bf16.msra.mxu1 %v8567_v47 }
 0x19c   : > { %v11105_v30 = vadd.f32 1e-05, %v1464_v60  ;;  %v1511_v60 = vmul.f32 %v11096_v61, %v1510_v22  ;;  %v8559_v22 = vld [vmem:[%s15091_s24 + $0x18] sm:$0xff]  ;;  %v1484_v35 = vmul.f32 %v11071_v18, %v1483_v19  ;;  %v1502_v15 = vmul.f32 0.5, %v1501_v13  ;;  %v11152_v19 = vld [vmem:[%s15092_s30] sm:$0xff] }
 0x19d   : > { %3375 = vmatpush.bf16.msra.mxu0 %v8559_v22  ;;  %v1532_v62 = vmul.f32 0.5, %v1531_v56  ;;  %v8566_v22 = vld [vmem:[%s15091_s24 + $0x50] sm:$0xff]  ;;  %v11213_v31 = vperm.slane %v11152_v19, 2 }
 0x19e   : > { %8884 = vrsqrt.f32 %v11105_v30  ;;  %v1512_v43 = vmul.f32 0.5, %v1511_v60  ;;  %v8574_v56 = vld [vmem:[%s15091_s24 + $0x90] sm:$0xff]  ;;  %v11164_v13 = vsel %vm1487_vm4, %v11071_v18, %v1484_v35  ;;  %v1503_v37 = vsub.f32 1.5, %v1502_v15  ;;  %v8573_v15 = vld [vmem:[%s15091_s24 + $0x88] sm:$0xff] }
 0x19f   : > { %15093 = vst [vmem:[#allocation133_spill] sm:$0xff] %v11164_v13  ;;  %3405 = vmatpush.bf16.msra.mxu1 %v8566_v22  ;;  %v1533_v11 = vsub.f32 1.5, %v1532_v62  ;;  %3434 = vmatpush.bf16.msra.mxu2 %v8574_v56  ;;  %v11177_v18 = vperm.slane %v11152_v19, 0  ;;  %v8565_v62 = vld [vmem:[%s15091_s24 + $0x48] sm:$0xff]  ;;  %vm1495_vm9 = vweird.f32 %v11105_v30  ;;  %v11202_v22 = vld [vmem:[%s15094_s1] sm:$0xff]  ;;  %v1560_v56 = vmul.f32 %v11164_v13, %v10165_v58 }
 0x1a0   : > { %v1513_v47 = vsub.f32 1.5, %v1512_v43  ;;  %v1504_v0 = vmul.f32 %v11098_v21, %v1503_v37  ;;  %v8572_v37 = vld [vmem:[%s15091_s24 + $0x80] sm:$0xff]  ;;  %v11236_v2 = vperm.slane %v11202_v22, 0 }
 0x1a1   : > { %3376 = vmatpush.bf16.msra.mxu0 %v8558_v5  ;;  %v1559_v5 = vmul.f32 %v11164_v13, %v10161_v14  ;;  %v1534_v7 = vmul.f32 %v11101_v44, %v1533_v11  ;;  %v8564_v11 = vld [vmem:[%s15091_s24 + $0x40] sm:$0xff] }
 0x1a3   : > { %3406 = vmatpush.bf16.msra.mxu1 %v8565_v62  ;;  %3435 = vmatpush.bf16.msra.mxu2 %v8573_v15 }
 0x1a4   : > { %v8885_v63 = vpop.eup %8884 }
 0x1a5   : > { %v1490_v38 = vmul.f32 %v8885_v63, %v11105_v30  ;;  %vm1496_vm8 = vweird.f32 %v8885_v63  ;;  %v1755_v30 = vmul.f32 %v11177_v18, %v1559_v5 }
 0x1a6   : > { %vm1497_vm12 = vmor %vm1495_vm9, %vm1496_vm8 }
 0x1a7   : > { %v1491_v60 = vmul.f32 %v8885_v63, %v1490_v38  ;;  %v11169_v38 = vld [vmem:[%s15091_s24 + $0xe0] sm:$0xff]  ;;  %3407 = vmatpush.bf16.msra.mxu1 %v8564_v11  ;;  %3436 = vmatpush.bf16.msra.mxu2 %v8572_v37 }
 0x1a8   : > { %8739 = vmatpush.bf16.msra.mxu3 %v11169_v38 }
 0x1a9   : > { %v1492_v42 = vmul.f32 0.5, %v1491_v60  ;;  %v8557_v60 = vld [vmem:[%s15091_s24 + $0x8] sm:$0xff] }
 0x1aa   : > { %v1399_v16 = vpop.xlane.xlu0 %1398  ;;  %3377 = vmatpush.bf16.msra.mxu0 %v8557_v60 }
 0x1ab   : > { %v1467_v59 = vmul.f32 %v1399_v16, %v10117_v6  ;;  %v1493_v35 = vsub.f32 1.5, %v1492_v42  ;;  %v1514_v42 = vmul.f32 %v11096_v61, %v1513_v47  ;;  %v11207_v16 = vperm.slane %v11152_v19, 1  ;;  %3458 = vmatpush.bf16.msrb.mxu1 %v11084_v23 }
 0x1ac   : > { %v1561_v47 = vmul.f32 %v11164_v13, %v10179_v24  ;;  %v8556_v24 = vld [vmem:[%s15091_s24] sm:$0xff] }
 0x1ad   : > { %v11179_v43 = vadd.f32 1e-05, %v1467_v59  ;;  %v11197_v59 = vld [vmem:[%s15091_s24 + $0xd8] sm:$0xff]  ;;  %v1494_v14 = vmul.f32 %v8885_v63, %v1493_v35  ;;  %v11246_v35 = vld [vmem:[%s15091_s24 + $0xd0] sm:$0xff]  ;;  %v1756_v15 = vmul.f32 %v11207_v16, %v1560_v56  ;;  %v11277_v56 = vsel %vm1537_vm1, %v11101_v44, %v1534_v7 }
 0x1ae   : > { %8740 = vmatpush.bf16.msra.mxu3 %v11197_v59  ;;  %3378 = vmatpush.bf16.msra.mxu0 %v8556_v24  ;;  %v11283_v24 = vld [vmem:[%s15091_s24 + $0xc8] sm:$0xff]  ;;  %vm4139_vm1 = vcmask 1040384  }
 0x1af   : > { %8886 = vrsqrt.f32 %v11179_v43  ;;  %v11223_v58 = vsel %vm1497_vm12, %v8885_v63, %v1494_v14  ;;  %v11239_v63 = vperm.slane %v11202_v22, 1  ;;  %v11261_v14 = vsel %vm1517_vm13, %v11096_v61, %v1514_v42  ;;  %3459 = vmatpush.bf16.msrb.mxu1 %v11125_v10 }
 0x1b0   : > { %15095 = vst [vmem:[#allocation134_spill] sm:$0xff] %v11223_v58  ;;  %v1578_v60 = vmul.f32 %v11223_v58, %v10498_v9  ;;  %v1579_v62 = vmul.f32 %v11223_v58, %v10502_v36  ;;  %v1580_v5 = vmul.f32 %v11223_v58, %v10529_v49  ;;  %v1757_v9 = vmul.f32 %v11213_v31, %v1561_v47 }
 0x1b1   : > { %v11265_v36 = vperm.slane %v11202_v22, 2  ;;  %v11274_v42 = vsel %vm1507_vm14, %v11098_v21, %v1504_v0  ;;  %v1951_v47 = vadd.f32 %v11236_v2, %v1755_v30  ;;  %v1616_v44 = vmul.f32 %v11261_v14, %v10390_v55 }
 0x1b2   : > { %8741 = vmatpush.bf16.msra.mxu3 %v11246_v35  ;;  %v1774_v49 = vmul.f32 %v11177_v18, %v1578_v60  ;;  %v1775_v40 = vmul.f32 %v11207_v16, %v1579_v62  ;;  %v1776_v17 = vmul.f32 %v11213_v31, %v1580_v5  ;;  %v1952_v60 = vadd.f32 %v11239_v63, %v1756_v15 }
 0x1b3   : > { %v1953_v7 = vadd.f32 %v11265_v36, %v1757_v9  ;;  %v1617_v30 = vmul.f32 %v11261_v14, %v10394_v57  ;;  %v1618_v15 = vmul.f32 %v11261_v14, %v10406_v29  ;;  %v1597_v57 = vmul.f32 %v11274_v42, %v10121_v52  ;;  %3460 = vmatpush.bf16.msrb.mxu1 %v11144_v3 }
 0x1b4   : > { %v1970_v37 = vadd.f32 %v11236_v2, %v1774_v49  ;;  %v1971_v0 = vadd.f32 %v11239_v63, %v1775_v40  ;;  %v1972_v21 = vadd.f32 %v11265_v36, %v1776_v17  ;;  %v11303_v40 = vld [vmem:[%s15091_s24 + $0xc0] sm:$0xff]  ;;  %v1598_v55 = vmul.f32 %v11274_v42, %v10124_v20 }
 0x1b5   : > { %v8887_v61 = vpop.eup %8886  ;;  %v1657_v29 = vmul.f32 %v11277_v56, %v10295_v4  ;;  %v1813_v52 = vmul.f32 %v11207_v16, %v1617_v30  ;;  %v11320_v20 = vperm.slane %v11152_v19, 3  ;;  %v8619_v4 = vld [vmem:[%s15091_s24 + $0x1f8] sm:$0xff]  ;;  %vm1525_vm3 = vweird.f32 %v11179_v43  ;;  %v8618_v30 = vld [vmem:[%s15091_s24 + $0x1f0] sm:$0xff] }
 0x1b6   : > { %v1520_v11 = vmul.f32 %v8887_v61, %v11179_v43  ;;  %v2103_v5 = vpack.c.bf16 %v1970_v37, %v1951_v47  ;;  %v2104_v39 = vpack.c.bf16 %v1971_v0, %v1952_v60  ;;  %8742 = vmatpush.bf16.msra.mxu3 %v11283_v24  ;;  %v2105_v9 = vpack.c.bf16 %v1972_v21, %v1953_v7  ;;  %v15096_v47 = vld [vmem:[#allocation95_spill] sm:$0xff] }
 0x1b7   : > { %v1441_v62 = vpop.xlane.xlu2 %1440  ;;  %v1812_v60 = vmul.f32 %v11177_v18, %v1616_v44  ;;  %vm1526_vm2 = vweird.f32 %v8887_v61  ;;  %v1793_v10 = vmul.f32 %v11177_v18, %v1597_v57  ;;  %v1794_v7 = vmul.f32 %v11207_v16, %v1598_v55  ;;  %3461 = vmatpush.bf16.msrb.mxu1 %v11169_v38 }
 0x1b8   : > { %v1521_v23 = vmul.f32 %v8887_v61, %v1520_v11  ;;  %v1469_v49 = vmul.f32 %v1441_v62, %v10117_v6  ;;  %3379 = vmatmul.bf16.vlgmr.msra.gmra.mxu0 %v2103_v5  ;;  %3408 = vmatmul.bf16.vlgmr.msra.gmra.mxu1 %v2104_v39  ;;  %v1599_v11 = vmul.f32 %v11274_v42, %v15096_v47  ;;  %vm1527_vm4 = vmor %vm1525_vm3, %vm1526_vm2  ;;  %v8617_v47 = vld [vmem:[%s15091_s24 + $0x1e8] sm:$0xff] }
 0x1b9   : > { %3437 = vmatmul.bf16.vlgmr.msra.gmra.mxu2 %v2105_v9  ;;  %v1814_v39 = vmul.f32 %v11213_v31, %v1618_v15  ;;  %v1853_v44 = vmul.f32 %v11320_v20, %v1657_v29  ;;  %v2008_v43 = vadd.f32 %v11236_v2, %v1812_v60  ;;  %v2009_v5 = vadd.f32 %v11239_v63, %v1813_v52 }
 0x1ba   : > { %v1522_v17 = vmul.f32 0.5, %v1521_v23  ;;  %v11314_v37 = vadd.f32 1e-05, %v1469_v49  ;;  %8743 = vmatpush.bf16.msra.mxu3 %v11303_v40  ;;  %v1795_v62 = vmul.f32 %v11213_v31, %v1599_v11  ;;  %v11337_v23 = vperm.slane %v11152_v19, 4 }
 0x1bb   : > { %v1654_v3 = vmul.f32 %v11277_v56, %v10264_v51  ;;  %v1563_v15 = vmul.f32 %v11164_v13, %v10216_v26  ;;  %v11349_v9 = vperm.slane %v11202_v22, 3  ;;  %v2010_v57 = vadd.f32 %v11265_v36, %v1814_v39  ;;  %3462 = vmatpush.bf16.msrb.mxu1 %v11197_v59 }
 0x1bc   : > { %v1523_v0 = vsub.f32 1.5, %v1522_v17  ;;  %8888 = vrsqrt.f32 %v11314_v37  ;;  %v1582_v55 = vmul.f32 %v11223_v58, %v10565_v8  ;;  %v1989_v29 = vadd.f32 %v11236_v2, %v1793_v10 }
 0x1bd   : > { %v1990_v51 = vadd.f32 %v11239_v63, %v1794_v7  ;;  %v2049_v26 = vadd.f32 %v11349_v9, %v1853_v44  ;;  %v1759_v8 = vmul.f32 %v11337_v23, %v1563_v15  ;;  %v11366_v11 = vperm.slane %v11202_v22, 4 }
 0x1be   : > { %v1524_v21 = vmul.f32 %v8887_v61, %v1523_v0  ;;  %3574 = vmatpush.bf16.msrb.mxu3 %v8619_v4  ;;  %v2122_v52 = vpack.c.bf16 %v2008_v43, %v1989_v29  ;;  %v11372_v0 = vmul.f32 %v11177_v18, %v1654_v3  ;;  %v1778_v7 = vmul.f32 %v11337_v23, %v1582_v55 }
 0x1bf   : > { %v2123_v38 = vpack.c.bf16 %v2009_v5, %v1990_v51  ;;  %v11395_v3 = vadd.f32 %v11366_v11, %v1759_v8  ;;  %v1655_v55 = vmul.f32 %v11277_v56, %v10268_v27  ;;  %v11420_v27 = vperm.slane %v11152_v19, 6  ;;  %3463 = vmatpush.bf16.msrb.mxu1 %v11246_v35  ;;  %v8615_v35 = vld [vmem:[%s15091_s24 + $0x1d8] sm:$0xff] }
 0x1c0   : > { %v11346_v49 = vsel %vm1527_vm4, %v8887_v61, %v1524_v21  ;;  %v1991_v61 = vadd.f32 %v11265_v36, %v1795_v62  ;;  %v1565_v62 = vmul.f32 %v11164_v13, %v10248_v12  ;;  %v1584_v12 = vmul.f32 %v11223_v58, %v10597_v28  ;;  %v8610_v28 = vld [vmem:[%s15091_s24 + $0x1b0] sm:$0xff] }
 0x1c1   : > { %v1638_v17 = vmul.f32 %v11346_v49, %v10652_v32  ;;  %v1635_v10 = vmul.f32 %v11346_v49, %v10621_v46  ;;  %v1636_v44 = vmul.f32 %v11346_v49, %v10625_v45  ;;  %v8595_v46 = vld [vmem:[%s15091_s24 + $0x138] sm:$0xff]  ;;  %v11428_v8 = vperm.slane %v11202_v22, 6 }
 0x1c2   : > { %3575 = vmatpush.bf16.msrb.mxu3 %v8618_v30  ;;  %v11368_v32 = vpop.eup %8888  ;;  %v2124_v39 = vpack.c.bf16 %v2010_v57, %v1991_v61  ;;  %v1637_v30 = vmul.f32 %v11346_v49, %v10641_v50  ;;  %v8611_v45 = vld [vmem:[%s15091_s24 + $0x1b8] sm:$0xff]  ;;  %v11398_v50 = vadd.f32 %v11366_v11, %v1778_v7  ;;  %v8616_v57 = vld [vmem:[%s15091_s24 + $0x1e0] sm:$0xff]  ;;  %3487 = vmatpush.bf16.msrb.mxu0 %v8595_v46  ;;  %vm1545_vm5 = vweird.f32 %v11314_v37 }
 0x1c3   : > { %v1834_v60 = vmul.f32 %v11320_v20, %v1638_v17  ;;  %v1540_v4 = vmul.f32 %v11368_v32, %v11314_v37  ;;  %v1656_v17 = vmul.f32 %v11277_v56, %v10284_v48  ;;  %v1831_v51 = vmul.f32 %v11177_v18, %v1635_v10  ;;  %3545 = vmatpush.bf16.msrb.mxu2 %v8611_v45 }
 0x1c4   : > { %v1832_v61 = vmul.f32 %v11207_v16, %v1636_v44  ;;  %v1780_v10 = vmul.f32 %v11420_v27, %v1584_v12  ;;  %v1600_v7 = vmul.f32 %v11274_v42, %v10130_v33  ;;  %vm1546_vm6 = vweird.f32 %v11368_v32  ;;  %3464 = vmatpush.bf16.msrb.mxu1 %v11283_v24 }
 0x1c5   : > { %v2030_v21 = vadd.f32 %v11349_v9, %v1834_v60  ;;  %v1541_v43 = vmul.f32 %v11368_v32, %v1540_v4  ;;  %v1761_v4 = vmul.f32 %v11420_v27, %v1565_v62  ;;  %v11450_v44 = vadd.f32 %v11236_v2, %v1831_v51  ;;  %vm1547_vm7 = vmor %vm1545_vm5, %vm1546_vm6 }
 0x1c6   : > { %v1462_v5 = vpop.xlane.xlu0 %1461  ;;  %3576 = vmatpush.bf16.msrb.mxu3 %v8617_v47  ;;  %v1833_v47 = vmul.f32 %v11213_v31, %v1637_v30  ;;  %v11453_v30 = vadd.f32 %v11239_v63, %v1832_v61  ;;  %v1619_v62 = vmul.f32 %v11261_v14, %v10418_v1  ;;  %v1601_v45 = vmul.f32 %v11274_v42, %v10137_v53  ;;  %v8614_v1 = vld [vmem:[%s15091_s24 + $0x1d0] sm:$0xff]  ;;  %v8613_v61 = vld [vmem:[%s15091_s24 + $0x1c8] sm:$0xff] }
 0x1c7   : > { %v1470_v59 = vmul.f32 %v1462_v5, %v10117_v6  ;;  %v2144_v15 = vpack.c.bf16 %v2049_v26, %v2030_v21  ;;  %v1542_v29 = vmul.f32 0.5, %v1541_v43  ;;  %v8594_v6 = vld [vmem:[%s15091_s24 + $0x130] sm:$0xff]  ;;  %v2107_v26 = vpack.c.bf16 %v11398_v50, %v11395_v3  ;;  %3546 = vmatpush.bf16.msrb.mxu2 %v8610_v28  ;;  %v8649_v3 = vld [vmem:[%s15091_s24 + $0x2e8] sm:$0xff] }
 0x1c8   : > { %3384 = vmatmul.bf16.gmra.mxu0 %v2122_v52  ;;  %3413 = vmatmul.bf16.gmra.mxu1 %v2123_v38  ;;  %v1851_v52 = vmul.f32 %v11207_v16, %v1655_v55  ;;  %v1852_v38 = vmul.f32 %v11213_v31, %v1656_v17  ;;  %v11444_v33 = vadd.f32 %v11428_v8, %v1761_v4  ;;  %v11785_v50 = vld [vmem:[%s15094_s1 + $0x8] sm:$0xff] }
 0x1c9   : > { %v11422_v48 = vadd.f32 1e-05, %v1470_v59  ;;  %3476 = vmatmul.bf16.vlgmr.msra.gmra.mxu3 %v2144_v15  ;;  %v1543_v60 = vsub.f32 1.5, %v1542_v29  ;;  %3442 = vmatmul.bf16.gmra.mxu2 %v2124_v39  ;;  %v11447_v39 = vadd.f32 %v11428_v8, %v1780_v10  ;;  %v1796_v43 = vmul.f32 %v11320_v20, %v1600_v7 }
 0x1ca   : > { %3577 = vmatpush.bf16.msrb.mxu3 %v8616_v57  ;;  %3488 = vmatpush.bf16.msrb.mxu0 %v8594_v6  ;;  %v11460_v5 = vadd.f32 %v11265_v36, %v1833_v47  ;;  %v1620_v12 = vmul.f32 %v11261_v14, %v10436_v54  ;;  %v2046_v24 = vadd.f32 %v11236_v2, %v11372_v0 }
 0x1cb   : > { %8890 = vrsqrt.f32 %v11422_v48  ;;  %v1544_v21 = vmul.f32 %v11368_v32, %v1543_v60  ;;  %v2109_v46 = vpack.c.bf16 %v11447_v39, %v11444_v33  ;;  %v2047_v59 = vadd.f32 %v11239_v63, %v1851_v52  ;;  %3465 = vmatpush.bf16.msrb.mxu1 %v11303_v40 }
 0x1cc   : > { %v2048_v15 = vadd.f32 %v11265_v36, %v1852_v38  ;;  %v1815_v54 = vmul.f32 %v11320_v20, %v1619_v62  ;;  %v11482_v37 = vadd.f32 %v11349_v9, %v1796_v43  ;;  %v1797_v57 = vmul.f32 %v11337_v23, %v1601_v45  ;;  %v15098_v38 = vld [vmem:[#allocation97_spill] sm:$0xff]  ;;  %v15100_v62 = vld [vmem:[#allocation62_spill] sm:$0xff] }
 0x1cd   : > { %v11478_v53 = vsel %vm1547_vm7, %v11368_v32, %v1544_v21  ;;  %v2141_v17 = vpack.c.bf16 %v2046_v24, %v11450_v44  ;;  %v2142_v29 = vpack.c.bf16 %v2047_v59, %v11453_v30  ;;  %v1816_v6 = vmul.f32 %v11337_v23, %v1620_v12  ;;  %v15099_v44 = vld [vmem:[#allocation39_spill] sm:$0xff]  ;;  %v15101_v12 = vld [vmem:[#allocation118_spill] sm:$0xff] }
 0x1ce   : > { %3578 = vmatpush.bf16.msrb.mxu3 %v8615_v35  ;;  %v2143_v51 = vpack.c.bf16 %v2048_v15, %v11460_v5  ;;  %v11491_v32 = vadd.f32 %v11349_v9, %v1815_v54  ;;  %v1676_v28 = vmul.f32 %v11478_v53, %v10768_v25  ;;  %v1673_v40 = vmul.f32 %v11478_v53, %v10736_v34  ;;  %v8593_v34 = vld [vmem:[%s15091_s24 + $0x128] sm:$0xff]  ;;  %v15097_v35 = vld [vmem:[#allocation36_spill] sm:$0xff]  ;;  %v8612_v15 = vld [vmem:[%s15091_s24 + $0x1c0] sm:$0xff] }
 0x1cf   : > { %v11503_v47 = vmul.f32 %v11478_v53, %v10740_v41  ;;  %v11506_v60 = vperm.slane %v11152_v19, 5  ;;  %v11511_v25 = vadd.f32 %v11366_v11, %v1797_v57  ;;  %v11514_v7 = vadd.f32 %v11366_v11, %v1816_v6  ;;  %v8609_v41 = vld [vmem:[%s15091_s24 + $0x1a8] sm:$0xff]  ;;  %3489 = vmatpush.bf16.msrb.mxu0 %v8593_v34 }
 0x1d0   : > { %v2125_v10 = vpack.c.bf16 %v11491_v32, %v11482_v37  ;;  %v11524_v52 = vmul.f32 %v11478_v53, %v15097_v35  ;;  %v1603_v21 = vmul.f32 %v11274_v42, %v15098_v38  ;;  %v1622_v30 = vmul.f32 %v11261_v14, %v15099_v44  ;;  %v15102_v24 = vld [vmem:[#allocation111_spill] sm:$0xff]  ;;  %3547 = vmatpush.bf16.msrb.mxu2 %v8609_v41 }
 0x1d1   : > { %v8891_v55 = vpop.eup %8890  ;;  %v1639_v43 = vmul.f32 %v11346_v49, %v15100_v62  ;;  %v2126_v45 = vpack.c.bf16 %v11514_v7, %v11511_v25  ;;  %v1564_v59 = vmul.f32 %v11164_v13, %v15102_v24  ;;  %v15103_v38 = vld [vmem:[#allocation51_spill] sm:$0xff]  ;;  %v1872_v44 = vmul.f32 %v11320_v20, %v1676_v28 }
 0x1d2   : > { %v1550_v0 = vmul.f32 %v8891_v55, %v11422_v48  ;;  %3579 = vmatpush.bf16.msrb.mxu3 %v8614_v1  ;;  %v1658_v1 = vmul.f32 %v11277_v56, %v15101_v12  ;;  %vm1556_vm8 = vweird.f32 %v8891_v55  ;;  %v1799_v54 = vmul.f32 %v11420_v27, %v1603_v21 }
 0x1d3   : > { %v1818_v57 = vmul.f32 %v11420_v27, %v1622_v30  ;;  %v1835_v35 = vmul.f32 %v11337_v23, %v1639_v43  ;;  %v1583_v21 = vmul.f32 %v11223_v58, %v15103_v38  ;;  %v1760_v62 = vmul.f32 %v11506_v60, %v1564_v59  ;;  %v15104_v59 = vld [vmem:[#allocation119_spill] sm:$0xff] }
 0x1d4   : > { %v1551_v4 = vmul.f32 %v8891_v55, %v1550_v0  ;;  %v11544_v0 = vperm.slane %v11202_v22, 5  ;;  %v1854_v34 = vmul.f32 %v11337_v23, %v1658_v1  ;;  %v11558_v30 = vadd.f32 %v11428_v8, %v1799_v54  ;;  %v15105_v54 = vld [vmem:[#allocation60_spill] sm:$0xff] }
 0x1d5   : > { %v11561_v41 = vadd.f32 %v11428_v8, %v1818_v57  ;;  %vm1555_vm9 = vweird.f32 %v11422_v48  ;;  %v11566_v43 = vadd.f32 %v11366_v11, %v1835_v35  ;;  %v1779_v1 = vmul.f32 %v11506_v60, %v1583_v21  ;;  %v15106_v57 = vld [vmem:[#allocation54_spill] sm:$0xff]  ;;  %v15108_v35 = vld [vmem:[#allocation57_spill] sm:$0xff] }
 0x1d6   : > { %v1552_v5 = vmul.f32 0.5, %v1551_v4  ;;  %3580 = vmatpush.bf16.msrb.mxu3 %v8613_v61  ;;  %v8592_v4 = vld [vmem:[%s15091_s24 + $0x120] sm:$0xff]  ;;  %v11569_v12 = vadd.f32 %v11366_v11, %v1854_v34  ;;  %vm1557_vm10 = vmor %vm1555_vm9, %vm1556_vm8  ;;  %v11576_v24 = vadd.f32 %v11544_v0, %v1760_v62  ;;  %v1869_v38 = vmul.f32 %v11177_v18, %v1673_v40  ;;  %v15109_v62 = vld [vmem:[#allocation15_spill] sm:$0xff] }
 0x1d7   : > { %v8608_v61 = vld [vmem:[%s15091_s24 + $0x1a0] sm:$0xff]  ;;  %v2128_v28 = vpack.c.bf16 %v11561_v41, %v11558_v30  ;;  %3490 = vmatpush.bf16.msrb.mxu0 %v8592_v4  ;;  %v15107_v4 = vld [vmem:[#allocation55_spill] sm:$0xff]  ;;  %v11600_v21 = vadd.f32 %v11544_v0, %v1779_v1  ;;  %v11876_v32 = vperm.slane %v11785_v50, 4 }
 0x1d8   : > { %v1553_v6 = vsub.f32 1.5, %v1552_v5  ;;  %3389 = vmatmul.bf16.gmra.mxu0 %v2141_v17  ;;  %3418 = vmatmul.bf16.gmra.mxu1 %v2142_v29  ;;  %v8591_v17 = vld [vmem:[%s15091_s24 + $0x118] sm:$0xff]  ;;  %v8590_v40 = vld [vmem:[%s15091_s24 + $0x110] sm:$0xff]  ;;  %v15135_v30 = vld [vmem:[#allocation58_spill] sm:$0xff] }
 0x1d9   : > { %3447 = vmatmul.bf16.gmra.mxu2 %v2143_v51  ;;  %v8607_v29 = vld [vmem:[%s15091_s24 + $0x198] sm:$0xff]  ;;  %v8606_v1 = vld [vmem:[%s15091_s24 + $0x190] sm:$0xff]  ;;  %v1590_v41 = vmul.f32 %v11223_v58, %v15135_v30 }
 0x1da   : > { %v1554_v5 = vmul.f32 %v8891_v55, %v1553_v6  ;;  %3581 = vmatpush.bf16.msrb.mxu3 %v8612_v15  ;;  %3548 = vmatpush.bf16.msrb.mxu2 %v8608_v61  ;;  %v1641_v15 = vmul.f32 %v11346_v49, %v15104_v59 }
 0x1db   : > { %3491 = vmatpush.bf16.msrb.mxu0 %v8591_v17  ;;  %v1871_v17 = vmul.f32 %v11213_v31, %v11524_v52 }
 0x1dc   : > { %v11578_v48 = vsel %vm1557_vm10, %v8891_v55, %v1554_v5  ;;  %v1660_v5 = vmul.f32 %v11277_v56, %v15109_v62  ;;  %v1837_v59 = vmul.f32 %v11420_v27, %v1641_v15 }
 0x1dd   : > { %v1695_v55 = vmul.f32 %v11578_v48, %v15105_v54  ;;  %v1692_v6 = vmul.f32 %v11578_v48, %v15106_v57  ;;  %v1693_v61 = vmul.f32 %v11578_v48, %v15107_v4  ;;  %v1694_v34 = vmul.f32 %v11578_v48, %v15108_v35 }
 0x1de   : > { %v1870_v4 = vmul.f32 %v11207_v16, %v11503_v47  ;;  %3549 = vmatpush.bf16.msrb.mxu2 %v8607_v29  ;;  %v1856_v15 = vmul.f32 %v11420_v27, %v1660_v5  ;;  %v2068_v47 = vadd.f32 %v11349_v9, %v1872_v44  ;;  %v15110_v29 = vld [vmem:[#allocation112_spill] sm:$0xff]  ;;  %v15111_v5 = vld [vmem:[#allocation66_spill] sm:$0xff] }
 0x1df   : > { %v1891_v54 = vmul.f32 %v11320_v20, %v1695_v55  ;;  %v1888_v57 = vmul.f32 %v11177_v18, %v1692_v6  ;;  %v1889_v51 = vmul.f32 %v11207_v16, %v1693_v61  ;;  %v1890_v35 = vmul.f32 %v11213_v31, %v1694_v34  ;;  %3492 = vmatpush.bf16.msrb.mxu0 %v8590_v40 }
 0x1e0   : > { %v1566_v55 = vmul.f32 %v11164_v13, %v15110_v29  ;;  %v11628_v61 = vadd.f32 %v11428_v8, %v1837_v59  ;;  %v11631_v34 = vadd.f32 %v11428_v8, %v1856_v15  ;;  %v1585_v44 = vmul.f32 %v11223_v58, %v15111_v5  ;;  %v8589_v15 = vld [vmem:[%s15091_s24 + $0x108] sm:$0xff] }
 0x1e1   : > { %v2087_v16 = vadd.f32 %v11349_v9, %v1891_v54  ;;  %v2084_v6 = vadd.f32 %v11236_v2, %v1888_v57  ;;  %v2065_v54 = vadd.f32 %v11236_v2, %v1869_v38  ;;  %v2085_v18 = vadd.f32 %v11239_v63, %v1889_v51  ;;  %v8605_v2 = vld [vmem:[%s15091_s24 + $0x188] sm:$0xff]  ;;  %v15112_v51 = vld [vmem:[#allocation49_spill] sm:$0xff]  ;;  %v15113_v38 = vld [vmem:[#allocation64_spill] sm:$0xff] }
 0x1e2   : > { %v2066_v31 = vadd.f32 %v11239_v63, %v1870_v4  ;;  %v2086_v52 = vadd.f32 %v11265_v36, %v1890_v35  ;;  %3550 = vmatpush.bf16.msrb.mxu2 %v8606_v1  ;;  %v2067_v57 = vadd.f32 %v11265_v36, %v1871_v17  ;;  %v1677_v63 = vmul.f32 %v11478_v53, %v15112_v51  ;;  %v15114_v35 = vld [vmem:[#allocation96_spill] sm:$0xff]  ;;  %v15116_v17 = vld [vmem:[#allocation59_spill] sm:$0xff] }
 0x1e3   : > { %v2163_v62 = vpack.c.bf16 %v2087_v16, %v2068_v47  ;;  %v1696_v4 = vmul.f32 %v11578_v48, %v15113_v38  ;;  %v1602_v40 = vmul.f32 %v11274_v42, %v15114_v35  ;;  %v2160_v1 = vpack.c.bf16 %v2084_v6, %v2065_v54  ;;  %v8603_v36 = vld [vmem:[%s15091_s24 + $0x178] sm:$0xff]  ;;  %3493 = vmatpush.bf16.msrb.mxu0 %v8589_v15 }
 0x1e4   : > { %v15115_v47 = vld [vmem:[#allocation16_spill] sm:$0xff]  ;;  %v1679_v29 = vmul.f32 %v11478_v53, %v15116_v17  ;;  %v2161_v51 = vpack.c.bf16 %v2085_v18, %v2066_v31  ;;  %v1873_v38 = vmul.f32 %v11337_v23, %v1677_v63  ;;  %v11667_v54 = vperm.slane %v11152_v19, 7  ;;  %v8604_v18 = vld [vmem:[%s15091_s24 + $0x180] sm:$0xff]  ;;  %3516 = vmatpush.bf16.msra.mxu1 %v8603_v36 }
 0x1e5   : > { %3481 = vmatmul.bf16.gmra.mxu3 %v2163_v62  ;;  %v1621_v16 = vmul.f32 %v11261_v14, %v15115_v47  ;;  %v15117_v62 = vld [vmem:[#allocation72_spill] sm:$0xff]  ;;  %v1892_v59 = vmul.f32 %v11337_v23, %v1696_v4  ;;  %v1798_v6 = vmul.f32 %v11506_v60, %v1602_v40  ;;  %v2162_v35 = vpack.c.bf16 %v2086_v52, %v2067_v57  ;;  %v8588_v47 = vld [vmem:[%s15091_s24 + $0x100] sm:$0xff] }
 0x1e6   : > { %v1698_v5 = vmul.f32 %v11578_v48, %v15117_v62  ;;  %3551 = vmatpush.bf16.msrb.mxu2 %v8605_v2  ;;  %v1875_v23 = vmul.f32 %v11420_v27, %v1679_v29  ;;  %v8602_v19 = vld [vmem:[%s15091_s24 + $0x170] sm:$0xff]  ;;  %v11681_v52 = vadd.f32 %v11366_v11, %v1873_v38  ;;  %v1781_v40 = vmul.f32 %v11667_v54, %v1585_v44  ;;  %v15118_v36 = vld [vmem:[#allocation22_spill] sm:$0xff] }
 0x1e7   : > { %v1817_v31 = vmul.f32 %v11506_v60, %v1621_v16  ;;  %v11684_v57 = vadd.f32 %v11366_v11, %v1892_v59  ;;  %v11687_v15 = vadd.f32 %v11544_v0, %v1798_v6  ;;  %v1581_v11 = vmul.f32 %v11223_v58, %v15118_v36  ;;  %3494 = vmatpush.bf16.msrb.mxu0 %v8588_v47  ;;  %v15120_v29 = vld [vmem:[#allocation11_spill] sm:$0xff]  ;;  %v15122_v36 = vld [vmem:[#allocation53_spill] sm:$0xff] }
 0x1e8   : > { %v1894_v2 = vmul.f32 %v11420_v27, %v1698_v5  ;;  %3394 = vmatmul.bf16.gmra.mxu0 %v2160_v1  ;;  %3423 = vmatmul.bf16.gmra.mxu1 %v2161_v51  ;;  %v11694_v4 = vadd.f32 %v11428_v8, %v1875_v23  ;;  %v15119_v1 = vld [vmem:[#allocation73_spill] sm:$0xff]  ;;  %v1659_v44 = vmul.f32 %v11277_v56, %v15120_v29  ;;  %v11712_v5 = vperm.slane %v11202_v22, 7  ;;  %v15121_v51 = vld [vmem:[#allocation104_spill] sm:$0xff]  ;;  %v8601_v29 = vld [vmem:[%s15091_s24 + $0x168] sm:$0xff] }
 0x1e9   : > { %v11691_v63 = vadd.f32 %v11544_v0, %v1817_v31  ;;  %3452 = vmatmul.bf16.gmra.mxu2 %v2162_v35  ;;  %v1640_v17 = vmul.f32 %v11346_v49, %v15119_v1  ;;  %v1762_v62 = vmul.f32 %v11667_v54, %v1566_v55  ;;  %3517 = vmatpush.bf16.msra.mxu1 %v8602_v19  ;;  %v15148_v27 = vld [vmem:[#allocation14_spill] sm:$0xff]  ;;  %v15161_v19 = vld [vmem:[#allocation85_spill] sm:$0xff] }
 0x1ea   : > { %v11702_v16 = vadd.f32 %v11428_v8, %v1894_v2  ;;  %3552 = vmatpush.bf16.msrb.mxu2 %v8604_v18  ;;  %v1562_v38 = vmul.f32 %v11164_v13, %v15121_v51  ;;  %v1855_v35 = vmul.f32 %v11506_v60, %v1659_v44  ;;  %v1977_v47 = vadd.f32 %v11712_v5, %v1781_v40  ;;  %v15123_v40 = vld [vmem:[#allocation69_spill] sm:$0xff] }
 0x1eb   : > { %v1836_v6 = vmul.f32 %v11506_v60, %v1640_v17  ;;  %v1777_v18 = vmul.f32 %v11320_v20, %v1581_v11  ;;  %v1958_v31 = vadd.f32 %v11712_v5, %v1762_v62  ;;  %v1678_v1 = vmul.f32 %v11478_v53, %v15122_v36 }
 0x1ec   : > { %v11726_v22 = vadd.f32 %v11544_v0, %v1855_v35  ;;  %v1758_v23 = vmul.f32 %v11320_v20, %v1562_v38  ;;  %v1697_v11 = vmul.f32 %v11578_v48, %v15123_v40  ;;  %v8651_v20 = vld [vmem:[%s15091_s24 + $0x2f8] sm:$0xff]  ;;  %v15124_v38 = vld [vmem:[#allocation50_spill] sm:$0xff]  ;;  %v1666_v59 = vmul.f32 %v11277_v56, %v15148_v27 }
 0x1ed   : > { %v11723_v55 = vadd.f32 %v11544_v0, %v1836_v6  ;;  %v2110_v2 = vpack.c.bf16 %v1977_v47, %v1958_v31  ;;  %v1973_v17 = vadd.f32 %v11349_v9, %v1777_v18  ;;  %v1874_v44 = vmul.f32 %v11506_v60, %v1678_v1  ;;  %3518 = vmatpush.bf16.msra.mxu1 %v8601_v29  ;;  %v8600_v35 = vld [vmem:[%s15091_s24 + $0x160] sm:$0xff]  ;;  %v8599_v1 = vld [vmem:[%s15091_s24 + $0x158] sm:$0xff] }
 0x1ee   : > { %v1893_v62 = vmul.f32 %v11506_v60, %v1697_v11  ;;  %v1954_v51 = vadd.f32 %v11349_v9, %v1758_v23  ;;  %v1623_v6 = vmul.f32 %v11261_v14, %v15124_v38  ;;  %3690 = vmatpush.bf16.msra.mxu3 %v8651_v20  ;;  %v8650_v9 = vld [vmem:[%s15091_s24 + $0x2f0] sm:$0xff]  ;;  %v15125_v60 = vld [vmem:[#allocation98_spill] sm:$0xff]  ;;  %v15153_v27 = vpack.c.bf16 %v11631_v34, %v11628_v61 }
 0x1ef   : > { %v11752_v47 = vadd.f32 %v11544_v0, %v1874_v44  ;;  %v1604_v23 = vmul.f32 %v11274_v42, %v15125_v60  ;;  %v15126_v40 = vld [vmem:[#allocation38_spill] sm:$0xff]  ;;  %v8647_v60 = vld [vmem:[%s15091_s24 + $0x2d8] sm:$0xff] }
 0x1f0   : > { %v11755_v18 = vadd.f32 %v11544_v0, %v1893_v62  ;;  %v2106_v31 = vpack.c.bf16 %v1973_v17, %v1954_v51  ;;  %v11770_v0 = vld [vmem:[%s15092_s30 + $0x8] sm:$0xff]  ;;  %v1819_v36 = vmul.f32 %v11667_v54, %v1623_v6  ;;  %v1574_v11 = vmul.f32 %v11164_v13, %v15126_v40  ;;  %v8648_v29 = vld [vmem:[%s15091_s24 + $0x2e0] sm:$0xff]  ;;  %v15158_v61 = vld [vmem:[#allocation88_spill] sm:$0xff] }
 0x1f1   : > { %3519 = vmatpush.bf16.msra.mxu1 %v8600_v35  ;;  %v11789_v33 = vperm.slane %v11770_v0, 7  ;;  %v11798_v17 = vperm.slane %v11785_v50, 7  ;;  %v15127_v20 = vld [vmem:[#allocation78_spill] sm:$0xff] }
 0x1f2   : > { %3691 = vmatpush.bf16.msra.mxu3 %v8650_v9  ;;  %v2015_v39 = vadd.f32 %v11712_v5, %v1819_v36  ;;  %v1593_v44 = vmul.f32 %v11223_v58, %v15127_v20  ;;  %v8597_v9 = vld [vmem:[%s15091_s24 + $0x148] sm:$0xff]  ;;  %v15131_v20 = vld [vmem:[#allocation17_spill] sm:$0xff] }
 0x1f3   : > { %v1770_v51 = vmul.f32 %v11789_v33, %v1574_v11  ;;  %v15130_v11 = vld [vmem:[#allocation26_spill] sm:$0xff] }
 0x1f4   : > { %v1789_v38 = vmul.f32 %v11789_v33, %v1593_v44  ;;  %v1661_v44 = vmul.f32 %v11277_v56, %v15131_v20  ;;  %v15134_v20 = vld [vmem:[#allocation117_spill] sm:$0xff] }
 0x1f5   : > { %3582 = vmatmul.bf16.vlgmr.msrb.gmra.mxu3 %v2110_v2  ;;  %3520 = vmatpush.bf16.msra.mxu1 %v8599_v1  ;;  %v11809_v35 = vadd.f32 %v11798_v17, %v1770_v51  ;;  %v8627_v1 = vld [vmem:[%s15091_s24 + $0x238] sm:$0xff] }
 0x1f6   : > { %3692 = vmatpush.bf16.msra.mxu3 %v8649_v3  ;;  %v8643_v3 = vld [vmem:[%s15091_s24 + $0x2b8] sm:$0xff]  ;;  %3603 = vmatpush.bf16.msra.mxu0 %v8627_v1  ;;  %v15133_v1 = vld [vmem:[#allocation63_spill] sm:$0xff]  ;;  %v1857_v25 = vmul.f32 %v11667_v54, %v1661_v44  ;;  %v15136_v44 = vld [vmem:[#allocation30_spill] sm:$0xff] }
 0x1f7   : > { %3661 = vmatpush.bf16.msra.mxu2 %v8643_v3  ;;  %v1680_v3 = vmul.f32 %v11478_v53, %v15133_v1  ;;  %v15138_v1 = vld [vmem:[#allocation126_spill] sm:$0xff] }
 0x1f8   : > { %3466 = vmatmul.bf16.vlgmr.msrb.gmra.mxu1 %v2106_v31  ;;  %3495 = vmatmul.bf16.vlgmr.msrb.gmra.mxu0 %v2107_v26  ;;  %v1800_v26 = vmul.f32 %v11667_v54, %v1604_v23  ;;  %v11812_v31 = vadd.f32 %v11798_v17, %v1789_v38  ;;  %v15128_v23 = vld [vmem:[#allocation121_spill] sm:$0xff]  ;;  %v8646_v38 = vld [vmem:[%s15091_s24 + $0x2d0] sm:$0xff] }
 0x1f9   : > { %3553 = vmatmul.bf16.vlgmr.msrb.gmra.mxu2 %v2109_v46  ;;  %v8598_v46 = vld [vmem:[%s15091_s24 + $0x150] sm:$0xff]  ;;  %v1642_v36 = vmul.f32 %v11346_v49, %v15128_v23 }
 0x1fa   : > { %v1996_v62 = vadd.f32 %v11712_v5, %v1800_v26  ;;  %3521 = vmatpush.bf16.msra.mxu1 %v8598_v46  ;;  %3693 = vmatpush.bf16.msra.mxu3 %v8648_v29  ;;  %v15129_v46 = vld [vmem:[#allocation107_spill] sm:$0xff]  ;;  %v1631_v29 = vmul.f32 %v11261_v14, %v15130_v11  ;;  %v15145_v26 = vld [vmem:[#allocation93_spill] sm:$0xff] }
 0x1fb   : > { %v1612_v40 = vmul.f32 %v11274_v42, %v15129_v46  ;;  %v1838_v11 = vmul.f32 %v11667_v54, %v1642_v36  ;;  %v1707_v2 = vmul.f32 %v11578_v48, %v15145_v26  ;;  %v8640_v26 = vld [vmem:[%s15091_s24 + $0x2a0] sm:$0xff] }
 0x1fc   : > { %v2129_v6 = vpack.c.bf16 %v2015_v39, %v1996_v62  ;;  %v8596_v39 = vld [vmem:[%s15091_s24 + $0x140] sm:$0xff]  ;;  %v15132_v62 = vld [vmem:[#allocation75_spill] sm:$0xff]  ;;  %v1827_v46 = vmul.f32 %v11789_v33, %v1631_v29 }
 0x1fd   : > { %v1699_v51 = vmul.f32 %v11578_v48, %v15132_v62  ;;  %v1808_v23 = vmul.f32 %v11789_v33, %v1612_v40  ;;  %v1571_v40 = vmul.f32 %v11164_v13, %v15134_v20  ;;  %v1573_v62 = vmul.f32 %v11164_v13, %v15136_v44  ;;  %v15139_v44 = vld [vmem:[#allocation18_spill] sm:$0xff] }
 0x1fe   : > { %3522 = vmatpush.bf16.msra.mxu1 %v8597_v9  ;;  %3694 = vmatpush.bf16.msra.mxu3 %v8647_v60  ;;  %v8642_v9 = vld [vmem:[%s15091_s24 + $0x2b0] sm:$0xff]  ;;  %v11853_v60 = vperm.slane %v11770_v0, 4  ;;  %v11873_v37 = vadd.f32 %v11798_v17, %v1827_v46 }
 0x1ff   : > { %v11870_v36 = vadd.f32 %v11798_v17, %v1808_v23  ;;  %v1895_v7 = vmul.f32 %v11667_v54, %v1699_v51  ;;  %3662 = vmatpush.bf16.msra.mxu2 %v8642_v9  ;;  %v15137_v51 = vld [vmem:[#allocation70_spill] sm:$0xff]  ;;  %v1876_v23 = vmul.f32 %v11667_v54, %v1680_v3  ;;  %v1650_v9 = vmul.f32 %v11346_v49, %v15138_v1  ;;  %v15140_v1 = vld [vmem:[#allocation103_spill] sm:$0xff] }
 0x200   : > { %v1767_v29 = vmul.f32 %v11853_v60, %v1571_v40  ;;  %v1786_v46 = vmul.f32 %v11853_v60, %v1590_v41  ;;  %v8644_v54 = vld [vmem:[%s15091_s24 + $0x2c0] sm:$0xff] }
 0x201   : > { %v1846_v3 = vmul.f32 %v11789_v33, %v1650_v9  ;;  %v11919_v41 = vadd.f32 %v11712_v5, %v1895_v7  ;;  %v1609_v9 = vmul.f32 %v11274_v42, %v15140_v1  ;;  %v11936_v7 = vadd.f32 %v11712_v5, %v1876_v23  ;;  %v8625_v23 = vld [vmem:[%s15091_s24 + $0x228] sm:$0xff] }
 0x202   : > { %3523 = vmatpush.bf16.msra.mxu1 %v8596_v39  ;;  %3695 = vmatpush.bf16.msra.mxu3 %v8646_v38  ;;  %v1592_v38 = vmul.f32 %v11223_v58, %v15137_v51  ;;  %v11904_v20 = vadd.f32 %v11876_v32, %v1767_v29  ;;  %v1669_v39 = vmul.f32 %v11277_v56, %v15139_v44 }
 0x203   : > { %v2053_v51 = vadd.f32 %v11712_v5, %v1857_v25  ;;  %v1805_v44 = vmul.f32 %v11853_v60, %v1609_v9 }
 0x204   : > { %v1865_v25 = vmul.f32 %v11789_v33, %v1669_v39  ;;  %v15141_v39 = vld [vmem:[#allocation40_spill] sm:$0xff] }
 0x205   : > { %3587 = vmatmul.bf16.gmra.mxu3 %v2129_v6  ;;  %v8626_v6 = vld [vmem:[%s15091_s24 + $0x230] sm:$0xff] }
 0x206   : > { %3604 = vmatpush.bf16.msra.mxu0 %v8626_v6  ;;  %v2034_v6 = vadd.f32 %v11712_v5, %v1838_v11  ;;  %v11915_v11 = vadd.f32 %v11876_v32, %v1786_v46  ;;  %v11931_v46 = vadd.f32 %v11798_v17, %v1846_v3  ;;  %v15149_v5 = vld [vmem:[#allocation27_spill] sm:$0xff] }
 0x208   : > { %3471 = vmatmul.bf16.gmra.mxu1 %v2125_v10  ;;  %3500 = vmatmul.bf16.gmra.mxu0 %v2126_v45  ;;  %v11879_v10 = vperm.slane %v11770_v0, 6  ;;  %v8645_v45 = vld [vmem:[%s15091_s24 + $0x2c8] sm:$0xff] }
 0x209   : > { %3558 = vmatmul.bf16.gmra.mxu2 %v2128_v28  ;;  %v11889_v28 = vperm.slane %v11785_v50, 6  ;;  %3696 = vmatpush.bf16.msra.mxu3 %v8645_v45  ;;  %v2148_v45 = vpack.c.bf16 %v2053_v51, %v2034_v6  ;;  %v1628_v6 = vmul.f32 %v11261_v14, %v15141_v39  ;;  %v15142_v51 = vld [vmem:[#allocation106_spill] sm:$0xff]  ;;  %v15144_v39 = vld [vmem:[#allocation87_spill] sm:$0xff] }
 0x20a   : > { %v1769_v40 = vmul.f32 %v11879_v10, %v1573_v62  ;;  %v1788_v30 = vmul.f32 %v11879_v10, %v1592_v38  ;;  %v1611_v3 = vmul.f32 %v11274_v42, %v15142_v51  ;;  %v15143_v38 = vld [vmem:[#allocation46_spill] sm:$0xff]  ;;  %3605 = vmatpush.bf16.msra.mxu0 %v8625_v23 }
 0x20b   : > { %v1630_v1 = vmul.f32 %v11261_v14, %v15143_v38  ;;  %v1824_v9 = vmul.f32 %v11853_v60, %v1628_v6  ;;  %v1688_v38 = vmul.f32 %v11478_v53, %v15144_v39 }
 0x20c   : > { %v11922_v29 = vadd.f32 %v11889_v28, %v1769_v40  ;;  %v11925_v62 = vadd.f32 %v11889_v28, %v1788_v30  ;;  %v11941_v30 = vadd.f32 %v11798_v17, %v1865_v25  ;;  %v1807_v51 = vmul.f32 %v11879_v10, %v1611_v3  ;;  %v8624_v25 = vld [vmem:[%s15091_s24 + $0x220] sm:$0xff] }
 0x20d   : > { %3697 = vmatpush.bf16.msra.mxu3 %v8644_v54  ;;  %v8641_v54 = vld [vmem:[%s15091_s24 + $0x2a8] sm:$0xff]  ;;  %v1826_v40 = vmul.f32 %v11879_v10, %v1630_v1  ;;  %v11974_v6 = vadd.f32 %v11876_v32, %v1824_v9  ;;  %v1884_v39 = vmul.f32 %v11789_v33, %v1688_v38  ;;  %v11981_v3 = vperm.slane %v11785_v50, 5 }
 0x20e   : > { %3663 = vmatpush.bf16.msra.mxu2 %v8641_v54  ;;  %v11987_v1 = vadd.f32 %v11889_v28, %v1807_v51  ;;  %v1903_v54 = vmul.f32 %v11789_v33, %v1707_v2  ;;  %v15146_v9 = vld [vmem:[#allocation123_spill] sm:$0xff]  ;;  %v1572_v51 = vmul.f32 %v11164_v13, %v15149_v5  ;;  %v15151_v2 = vpack.c.bf16 %v11600_v21, %v11576_v24  ;;  %v15159_v33 = vld [vmem:[#allocation105_spill] sm:$0xff] }
 0x20f   : > { %v11990_v23 = vadd.f32 %v11889_v28, %v1826_v40  ;;  %v1647_v38 = vmul.f32 %v11346_v49, %v15146_v9  ;;  %v11998_v8 = vadd.f32 %v11798_v17, %v1884_v39  ;;  %v15150_v40 = vpack.c.bf16 %v11569_v12, %v11566_v43  ;;  %3606 = vmatpush.bf16.msra.mxu0 %v8624_v25  ;;  %v8623_v43 = vld [vmem:[%s15091_s24 + $0x218] sm:$0xff]  ;;  %v15154_v24 = vld [vmem:[#allocation67_spill] sm:$0xff] }
 0x210   : > { %v12013_v39 = vadd.f32 %v11798_v17, %v1903_v54  ;;  %v1862_v12 = vmul.f32 %v11853_v60, %v1666_v59  ;;  %v1591_v21 = vmul.f32 %v11223_v58, %v15154_v24  ;;  %v8639_v17 = vld [vmem:[%s15091_s24 + $0x298] sm:$0xff] }
 0x211   : > { %15147 = vst [vmem:[#allocation95_spill] sm:$0xff] %v11998_v8  ;;  %v1843_v9 = vmul.f32 %v11853_v60, %v1647_v38  ;;  %v15155_v25 = vld [vmem:[#allocation125_spill] sm:$0xff]  ;;  %v15156_v59 = vld [vmem:[#allocation32_spill] sm:$0xff]  ;;  %v1687_v8 = vmul.f32 %v11478_v53, %v15161_v19 }
 0x212   : > { %15152 = vst [vmem:[#allocation36_spill] sm:$0xff] %v12013_v39  ;;  %3664 = vmatpush.bf16.msra.mxu2 %v8640_v26  ;;  %v1649_v54 = vmul.f32 %v11346_v49, %v15155_v25  ;;  %v1668_v38 = vmul.f32 %v11277_v56, %v15156_v59  ;;  %v1704_v25 = vmul.f32 %v11578_v48, %v15158_v61  ;;  %v15165_v39 = vld [vmem:[#allocation28_spill] sm:$0xff] }
 0x213   : > { %v12032_v34 = vadd.f32 %v11876_v32, %v1843_v9  ;;  %v1610_v59 = vmul.f32 %v11274_v42, %v15159_v33  ;;  %3607 = vmatpush.bf16.msra.mxu0 %v8623_v43  ;;  %v8638_v33 = vld [vmem:[%s15091_s24 + $0x290] sm:$0xff] }
 0x214   : > { %v1845_v9 = vmul.f32 %v11879_v10, %v1649_v54  ;;  %v1864_v24 = vmul.f32 %v11879_v10, %v1668_v38  ;;  %v15160_v38 = vld [vmem:[#allocation23_spill] sm:$0xff] }
 0x215   : > { %3592 = vmatmul.bf16.gmra.mxu3 %v2148_v45  ;;  %v11964_v45 = vadd.f32 %v11876_v32, %v1805_v44  ;;  %v11978_v44 = vperm.slane %v11770_v0, 5 }
 0x216   : > { %3665 = vmatpush.bf16.msra.mxu2 %v8639_v17  ;;  %v12068_v43 = vadd.f32 %v11889_v28, %v1845_v9  ;;  %v12071_v61 = vadd.f32 %v11889_v28, %v1864_v24  ;;  %v1667_v9 = vmul.f32 %v11277_v56, %v15165_v39  ;;  %v15175_v39 = vpack.c.bf16 %v11691_v63, %v11687_v15 }
 0x217   : > { %v1768_v5 = vmul.f32 %v11978_v44, %v1572_v51  ;;  %v1787_v26 = vmul.f32 %v11978_v44, %v1591_v21  ;;  %v1900_v21 = vmul.f32 %v11853_v60, %v1704_v25  ;;  %v15163_v25 = vld [vmem:[#allocation92_spill] sm:$0xff]  ;;  %v12172_v63 = vperm.slane %v11785_v50, 3 }
 0x218   : > { %3505 = vmatmul.bf16.gmra.mxu0 %v15150_v40  ;;  %3524 = vmatmul.bf16.vlgmr.msra.gmra.mxu1 %v15151_v2  ;;  %v12039_v40 = vadd.f32 %v11876_v32, %v1862_v12  ;;  %v15157_v2 = vld [vmem:[#allocation79_spill] sm:$0xff] }
 0x219   : > { %3563 = vmatmul.bf16.gmra.mxu2 %v15153_v27  ;;  %v12043_v51 = vadd.f32 %v11981_v3, %v1768_v5  ;;  %v1685_v27 = vmul.f32 %v11478_v53, %v15157_v2  ;;  %v8622_v12 = vld [vmem:[%s15091_s24 + $0x210] sm:$0xff]  ;;  %v12059_v5 = vadd.f32 %v11981_v3, %v1787_v26  ;;  %v1629_v2 = vmul.f32 %v11261_v14, %v15160_v38 }
 0x21a   : > { %v1806_v26 = vmul.f32 %v11978_v44, %v1610_v59  ;;  %v12086_v24 = vadd.f32 %v11876_v32, %v1900_v21  ;;  %v1706_v59 = vmul.f32 %v11578_v48, %v15163_v25  ;;  %3608 = vmatpush.bf16.msra.mxu0 %v8622_v12  ;;  %3666 = vmatpush.bf16.msra.mxu2 %v8638_v33 }
 0x21b   : > { %v1881_v54 = vmul.f32 %v11853_v60, %v1685_v27  ;;  %v1825_v17 = vmul.f32 %v11978_v44, %v1629_v2  ;;  %v1883_v2 = vmul.f32 %v11879_v10, %v1687_v8  ;;  %v15164_v27 = vld [vmem:[#allocation124_spill] sm:$0xff]  ;;  %v15166_v12 = vpack.c.bf16 %v11919_v41, %v11936_v7  ;;  %v8621_v8 = vld [vmem:[%s15091_s24 + $0x208] sm:$0xff] }
 0x21c   : > { %v12089_v60 = vadd.f32 %v11981_v3, %v1806_v26  ;;  %v1648_v19 = vmul.f32 %v11346_v49, %v15164_v27  ;;  %v1902_v21 = vmul.f32 %v11879_v10, %v1706_v59  ;;  %v8637_v26 = vld [vmem:[%s15091_s24 + $0x288] sm:$0xff]  ;;  %v1863_v27 = vmul.f32 %v11978_v44, %v1667_v9  ;;  %v8635_v41 = vld [vmem:[%s15091_s24 + $0x278] sm:$0xff]  ;;  %v8620_v59 = vld [vmem:[%s15091_s24 + $0x200] sm:$0xff] }
 0x21d   : > { %v12078_v38 = vadd.f32 %v11876_v32, %v1881_v54  ;;  %v12094_v54 = vadd.f32 %v11981_v3, %v1825_v17  ;;  %v12116_v33 = vadd.f32 %v11889_v28, %v1883_v2  ;;  %v15169_v17 = vld [vmem:[#allocation52_spill] sm:$0xff]  ;;  %3632 = vmatpush.bf16.msrb.mxu1 %v8635_v41  ;;  %v15174_v41 = vpack.c.bf16 %v11684_v57, %v11681_v52 }
 0x21e   : > { %15162 = vst [vmem:[#allocation97_spill] sm:$0xff] %v12089_v60  ;;  %v1844_v10 = vmul.f32 %v11978_v44, %v1648_v19  ;;  %v12124_v7 = vadd.f32 %v11889_v28, %v1902_v21  ;;  %v1589_v25 = vmul.f32 %v11223_v58, %v15169_v17  ;;  %3609 = vmatpush.bf16.msra.mxu0 %v8621_v8  ;;  %v8636_v28 = vld [vmem:[%s15091_s24 + $0x280] sm:$0xff]  ;;  %v8634_v19 = vld [vmem:[%s15091_s24 + $0x270] sm:$0xff] }
 0x21f   : > { %15167 = vst [vmem:[#allocation39_spill] sm:$0xff] %v12116_v33  ;;  %v12135_v9 = vadd.f32 %v11981_v3, %v1863_v27  ;;  %3667 = vmatpush.bf16.msra.mxu2 %v8637_v26  ;;  %v15173_v27 = vld [vmem:[#allocation82_spill] sm:$0xff]  ;;  %v15176_v21 = vld [vmem:[#allocation89_spill] sm:$0xff]  ;;  %v15177_v33 = vpack.c.bf16 %v11702_v16, %v11694_v4 }
 0x220   : > { %15168 = vst [vmem:[#allocation62_spill] sm:$0xff] %v12124_v7  ;;  %v12132_v2 = vadd.f32 %v11981_v3, %v1844_v10  ;;  %v12148_v10 = vperm.slane %v11770_v0, 3  ;;  %v1686_v17 = vmul.f32 %v11478_v53, %v15173_v27  ;;  %v15178_v26 = vld [vmem:[#allocation34_spill] sm:$0xff]  ;;  %v15181_v16 = vld [vmem:[#allocation113_spill] sm:$0xff] }
 0x221   : > { %15171 = vst [vmem:[#allocation111_spill] sm:$0xff] %v12135_v9  ;;  %v1586_v52 = vmul.f32 %v11223_v58, %v15178_v26  ;;  %3633 = vmatpush.bf16.msrb.mxu1 %v8634_v19  ;;  %v15183_v19 = vld [vmem:[#allocation115_spill] sm:$0xff] }
 0x222   : > { %15170 = vst [vmem:[#allocation118_spill] sm:$0xff] %v12132_v2  ;;  %v1785_v32 = vmul.f32 %v12148_v10, %v1589_v25  ;;  %3610 = vmatpush.bf16.msra.mxu0 %v8620_v59  ;;  %v1882_v27 = vmul.f32 %v11978_v44, %v1686_v17  ;;  %v12182_v59 = vperm.slane %v11770_v0, 0 }
 0x223   : > { %3668 = vmatpush.bf16.msra.mxu2 %v8636_v28 }
 0x224   : > { %v12177_v4 = vadd.f32 %v11981_v3, %v1882_v27  ;;  %v1782_v26 = vmul.f32 %v12182_v59, %v1586_v52  ;;  %v12200_v27 = vperm.slane %v11785_v50, 0  ;;  %v12209_v52 = vld [vmem:[%s15184_s2] ss:$0 sm:$0xff]  ;;  %s14774_s2 = smov 96  }
 0x225   : > { %3597 = vmatmul.bf16.gmra.mxu3 %v15166_v12  ;;  %v15172_v12 = vld [vmem:[#allocation116_spill] sm:$0xff] }
 0x226   : > { %v1570_v8 = vmul.f32 %v11164_v13, %v15172_v12  ;;  %v1705_v12 = vmul.f32 %v11578_v48, %v15176_v21  ;;  %15180 = vst [vmem:[#allocation51_spill] sm:$0xff] %v12177_v4  ;;  %v1569_v21 = vmul.f32 %v11164_v13, %v15183_v19  ;;  %v15185_v19 = vld [vmem:[#allocation65_spill] sm:$0xff] }
 0x228   : > { %3510 = vmatmul.bf16.gmra.mxu0 %v15174_v41  ;;  %3529 = vmatmul.bf16.gmra.mxu1 %v15175_v39  ;;  %v1901_v57 = vmul.f32 %v11978_v44, %v1705_v12  ;;  %v1766_v15 = vmul.f32 %v12148_v10, %v1570_v8  ;;  %v15179_v39 = vld [vmem:[#allocation48_spill] sm:$0xff]  ;;  %v1981_v44 = vadd.f32 %v12172_v63, %v1785_v32  ;;  %v12191_v8 = vperm.slane %v11770_v0, 2 }
 0x229   : > { %3568 = vmatmul.bf16.gmra.mxu2 %v15177_v33  ;;  %v1588_v25 = vmul.f32 %v11223_v58, %v15179_v39  ;;  %v1567_v33 = vmul.f32 %v11164_v13, %v15181_v16  ;;  %v12204_v39 = vperm.slane %v11785_v50, 2  ;;  %v8633_v16 = vld [vmem:[%s15091_s24 + $0x268] sm:$0xff] }
 0x22a   : > { %v12185_v28 = vadd.f32 %v11981_v3, %v1901_v57  ;;  %v1962_v41 = vadd.f32 %v12172_v63, %v1766_v15  ;;  %v1765_v57 = vmul.f32 %v12191_v8, %v1569_v21  ;;  %v1978_v15 = vadd.f32 %v12200_v27, %v1782_v26  ;;  %3634 = vmatpush.bf16.msrb.mxu1 %v8633_v16 }
 0x22b   : > { %v1784_v12 = vmul.f32 %v12191_v8, %v1588_v25  ;;  %v1763_v3 = vmul.f32 %v12182_v59, %v1567_v33  ;;  %v8683_v33 = vld [vmem:[%s15091_s24 + $0x3f8] sm:$0xff]  ;;  %v1627_v21 = vmul.f32 %v11261_v14, %v15185_v19 }
 0x22c   : > { %15182 = vst [vmem:[#allocation119_spill] sm:$0xff] %v12185_v28  ;;  %v2114_v32 = vpack.c.bf16 %v1981_v44, %v1962_v41  ;;  %v1961_v26 = vadd.f32 %v12204_v39, %v1765_v57  ;;  %3806 = vmatpush.bf16.msrb.mxu3 %v8683_v33  ;;  %v15186_v28 = vld [vmem:[#allocation102_spill] sm:$0xff]  ;;  %v15187_v57 = vpack.c.bf16 %v11726_v22, %v11723_v55  ;;  %v15188_v33 = vld [vmem:[#allocation25_spill] sm:$0xff] }
 0x22d   : > { %v1980_v25 = vadd.f32 %v12204_v39, %v1784_v12  ;;  %v1959_v44 = vadd.f32 %v12200_v27, %v1763_v3  ;;  %v8632_v12 = vld [vmem:[%s15091_s24 + $0x260] sm:$0xff]  ;;  %v8682_v3 = vld [vmem:[%s15091_s24 + $0x3f0] sm:$0xff]  ;;  %v1608_v19 = vmul.f32 %v11274_v42, %v15186_v28  ;;  %v1823_v16 = vmul.f32 %v12148_v10, %v1627_v21  ;;  %v8681_v28 = vld [vmem:[%s15091_s24 + $0x3e8] sm:$0xff] }
 0x22e   : > { %3635 = vmatpush.bf16.msrb.mxu1 %v8632_v12  ;;  %v15189_v22 = vld [vmem:[#allocation21_spill] sm:$0xff] }
 0x22f   : > { %v2111_v4 = vpack.c.bf16 %v1978_v15, %v1959_v44  ;;  %v2113_v2 = vpack.c.bf16 %v1980_v25, %v1961_v26  ;;  %v8631_v15 = vld [vmem:[%s15091_s24 + $0x258] sm:$0xff]  ;;  %v1624_v44 = vmul.f32 %v11261_v14, %v15188_v33  ;;  %v1804_v55 = vmul.f32 %v12148_v10, %v1608_v19  ;;  %v8630_v19 = vld [vmem:[%s15091_s24 + $0x250] sm:$0xff] }
 0x230   : > { %3807 = vmatpush.bf16.msrb.mxu3 %v8682_v3  ;;  %v2019_v21 = vadd.f32 %v12172_v63, %v1823_v16 }
 0x231   : > { %v1820_v33 = vmul.f32 %v12182_v59, %v1624_v44  ;;  %v2000_v16 = vadd.f32 %v12172_v63, %v1804_v55  ;;  %v8679_v55 = vld [vmem:[%s15091_s24 + $0x3d8] sm:$0xff] }
 0x232   : > { %3636 = vmatpush.bf16.msrb.mxu1 %v8631_v15 }
 0x234   : > { %3808 = vmatpush.bf16.msrb.mxu3 %v8681_v28  ;;  %v8629_v28 = vld [vmem:[%s15091_s24 + $0x248] sm:$0xff] }
 0x235   : > { %3698 = vmatmul.bf16.vlgmr.msra.gmra.mxu3 %v2114_v32  ;;  %v3380_v41 = vpop.f32.mrf.mxu0  ;;  %v3409_v17 = vpop.f32.mrf.mxu1 }
 0x236   : > { %v3381_v32 = vadd.f32 %v12209_v52, %v3380_v41  ;;  %3637 = vmatpush.bf16.msrb.mxu1 %v8630_v19 }
 0x238   : > { %v3410_v9 = vadd.f32 %v3409_v17, %v3381_v32  ;;  %3534 = vmatmul.bf16.gmra.mxu1 %v15187_v57  ;;  %3611 = vmatmul.bf16.vlgmr.msra.gmra.mxu0 %v2111_v4  ;;  %v1626_v4 = vmul.f32 %v11261_v14, %v15189_v22  ;;  %v15191_v32 = vld [vmem:[#allocation101_spill] sm:$0xff] }
 0x239   : > { %3669 = vmatmul.bf16.vlgmr.msra.gmra.mxu2 %v2113_v2  ;;  %v15190_v2 = vld [vmem:[#allocation99_spill] sm:$0xff]  ;;  %v1607_v3 = vmul.f32 %v11274_v42, %v15191_v32 }
 0x23a   : > { %v1605_v25 = vmul.f32 %v11274_v42, %v15190_v2  ;;  %v1822_v22 = vmul.f32 %v12191_v8, %v1626_v4  ;;  %v2133_v2 = vpack.c.bf16 %v2019_v21, %v2000_v16  ;;  %v15192_v21 = vld [vmem:[#allocation43_spill] sm:$0xff]  ;;  %3638 = vmatpush.bf16.msrb.mxu1 %v8629_v28 }
 0x23b   : > { %v1803_v32 = vmul.f32 %v12191_v8, %v1607_v3 }
 0x23c   : > { %v3438_v17 = vpop.f32.mrf.mxu2  ;;  %v1801_v15 = vmul.f32 %v12182_v59, %v1605_v25  ;;  %v2018_v44 = vadd.f32 %v12204_v39, %v1822_v22  ;;  %v8628_v22 = vld [vmem:[%s15091_s24 + $0x240] sm:$0xff] }
 0x23d   : > { %v12250_v41 = vadd.f32 %v3438_v17, %v3410_v9  ;;  %v3382_v26 = vpop.f32.mrf.mxu0  ;;  %v3411_v12 = vpop.f32.mrf.mxu1  ;;  %v8680_v9 = vld [vmem:[%s15091_s24 + $0x3e0] sm:$0xff] }
 0x23e   : > { %v3383_v57 = vadd.f32 %v12209_v52, %v3382_v26  ;;  %v2016_v26 = vadd.f32 %v12200_v27, %v1820_v33  ;;  %3809 = vmatpush.bf16.msrb.mxu3 %v8680_v9  ;;  %v1997_v25 = vadd.f32 %v12200_v27, %v1801_v15  ;;  %v1999_v33 = vadd.f32 %v12204_v39, %v1803_v32  ;;  %v8678_v15 = vld [vmem:[%s15091_s24 + $0x3d0] sm:$0xff] }
 0x23f   : > { %3639 = vmatpush.bf16.msrb.mxu1 %v8628_v22  ;;  %v15199_v22 = vld [vmem:[#allocation114_spill] sm:$0xff] }
 0x240   : > { %v3412_v17 = vadd.f32 %v3411_v12, %v3383_v57  ;;  %v1646_v12 = vmul.f32 %v11346_v49, %v15192_v21  ;;  %v2130_v16 = vpack.c.bf16 %v2016_v26, %v1997_v25  ;;  %v2132_v28 = vpack.c.bf16 %v2018_v44, %v1999_v33  ;;  %v8675_v26 = vld [vmem:[%s15091_s24 + $0x3b8] sm:$0xff]  ;;  %v15195_v21 = vld [vmem:[#allocation122_spill] sm:$0xff] }
 0x241   : > { %3777 = vmatpush.bf16.msrb.mxu2 %v8675_v26 }
 0x242   : > { %3810 = vmatpush.bf16.msrb.mxu3 %v8679_v55  ;;  %v1842_v25 = vmul.f32 %v12148_v10, %v1646_v12 }
 0x244   : > { %v3440_v4 = vpop.f32.mrf.mxu2 }
 0x245   : > { %3703 = vmatmul.bf16.gmra.mxu3 %v2133_v2  ;;  %v12277_v3 = vadd.f32 %v3440_v4, %v3412_v17  ;;  %v3385_v19 = vpop.f32.mrf.mxu0  ;;  %v3414_v57 = vpop.f32.mrf.mxu1  ;;  %v8659_v17 = vld [vmem:[%s15091_s24 + $0x338] sm:$0xff]  ;;  %v15194_v4 = vpack.c.bf16 %v11755_v18, %v11752_v47 }
 0x246   : > { %v3386_v9 = vadd.f32 %v12209_v52, %v3385_v19  ;;  %v15193_v2 = vld [vmem:[#allocation13_spill] sm:$0xff]  ;;  %3811 = vmatpush.bf16.msrb.mxu3 %v8678_v15  ;;  %v1643_v19 = vmul.f32 %v11346_v49, %v15195_v21  ;;  %3719 = vmatpush.bf16.msrb.mxu0 %v8659_v17  ;;  %v1568_v15 = vmul.f32 %v11164_v13, %v15199_v22 }
 0x247   : > { %v1665_v32 = vmul.f32 %v11277_v56, %v15193_v2  ;;  %v15196_v2 = vld [vmem:[#allocation42_spill] sm:$0xff]  ;;  %v15197_v18 = vld [vmem:[#allocation37_spill] sm:$0xff]  ;;  %v2038_v17 = vadd.f32 %v12172_v63, %v1842_v25 }
 0x248   : > { %v3415_v55 = vadd.f32 %v3414_v57, %v3386_v9  ;;  %3539 = vmatmul.bf16.gmra.mxu1 %v15194_v4  ;;  %3616 = vmatmul.bf16.gmra.mxu0 %v2130_v16  ;;  %v1587_v44 = vmul.f32 %v11223_v58, %v15196_v2  ;;  %v8677_v57 = vld [vmem:[%s15091_s24 + $0x3c8] sm:$0xff]  ;;  %v1645_v33 = vmul.f32 %v11346_v49, %v15197_v18  ;;  %v15200_v2 = vld [vmem:[#allocation12_spill] sm:$0xff]  ;;  %v8676_v25 = vld [vmem:[%s15091_s24 + $0x3c0] sm:$0xff] }
 0x249   : > { %3674 = vmatmul.bf16.gmra.mxu2 %v2132_v28  ;;  %v1861_v47 = vmul.f32 %v12148_v10, %v1665_v32  ;;  %v15198_v9 = vld [vmem:[#allocation19_spill] sm:$0xff]  ;;  %v12314_v28 = vperm.slane %v11770_v0, 1  ;;  %v1664_v18 = vmul.f32 %v11277_v56, %v15200_v2  ;;  %v1839_v58 = vmul.f32 %v12182_v59, %v1643_v19 }
 0x24a   : > { %v1662_v16 = vmul.f32 %v11277_v56, %v15198_v9  ;;  %3812 = vmatpush.bf16.msrb.mxu3 %v8677_v57  ;;  %v8658_v0 = vld [vmem:[%s15091_s24 + $0x330] sm:$0xff]  ;;  %v1841_v22 = vmul.f32 %v12191_v8, %v1645_v33  ;;  %v8657_v33 = vld [vmem:[%s15091_s24 + $0x328] sm:$0xff] }
 0x24b   : > { %v1783_v9 = vmul.f32 %v12314_v28, %v1587_v44  ;;  %v1764_v57 = vmul.f32 %v12314_v28, %v1568_v15  ;;  %3720 = vmatpush.bf16.msrb.mxu0 %v8658_v0  ;;  %v1860_v13 = vmul.f32 %v12191_v8, %v1664_v18  ;;  %v2035_v7 = vadd.f32 %v12200_v27, %v1839_v58  ;;  %v15201_v58 = vld [vmem:[#allocation86_spill] sm:$0xff] }
 0x24c   : > { %v3443_v12 = vpop.f32.mrf.mxu2  ;;  %v1858_v44 = vmul.f32 %v12182_v59, %v1662_v16 }
 0x24d   : > { %v12317_v4 = vadd.f32 %v3443_v12, %v3415_v55  ;;  %v3387_v21 = vpop.f32.mrf.mxu0  ;;  %v3416_v32 = vpop.f32.mrf.mxu1  ;;  %v8674_v55 = vld [vmem:[%s15091_s24 + $0x3b0] sm:$0xff]  ;;  %v2057_v12 = vadd.f32 %v12172_v63, %v1861_v47  ;;  %v2037_v47 = vadd.f32 %v12204_v39, %v1841_v22  ;;  %v2056_v0 = vadd.f32 %v12204_v39, %v1860_v13  ;;  %v8656_v22 = vld [vmem:[%s15091_s24 + $0x320] sm:$0xff] }
 0x24e   : > { %v3388_v26 = vadd.f32 %v12209_v52, %v3387_v21  ;;  %v12338_v21 = vperm.slane %v11785_v50, 1  ;;  %3778 = vmatpush.bf16.msrb.mxu2 %v8674_v55  ;;  %3813 = vmatpush.bf16.msrb.mxu3 %v8676_v25  ;;  %v8673_v50 = vld [vmem:[%s15091_s24 + $0x3a8] sm:$0xff]  ;;  %v2054_v15 = vadd.f32 %v12200_v27, %v1858_v44  ;;  %v8672_v44 = vld [vmem:[%s15091_s24 + $0x3a0] sm:$0xff] }
 0x24f   : > { %v2152_v2 = vpack.c.bf16 %v2057_v12, %v2038_v17  ;;  %3721 = vmatpush.bf16.msrb.mxu0 %v8657_v33 }
 0x250   : > { %v3417_v19 = vadd.f32 %v3416_v32, %v3388_v26  ;;  %v1979_v60 = vadd.f32 %v12338_v21, %v1783_v9  ;;  %v1960_v17 = vadd.f32 %v12338_v21, %v1764_v57  ;;  %v1703_v32 = vmul.f32 %v11578_v48, %v15201_v58  ;;  %v15205_v58 = vld [vmem:[#allocation83_spill] sm:$0xff] }
 0x251   : > { %v2149_v25 = vpack.c.bf16 %v2054_v15, %v2035_v7  ;;  %v15203_v7 = vld [vmem:[#allocation77_spill] sm:$0xff] }
 0x252   : > { %3779 = vmatpush.bf16.msrb.mxu2 %v8673_v50  ;;  %v2112_v12 = vpack.c.bf16 %v1979_v60, %v1960_v17  ;;  %v1899_v13 = vmul.f32 %v12148_v10, %v1703_v32  ;;  %v8655_v60 = vld [vmem:[%s15091_s24 + $0x318] sm:$0xff]  ;;  %v1700_v33 = vmul.f32 %v11578_v48, %v15203_v7  ;;  %v1702_v32 = vmul.f32 %v11578_v48, %v15205_v58  ;;  %v8654_v58 = vld [vmem:[%s15091_s24 + $0x310] sm:$0xff] }
 0x253   : > { %3722 = vmatpush.bf16.msrb.mxu0 %v8656_v22  ;;  %v15204_v50 = vld [vmem:[#allocation33_spill] sm:$0xff] }
 0x254   : > { %v3445_v16 = vpop.f32.mrf.mxu2  ;;  %v1625_v15 = vmul.f32 %v11261_v14, %v15204_v50 }
 0x255   : > { %3708 = vmatmul.bf16.gmra.mxu3 %v2152_v2  ;;  %v12354_v18 = vadd.f32 %v3445_v16, %v3417_v19  ;;  %v3390_v26 = vpop.f32.mrf.mxu0  ;;  %v3419_v9 = vpop.f32.mrf.mxu1  ;;  %v15202_v19 = vld [vmem:[#allocation76_spill] sm:$0xff]  ;;  %v2151_v2 = vpack.c.bf16 %v2056_v0, %v2037_v47 }
 0x256   : > { %v3391_v55 = vadd.f32 %v12209_v52, %v3390_v26  ;;  %v1684_v57 = vmul.f32 %v11478_v53, %v15202_v19  ;;  %3780 = vmatpush.bf16.msrb.mxu2 %v8672_v44  ;;  %v8671_v47 = vld [vmem:[%s15091_s24 + $0x398] sm:$0xff]  ;;  %v1821_v50 = vmul.f32 %v12314_v28, %v1625_v15 }
 0x257   : > { %3723 = vmatpush.bf16.msrb.mxu0 %v8655_v60 }
 0x258   : > { %v3420_v16 = vadd.f32 %v3419_v9, %v3391_v55  ;;  %3621 = vmatmul.bf16.gmra.mxu0 %v2149_v25  ;;  %3640 = vmatmul.bf16.vlgmr.msrb.gmra.mxu1 %v2112_v12  ;;  %v1880_v17 = vmul.f32 %v12148_v10, %v1684_v57  ;;  %v15206_v9 = vld [vmem:[#allocation68_spill] sm:$0xff]  ;;  %v2095_v12 = vadd.f32 %v12172_v63, %v1899_v13 }
 0x259   : > { %3679 = vmatmul.bf16.gmra.mxu2 %v2151_v2  ;;  %v1681_v0 = vmul.f32 %v11478_v53, %v15206_v9  ;;  %v15207_v55 = vld [vmem:[#allocation100_spill] sm:$0xff]  ;;  %v15208_v2 = vld [vmem:[#allocation74_spill] sm:$0xff]  ;;  %v1896_v57 = vmul.f32 %v12182_v59, %v1700_v33 }
 0x25a   : > { %v1606_v25 = vmul.f32 %v11274_v42, %v15207_v55  ;;  %v1683_v7 = vmul.f32 %v11478_v53, %v15208_v2  ;;  %3781 = vmatpush.bf16.msrb.mxu2 %v8671_v47  ;;  %v2076_v13 = vadd.f32 %v12172_v63, %v1880_v17  ;;  %v8653_v63 = vld [vmem:[%s15091_s24 + $0x308] sm:$0xff] }
 0x25b   : > { %v1877_v9 = vmul.f32 %v12182_v59, %v1681_v0  ;;  %3724 = vmatpush.bf16.msrb.mxu0 %v8654_v58  ;;  %v2092_v47 = vadd.f32 %v12200_v27, %v1896_v57  ;;  %v8669_v59 = vld [vmem:[%s15091_s24 + $0x388] sm:$0xff]  ;;  %v8667_v58 = vld [vmem:[%s15091_s24 + $0x378] sm:$0xff] }
 0x25c   : > { %v3448_v26 = vpop.f32.mrf.mxu2  ;;  %v1802_v33 = vmul.f32 %v12314_v28, %v1606_v25  ;;  %v2171_v55 = vpack.c.bf16 %v2095_v12, %v2076_v13  ;;  %v1879_v15 = vmul.f32 %v12191_v8, %v1683_v7  ;;  %v15209_v13 = vld [vmem:[#allocation35_spill] sm:$0xff]  ;;  %3748 = vmatpush.bf16.msra.mxu1 %v8667_v58  ;;  %v15212_v58 = vpack.c.bf16 %v11915_v11, %v11904_v20 }
 0x25d   : > { %v12385_v22 = vadd.f32 %v3448_v26, %v3420_v16  ;;  %v3392_v44 = vpop.f32.mrf.mxu0  ;;  %v3421_v19 = vpop.f32.mrf.mxu1  ;;  %v8670_v16 = vld [vmem:[%s15091_s24 + $0x390] sm:$0xff]  ;;  %v1898_v26 = vmul.f32 %v12191_v8, %v1702_v32  ;;  %v2073_v8 = vadd.f32 %v12200_v27, %v1877_v9  ;;  %v8668_v27 = vld [vmem:[%s15091_s24 + $0x380] sm:$0xff] }
 0x25e   : > { %v3393_v10 = vadd.f32 %v12209_v52, %v3392_v44  ;;  %v2017_v44 = vadd.f32 %v12338_v21, %v1821_v50  ;;  %3782 = vmatpush.bf16.msrb.mxu2 %v8670_v16  ;;  %v1998_v32 = vadd.f32 %v12338_v21, %v1802_v33  ;;  %v8652_v50 = vld [vmem:[%s15091_s24 + $0x300] sm:$0xff]  ;;  %v15210_v9 = vld [vmem:[#allocation24_spill] sm:$0xff] }
 0x25f   : > { %v2094_v2 = vadd.f32 %v12204_v39, %v1898_v26  ;;  %3725 = vmatpush.bf16.msrb.mxu0 %v8653_v63  ;;  %v1644_v26 = vmul.f32 %v11346_v49, %v15209_v13  ;;  %v1663_v33 = vmul.f32 %v11277_v56, %v15210_v9  ;;  %v8666_v63 = vld [vmem:[%s15091_s24 + $0x370] sm:$0xff] }
 0x260   : > { %v3422_v60 = vadd.f32 %v3421_v19, %v3393_v10  ;;  %v2075_v19 = vadd.f32 %v12204_v39, %v1879_v15  ;;  %v2168_v10 = vpack.c.bf16 %v2092_v47, %v2073_v8  ;;  %v2131_v57 = vpack.c.bf16 %v2017_v44, %v1998_v32  ;;  %3749 = vmatpush.bf16.msra.mxu1 %v8666_v63  ;;  %v15214_v13 = vld [vmem:[#allocation80_spill] sm:$0xff]  ;;  %v15215_v9 = vld [vmem:[#allocation71_spill] sm:$0xff] }
 0x261   : > { %v1859_v8 = vmul.f32 %v12314_v28, %v1663_v33  ;;  %v1682_v33 = vmul.f32 %v11478_v53, %v15215_v9  ;;  %v15216_v63 = vpack.c.bf16 %v11873_v37, %v11870_v36  ;;  %v8660_v36 = vld [vmem:[%s15091_s24 + $0x340] sm:$0xff]  ;;  %v8691_v37 = vld [vmem:[%s15091_s24 + $0x438] sm:$0xff] }
 0x262   : > { %3783 = vmatpush.bf16.msrb.mxu2 %v8669_v59  ;;  %v2170_v16 = vpack.c.bf16 %v2094_v2, %v2075_v19  ;;  %v1840_v2 = vmul.f32 %v12314_v28, %v1644_v26  ;;  %v3477_v59 = vpop.f32.mrf.mxu3  ;;  %v1701_v26 = vmul.f32 %v11578_v48, %v15214_v13  ;;  %v8688_v13 = vld [vmem:[%s15091_s24 + $0x420] sm:$0xff] }
 0x263   : > { %3726 = vmatpush.bf16.msrb.mxu0 %v8652_v50  ;;  %v2055_v19 = vadd.f32 %v12338_v21, %v1859_v8 }
 0x264   : > { %v3450_v17 = vpop.f32.mrf.mxu2  ;;  %v2036_v32 = vadd.f32 %v12338_v21, %v1840_v2 }
 0x265   : > { %3713 = vmatmul.bf16.gmra.mxu3 %v2171_v55  ;;  %v12414_v0 = vadd.f32 %v3450_v17, %v3422_v60  ;;  %v3395_v25 = vpop.f32.mrf.mxu0  ;;  %v3424_v12 = vpop.f32.mrf.mxu1 }
 0x266   : > { %v3396_v7 = vadd.f32 %v12209_v52, %v3395_v25  ;;  %3784 = vmatpush.bf16.msrb.mxu2 %v8668_v27  ;;  %v15211_v25 = vpack.c.bf16 %v11812_v31, %v11809_v35  ;;  %v2150_v27 = vpack.c.bf16 %v2055_v19, %v2036_v32  ;;  %v8664_v35 = vld [vmem:[%s15091_s24 + $0x360] sm:$0xff]  ;;  %v3478_v19 = vadd.f32 %v3477_v59, %v12385_v22 }
 0x267   : > { %3835 = vmatpush.bf16.msra.mxu0 %v8691_v37 }
 0x268   : > { %v3425_v39 = vadd.f32 %v3424_v12, %v3396_v7  ;;  %3626 = vmatmul.bf16.gmra.mxu0 %v2168_v10  ;;  %3645 = vmatmul.bf16.gmra.mxu1 %v2131_v57 }
 0x269   : > { %3684 = vmatmul.bf16.gmra.mxu2 %v2170_v16  ;;  %v15213_v16 = vpack.c.bf16 %v11925_v62, %v11922_v29  ;;  %v1897_v29 = vmul.f32 %v12314_v28, %v1701_v26  ;;  %v8662_v62 = vld [vmem:[%s15091_s24 + $0x350] sm:$0xff] }
 0x26a   : > { %8744 = vmatpush.bf16.msra.mxu2 %v8691_v37  ;;  %v12569_v37 = vld [vmem:[%s15092_s30 + $0x10] sm:$0x7] }
 0x26b   : > { %v2093_v2 = vadd.f32 %v12338_v21, %v1897_v29  ;;  %v15224_v29 = vld [vmem:[#allocation95_spill] sm:$0xff] }
 0x26c   : > { %v3453_v60 = vpop.f32.mrf.mxu2 }
 0x26d   : > { %v12431_v55 = vadd.f32 %v3453_v60, %v3425_v39  ;;  %v3397_v15 = vpop.f32.mrf.mxu0  ;;  %v3426_v47 = vpop.f32.mrf.mxu1 }
 0x26e   : > { %v3398_v44 = vadd.f32 %v12209_v52, %v3397_v15  ;;  %v8665_v52 = vld [vmem:[%s15091_s24 + $0x368] sm:$0xff]  ;;  %v3479_v39 = vpop.f32.mrf.mxu3 }
 0x26f   : > { %3750 = vmatpush.bf16.msra.mxu1 %v8665_v52 }
 0x270   : > { %v3427_v17 = vadd.f32 %v3426_v47, %v3398_v44  ;;  %v1878_v44 = vmul.f32 %v12314_v28, %v1682_v33  ;;  %v15222_v33 = vpack.c.bf16 %v12071_v61, %v12068_v43  ;;  %v8685_v61 = vld [vmem:[%s15091_s24 + $0x408] sm:$0xff] }
 0x272   : > { %v2074_v32 = vadd.f32 %v12338_v21, %v1878_v44  ;;  %v15217_v21 = vpack.c.bf16 %v11974_v6, %v11964_v45  ;;  %v8690_v45 = vld [vmem:[%s15091_s24 + $0x430] sm:$0xff] }
 0x273   : > { %3751 = vmatpush.bf16.msra.mxu1 %v8664_v35  ;;  %v3480_v35 = vadd.f32 %v3479_v39, %v12414_v0  ;;  %3836 = vmatpush.bf16.msra.mxu0 %v8690_v45 }
 0x274   : > { %v3455_v12 = vpop.f32.mrf.mxu2  ;;  %8745 = vmatpush.bf16.msra.mxu2 %v8690_v45 }
 0x275   : > { %3814 = vmatmul.bf16.vlgmr.msrb.gmra.mxu3 %v15211_v25  ;;  %v12447_v7 = vadd.f32 %v3455_v12, %v3427_v17  ;;  %v3467_v10 = vpop.f32.mrf.mxu1  ;;  %v3496_v57 = vpop.f32.mrf.mxu0  ;;  %v2169_v12 = vpack.c.bf16 %v2093_v2, %v2074_v32 }
 0x276   : > { %v3468_v50 = vadd.f32 %v3467_v10, %v12250_v41  ;;  %v8663_v41 = vld [vmem:[%s15091_s24 + $0x358] sm:$0xff]  ;;  %v3482_v17 = vpop.f32.mrf.mxu3 }
 0x277   : > { %3752 = vmatpush.bf16.msra.mxu1 %v8663_v41  ;;  %v3483_v39 = vadd.f32 %v3482_v17, %v12431_v55  ;;  %v8687_v55 = vld [vmem:[%s15091_s24 + $0x418] sm:$0xff]  ;;  %v8684_v17 = vld [vmem:[%s15091_s24 + $0x400] sm:$0xff] }
 0x278   : > { %v3497_v31 = vadd.f32 %v3496_v57, %v3468_v50  ;;  %3650 = vmatmul.bf16.gmra.mxu1 %v2150_v27  ;;  %3727 = vmatmul.bf16.vlgmr.msrb.gmra.mxu0 %v15212_v58 }
 0x279   : > { %3785 = vmatmul.bf16.vlgmr.msrb.gmra.mxu2 %v15213_v16 }
 0x27b   : > { %3753 = vmatpush.bf16.msra.mxu1 %v8662_v62 }
 0x27c   : > { %v3554_v60 = vpop.f32.mrf.mxu2 }
 0x27d   : > { %v3469_v15 = vpop.f32.mrf.mxu1  ;;  %v3498_v20 = vpop.f32.mrf.mxu0 }
 0x27e   : > { %v3470_v11 = vadd.f32 %v3469_v15, %v12277_v3  ;;  %v8661_v3 = vld [vmem:[%s15091_s24 + $0x348] sm:$0xff]  ;;  %v3484_v50 = vpop.f32.mrf.mxu3 }
 0x27f   : > { %3754 = vmatpush.bf16.msra.mxu1 %v8661_v3 }
 0x280   : > { %v3499_v47 = vadd.f32 %v3498_v20, %v3470_v11  ;;  %v15223_v11 = vld [vmem:[#allocation36_spill] sm:$0xff] }
 0x281   : > { %v15225_v62 = vpack.c.bf16 %v15223_v11, %v15224_v29 }
 0x283   : > { %3755 = vmatpush.bf16.msra.mxu1 %v8660_v36 }
 0x284   : > { %v3556_v8 = vpop.f32.mrf.mxu2 }
 0x285   : > { %3819 = vmatmul.bf16.gmra.mxu3 %v15216_v63  ;;  %v3472_v25 = vpop.f32.mrf.mxu1  ;;  %v3501_v52 = vpop.f32.mrf.mxu0 }
 0x286   : > { %v3473_v28 = vadd.f32 %v3472_v25, %v12317_v4  ;;  %v15218_v4 = vpack.c.bf16 %v11990_v23, %v11987_v1  ;;  %v8689_v1 = vld [vmem:[%s15091_s24 + $0x428] sm:$0xff]  ;;  %v15219_v23 = vpack.c.bf16 %v11941_v30, %v11931_v46  ;;  %v3583_v26 = vpop.f32.mrf.mxu3  ;;  %v15220_v46 = vpack.c.bf16 %v12039_v40, %v12032_v34 }
 0x287   : > { %3837 = vmatpush.bf16.msra.mxu0 %v8689_v1  ;;  %8746 = vmatpush.bf16.msra.mxu2 %v8689_v1  ;;  %v15221_v30 = vpack.c.bf16 %v12059_v5, %v12043_v51  ;;  %v12532_v51 = vadd.f32 %v3484_v50, %v12447_v7  ;;  %v8686_v5 = vld [vmem:[%s15091_s24 + $0x410] sm:$0xff]  ;;  %v15226_v25 = vpack.c.bf16 %v12086_v24, %v12078_v38 }
 0x288   : > { %v3502_v10 = vadd.f32 %v3501_v52, %v3473_v28  ;;  %3655 = vmatmul.bf16.gmra.mxu1 %v2169_v12  ;;  %3732 = vmatmul.bf16.gmra.mxu0 %v15217_v21  ;;  %v15227_v52 = vld [vmem:[#allocation97_spill] sm:$0xff]  ;;  %v15229_v12 = vld [vmem:[#allocation62_spill] sm:$0xff]  ;;  %v15234_v38 = vld [vmem:[#allocation131_spill] sm:$0xff] }
 0x289   : > { %3790 = vmatmul.bf16.gmra.mxu2 %v15218_v4  ;;  %v15228_v28 = vpack.c.bf16 %v12094_v54, %v15227_v52  ;;  %v15233_v21 = vld [vmem:[#allocation134_spill] sm:$0xff]  ;;  %v1708_v24 = vmul.f32 %v11578_v48, %v15234_v38  ;;  %v12587_v1 = vld [vmem:[%s15094_s1 + $0x10] sm:$0x7] }
 0x28b   : > { %3838 = vmatpush.bf16.msra.mxu0 %v8688_v13  ;;  %8747 = vmatpush.bf16.msra.mxu2 %v8688_v13  ;;  %v8702_v13 = vld [vmem:[%s15091_s24 + $0x490] sm:$0xff] }
 0x28c   : > { %v3559_v22 = vpop.f32.mrf.mxu2 }
 0x28d   : > { %v3474_v59 = vpop.f32.mrf.mxu1  ;;  %v3503_v57 = vpop.f32.mrf.mxu0 }
 0x28e   : > { %v3475_v27 = vadd.f32 %v3474_v59, %v12354_v18  ;;  %v12542_v20 = vpop.f32.mrf.mxu3  ;;  %v15235_v59 = vld [vmem:[#allocation41_spill] sm:$0xff] }
 0x28f   : > { %3839 = vmatpush.bf16.msra.mxu0 %v8687_v55  ;;  %8748 = vmatpush.bf16.msra.mxu2 %v8687_v55 }
 0x290   : > { %v12499_v6 = vadd.f32 %v3503_v57, %v3475_v27  ;;  %v15236_v57 = vld [vmem:[#allocation133_spill] sm:$0xff]  ;;  %v12580_v27 = vperm.slane %v12569_v37, 0 }
 0x291   : > { %v1575_v50 = vmul.f32 %v15236_v57, %v15235_v59 }
 0x293   : > { %3840 = vmatpush.bf16.msra.mxu0 %v8686_v5  ;;  %8749 = vmatpush.bf16.msra.mxu2 %v8686_v5 }
 0x294   : > { %v12507_v58 = vpop.f32.mrf.mxu2 }
 0x295   : > { %3824 = vmatmul.bf16.gmra.mxu3 %v15219_v23  ;;  %v3506_v18 = vpop.f32.mrf.mxu0  ;;  %v3525_v0 = vpop.f32.mrf.mxu1  ;;  %v15237_v23 = vld [vmem:[#allocation130_spill] sm:$0xff] }
 0x296   : > { %v12509_v16 = vadd.f32 %v3506_v18, %v3478_v19  ;;  %v3526_v41 = vadd.f32 %v3525_v0, %v3497_v31  ;;  %v15230_v19 = vld [vmem:[#allocation39_spill] sm:$0xff]  ;;  %v3588_v54 = vpop.f32.mrf.mxu3  ;;  %v1689_v18 = vmul.f32 %v11478_v53, %v15237_v23 }
 0x297   : > { %3841 = vmatpush.bf16.msra.mxu0 %v8685_v61  ;;  %8750 = vmatpush.bf16.msra.mxu2 %v8685_v61  ;;  %v15231_v36 = vpack.c.bf16 %v15229_v12, %v15230_v19  ;;  %v15239_v12 = vld [vmem:[#allocation118_spill] sm:$0xff] }
 0x298   : > { %v3555_v9 = vadd.f32 %v3554_v60, %v3526_v41  ;;  %3737 = vmatmul.bf16.gmra.mxu0 %v15220_v46  ;;  %3756 = vmatmul.bf16.vlgmr.msra.gmra.mxu1 %v15221_v30  ;;  %v1771_v46 = vmul.f32 %v12580_v27, %v1575_v50  ;;  %v12605_v30 = vperm.slane %v12587_v1, 0  ;;  %v1885_v55 = vmul.f32 %v12580_v27, %v1689_v18  ;;  %v15244_v50 = vld [vmem:[#allocation47_spill] sm:$0xff] }
 0x299   : > { %3795 = vmatmul.bf16.gmra.mxu2 %v15222_v33  ;;  %v8701_v33 = vld [vmem:[%s15091_s24 + $0x488] sm:$0xff] }
 0x29a   : > { %v3584_v3 = vadd.f32 %v3583_v26, %v3555_v9  ;;  %v1904_v26 = vmul.f32 %v12580_v27, %v1708_v24  ;;  %v2081_v11 = vadd.f32 %v12605_v30, %v1885_v55  ;;  %v12647_v24 = vperm.slane %v12569_v37, 2 }
 0x29b   : > { %3842 = vmatpush.bf16.msra.mxu0 %v8684_v17  ;;  %8751 = vmatpush.bf16.msra.mxu2 %v8684_v17  ;;  %v8696_v17 = vld [vmem:[%s15091_s24 + $0x460] sm:$0xff] }
 0x29c   : > { %v12527_v31 = vpop.f32.mrf.mxu2 }
 0x29d   : > { %v3508_v60 = vpop.f32.mrf.mxu0  ;;  %v3527_v15 = vpop.f32.mrf.mxu1 }
 0x29e   : > { %v12529_v34 = vadd.f32 %v3508_v60, %v3480_v35  ;;  %v3528_v40 = vadd.f32 %v3527_v15, %v3499_v47  ;;  %v2100_v60 = vadd.f32 %v12605_v30, %v1904_v26  ;;  %v12620_v29 = vpop.f32.mrf.mxu3 }
 0x29f   : > { %3898 = vmatpush.bf16.msrb.mxu2 %v8702_v13 }
 0x2a0   : > { %v12537_v43 = vadd.f32 %v3556_v8, %v3528_v40  ;;  %v8699_v8 = vld [vmem:[%s15091_s24 + $0x478] sm:$0xff]  ;;  %v1967_v40 = vadd.f32 %v12605_v30, %v1771_v46  ;;  %v12664_v46 = vperm.slane %v12587_v1, 2 }
 0x2a1   : > { %3864 = vmatpush.bf16.msrb.mxu1 %v8699_v8  ;;  %v8700_v8 = vld [vmem:[%s15091_s24 + $0x480] sm:$0xff] }
 0x2a3   : > { %3899 = vmatpush.bf16.msrb.mxu2 %v8701_v33 }
 0x2a4   : > { %v12547_v7 = vpop.f32.mrf.mxu2 }
 0x2a5   : > { %3829 = vmatmul.bf16.gmra.mxu3 %v15225_v62  ;;  %v3511_v47 = vpop.f32.mrf.mxu0  ;;  %v3530_v44 = vpop.f32.mrf.mxu1 }
 0x2a6   : > { %v12549_v2 = vadd.f32 %v3511_v47, %v3483_v39  ;;  %v3531_v63 = vadd.f32 %v3530_v44, %v3502_v10  ;;  %v15232_v10 = vld [vmem:[#allocation81_spill] sm:$0xff]  ;;  %v8698_v39 = vld [vmem:[%s15091_s24 + $0x470] sm:$0xff] }
 0x2a7   : > { %v1594_v4 = vmul.f32 %v15233_v21, %v15232_v10  ;;  %3865 = vmatpush.bf16.msrb.mxu1 %v8698_v39  ;;  %3900 = vmatpush.bf16.msrb.mxu2 %v8700_v8  ;;  %v3593_v39 = vpop.f32.mrf.mxu3 }
 0x2a8   : > { %v3560_v32 = vadd.f32 %v3559_v22, %v3531_v63  ;;  %3742 = vmatmul.bf16.gmra.mxu0 %v15226_v25  ;;  %3761 = vmatmul.bf16.gmra.mxu1 %v15228_v28  ;;  %v2176_v25 = vpack.c.bf16 %v2100_v60, %v2081_v11  ;;  %v15238_v28 = vld [vmem:[#allocation111_spill] sm:$0xff] }
 0x2a9   : > { %3800 = vmatmul.bf16.gmra.mxu2 %v15231_v36  ;;  %v1790_v41 = vmul.f32 %v12580_v27, %v1594_v4  ;;  %v15240_v19 = vpack.c.bf16 %v15238_v28, %v15239_v12  ;;  %v15242_v36 = vld [vmem:[#allocation84_spill] sm:$0xff]  ;;  %v15245_v28 = vld [vmem:[#allocation119_spill] sm:$0xff] }
 0x2aa   : > { %v3589_v63 = vadd.f32 %v3588_v54, %v3560_v32  ;;  %v1596_v10 = vmul.f32 %v15233_v21, %v15242_v36  ;;  %v15246_v12 = vld [vmem:[#allocation51_spill] sm:$0xff] }
 0x2ac   : > { %v12575_v22 = vpop.f32.mrf.mxu2 }
 0x2ad   : > { %v12582_v35 = vpop.f32.mrf.mxu0  ;;  %v3532_v45 = vpop.f32.mrf.mxu1 }
 0x2ae   : > { %v3533_v0 = vadd.f32 %v3532_v45, %v12499_v6  ;;  %v8697_v6 = vld [vmem:[%s15091_s24 + $0x468] sm:$0xff]  ;;  %v1577_v45 = vmul.f32 %v15236_v57, %v15244_v50 }
 0x2af   : > { %3866 = vmatpush.bf16.msrb.mxu1 %v8697_v6 }
 0x2b0   : > { %v12601_v9 = vadd.f32 %v12507_v58, %v3533_v0  ;;  %v1986_v58 = vadd.f32 %v12605_v30, %v1790_v41  ;;  %v8694_v0 = vld [vmem:[%s15091_s24 + $0x450] sm:$0xff]  ;;  %v1792_v41 = vmul.f32 %v12647_v24, %v1596_v10  ;;  %v1773_v6 = vmul.f32 %v12647_v24, %v1577_v45 }
 0x2b1   : > { %v12702_v45 = vperm.slane %v12569_v37, 1 }
 0x2b2   : > { %v2119_v44 = vpack.c.bf16 %v1986_v58, %v1967_v40  ;;  %v1988_v55 = vadd.f32 %v12664_v46, %v1792_v41 }
 0x2b3   : > { %3867 = vmatpush.bf16.msrb.mxu1 %v8696_v17  ;;  %v8692_v17 = vld [vmem:[%s15091_s24 + $0x440] sm:$0xff] }
 0x2b4   : > { %v12616_v15 = vpop.f32.mrf.mxu2 }
 0x2b5   : > { %v3535_v5 = vpop.f32.mrf.mxu1  ;;  %v3612_v61 = vpop.f32.mrf.mxu0 }
 0x2b6   : > { %v3536_v62 = vadd.f32 %v3535_v5, %v12509_v16  ;;  %v12623_v47 = vadd.f32 %v3612_v61, %v3584_v3  ;;  %v8695_v16 = vld [vmem:[%s15091_s24 + $0x458] sm:$0xff]  ;;  %v1969_v5 = vadd.f32 %v12664_v46, %v1773_v6  ;;  %v12717_v6 = vperm.slane %v12587_v1, 1 }
 0x2b7   : > { %v15241_v3 = vld [vmem:[#allocation56_spill] sm:$0xff]  ;;  %3868 = vmatpush.bf16.msrb.mxu1 %v8695_v16  ;;  %v12689_v16 = vpop.f32.mrf.mxu3 }
 0x2b8   : > { %v3565_v52 = vadd.f32 %v12527_v31, %v3536_v62  ;;  %3766 = vmatmul.bf16.gmra.mxu1 %v15240_v19  ;;  %3843 = vmatmul.bf16.vlgmr.msra.gmra.mxu0 %v2119_v44  ;;  %v1632_v32 = vmul.f32 %v11261_v14, %v15241_v3  ;;  %v15243_v31 = vld [vmem:[#allocation108_spill] sm:$0xff]  ;;  %v2121_v8 = vpack.c.bf16 %v1988_v55, %v1969_v5 }
 0x2b9   : > { %3858 = vmatmul.bf16.vlgmr.msra.gmra.mxu2 %v2176_v25  ;;  %v1613_v38 = vmul.f32 %v11274_v42, %v15243_v31  ;;  %v15247_v19 = vpack.c.bf16 %v15245_v28, %v15246_v12  ;;  %v3514_v31 = vadd.f32 %v12582_v35, %v12532_v51 }
 0x2ba   : > { %v1828_v18 = vmul.f32 %v12580_v27, %v1632_v32  ;;  %v3594_v44 = vadd.f32 %v3593_v39, %v3565_v52  ;;  %v15249_v52 = vld [vmem:[#allocation120_spill] sm:$0xff]  ;;  %v15250_v32 = vld [vmem:[#allocation45_spill] sm:$0xff] }
 0x2bb   : > { %v1809_v26 = vmul.f32 %v12580_v27, %v1613_v38  ;;  %3869 = vmatpush.bf16.msrb.mxu1 %v8694_v0  ;;  %v1595_v3 = vmul.f32 %v15233_v21, %v15249_v52  ;;  %v1670_v36 = vmul.f32 %v11277_v56, %v15250_v32  ;;  %v15253_v0 = vld [vmem:[#allocation110_spill] sm:$0xff]  ;;  %v15256_v32 = vld [vmem:[#allocation109_spill] sm:$0xff] }
 0x2bc   : > { %v12642_v4 = vpop.f32.mrf.mxu2  ;;  %v2024_v33 = vadd.f32 %v12605_v30, %v1828_v18  ;;  %v1615_v41 = vmul.f32 %v11274_v42, %v15253_v0 }
 0x2bd   : > { %v3537_v54 = vpop.f32.mrf.mxu1  ;;  %v12649_v59 = vpop.f32.mrf.mxu0  ;;  %v1866_v51 = vmul.f32 %v12580_v27, %v1670_v36 }
 0x2be   : > { %v3538_v23 = vadd.f32 %v3537_v54, %v12529_v34  ;;  %v8693_v34 = vld [vmem:[%s15091_s24 + $0x448] sm:$0xff]  ;;  %v15252_v54 = vld [vmem:[#allocation44_spill] sm:$0xff] }
 0x2bf   : > { %3870 = vmatpush.bf16.msrb.mxu1 %v8693_v34  ;;  %v1576_v50 = vmul.f32 %v15236_v57, %v15252_v54 }
 0x2c0   : > { %v12660_v13 = vadd.f32 %v12547_v7, %v3538_v23  ;;  %v2005_v7 = vadd.f32 %v12605_v30, %v1809_v26  ;;  %v1791_v26 = vmul.f32 %v12702_v45, %v1595_v3  ;;  %v15255_v3 = vld [vmem:[#allocation129_spill] sm:$0xff] }
 0x2c1   : > { %v1772_v37 = vmul.f32 %v12702_v45, %v1576_v50 }
 0x2c2   : > { %v2138_v62 = vpack.c.bf16 %v2024_v33, %v2005_v7  ;;  %v1811_v33 = vmul.f32 %v12647_v24, %v1615_v41  ;;  %v1987_v55 = vadd.f32 %v12717_v6, %v1791_v26  ;;  %v2062_v7 = vadd.f32 %v12605_v30, %v1866_v51 }
 0x2c3   : > { %3871 = vmatpush.bf16.msrb.mxu1 %v8692_v17 }
 0x2c4   : > { %v12672_v58 = vpop.f32.mrf.mxu2  ;;  %v2007_v1 = vadd.f32 %v12664_v46, %v1811_v33 }
 0x2c5   : > { %v3540_v60 = vpop.f32.mrf.mxu1  ;;  %v3617_v40 = vpop.f32.mrf.mxu0 }
 0x2c6   : > { %v3541_v61 = vadd.f32 %v3540_v60, %v12549_v2  ;;  %v12677_v11 = vadd.f32 %v3617_v40, %v3589_v63  ;;  %v15248_v2 = vld [vmem:[#allocation127_spill] sm:$0xff]  ;;  %v3598_v60 = vpop.f32.mrf.mxu3 }
 0x2c7   : > { %v1651_v63 = vmul.f32 %v11346_v49, %v15248_v2  ;;  %v3586_v2 = vadd.f32 %v12542_v20, %v12537_v43 }
 0x2c8   : > { %v3570_v25 = vadd.f32 %v12575_v22, %v3541_v61  ;;  %3771 = vmatmul.bf16.gmra.mxu1 %v15247_v19  ;;  %3848 = vmatmul.bf16.gmra.mxu0 %v2138_v62  ;;  %v15251_v22 = vld [vmem:[#allocation61_spill] sm:$0xff] }
 0x2c9   : > { %8337 = vmatmul.msk.bf16.vlgmr.msrb.gmra.mxu2 %vm824_vm0, %v2121_v8  ;;  %v1634_v10 = vmul.f32 %v11261_v14, %v15251_v22  ;;  %v1847_v21 = vmul.f32 %v12580_v27, %v1651_v63  ;;  %v15254_v63 = vld [vmem:[#allocation31_spill] sm:$0xff] }
 0x2ca   : > { %v3599_v12 = vadd.f32 %v3598_v60, %v3570_v25  ;;  %v1633_v52 = vmul.f32 %v11261_v14, %v15254_v63 }
 0x2cb   : > { %v1830_v35 = vmul.f32 %v12647_v24, %v1634_v10  ;;  %v2043_v34 = vadd.f32 %v12605_v30, %v1847_v21  ;;  %v15257_v10 = vld [vmem:[#allocation20_spill] sm:$0xff] }
 0x2cc   : > { %v3675_v38 = vpop.f32.mrf.mxu2  ;;  %v1829_v43 = vmul.f32 %v12702_v45, %v1633_v52 }
 0x2cd   : > { %v3542_v23 = vpop.f32.mrf.mxu1  ;;  %v12704_v18 = vpop.f32.mrf.mxu0  ;;  %v2026_v27 = vadd.f32 %v12664_v46, %v1830_v35  ;;  %v2157_v62 = vpack.c.bf16 %v2062_v7, %v2043_v34 }
 0x2ce   : > { %v3543_v39 = vadd.f32 %v3542_v23, %v3514_v31  ;;  %v1672_v31 = vmul.f32 %v11277_v56, %v15257_v10  ;;  %v12760_v33 = vpop.f32.mrf.mxu3 }
 0x2cf   : > { %v2140_v19 = vpack.c.bf16 %v2026_v27, %v2007_v1  ;;  %v15259_v27 = vld [vmem:[#allocation94_spill] sm:$0xff] }
 0x2d0   : > { %v12713_v57 = vadd.f32 %v12616_v15, %v3543_v39  ;;  %v1968_v15 = vadd.f32 %v12717_v6, %v1772_v37  ;;  %v1868_v50 = vmul.f32 %v12647_v24, %v1672_v31  ;;  %v1710_v60 = vmul.f32 %v11578_v48, %v15259_v27 }
 0x2d2   : > { %v2120_v28 = vpack.c.bf16 %v1987_v55, %v1968_v15  ;;  %v2064_v26 = vadd.f32 %v12664_v46, %v1868_v50  ;;  %v15258_v55 = vld [vmem:[#allocation128_spill] sm:$0xff] }
 0x2d3   : > { %v1652_v7 = vmul.f32 %v11346_v49, %v15258_v55 }
 0x2d4   : > { %v12724_v40 = vpop.f32.mrf.mxu2 }
 0x2d5   : > { %v3622_v5 = vpop.f32.mrf.mxu0  ;;  %v3641_v61 = vpop.f32.mrf.mxu1 }
 0x2d6   : > { %v3623_v17 = vadd.f32 %v3622_v5, %v3594_v44  ;;  %v3642_v8 = vadd.f32 %v3641_v61, %v12623_v47  ;;  %v1653_v44 = vmul.f32 %v11346_v49, %v15255_v3  ;;  %v3615_v47 = vadd.f32 %v12649_v59, %v3586_v2  ;;  %v15260_v5 = vld [vmem:[#allocation29_spill] sm:$0xff]  ;;  %v3699_v2 = vpop.f32.mrf.mxu3 }
 0x2d7   : > { %v1671_v61 = vmul.f32 %v11277_v56, %v15260_v5 }
 0x2d8   : > { %v12730_v30 = vadd.f32 %v12642_v4, %v3642_v8  ;;  %3853 = vmatmul.bf16.gmra.mxu0 %v2157_v62  ;;  %3872 = vmatmul.bf16.vlgmr.msrb.gmra.mxu1 %v2120_v28  ;;  %v1614_v4 = vmul.f32 %v11274_v42, %v15256_v32  ;;  %v1849_v14 = vmul.f32 %v12647_v24, %v1653_v44 }
 0x2d9   : > { %8338 = vmatmul.msk.bf16.gmra.mxu2 %vm824_vm0, %v2140_v19  ;;  %v2025_v42 = vadd.f32 %v12717_v6, %v1829_v43  ;;  %v1848_v8 = vmul.f32 %v12702_v45, %v1652_v7  ;;  %v1906_v28 = vmul.f32 %v12647_v24, %v1710_v60  ;;  %v1867_v49 = vmul.f32 %v12702_v45, %v1671_v61  ;;  %v15263_v43 = vld [vmem:[#allocation91_spill] sm:$0xff] }
 0x2da   : > { %v1810_v59 = vmul.f32 %v12702_v45, %v1614_v4  ;;  %v2045_v23 = vadd.f32 %v12664_v46, %v1849_v14  ;;  %v1690_v14 = vmul.f32 %v11478_v53, %v15263_v43 }
 0x2db   : > { %v2044_v19 = vadd.f32 %v12717_v6, %v1848_v8  ;;  %v2102_v56 = vadd.f32 %v12664_v46, %v1906_v28  ;;  %v2063_v52 = vadd.f32 %v12717_v6, %v1867_v49 }
 0x2dc   : > { %v3680_v25 = vpop.f32.mrf.mxu2  ;;  %v2006_v0 = vadd.f32 %v12717_v6, %v1810_v59  ;;  %v2159_v37 = vpack.c.bf16 %v2064_v26, %v2045_v23 }
 0x2dd   : > { %v12742_v36 = vpop.f32.mrf.mxu0  ;;  %v3643_v22 = vpop.f32.mrf.mxu1  ;;  %v2158_v32 = vpack.c.bf16 %v2063_v52, %v2044_v19 }
 0x2de   : > { %v3644_v54 = vadd.f32 %v3643_v22, %v3615_v47  ;;  %v2139_v35 = vpack.c.bf16 %v2025_v42, %v2006_v0  ;;  %v3701_v59 = vpop.f32.mrf.mxu3 }
 0x2e0   : > { %v12749_v20 = vadd.f32 %v12672_v58, %v3644_v54 }
 0x2e4   : > { %v12755_v21 = vpop.f32.mrf.mxu2 }
 0x2e5   : > { %v3627_v41 = vpop.f32.mrf.mxu0  ;;  %v3646_v39 = vpop.f32.mrf.mxu1 }
 0x2e6   : > { %v3628_v51 = vadd.f32 %v3627_v41, %v3599_v12  ;;  %v3647_v58 = vadd.f32 %v3646_v39, %v12677_v11  ;;  %v3704_v26 = vpop.f32.mrf.mxu3 }
 0x2e8   : > { %v3676_v34 = vadd.f32 %v3675_v38, %v3647_v58  ;;  %3877 = vmatmul.bf16.gmra.mxu1 %v2139_v35  ;;  %v15261_v38 = vld [vmem:[#allocation90_spill] sm:$0xff] }
 0x2e9   : > { %8339 = vmatmul.msk.bf16.gmra.mxu2 %vm824_vm0, %v2159_v37  ;;  %v1691_v1 = vmul.f32 %v11478_v53, %v15261_v38 }
 0x2ea   : > { %v3705_v8 = vadd.f32 %v3704_v26, %v3676_v34 }
 0x2eb   : > { %v1887_v12 = vmul.f32 %v12647_v24, %v1691_v1  ;;  %v15262_v24 = vld [vmem:[#allocation132_spill] sm:$0xff] }
 0x2ec   : > { %v3685_v15 = vpop.f32.mrf.mxu2  ;;  %v1709_v31 = vmul.f32 %v11578_v48, %v15262_v24 }
 0x2ed   : > { %v12769_v62 = vpop.f32.mrf.mxu0  ;;  %v12771_v11 = vpop.f32.mrf.mxu1  ;;  %v2083_v44 = vadd.f32 %v12664_v46, %v1887_v12 }
 0x2ee   : > { %v1905_v46 = vmul.f32 %v12702_v45, %v1709_v31  ;;  %v12800_v55 = vpop.f32.mrf.mxu3 }
 0x2ef   : > { %v2178_v22 = vpack.c.bf16 %v2102_v56, %v2083_v44 }
 0x2f4   : > { %v12781_v63 = vpop.f32.mrf.mxu2 }
 0x2f5   : > { %v3651_v3 = vpop.f32.mrf.mxu1  ;;  %v3728_v4 = vpop.f32.mrf.mxu0 }
 0x2f6   : > { %v3652_v47 = vadd.f32 %v3651_v3, %v3623_v17  ;;  %v1886_v17 = vmul.f32 %v12702_v45, %v1690_v14  ;;  %v3700_v45 = vadd.f32 %v3699_v2, %v12730_v30  ;;  %v3709_v61 = vpop.f32.mrf.mxu3 }
 0x2f8   : > { %v3681_v10 = vadd.f32 %v3680_v25, %v3652_v47  ;;  %3882 = vmatmul.bf16.gmra.mxu1 %v2158_v32  ;;  %v2101_v25 = vadd.f32 %v12717_v6, %v1905_v46  ;;  %v2082_v0 = vadd.f32 %v12717_v6, %v1886_v17  ;;  %v3729_v7 = vadd.f32 %v3728_v4, %v3700_v45 }
 0x2f9   : > { %8340 = vmatmul.msk.bf16.gmra.mxu2 %vm824_vm0, %v2178_v22  ;;  %vm3922_vm0 = vcmask 261120  }
 0x2fa   : > { %v2177_v39 = vpack.c.bf16 %v2101_v25, %v2082_v0  ;;  %v3710_v47 = vadd.f32 %v3709_v61, %v3681_v10 }
 0x2fc   : > { %v3786_v54 = vpop.f32.mrf.mxu2 }
 0x2fd   : > { %v12790_v50 = vpop.f32.mrf.mxu1  ;;  %v3730_v42 = vpop.f32.mrf.mxu0 }
 0x2fe   : > { %v12809_v12 = vpop.f32.mrf.mxu3 }
 0x304   : > { %v12795_v23 = vpop.f32.mrf.mxu2 }
 0x305   : > { %v3656_v41 = vpop.f32.mrf.mxu1  ;;  %v3733_v53 = vpop.f32.mrf.mxu0 }
 0x306   : > { %v3657_v48 = vadd.f32 %v3656_v41, %v3628_v51  ;;  %v3734_v28 = vadd.f32 %v3733_v53, %v3705_v8  ;;  %v3714_v44 = vpop.f32.mrf.mxu3 }
 0x308   : > { %v3686_v58 = vadd.f32 %v3685_v15, %v3657_v48  ;;  %3887 = vmatmul.bf16.gmra.mxu1 %v2177_v39 }
 0x30a   : > { %v3715_v17 = vadd.f32 %v3714_v44, %v3686_v58  ;;  %v3591_v58 = vadd.f32 %v12620_v29, %v12601_v9 }
 0x30c   : > { %v3791_v35 = vpop.f32.mrf.mxu2 }
 0x30d   : > { %v12798_v37 = vpop.f32.mrf.mxu1  ;;  %v12805_v60 = vpop.f32.mrf.mxu0 }
 0x314   : > { %v12803_v27 = vpop.f32.mrf.mxu2 }
 0x315   : > { %v3757_v6 = vpop.f32.mrf.mxu1  ;;  %v3738_v1 = vpop.f32.mrf.mxu0 }
 0x316   : > { %v3758_v5 = vadd.f32 %v3757_v6, %v3729_v7  ;;  %v3739_v4 = vadd.f32 %v3738_v1, %v3710_v47  ;;  %v3702_v7 = vadd.f32 %v3701_v59, %v12749_v20  ;;  %v3620_v1 = vadd.f32 %v12704_v18, %v3591_v58 }
 0x318   : > { %v3787_v51 = vadd.f32 %v3786_v54, %v3758_v5  ;;  %v12817_v54 = vpop.f32.mrf.mxu3  ;;  %v3731_v6 = vadd.f32 %v3730_v42, %v3702_v7 }
 0x31c   : > { %v3796_v38 = vpop.f32.mrf.mxu2 }
 0x31d   : > { %v3759_v15 = vpop.f32.mrf.mxu1  ;;  %v12811_v56 = vpop.f32.mrf.mxu0 }
 0x31e   : > { %v3760_v61 = vadd.f32 %v3759_v15, %v3731_v6 }
 0x320   : > { %v3815_v25 = vpop.f32.mrf.mxu3 }
 0x324   : > { %v12807_v49 = vpop.f32.mrf.mxu2 }
 0x325   : > { %v3762_v19 = vpop.f32.mrf.mxu1  ;;  %v3743_v32 = vpop.f32.mrf.mxu0 }
 0x326   : > { %v3763_v30 = vadd.f32 %v3762_v19, %v3734_v28  ;;  %v3744_v0 = vadd.f32 %v3743_v32, %v3715_v17 }
 0x328   : > { %v3792_v2 = vadd.f32 %v3791_v35, %v3763_v30  ;;  %v3817_v35 = vpop.f32.mrf.mxu3  ;;  %v3649_v30 = vadd.f32 %v12771_v11, %v3620_v1 }
 0x32a   : > { %v3678_v59 = vadd.f32 %v12724_v40, %v3649_v30  ;;  %v3596_v40 = vadd.f32 %v12689_v16, %v12660_v13 }
 0x32c   : > { %v3801_v52 = vpop.f32.mrf.mxu2  ;;  %v3707_v15 = vadd.f32 %v12800_v55, %v3678_v59 }
 0x32d   : > { %v3764_v3 = vpop.f32.mrf.mxu1  ;;  %v12821_v14 = vpop.f32.mrf.mxu0 }
 0x330   : > { %v3820_v47 = vpop.f32.mrf.mxu3 }
 0x331   : > { %v3821_v17 = vadd.f32 %v3820_v47, %v3792_v2 }
 0x334   : > { %v12813_v22 = vpop.f32.mrf.mxu2 }
 0x335   : > { %v3767_v24 = vpop.f32.mrf.mxu1  ;;  %v3844_v39 = vpop.f32.mrf.mxu0 }
 0x336   : > { %v3768_v34 = vadd.f32 %v3767_v24, %v3739_v4 }
 0x338   : > { %v12815_v31 = vadd.f32 %v3796_v38, %v3768_v34  ;;  %v3816_v38 = vadd.f32 %v3815_v25, %v3787_v51  ;;  %v3822_v24 = vpop.f32.mrf.mxu3 }
 0x33a   : > { %v3845_v8 = vadd.f32 %v3844_v39, %v3816_v38 }
 0x33c   : > { %v12819_v43 = vpop.f32.mrf.mxu2 }
 0x33d   : > { %v12823_v46 = vpop.f32.mrf.mxu1  ;;  %v3846_v5 = vpop.f32.mrf.mxu0 }
 0x344   : > { %v12825_v10 = vpop.f32.mrf.mxu2 }
 0x345   : > { %v3772_v41 = vpop.f32.mrf.mxu1  ;;  %v3849_v29 = vpop.f32.mrf.mxu0 }
 0x346   : > { %v3773_v48 = vadd.f32 %v3772_v41, %v3744_v0  ;;  %v3625_v0 = vadd.f32 %v12742_v36, %v3596_v40  ;;  %v3850_v41 = vadd.f32 %v3849_v29, %v3821_v17 }
 0x348   : > { %v12827_v26 = vadd.f32 %v3801_v52, %v3773_v48  ;;  %v3789_v52 = vadd.f32 %v12795_v23, %v3760_v61  ;;  %v3736_v23 = vadd.f32 %v12805_v60, %v3707_v15  ;;  %v3654_v39 = vadd.f32 %v12790_v50, %v3625_v0 }
 0x34a   : > { %v3818_v42 = vadd.f32 %v3817_v35, %v3789_v52  ;;  %v3765_v34 = vadd.f32 %v3764_v3, %v3736_v23  ;;  %v3683_v13 = vadd.f32 %v12755_v21, %v3654_v39  ;;  %v3825_v3 = vpop.f32.mrf.mxu3 }
 0x34b   : > { %v3826_v21 = vadd.f32 %v3825_v3, %v12815_v31 }
 0x34c   : > { %v3902_v53 = vpop.f32.mrf.mxu2  ;;  %v3847_v18 = vadd.f32 %v3846_v5, %v3818_v42  ;;  %v3794_v60 = vadd.f32 %v12803_v27, %v3765_v34  ;;  %v3712_v5 = vadd.f32 %v12809_v12, %v3683_v13  ;;  %v9380_v34 = vmov 32.0  }
 0x34d   : > { %v12829_v45 = vpop.f32.mrf.mxu1  ;;  %v3851_v55 = vpop.f32.mrf.mxu0  ;;  %8892 = vrcp.f32 %v9380_v34 }
 0x34e   : > { %v3823_v16 = vadd.f32 %v3822_v24, %v3794_v60  ;;  %v3741_v27 = vadd.f32 %v12811_v56, %v3712_v5 }
 0x350   : > { %v3852_v36 = vadd.f32 %v3851_v55, %v3823_v16  ;;  %v3770_v38 = vadd.f32 %v12823_v46, %v3741_v27 }
 0x352   : > { %v3799_v12 = vadd.f32 %v12807_v49, %v3770_v38 }
 0x353   : > { %v8893_v17 = vpop.eup %8892 }
 0x354   : > { %v3904_v28 = vpop.f32.mrf.mxu2  ;;  %vm3952_vm11 = vweird.f32 %v8893_v17 }
 0x355   : > { %v3873_v19 = vpop.f32.mrf.mxu1  ;;  %v3854_v50 = vpop.f32.mrf.mxu0 }
 0x356   : > { %v3874_v44 = vadd.f32 %v3873_v19, %v3845_v8  ;;  %v3827_v19 = vpop.f32.mrf.mxu3 }
 0x357   : > { %v3828_v47 = vadd.f32 %v3827_v19, %v3799_v12  ;;  %v9381_v19 = vmov 0.0  }
 0x358   : > { %v12837_v20 = vadd.f32 %v3902_v53, %v3874_v44  ;;  %4183 = vst [vmem:[#allocation2] sm:$0xff] %v9381_v19 }
 0x359   : > { %4184 = vst [vmem:[#allocation2 + $0x8] sm:$0xff] %v9381_v19 }
 0x35a   : > { %v3923_v9 = vsel %vm3922_vm0, %v12837_v20, 0.0  ;;  %4185 = vst [vmem:[#allocation2 + $0x10] sm:$0xff] %v9381_v19 }
 0x35b   : > { %3924 = vadd.xlane.f32.xlu1 %v3923_v9  ;;  %4186 = vst [vmem:[#allocation2 + $0x18] sm:$0xff] %v9381_v19 }
 0x35c   : > { %v3907_v32 = vpop.f32.mrf.mxu2  ;;  %4187 = vst [vmem:[#allocation2 + $0x20] sm:$0xff] %v9381_v19 }
 0x35d   : > { %v3875_v51 = vpop.f32.mrf.mxu1  ;;  %v3856_v56 = vpop.f32.mrf.mxu0  ;;  %4188 = vst [vmem:[#allocation2 + $0x28] sm:$0xff] %v9381_v19 }
 0x35e   : > { %v3876_v11 = vadd.f32 %v3875_v51, %v3847_v18  ;;  %v3857_v31 = vadd.f32 %v3856_v56, %v3828_v47  ;;  %v3830_v29 = vpop.f32.mrf.mxu3  ;;  %4189 = vst [vmem:[#allocation2 + $0x30] sm:$0xff] %v9381_v19 }
 0x35f   : > { %v3831_v51 = vadd.f32 %v3830_v29, %v12827_v26  ;;  %v3601_v26 = vadd.f32 %v12760_v33, %v12713_v57  ;;  %4190 = vst [vmem:[#allocation2 + $0x38] sm:$0xff] %v9381_v19 }
 0x360   : > { %v12844_v4 = vadd.f32 %v3904_v28, %v3876_v11  ;;  %v3855_v28 = vadd.f32 %v3854_v50, %v3826_v21  ;;  %4191 = vst [vmem:[#allocation2 + $0x40] sm:$0x1] %v9381_v19 }
 0x361   : > { %v3860_v15 = vadd.f32 %v12819_v43, %v3831_v51  ;;  %v3948_v43 = vmul.f32 32.0, %v8893_v17 }
 0x362   : > { %v3926_v25 = vsel %vm3922_vm0, %v12844_v4, 0.0 }
 0x363   : > { %3927 = vadd.xlane.f32.xlu2 %v3926_v25  ;;  %v3630_v25 = vadd.f32 %v12769_v62, %v3601_v26  ;;  %v3949_v55 = vsub.f32 1.0, %v3948_v43 }
 0x364   : > { %v3909_v7 = vpop.f32.mrf.mxu2 }
 0x365   : > { %v3878_v48 = vpop.f32.mrf.mxu1  ;;  %v3659_v0 = vadd.f32 %v12798_v37, %v3630_v25  ;;  %v3950_v39 = vmul.f32 %v8893_v17, %v3949_v55 }
 0x366   : > { %v3879_v53 = vadd.f32 %v3878_v48, %v3850_v41  ;;  %v3832_v62 = vpop.f32.mrf.mxu3 }
 0x367   : > { %v3688_v41 = vadd.f32 %v12781_v63, %v3659_v0 }
 0x368   : > { %v12853_v35 = vadd.f32 %v3907_v32, %v3879_v53 }
 0x369   : > { %v3717_v48 = vadd.f32 %v12817_v54, %v3688_v41 }
 0x36a   : > { %v3929_v2 = vsel %vm3922_vm0, %v12853_v35, 0.0 }
 0x36b   : > { %3930 = vadd.xlane.f32.xlu0 %v3929_v2  ;;  %v3746_v60 = vadd.f32 %v12821_v14, %v3717_v48 }
 0x36c   : > { %v3912_v8 = vpop.f32.mrf.mxu2 }
 0x36d   : > { %v3880_v6 = vpop.f32.mrf.mxu1  ;;  %v3775_v53 = vadd.f32 %v12829_v45, %v3746_v60 }
 0x36e   : > { %v3881_v58 = vadd.f32 %v3880_v6, %v3852_v36 }
 0x36f   : > { %v3804_v57 = vadd.f32 %v12813_v22, %v3775_v53 }
 0x370   : > { %v12860_v61 = vadd.f32 %v3909_v7, %v3881_v58  ;;  %v3951_v7 = vadd.f32 %v8893_v17, %v3950_v39 }
 0x371   : > { %v3833_v37 = vadd.f32 %v3832_v62, %v3804_v57 }
 0x372   : > { %v3932_v1 = vsel %vm3922_vm0, %v12860_v61, 0.0  ;;  %v12890_v33 = vsel %vm3952_vm11, %v8893_v17, %v3951_v7  ;;  %v8710_v7 = vld [vmem:[%s14532_s10 + $0x38] sm:$0xff] }
 0x373   : > { %3933 = vadd.xlane.f32.xlu1 %v3932_v1  ;;  %v3862_v2 = vadd.f32 %v12825_v10, %v3833_v37  ;;  %4289 = vmatpush.bf16.msra.mxu3 %v8710_v7 }
 0x374   : > { %v3914_v59 = vpop.f32.mrf.mxu2 }
 0x375   : > { %v3883_v30 = vpop.f32.mrf.mxu1 }
 0x376   : > { %v3884_v52 = vadd.f32 %v3883_v30, %v3855_v28 }
 0x378   : > { %v12867_v44 = vadd.f32 %v3912_v8, %v3884_v52 }
 0x37a   : > { %v3935_v46 = vsel %vm3922_vm0, %v12867_v44, 0.0 }
 0x37b   : > { %3936 = vadd.xlane.f32.xlu2 %v3935_v46 }
 0x37c   : > { %v3917_v23 = vpop.f32.mrf.mxu2 }
 0x37d   : > { %v3885_v42 = vpop.f32.mrf.mxu1 }
 0x37e   : > { %v3886_v9 = vadd.f32 %v3885_v42, %v3857_v31 }
 0x380   : > { %v12871_v18 = vadd.f32 %v3914_v59, %v3886_v9 }
 0x382   : > { %v3938_v49 = vsel %vm3922_vm0, %v12871_v18, 0.0 }
 0x383   : > { %3939 = vadd.xlane.f32.xlu0 %v3938_v49 }
 0x384   : > { %v3919_v6 = vpop.f32.mrf.mxu2 }
 0x385   : > { %v3888_v11 = vpop.f32.mrf.mxu1 }
 0x386   : > { %v3889_v32 = vadd.f32 %v3888_v11, %v3860_v15 }
 0x388   : > { %v12877_v24 = vadd.f32 %v3917_v23, %v3889_v32 }
 0x38a   : > { %v3941_v40 = vsel %vm3922_vm0, %v12877_v24, 0.0 }
 0x38b   : > { %3942 = vadd.xlane.f32.xlu0 %v3941_v40 }
 0x38d   : > { %v3890_v54 = vpop.f32.mrf.mxu1 }
 0x38e   : > { %v3891_v45 = vadd.f32 %v3890_v54, %v3862_v2  ;;  %v12967_v54 = vld [vmem:[%s15264_s6] ss:$0 sm:$0xff]  ;;  %s9335_s6 = scalar_lea.hbm %s14543_s21, 2 }
 0x390   : > { %v3920_v58 = vadd.f32 %v3919_v6, %v3891_v45  ;;  %v12972_v45 = vld [vmem:[%s15265_s7] ss:$0 sm:$0xff]  ;;  %s7685_s7 = scalar_lea.hbm %s14543_s21, %s9524_s3 }
 0x391   : > { %s7689_s1 = sshll.u32 %s7685_s7, 4  ;;  %s7690_s1 = int_to_ptr.hbm [resolvable:$true] %s7689_s1 }
 0x392   : > { %v3944_v50 = vsel %vm3922_vm0, %v3920_v58, 0.0 }
 0x3ce   : > { %v3925_v13 = vpop.xlane.xlu1 %3924 }
 0x3cf   : > { %v3954_v16 = vmul.f32 %v12890_v33, %v3925_v13 }
 0x3d1   : > { %v12894_v63 = vsub.f32 %v12837_v20, %v3954_v16 }
 0x3d3   : > { %v3970_v14 = vmul.f32 %v12894_v63, %v12894_v63 }
 0x3d5   : > { %v3978_v3 = vsel %vm3922_vm0, %v3970_v14, 0.0 }
 0x3d6   : > { %v3928_v22 = vpop.xlane.xlu2 %3927  ;;  %3979 = vadd.xlane.f32.xlu1 %v3978_v3 }
 0x3d7   : > { %v3955_v36 = vmul.f32 %v12890_v33, %v3928_v22 }
 0x3d9   : > { %v12902_v5 = vsub.f32 %v12844_v4, %v3955_v36 }
 0x3db   : > { %v3971_v20 = vmul.f32 %v12902_v5, %v12902_v5 }
 0x3dd   : > { %v3981_v10 = vsel %vm3922_vm0, %v3971_v20, 0.0 }
 0x3de   : > { %v3931_v27 = vpop.xlane.xlu0 %3930  ;;  %3982 = vadd.xlane.f32.xlu2 %v3981_v10  ;;  %3945 = vadd.xlane.f32.xlu1 %v3944_v50  ;;  %v8709_v10 = vld [vmem:[%s14532_s10 + $0x30] sm:$0xff] }
 0x3df   : > { %v3956_v38 = vmul.f32 %v12890_v33, %v3931_v27  ;;  %4290 = vmatpush.bf16.msra.mxu3 %v8709_v10 }
 0x3e1   : > { %v12910_v21 = vsub.f32 %v12853_v35, %v3956_v38 }
 0x3e3   : > { %v3972_v4 = vmul.f32 %v12910_v21, %v12910_v21 }
 0x3e5   : > { %v3984_v1 = vsel %vm3922_vm0, %v3972_v4, 0.0 }
 0x3e6   : > { %3985 = vadd.xlane.f32.xlu2 %v3984_v1  ;;  %v3934_v8 = vpop.xlane.xlu1 %3933 }
 0x3e7   : > { %v3957_v28 = vmul.f32 %v12890_v33, %v3934_v8  ;;  %v8708_v8 = vld [vmem:[%s14532_s10 + $0x28] sm:$0xff] }
 0x3e8   : > { %4291 = vmatpush.bf16.msra.mxu3 %v8708_v8 }
 0x3e9   : > { %v12918_v30 = vsub.f32 %v12860_v61, %v3957_v28  ;;  %v4165_v28 = vld [vmem:[%s15267_s9] sm:$0xff] }
 0x3eb   : > { %v3973_v35 = vmul.f32 %v12918_v30, %v12918_v30 }
 0x3ed   : > { %v3987_v12 = vsel %vm3922_vm0, %v3973_v35, 0.0 }
 0x3ee   : > { %v3937_v52 = vpop.xlane.xlu2 %3936  ;;  %3988 = vadd.xlane.f32.xlu0 %v3987_v12 }
 0x3ef   : > { %v3958_v61 = vmul.f32 %v12890_v33, %v3937_v52 }
 0x3f1   : > { %v12933_v56 = vsub.f32 %v12867_v44, %v3958_v61 }
 0x3f3   : > { %v3974_v47 = vmul.f32 %v12933_v56, %v12933_v56 }
 0x3f5   : > { %v3990_v46 = vsel %vm3922_vm0, %v3974_v47, 0.0 }
 0x3f6   : > { %v3940_v31 = vpop.xlane.xlu0 %3939  ;;  %3991 = vadd.xlane.f32.xlu1 %v3990_v46 }
 0x3f7   : > { %v3959_v59 = vmul.f32 %v12890_v33, %v3940_v31 }
 0x3f9   : > { %v12940_v42 = vsub.f32 %v12871_v18, %v3959_v59 }
 0x3fb   : > { %v3975_v9 = vmul.f32 %v12940_v42, %v12940_v42 }
 0x3fd   : > { %v3993_v29 = vsel %vm3922_vm0, %v3975_v9, 0.0 }
 0x3fe   : > { %3994 = vadd.xlane.f32.xlu2 %v3993_v29  ;;  %v3943_v44 = vpop.xlane.xlu0 %3942 }
 0x3ff   : > { %v3960_v51 = vmul.f32 %v12890_v33, %v3943_v44 }
 0x401   : > { %v12947_v49 = vsub.f32 %v12877_v24, %v3960_v51  ;;  %v8707_v51 = vld [vmem:[%s14532_s10 + $0x20] sm:$0xff] }
 0x402   : > { %4292 = vmatpush.bf16.msra.mxu3 %v8707_v51 }
 0x403   : > { %v3976_v15 = vmul.f32 %v12947_v49, %v12947_v49 }
 0x405   : > { %v3996_v11 = vsel %vm3922_vm0, %v3976_v15, 0.0 }
 0x406   : > { %3997 = vadd.xlane.f32.xlu0 %v3996_v11 }
 0x449   : > { %v3980_v18 = vpop.xlane.xlu1 %3979 }
 0x44a   : > { %v4002_v32 = vmul.f32 %v3980_v18, %v12890_v33 }
 0x44c   : > { %v4010_v23 = vadd.f32 1e-05, %v4002_v32 }
 0x44e   : > { %8894 = vrsqrt.f32 %v4010_v23  ;;  %vm4024_vm13 = vweird.f32 %v4010_v23 }
 0x451   : > { %v3983_v40 = vpop.xlane.xlu2 %3982  ;;  %v3946_v26 = vpop.xlane.xlu1 %3945 }
 0x452   : > { %v4003_v34 = vmul.f32 %v3983_v40, %v12890_v33  ;;  %v3961_v24 = vmul.f32 %v12890_v33, %v3946_v26  ;;  %v4166_v40 = vld [vmem:[%s15267_s9 + $0x8] sm:$0xff] }
 0x454   : > { %v8895_v17 = vpop.eup %8894  ;;  %v4011_v25 = vadd.f32 1e-05, %v4003_v34  ;;  %v12955_v41 = vsub.f32 %v3920_v58, %v3961_v24 }
 0x455   : > { %v4019_v0 = vmul.f32 %v8895_v17, %v4010_v23  ;;  %vm4025_vm12 = vweird.f32 %v8895_v17  ;;  %v8706_v23 = vld [vmem:[%s14532_s10 + $0x18] sm:$0xff] }
 0x456   : > { %8896 = vrsqrt.f32 %v4011_v25  ;;  %v3977_v53 = vmul.f32 %v12955_v41, %v12955_v41  ;;  %vm4026_vm14 = vmor %vm4024_vm13, %vm4025_vm12  ;;  %vm4034_vm2 = vweird.f32 %v4011_v25  ;;  %4293 = vmatpush.bf16.msra.mxu3 %v8706_v23 }
 0x457   : > { %v4020_v43 = vmul.f32 %v8895_v17, %v4019_v0 }
 0x458   : > { %v3999_v16 = vsel %vm3922_vm0, %v3977_v53, 0.0  ;;  %v8705_v53 = vld [vmem:[%s14532_s10 + $0x10] sm:$0xff] }
 0x459   : > { %v4021_v55 = vmul.f32 0.5, %v4020_v43  ;;  %v3986_v48 = vpop.xlane.xlu2 %3985  ;;  %4000 = vadd.xlane.f32.xlu1 %v3999_v16  ;;  %v4167_v16 = vld [vmem:[%s15267_s9 + $0x10] sm:$0xff] }
 0x45a   : > { %v4004_v39 = vmul.f32 %v3986_v48, %v12890_v33  ;;  %4294 = vmatpush.bf16.msra.mxu3 %v8705_v53 }
 0x45b   : > { %v4022_v60 = vsub.f32 1.5, %v4021_v55 }
 0x45c   : > { %v8897_v57 = vpop.eup %8896  ;;  %v4012_v62 = vadd.f32 1e-05, %v4004_v39 }
 0x45d   : > { %v4023_v13 = vmul.f32 %v8895_v17, %v4022_v60  ;;  %v4029_v37 = vmul.f32 %v8897_v57, %v4011_v25  ;;  %vm4035_vm15 = vweird.f32 %v8897_v57 }
 0x45e   : > { %8898 = vrsqrt.f32 %v4012_v62  ;;  %vm4036_vm3 = vmor %vm4034_vm2, %vm4035_vm15  ;;  %vm4044_vm5 = vweird.f32 %v4012_v62 }
 0x45f   : > { %v4027_v2 = vsel %vm4026_vm14, %v8895_v17, %v4023_v13  ;;  %v4030_v14 = vmul.f32 %v8897_v57, %v4029_v37  ;;  %v8704_v37 = vld [vmem:[%s14532_s10 + $0x8] sm:$0xff] }
 0x460   : > { %v4098_v3 = vmul.f32 %v4027_v2, %v12894_v63  ;;  %v4130_v63 = vld [vmem:[%s15266_s8] sm:$0x1]  ;;  %4295 = vmatpush.bf16.msra.mxu3 %v8704_v37 }
 0x461   : > { %v4031_v22 = vmul.f32 0.5, %v4030_v14  ;;  %v3989_v36 = vpop.xlane.xlu0 %3988 }
 0x462   : > { %v4110_v6 = vmul.f32 %v12967_v54, %v4098_v3  ;;  %v4005_v58 = vmul.f32 %v3989_v36, %v12890_v33 }
 0x463   : > { %v4032_v20 = vsub.f32 1.5, %v4031_v22 }
 0x464   : > { %v8899_v50 = vpop.eup %8898  ;;  %v4122_v27 = vadd.f32 %v12972_v45, %v4110_v6  ;;  %v4013_v38 = vadd.f32 1e-05, %v4005_v58 }
 0x465   : > { %v4033_v4 = vmul.f32 %v8897_v57, %v4032_v20  ;;  %v4039_v1 = vmul.f32 %v8899_v50, %v4012_v62  ;;  %vm4045_vm4 = vweird.f32 %v8899_v50 }
 0x466   : > { %v4140_v35 = vrot.slane %v4122_v27, 7  ;;  %8900 = vrsqrt.f32 %v4013_v38  ;;  %vm4046_vm6 = vmor %vm4044_vm5, %vm4045_vm4  ;;  %vm4054_vm8 = vweird.f32 %v4013_v38 }
 0x467   : > { %v4037_v12 = vsel %vm4036_vm3, %v8897_v57, %v4033_v4  ;;  %v4040_v52 = vmul.f32 %v8899_v50, %v4039_v1 }
 0x468   : > { %v4164_v61 = vsel %vm4139_vm1, %v4130_v63, %v4140_v35  ;;  %v4099_v47 = vmul.f32 %v4037_v12, %v12902_v5 }
 0x469   : > { %v4174_v46 = vadd.f32 %v4165_v28, %v4164_v61  ;;  %v4041_v31 = vmul.f32 0.5, %v4040_v52  ;;  %v3992_v59 = vpop.xlane.xlu1 %3991  ;;  %v4168_v52 = vld [vmem:[%s15267_s9 + $0x18] sm:$0xff] }
 0x46a   : > { %v4111_v9 = vmul.f32 %v12967_v54, %v4099_v47  ;;  %v4006_v29 = vmul.f32 %v3992_v59, %v12890_v33 }
 0x46b   : > { %4192 = vst.msk [vmem:[#allocation2] sm:$0xff] %vm3922_vm0, %v4174_v46  ;;  %v4042_v44 = vsub.f32 1.5, %v4041_v31 }
 0x46c   : > { %v8901_v15 = vpop.eup %8900  ;;  %v4123_v11 = vadd.f32 %v12972_v45, %v4111_v9  ;;  %v12999_v5 = vadd.f32 1e-05, %v4006_v29 }
 0x46d   : > { %v4043_v18 = vmul.f32 %v8899_v50, %v4042_v44  ;;  %v4049_v32 = vmul.f32 %v8901_v15, %v4013_v38  ;;  %vm4055_vm7 = vweird.f32 %v8901_v15  ;;  %v8703_v38 = vld [vmem:[%s14532_s10] sm:$0xff] }
 0x46e   : > { %v4141_v34 = vrot.slane %v4123_v11, 7  ;;  %8902 = vrsqrt.f32 %v12999_v5  ;;  %vm4056_vm9 = vmor %vm4054_vm8, %vm4055_vm7  ;;  %vm4064_vm11 = vweird.f32 %v12999_v5  ;;  %4296 = vmatpush.bf16.msra.mxu3 %v8703_v38  ;;  %vm4200_vm8 = vcmask 253952  }
 0x46f   : > { %v4047_v26 = vsel %vm4046_vm6, %v8899_v50, %v4043_v18  ;;  %v4050_v17 = vmul.f32 %v8901_v15, %v4049_v32 }
 0x470   : > { %v4142_v25 = vsel %vm4139_vm1, %v4140_v35, %v4141_v34  ;;  %v4100_v24 = vmul.f32 %v4047_v26, %v12910_v21 }
 0x471   : > { %v4175_v0 = vadd.f32 %v4166_v40, %v4142_v25  ;;  %v4051_v43 = vmul.f32 0.5, %v4050_v17  ;;  %v3995_v55 = vpop.xlane.xlu2 %3994 }
 0x472   : > { %v4112_v48 = vmul.f32 %v12967_v54, %v4100_v24  ;;  %v4007_v39 = vmul.f32 %v3995_v55, %v12890_v33  ;;  %v4211_v63 = vld [vmem:[#allocation2] sm:$0xff] }
 0x473   : > { %4193 = vst.msk [vmem:[#allocation2 + $0x8] sm:$0xff] %vm3922_vm0, %v4175_v0  ;;  %v4052_v60 = vsub.f32 1.5, %v4051_v43 }
 0x474   : > { %v8903_v7 = vpop.eup %8902  ;;  %v4124_v57 = vadd.f32 %v12972_v45, %v4112_v48  ;;  %v4015_v21 = vadd.f32 1e-05, %v4007_v39  ;;  %4452 = vst [vmem:[#allocation2] sm:$0xff] %v9381_v19 }
 0x475   : > { %v4053_v62 = vmul.f32 %v8901_v15, %v4052_v60  ;;  %v4059_v13 = vmul.f32 %v8903_v7, %v12999_v5  ;;  %vm4065_vm10 = vweird.f32 %v8903_v7 }
 0x476   : > { %v4143_v2 = vrot.slane %v4124_v57, 7  ;;  %8904 = vrsqrt.f32 %v4015_v21  ;;  %vm4066_vm12 = vmor %vm4064_vm11, %vm4065_vm10  ;;  %vm4074_vm14 = vweird.f32 %v4015_v21  ;;  %vm4552_vm10 = vcmask 531456  }
 0x477   : > { %v4057_v14 = vsel %vm4056_vm9, %v8901_v15, %v4053_v62  ;;  %v4060_v3 = vmul.f32 %v8903_v7, %v4059_v13  ;;  %vm4386_vm9 = vcmask 523264  }
 0x478   : > { %v4144_v22 = vsel %vm4139_vm1, %v4141_v34, %v4143_v2  ;;  %v4101_v36 = vmul.f32 %v4057_v14, %v12918_v30 }
 0x479   : > { %v4176_v6 = vadd.f32 %v4167_v16, %v4144_v22  ;;  %v4061_v58 = vmul.f32 0.5, %v4060_v3  ;;  %v3998_v20 = vpop.xlane.xlu0 %3997 }
 0x47a   : > { %v4113_v10 = vmul.f32 %v12967_v54, %v4101_v36  ;;  %v4008_v50 = vmul.f32 %v3998_v20, %v12890_v33  ;;  %v4212_v4 = vld [vmem:[#allocation2 + $0x8] sm:$0xff] }
 0x47b   : > { %4194 = vst.msk [vmem:[#allocation2 + $0x10] sm:$0xff] %vm3922_vm0, %v4176_v6  ;;  %v4062_v27 = vsub.f32 1.5, %v4061_v58  ;;  %v4220_v28 = vpack.c.bf16 %v4212_v4, %v4211_v63 }
 0x47c   : > { %v8905_v1 = vpop.eup %8904  ;;  %v4125_v30 = vadd.f32 %v12972_v45, %v4113_v10  ;;  %v4016_v8 = vadd.f32 1e-05, %v4008_v50  ;;  %4453 = vst [vmem:[#allocation2 + $0x8] sm:$0xff] %v9381_v19 }
 0x47d   : > { %v4063_v35 = vmul.f32 %v8903_v7, %v4062_v27  ;;  %v4069_v12 = vmul.f32 %v8905_v1, %v4015_v21  ;;  %4297 = vmatmul.bf16.vlgmr.msra.gmra.mxu3 %v4220_v28  ;;  %vm4075_vm13 = vweird.f32 %v8905_v1  ;;  %v8713_v28 = vld [vmem:[%s14533_s11 + $0x10] sm:$0xff] }
 0x47e   : > { %v4145_v61 = vrot.slane %v4125_v30, 7  ;;  %8906 = vrsqrt.f32 %v4016_v8  ;;  %vm4076_vm15 = vmor %vm4074_vm14, %vm4075_vm13  ;;  %vm4084_vm3 = vweird.f32 %v4016_v8  ;;  %v8714_v30 = vld [vmem:[%s14533_s11 + $0x18] sm:$0xff] }
 0x47f   : > { %v4067_v47 = vsel %vm4066_vm12, %v8903_v7, %v4063_v35  ;;  %v4070_v46 = vmul.f32 %v8905_v1, %v4069_v12  ;;  %4406 = vmatpush.bf16.msrb.mxu0 %v8714_v30 }
 0x480   : > { %v4146_v31 = vsel %vm4139_vm1, %v4143_v2, %v4145_v61  ;;  %v4102_v59 = vmul.f32 %v4067_v47, %v12933_v56  ;;  %v4169_v56 = vld [vmem:[%s15267_s9 + $0x20] sm:$0xff]  ;;  %v4171_v2 = vld [vmem:[%s15267_s9 + $0x30] sm:$0xff]  ;;  %v4172_v47 = vld [vmem:[%s15267_s9 + $0x38] sm:$0xff] }
 0x481   : > { %v4177_v9 = vadd.f32 %v4168_v52, %v4146_v31  ;;  %v4071_v29 = vmul.f32 0.5, %v4070_v46  ;;  %v4173_v52 = vld [vmem:[%s15267_s9 + $0x40] sm:$0x1] }
 0x482   : > { %v4114_v44 = vmul.f32 %v12967_v54, %v4102_v59  ;;  %v4213_v15 = vld [vmem:[#allocation2 + $0x10] sm:$0xff] }
 0x483   : > { %4195 = vst.msk [vmem:[#allocation2 + $0x18] sm:$0xff] %vm3922_vm0, %v4177_v9  ;;  %v4072_v51 = vsub.f32 1.5, %v4071_v29  ;;  %4407 = vmatpush.bf16.msrb.mxu0 %v8713_v28 }
 0x484   : > { %v8907_v11 = vpop.eup %8906  ;;  %v4126_v5 = vadd.f32 %v12972_v45, %v4114_v44  ;;  %4454 = vst [vmem:[#allocation2 + $0x10] sm:$0xff] %v9381_v19 }
 0x485   : > { %v4073_v18 = vmul.f32 %v8905_v1, %v4072_v51  ;;  %v4079_v32 = vmul.f32 %v8907_v11, %v4016_v8  ;;  %vm4085_vm2 = vweird.f32 %v8907_v11 }
 0x486   : > { %v4147_v23 = vrot.slane %v4126_v5, 7  ;;  %vm4086_vm4 = vmor %vm4084_vm3, %vm4085_vm2 }
 0x487   : > { %v4077_v40 = vsel %vm4076_vm15, %v8905_v1, %v4073_v18  ;;  %v4080_v34 = vmul.f32 %v8907_v11, %v4079_v32 }
 0x488   : > { %v4148_v26 = vsel %vm4139_vm1, %v4145_v61, %v4147_v23  ;;  %v4103_v17 = vmul.f32 %v4077_v40, %v12940_v42  ;;  %v4170_v42 = vld [vmem:[%s15267_s9 + $0x28] sm:$0xff] }
 0x489   : > { %v4178_v25 = vadd.f32 %v4169_v56, %v4148_v26  ;;  %v4081_v24 = vmul.f32 0.5, %v4080_v34 }
 0x48a   : > { %v4115_v0 = vmul.f32 %v12967_v54, %v4103_v17  ;;  %v4214_v43 = vld [vmem:[#allocation2 + $0x18] sm:$0xff] }
 0x48b   : > { %4196 = vst.msk [vmem:[#allocation2 + $0x20] sm:$0xff] %vm3922_vm0, %v4178_v25  ;;  %v4082_v55 = vsub.f32 1.5, %v4081_v24  ;;  %v4221_v39 = vpack.c.bf16 %v4214_v43, %v4213_v15 }
 0x48c   : > { %v4127_v48 = vadd.f32 %v12972_v45, %v4115_v0  ;;  %4455 = vst [vmem:[#allocation2 + $0x18] sm:$0xff] %v9381_v19 }
 0x48d   : > { %v4083_v60 = vmul.f32 %v8907_v11, %v4082_v55  ;;  %4302 = vmatmul.bf16.gmra.mxu3 %v4221_v39 }
 0x48e   : > { %v4149_v53 = vrot.slane %v4127_v48, 7 }
 0x48f   : > { %v4087_v7 = vsel %vm4086_vm4, %v8907_v11, %v4083_v60 }
 0x490   : > { %v4150_v57 = vsel %vm4139_vm1, %v4147_v23, %v4149_v53  ;;  %v4104_v21 = vmul.f32 %v4087_v7, %v12947_v49 }
 0x491   : > { %v4179_v62 = vadd.f32 %v4170_v42, %v4150_v57  ;;  %v9385_v42 = vmov 2  }
 0x492   : > { %v4116_v13 = vmul.f32 %v12967_v54, %v4104_v21  ;;  %v4215_v37 = vld [vmem:[#allocation2 + $0x20] sm:$0xff]  ;;  %8807 = vset.pattern.permute.xlu1 %v9385_v42 }
 0x493   : > { %4197 = vst.msk [vmem:[#allocation2 + $0x28] sm:$0xff] %vm3922_vm0, %v4179_v62 }
 0x494   : > { %v4128_v16 = vadd.f32 %v12972_v45, %v4116_v13  ;;  %4456 = vst [vmem:[#allocation2 + $0x20] sm:$0xff] %v9381_v19 }
 0x496   : > { %v4151_v14 = vrot.slane %v4128_v16, 7 }
 0x498   : > { %v4152_v3 = vsel %vm4139_vm1, %v4149_v53, %v4151_v14  ;;  %v9386_v53 = vmov 1  }
 0x499   : > { %v4180_v22 = vadd.f32 %v4171_v2, %v4152_v3  ;;  %8806 = vset.pattern.permute.xlu2 %v9386_v53  ;;  %8810 = vset.pattern.permute.xlu0 %v9386_v53 }
 0x49a   : > { %v4216_v49 = vld [vmem:[#allocation2 + $0x28] sm:$0xff] }
 0x49b   : > { %4198 = vst.msk [vmem:[#allocation2 + $0x30] sm:$0xff] %vm3922_vm0, %v4180_v22  ;;  %v4222_v36 = vpack.c.bf16 %v4216_v49, %v4215_v37  ;;  %v9387_v49 = vmov 0  }
 0x49c   : > { %4457 = vst [vmem:[#allocation2 + $0x28] sm:$0xff] %v9381_v19 }
 0x49d   : > { %4307 = vmatmul.bf16.gmra.mxu3 %v4222_v36  ;;  %v13129_v36 = vsel %vm4139_vm1, 65535, %v9387_v49 }
 0x4a2   : > { %v4217_v10 = vld [vmem:[#allocation2 + $0x30] sm:$0xff] }
 0x4a3   : > { %4458 = vst [vmem:[#allocation2 + $0x30] sm:$0xff] %v9381_v19 }
 0x4cc   : > { %v4001_v6 = vpop.xlane.xlu1 %4000 }
 0x4cd   : > { %v4009_v58 = vmul.f32 %v4001_v6, %v12890_v33 }
 0x4cf   : > { %v4017_v20 = vadd.f32 1e-05, %v4009_v58 }
 0x4d1   : > { %8908 = vrsqrt.f32 %v4017_v20  ;;  %vm4094_vm6 = vweird.f32 %v4017_v20 }
 0x4d7   : > { %v8909_v50 = vpop.eup %8908 }
 0x4d8   : > { %v4089_v27 = vmul.f32 %v8909_v50, %v4017_v20  ;;  %vm4095_vm5 = vweird.f32 %v8909_v50 }
 0x4d9   : > { %vm4096_vm7 = vmor %vm4094_vm6, %vm4095_vm5 }
 0x4da   : > { %v4090_v38 = vmul.f32 %v8909_v50, %v4089_v27  ;;  %v9388_v27 = vmov 3  }
 0x4dc   : > { %v4091_v63 = vmul.f32 0.5, %v4090_v38 }
 0x4de   : > { %v4092_v4 = vsub.f32 1.5, %v4091_v63 }
 0x4e0   : > { %v4093_v1 = vmul.f32 %v8909_v50, %v4092_v4 }
 0x4e2   : > { %v4097_v8 = vsel %vm4096_vm7, %v8909_v50, %v4093_v1 }
 0x4e3   : > { %v4105_v33 = vmul.f32 %v4097_v8, %v12955_v41 }
 0x4e5   : > { %v4117_v35 = vmul.f32 %v12967_v54, %v4105_v33  ;;  %v8712_v54 = vld [vmem:[%s14533_s11 + $0x8] sm:$0xff]  ;;  %v4435_v33 = vld [vmem:[%s14534_s12] sm:$0x3] }
 0x4e6   : > { %4408 = vmatpush.bf16.msrb.mxu0 %v8712_v54 }
 0x4e7   : > { %v4129_v12 = vadd.f32 %v12972_v45, %v4117_v35  ;;  %v8711_v45 = vld [vmem:[%s14533_s11] sm:$0xff] }
 0x4e9   : > { %v4153_v61 = vrot.slane %v4129_v12, 7 }
 0x4ea   : > { %4409 = vmatpush.bf16.msrb.mxu0 %v8711_v45 }
 0x4eb   : > { %v4182_v41 = vadd.f32 %v4173_v52, %v4153_v61  ;;  %v4154_v46 = vsel %vm4139_vm1, %v4151_v14, %v4153_v61 }
 0x4ec   : > { %v4181_v31 = vadd.f32 %v4172_v47, %v4154_v46 }
 0x4ed   : > { %4201 = vst.msk [vmem:[#allocation2 + $0x40] sm:$0x1] %vm4200_vm8, %v4182_v41 }
 0x4ee   : > { %4199 = vst.msk [vmem:[#allocation2 + $0x38] sm:$0xff] %vm3922_vm0, %v4181_v31 }
 0x4f4   : > { %v4219_v59 = vld [vmem:[#allocation2 + $0x40] sm:$0x1] }
 0x4f5   : > { %4460 = vst [vmem:[#allocation2 + $0x40] sm:$0x1] %v9381_v19  ;;  %v4218_v9 = vld [vmem:[#allocation2 + $0x38] sm:$0xff]  ;;  %v4224_v11 = vpack.c.bf16 %v4219_v59, %v4219_v59 }
 0x4f6   : > { %v4223_v29 = vpack.c.bf16 %v4218_v9, %v4217_v10  ;;  %4459 = vst [vmem:[#allocation2 + $0x38] sm:$0xff] %v9381_v19 }
 0x4f8   : > { %4312 = vmatmul.bf16.gmra.mxu3 %v4223_v29 }
 0x500   : > { %v4298_v44 = vpop.f32.mrf.mxu3 }
 0x501   : > { %v4322_v51 = vpack.c.bf16 %v4298_v44, %v4298_v44 }
 0x503   : > { %v4348_v18 = vunpack.c.l.b16 %v4322_v51 }
 0x508   : > { %v4300_v15 = vpop.f32.mrf.mxu3  ;;  %4317 = vmatmul.bf16.gmra.mxu3 %v4224_v11 }
 0x509   : > { %v4323_v5 = vpack.c.bf16 %v4300_v15, %v4300_v15 }
 0x50b   : > { %v4349_v32 = vunpack.c.l.b16 %v4323_v5 }
 0x50d   : > { %v13097_v56 = vpack.c.b16 %v4349_v32, %v4348_v18 }
 0x50f   : > { %4902 = vrot.lane.b32.xlu2 %v13097_v56, %s14776_s0  ;;  %8389 = vmatmul.msk.bf16.vlgmr.msrb.gmra.mxu0 %vm4386_vm9, %v13097_v56  ;;  %v4388_v30 = vsel %vm4386_vm9, %v13097_v56, 0 }
 0x510   : > { %5200 = vrot.lane.b32.xlu0 %v13097_v56, %s14774_s2  ;;  %v4303_v19 = vpop.f32.mrf.mxu3 }
 0x511   : > { %v4324_v23 = vpack.c.bf16 %v4303_v19, %v4303_v19 }
 0x513   : > { %v4350_v26 = vunpack.c.l.b16 %v4324_v23 }
 0x518   : > { %5498 = vrot.lane.b32.xlu0 %v13097_v56, %s14772_s4  ;;  %v4305_v40 = vpop.f32.mrf.mxu3 }
 0x519   : > { %v4325_v34 = vpack.c.bf16 %v4305_v40, %v4305_v40 }
 0x51b   : > { %v4351_v17 = vunpack.c.l.b16 %v4325_v34 }
 0x51d   : > { %v13107_v25 = vpack.c.b16 %v4351_v17, %v4350_v26 }
 0x51f   : > { %5500 = vrot.lane.b32.xlu2 %v13107_v25, %s14772_s4  ;;  %8390 = vmatmul.msk.bf16.gmra.mxu0 %vm4386_vm9, %v13107_v25  ;;  %v4391_v1 = vsel %vm4386_vm9, %v13107_v25, 0 }
 0x520   : > { %4904 = vrot.lane.b32.xlu0 %v13107_v25, %s14776_s0  ;;  %v4308_v24 = vpop.f32.mrf.mxu3 }
 0x521   : > { %v4326_v0 = vpack.c.bf16 %v4308_v24, %v4308_v24 }
 0x523   : > { %v4352_v48 = vunpack.c.l.b16 %v4326_v0 }
 0x528   : > { %5202 = vrot.lane.b32.xlu0 %v13107_v25, %s14774_s2  ;;  %v4310_v43 = vpop.f32.mrf.mxu3 }
 0x529   : > { %v4327_v55 = vpack.c.bf16 %v4310_v43, %v4310_v43 }
 0x52b   : > { %v4353_v39 = vunpack.c.l.b16 %v4327_v55 }
 0x52d   : > { %v4359_v60 = vpack.c.b16 %v4353_v39, %v4352_v48 }
 0x52f   : > { %5204 = vrot.lane.b32.xlu1 %v4359_v60, %s14774_s2  ;;  %8391 = vmatmul.msk.bf16.gmra.mxu0 %vm4386_vm9, %v4359_v60  ;;  %v4394_v63 = vsel %vm4386_vm9, %v4359_v60, 0 }
 0x530   : > { %4906 = vrot.lane.b32.xlu0 %v4359_v60, %s14776_s0 }
 0x537   : > { %5502 = vrot.lane.b32.xlu1 %v4359_v60, %s14772_s4 }
 0x569   : > { %v4903_v31 = vpop.permute.xlu2 %4902 }
 0x579   : > { %v5501_v29 = vpop.permute.xlu2 %5500 }
 0x57b   : > { %v4313_v7 = vpop.f32.mrf.mxu3 }
 0x57c   : > { %v4328_v57 = vpack.c.bf16 %v4313_v7, %v4313_v7 }
 0x57e   : > { %v4354_v13 = vunpack.c.l.b16 %v4328_v57 }
 0x582   : > { %v13164_v12 = vpop.permute.xlu0 %5200 }
 0x583   : > { %v4315_v21 = vpop.f32.mrf.mxu3 }
 0x584   : > { %v4329_v62 = vpack.c.bf16 %v4315_v21, %v4315_v21 }
 0x586   : > { %v4355_v37 = vunpack.c.l.b16 %v4329_v62 }
 0x588   : > { %v4360_v16 = vpack.c.b16 %v4355_v37, %v4354_v13  ;;  %v13211_v13 = vld [vmem:[%s15268_s28 + $0x8] sm:$0xff] }
 0x58a   : > { %5206 = vrot.lane.b32.xlu2 %v4360_v16, %s14774_s2  ;;  %4908 = vrot.lane.b32.xlu0 %v4360_v16, %s14776_s0  ;;  %v4397_v38 = vsel %vm4386_vm9, %v4360_v16, 0  ;;  %v13169_v52 = vpop.permute.xlu0 %5498 }
 0x58b   : > { %8392 = vmatmul.msk.bf16.gmra.mxu0 %vm4386_vm9, %v4360_v16  ;;  %v4318_v14 = vpop.f32.mrf.mxu3 }
 0x58c   : > { %v4411_v2 = vpop.f32.mrf.mxu0  ;;  %v4330_v3 = vpack.c.bf16 %v4318_v14, %v4318_v14 }
 0x58d   : > { %5024 = vperm.xlu1 %8807, %v4411_v2  }
 0x58e   : > { %v4356_v22 = vunpack.c.l.b16 %v4330_v3 }
 0x590   : > { %v4361_v6 = vpack.c.b16 %v4356_v22, %v4356_v22 }
 0x592   : > { %4726 = vperm.xlu2 %8806, %v4411_v2   ;;  %5504 = vrot.lane.b32.xlu0 %v4360_v16, %s14772_s4  ;;  %v4400_v58 = vsel %vm4386_vm9, %v4361_v6, 0  ;;  %v4670_v10 = vand.u32 %v13129_v36, %v4361_v6  ;;  %v4905_v61 = vpop.permute.xlu0 %4904 }
 0x593   : > { %v4320_v50 = vpop.f32.mrf.mxu3  ;;  %4442 = vmatpush.bf16.xpose.msra.mxu1 %v4400_v58 }
 0x594   : > { %v4413_v20 = vpop.f32.mrf.mxu0  ;;  %4675 = vmatpush.bf16.msra.mxu2 %v4670_v10  ;;  %v4202_v50 = vld [vmem:[%s15268_s28] sm:$0xff] }
 0x595   : > { %8812 = vset.pattern.permute.xlu1 %v9388_v27 }
 0x596   : > { %5326 = vperm.xlu1 %8812, %v4413_v20  }
 0x598   : > { %4676 = vmatpush.bf16.msra.mxu2 %v4360_v16 }
 0x59a   : > { %8808 = vset.pattern.permute.xlu2 %v9388_v27  ;;  %4910 = vrot.lane.b32.xlu0 %v4361_v6, %s14776_s0  ;;  %v5203_v47 = vpop.permute.xlu0 %5202  ;;  %s15271_s0 = smov 80  }
 0x59b   : > { %8393 = vmatmul.msk.bf16.gmra.mxu0 %vm4386_vm9, %v4361_v6  ;;  %5322 = vperm.xlu2 %8808, %v4411_v2  }
 0x59c   : > { %4443 = vmatpush.bf16.xpose.msra.mxu1 %v4397_v38  ;;  %4677 = vmatpush.bf16.msra.mxu2 %v4359_v60  ;;  %v4416_v4 = vpop.f32.mrf.mxu0 }
 0x59e   : > { %8813 = vset.pattern.permute.xlu1 %v9387_v49 }
 0x59f   : > { %4468 = vperm.xlu1 %8813, %v4413_v20  }
 0x5a0   : > { %4678 = vmatpush.bf16.msra.mxu2 %v13107_v25 }
 0x5a1   : > { %v5205_v46 = vpop.permute.xlu1 %5204 }
 0x5a2   : > { %5208 = vrot.lane.b32.xlu0 %v4361_v6, %s14774_s2  ;;  %v4907_v41 = vpop.permute.xlu0 %4906 }
 0x5a3   : > { %8809 = vset.pattern.permute.xlu2 %v9387_v49 }
 0x5a4   : > { %4444 = vmatpush.bf16.xpose.msra.mxu1 %v4394_v63  ;;  %4463 = vperm.xlu2 %8809, %v4411_v2   ;;  %v4418_v8 = vpop.f32.mrf.mxu0 }
 0x5a5   : > { %4679 = vmatpush.bf16.msra.mxu2 %v13097_v56 }
 0x5a7   : > { %8816 = vset.pattern.permute.xlu1 %v9388_v27 }
 0x5a8   : > { %5330 = vperm.xlu1 %8816, %v4416_v4  }
 0x5a9   : > { %v5503_v45 = vpop.permute.xlu1 %5502 }
 0x5aa   : > { %5506 = vrot.lane.b32.xlu0 %v4361_v6, %s14772_s4  ;;  %s9329_s4 = sshra.s32 %s7690_s1, 4  ;;  %s9330_s4 = int_to_ptr.hbm [resolvable:$true] %s9329_s4 }
 0x5ab   : > { %p9336_p0 = scmp.lt.s32.totalorder %s9330_s4, %s14543_s21 }
 0x5ac   : > { %4445 = vmatpush.bf16.xpose.msra.mxu1 %v4391_v1  ;;  %8811 = vset.pattern.permute.xlu2 %v9385_v42  ;;  %v4421_v28 = vpop.f32.mrf.mxu0 }
 0x5ad   : > { %5028 = vperm.xlu2 %8811, %v4413_v20  }
 0x5b0   : > { %8817 = vset.pattern.permute.xlu1 %v9387_v49 }
 0x5b1   : > { %4473 = vperm.xlu1 %8817, %v4416_v4  }
 0x5b2   : > { %4730 = vperm.xlu0 %8810, %v4413_v20  }
 0x5b4   : > { %4446 = vmatpush.bf16.xpose.msra.mxu1 %v4388_v30  ;;  %v4423_v35 = vpop.f32.mrf.mxu0 }
 0x5b5   : > { %8814 = vset.pattern.permute.xlu2 %v9386_v53 }
 0x5b6   : > { %4734 = vperm.xlu2 %8814, %v4416_v4  }
 0x5b9   : > { %8818 = vset.pattern.permute.xlu1 %v9386_v53 }
 0x5ba   : > { %4738 = vperm.xlu1 %8818, %v4418_v8   ;;  %8815 = vset.pattern.permute.xlu0 %v9385_v42 }
 0x5bb   : > { %8394 = vmatmul.msk.bf16.vlgmr.msra.gmra.mxu1 %vm4386_vm9, %v4435_v33  ;;  %5032 = vperm.xlu0 %8815, %v4416_v4  }
 0x5be   : > { %8819 = vset.pattern.permute.xlu2 %v9385_v42 }
 0x5bf   : > { %5036 = vperm.xlu2 %8819, %v4418_v8  }
 0x5c2   : > { %4742 = vperm.xlu1 %8818, %v4421_v28  }
 0x5c3   : > { %8821 = vset.pattern.permute.xlu0 %v9387_v49 }
 0x5c4   : > { %4478 = vperm.xlu0 %8821, %v4418_v8  }
 0x5c7   : > { %8820 = vset.pattern.permute.xlu2 %v9388_v27 }
 0x5c8   : > { %5334 = vperm.xlu2 %8820, %v4418_v8  }
 0x5ca   : > { %8825 = vset.pattern.permute.xlu1 %v9385_v42 }
 0x5cb   : > { %5044 = vperm.xlu1 %8825, %v4423_v35  }
 0x5cc   : > { %4483 = vperm.xlu0 %8821, %v4421_v28  }
 0x5d0   : > { %8822 = vset.pattern.permute.xlu2 %v9385_v42 }
 0x5d1   : > { %5040 = vperm.xlu2 %8822, %v4421_v28  }
 0x5d3   : > { %8826 = vset.pattern.permute.xlu1 %v9388_v27 }
 0x5d4   : > { %5342 = vperm.xlu1 %8826, %v4423_v35   ;;  %8824 = vset.pattern.permute.xlu0 %v9386_v53 }
 0x5d5   : > { %4746 = vperm.xlu0 %8824, %v4423_v35  }
 0x5d9   : > { %8823 = vset.pattern.permute.xlu2 %v9388_v27 }
 0x5da   : > { %5338 = vperm.xlu2 %8823, %v4421_v28  }
 0x5dc   : > { %8827 = vset.pattern.permute.xlu1 %v9387_v49 }
 0x5dd   : > { %4488 = vperm.xlu1 %8827, %v4423_v35  }
 0x5e4   : > { %v5207_v5 = vpop.permute.xlu2 %5206 }
 0x5e5   : > { %8829 = vset.pattern.permute.xlu1 %v9388_v27 }
 0x5ec   : > { %v4727_v34 = vpop.permute.xlu2 %4726 }
 0x5f5   : > { %v13189_v25 = vpop.permute.xlu2 %5322 }
 0x5fc   : > { %v4909_v54 = vpop.permute.xlu0 %4908 }
 0x5fe   : > { %v4464_v0 = vpop.permute.xlu2 %4463 }
 0x5ff   : > { %v13174_v44 = vpop.permute.xlu1 %5024 }
 0x604   : > { %v5505_v59 = vpop.permute.xlu0 %5504 }
 0x607   : > { %v5029_v57 = vpop.permute.xlu2 %5028 }
 0x608   : > { %v4426_v9 = vpop.f32.mrf.mxu0  ;;  %v13180_v56 = vpop.permute.xlu1 %5326 }
 0x609   : > { %5346 = vperm.xlu1 %8829, %v4426_v9   ;;  %4750 = vperm.xlu0 %8824, %v4426_v9  }
 0x60c   : > { %v4911_v51 = vpop.permute.xlu0 %4910 }
 0x60d   : > { %v4932_v15 = vand.u32 %v4911_v51, %v13129_v36 }
 0x60f   : > { %4937 = vmatpush.bf16.msrb.mxu3 %v4932_v15 }
 0x610   : > { %v4428_v11 = vpop.f32.mrf.mxu0 }
 0x611   : > { %8830 = vset.pattern.permute.xlu1 %v9387_v49  ;;  %5350 = vperm.xlu2 %8823, %v4428_v11   ;;  %v4469_v26 = vpop.permute.xlu1 %4468 }
 0x612   : > { %8828 = vset.pattern.permute.xlu0 %v9385_v42  ;;  %4493 = vperm.xlu1 %8830, %v4426_v9  }
 0x613   : > { %5048 = vperm.xlu0 %8828, %v4426_v9   ;;  %4938 = vmatpush.bf16.msrb.mxu3 %v4909_v54 }
 0x614   : > { %v5209_v18 = vpop.permute.xlu0 %5208 }
 0x615   : > { %v5230_v32 = vand.u32 %v5209_v18, %v13129_v36 }
 0x617   : > { %4939 = vmatpush.bf16.msrb.mxu3 %v4907_v41  ;;  %5235 = vmatpush.bf16.msrb.mxu1 %v5230_v32 }
 0x618   : > { %v4431_v19 = vpop.f32.mrf.mxu0 }
 0x619   : > { %8835 = vset.pattern.permute.xlu2 %v9385_v42 }
 0x61a   : > { %8834 = vset.pattern.permute.xlu1 %v9386_v53  ;;  %5056 = vperm.xlu2 %8835, %v4431_v19   ;;  %v13192_v24 = vpop.permute.xlu1 %5330 }
 0x61b   : > { %8831 = vset.pattern.permute.xlu0 %v9386_v53  ;;  %4758 = vperm.xlu1 %8834, %v4431_v19  }
 0x61c   : > { %4754 = vperm.xlu0 %8831, %v4428_v11   ;;  %4940 = vmatpush.bf16.msrb.mxu3 %v4905_v61  ;;  %v5507_v23 = vpop.permute.xlu0 %5506  ;;  %v4735_v61 = vpop.permute.xlu2 %4734 }
 0x61d   : > { %5236 = vmatpush.bf16.msrb.mxu1 %v5207_v5  ;;  %v5528_v40 = vand.u32 %v5507_v23, %v13129_v36 }
 0x61f   : > { %5533 = vmatpush.bf16.msra.mxu0 %v5528_v40  ;;  %v13263_v40 = vld [vmem:[%s15268_s28 + $0x10] sm:$0xff] }
 0x620   : > { %v4433_v17 = vpop.f32.mrf.mxu0  ;;  %4941 = vmatpush.bf16.msrb.mxu3 %v4903_v31 }
 0x621   : > { %5237 = vmatpush.bf16.msrb.mxu1 %v5205_v46 }
 0x622   : > { %8837 = vset.pattern.permute.xlu2 %v9387_v49 }
 0x623   : > { %4503 = vperm.xlu2 %8837, %v4431_v19   ;;  %5534 = vmatpush.bf16.msra.mxu0 %v5505_v59  ;;  %v13197_v55 = vpop.permute.xlu1 %4473 }
 0x624   : > { %8832 = vset.pattern.permute.xlu0 %v9385_v42  ;;  %8845 = vset.pattern.permute.xlu1 %v9385_v42  ;;  %v4731_v43 = vpop.permute.xlu0 %4730 }
 0x625   : > { %5052 = vperm.xlu0 %8832, %v4428_v11   ;;  %5238 = vmatpush.bf16.msrb.mxu1 %v5203_v47 }
 0x627   : > { %5535 = vmatpush.bf16.msra.mxu0 %v5503_v45 }
 0x629   : > { %5239 = vmatpush.bf16.msrb.mxu1 %v13164_v12 }
 0x62b   : > { %5536 = vmatpush.bf16.msra.mxu0 %v5501_v29  ;;  %8838 = vset.pattern.permute.xlu2 %v9385_v42 }
 0x62c   : > { %v13214_v2 = vpop.permute.xlu1 %4738 }
 0x62d   : > { %8833 = vset.pattern.permute.xlu0 %v9387_v49  ;;  %v13205_v21 = vpop.permute.xlu0 %5032 }
 0x62e   : > { %4498 = vperm.xlu0 %8833, %v4428_v11  }
 0x62f   : > { %5537 = vmatpush.bf16.msra.mxu0 %v13169_v52 }
 0x634   : > { %v13233_v33 = vpop.permute.xlu1 %4742 }
 0x636   : > { %8836 = vset.pattern.permute.xlu0 %v9388_v27  ;;  %v13229_v30 = vpop.permute.xlu0 %4478 }
 0x637   : > { %5354 = vperm.xlu0 %8836, %v4431_v19  }
 0x638   : > { %v4448_v48 = vpop.f32.mrf.mxu1 }
 0x639   : > { %v13200_v39 = vperm.slane %v4448_v48, 1  ;;  %v13202_v60 = vperm.slane %v4448_v48, 2  ;;  %v13219_v58 = vperm.slane %v4448_v48, 0  ;;  %v13243_v54 = vperm.slane %v4448_v48, 3 }
 0x63b   : > { %v4763_v7 = vadd.f32 %v13200_v39, %v4731_v43  ;;  %v4762_v62 = vadd.f32 %v13200_v39, %v4727_v34  ;;  %v5061_v16 = vadd.f32 %v13202_v60, %v5029_v57  ;;  %v5060_v63 = vadd.f32 %v13202_v60, %v13174_v44 }
 0x63c   : > { %v4508_v1 = vadd.f32 %v13219_v58, %v4469_v26  ;;  %v4507_v46 = vadd.f32 %v13219_v58, %v4464_v0  ;;  %v4764_v45 = vadd.f32 %v13200_v39, %v4735_v61  ;;  %v5358_v15 = vadd.f32 %v13243_v54, %v13189_v25  ;;  %v5037_v25 = vpop.permute.xlu2 %5036 }
 0x63d   : > { %vm4772_vm0 = vcmp.gt.f32.partialorder %v4763_v7, 0.0  ;;  %v4781_v37 = vmul.f32 0.2, %v4763_v7  ;;  %v4780_v6 = vmul.f32 0.2, %v4762_v62  ;;  %vm4771_vm11 = vcmp.gt.f32.partialorder %v4762_v62, 0.0  ;;  %v5045_v11 = vpop.permute.xlu1 %5044 }
 0x63e   : > { %v5079_v20 = vmul.f32 0.2, %v5061_v16  ;;  %vm5070_vm12 = vcmp.gt.f32.partialorder %v5061_v16, 0.0  ;;  %v5078_v35 = vmul.f32 0.2, %v5060_v63  ;;  %vm5069_vm13 = vcmp.gt.f32.partialorder %v5060_v63, 0.0  ;;  %v4484_v9 = vpop.permute.xlu0 %4483 }
 0x63f   : > { %v4790_v14 = vsel %vm4772_vm0, %v4763_v7, %v4781_v37  ;;  %v4789_v38 = vsel %vm4771_vm11, %v4762_v62, %v4780_v6  ;;  %v4526_v12 = vmul.f32 0.2, %v4508_v1  ;;  %vm4517_vm14 = vcmp.gt.f32.partialorder %v4508_v1, 0.0 }
 0x640   : > { %v4450_v3 = vpop.f32.mrf.mxu1  ;;  %v13217_v22 = vadd.f32 %v4790_v14, %v13211_v13  ;;  %v5088_v4 = vsel %vm5070_vm12, %v5061_v16, %v5079_v20  ;;  %v13231_v8 = vadd.f32 %v4789_v38, %v4202_v50  ;;  %v5087_v41 = vsel %vm5069_vm13, %v5060_v63, %v5078_v35 }
 0x641   : > { %v13236_v28 = vadd.f32 %v5088_v4, %v13211_v13  ;;  %v4535_v31 = vsel %vm4517_vm14, %v4508_v1, %v4526_v12  ;;  %v13246_v59 = vadd.f32 %v5087_v41, %v4202_v50  ;;  %v4525_v44 = vmul.f32 0.2, %v4507_v46  ;;  %v13286_v4 = vld [vmem:[%s15268_s28 + $0x20] sm:$0xff] }
 0x642   : > { %v4810_v10 = vsel %vm4552_vm10, %v13217_v22, -inf  ;;  %v4807_v52 = vsel %vm4552_vm10, %v13231_v8, -inf  ;;  %v13249_v29 = vadd.f32 %v4535_v31, %v13211_v13  ;;  %vm4516_vm15 = vcmp.gt.f32.partialorder %v4507_v46, 0.0 }
 0x643   : > { %v5108_v47 = vsel %vm4552_vm10, %v13236_v28, -inf  ;;  %v4782_v51 = vmul.f32 0.2, %v4764_v45  ;;  %vm4773_vm2 = vcmp.gt.f32.partialorder %v4764_v45, 0.0  ;;  %v5105_v5 = vsel %vm4552_vm10, %v13246_v59, -inf }
 0x644   : > { %v4556_v18 = vsel %vm4552_vm10, %v13249_v29, -inf  ;;  %v4534_v32 = vsel %vm4516_vm15, %v4507_v46, %v4525_v44  ;;  %v5359_v19 = vadd.f32 %v13243_v54, %v13180_v56  ;;  %v4511_v23 = vadd.f32 %v13219_v58, %v4484_v9 }
 0x645   : > { %4811 = vmax.xlane.f32.xlu1 %v4810_v10  ;;  %v4791_v34 = vsel %vm4773_vm2, %v4764_v45, %v4782_v51  ;;  %v5376_v26 = vmul.f32 0.2, %v5358_v15  ;;  %vm5367_vm3 = vcmp.gt.f32.partialorder %v5358_v15, 0.0  ;;  %v13265_v17 = vadd.f32 %v4534_v32, %v4202_v50 }
 0x646   : > { %v13268_v0 = vadd.f32 %v4791_v34, %v13263_v40  ;;  %v5377_v43 = vmul.f32 0.2, %v5359_v19  ;;  %v4529_v48 = vmul.f32 0.2, %v4511_v23  ;;  %vm5368_vm4 = vcmp.gt.f32.partialorder %v5359_v19, 0.0  ;;  %v5343_v37 = vpop.permute.xlu1 %5342 }
 0x647   : > { %v5385_v56 = vsel %vm5367_vm3, %v5358_v15, %v5376_v26  ;;  %v5063_v7 = vadd.f32 %v13202_v60, %v5037_v25  ;;  %v4747_v57 = vpop.permute.xlu0 %4746  ;;  %vm4520_vm5 = vcmp.gt.f32.partialorder %v4511_v23, 0.0  ;;  %v4553_v62 = vsel %vm4552_vm10, %v13265_v17, -inf }
 0x648   : > { %v4813_v16 = vsel %vm4552_vm10, %v13268_v0, -inf  ;;  %v13275_v14 = vadd.f32 %v5385_v56, %v4202_v50  ;;  %v5386_v3 = vsel %vm5368_vm4, %v5359_v19, %v5377_v43  ;;  %v5062_v6 = vadd.f32 %v13202_v60, %v13205_v21  ;;  %v5335_v56 = vpop.permute.xlu2 %5334 }
 0x649   : > { %v4767_v20 = vadd.f32 %v13200_v39, %v4747_v57  ;;  %v4538_v10 = vsel %vm4520_vm5, %v4511_v23, %v4529_v48  ;;  %v5081_v38 = vmul.f32 0.2, %v5063_v7  ;;  %vm5072_vm6 = vcmp.gt.f32.partialorder %v5063_v7, 0.0 }
 0x64a   : > { %v13281_v63 = vadd.f32 %v5386_v3, %v13211_v13  ;;  %v5403_v50 = vsel %vm4552_vm10, %v13275_v14, -inf  ;;  %v13291_v1 = vadd.f32 %v4538_v10, %v13286_v4  ;;  %v5080_v21 = vmul.f32 0.2, %v5062_v6  ;;  %v13297_v13 = vld [vmem:[%s15268_s28 + $0x18] sm:$0xff] }
 0x64b   : > { %v5065_v35 = vadd.f32 %v13202_v60, %v5045_v11  ;;  %v4785_v12 = vmul.f32 0.2, %v4767_v20  ;;  %vm5071_vm7 = vcmp.gt.f32.partialorder %v5062_v6, 0.0  ;;  %vm4776_vm8 = vcmp.gt.f32.partialorder %v4767_v20, 0.0  ;;  %v4207_v11 = vld [vmem:[%s15268_s28 + $0x28] sm:$0xff] }
 0x64c   : > { %4808 = vmax.xlane.f32.xlu2 %v4807_v52  ;;  %v5090_v52 = vsel %vm5072_vm6, %v5063_v7, %v5081_v38  ;;  %v5406_v61 = vsel %vm4552_vm10, %v13281_v63, -inf  ;;  %v5089_v46 = vsel %vm5071_vm7, %v5062_v6, %v5080_v21  ;;  %v5360_v31 = vadd.f32 %v13243_v54, %v13192_v24 }
 0x64d   : > { %5109 = vmax.xlane.f32.xlu1 %v5108_v47  ;;  %v4565_v47 = vsel %vm4552_vm10, %v13291_v1, -inf  ;;  %v13304_v41 = vadd.f32 %v5090_v52, %v13297_v13  ;;  %v5083_v45 = vmul.f32 0.2, %v5065_v35  ;;  %v5363_v9 = vadd.f32 %v13243_v54, %v5343_v37 }
 0x64e   : > { %v4794_v44 = vsel %vm4776_vm8, %v4767_v20, %v4785_v12  ;;  %vm5074_vm0 = vcmp.gt.f32.partialorder %v5065_v35, 0.0  ;;  %v13310_v15 = vadd.f32 %v5089_v46, %v13263_v40  ;;  %v5378_v24 = vmul.f32 0.2, %v5360_v31 }
 0x64f   : > { %v4489_v51 = vpop.permute.xlu1 %4488  ;;  %v5381_v32 = vmul.f32 0.2, %v5363_v9  ;;  %v5092_v23 = vsel %vm5074_vm0, %v5065_v35, %v5083_v45  ;;  %vm5369_vm11 = vcmp.gt.f32.partialorder %v5360_v31, 0.0  ;;  %vm5372_vm12 = vcmp.gt.f32.partialorder %v5363_v9, 0.0 }
 0x650   : > { %v4512_v19 = vadd.f32 %v13219_v58, %v4489_v51  ;;  %v5111_v34 = vsel %vm4552_vm10, %v13310_v15, -inf  ;;  %v13324_v25 = vadd.f32 %v5092_v23, %v4207_v11  ;;  %v5387_v43 = vsel %vm5369_vm11, %v5360_v31, %v5378_v24  ;;  %v13343_v21 = vpop.permute.xlu2 %5040 }
 0x651   : > { %v4509_v48 = vadd.f32 %v13219_v58, %v13197_v55  ;;  %v5390_v57 = vsel %vm5372_vm12, %v5363_v9, %v5381_v32  ;;  %v5361_v45 = vadd.f32 %v13243_v54, %v5335_v56  ;;  %v13359_v9 = vld [vmem:[%s15268_s28 + $0x30] sm:$0xff]  ;;  %vm4577_vm11 = vcmask 524288  }
 0x652   : > { %v4530_v7 = vmul.f32 0.2, %v4512_v19  ;;  %vm4521_vm13 = vcmp.gt.f32.partialorder %v4512_v19, 0.0  ;;  %v5120_v37 = vsel %vm4552_vm10, %v13324_v25, -inf }
 0x653   : > { %v4527_v3 = vmul.f32 0.2, %v4509_v48  ;;  %vm4518_vm14 = vcmp.gt.f32.partialorder %v4509_v48, 0.0  ;;  %vm5370_vm3 = vcmp.gt.f32.partialorder %v5361_v45, 0.0 }
 0x654   : > { %5106 = vmax.xlane.f32.xlu2 %v5105_v5  ;;  %v5114_v5 = vsel %vm4552_vm10, %v13304_v41, -inf  ;;  %v4539_v6 = vsel %vm4521_vm13, %v4512_v19, %v4530_v7 }
 0x655   : > { %4557 = vmax.xlane.f32.xlu1 %v4556_v18  ;;  %v13317_v18 = vadd.f32 %v4794_v44, %v4207_v11  ;;  %v13339_v10 = vadd.f32 %v4539_v6, %v4207_v11  ;;  %v4536_v38 = vsel %vm4518_vm14, %v4509_v48, %v4527_v3 }
 0x656   : > { %v13346_v35 = vadd.f32 %v4536_v38, %v13263_v40 }
 0x657   : > { %v4822_v26 = vsel %vm4552_vm10, %v13317_v18, -inf  ;;  %v4568_v12 = vsel %vm4552_vm10, %v13339_v10, -inf }
 0x658   : > { %v4559_v46 = vsel %vm4552_vm10, %v13346_v35, -inf }
 0x65c   : > { %4554 = vmax.xlane.f32.xlu2 %v4553_v62  ;;  %v13329_v62 = vadd.f32 %v5387_v43, %v13263_v40 }
 0x65d   : > { %4814 = vmax.xlane.f32.xlu1 %v4813_v16  ;;  %v13333_v16 = vadd.f32 %v5390_v57, %v4207_v11  ;;  %v5379_v11 = vmul.f32 0.2, %v5361_v45 }
 0x65e   : > { %v5409_v55 = vsel %vm4552_vm10, %v13329_v62, -inf }
 0x65f   : > { %v5418_v20 = vsel %vm4552_vm10, %v13333_v16, -inf }
 0x661   : > { %5404 = vmax.xlane.f32.xlu0 %v5403_v50  ;;  %v4765_v50 = vadd.f32 %v13200_v39, %v13214_v2 }
 0x663   : > { %v4783_v52 = vmul.f32 0.2, %v4765_v50  ;;  %vm4774_vm15 = vcmp.gt.f32.partialorder %v4765_v50, 0.0 }
 0x664   : > { %5407 = vmax.xlane.f32.xlu2 %v5406_v61 }
 0x665   : > { %4566 = vmax.xlane.f32.xlu1 %v4565_v47  ;;  %v4792_v31 = vsel %vm4774_vm15, %v4765_v50, %v4783_v52  ;;  %v4766_v50 = vadd.f32 %v13200_v39, %v13233_v33 }
 0x666   : > { %v13362_v44 = vadd.f32 %v4792_v31, %v13297_v13 }
 0x667   : > { %vm4775_vm8 = vcmp.gt.f32.partialorder %v4766_v50, 0.0 }
 0x668   : > { %v4816_v32 = vsel %vm4552_vm10, %v13362_v44, -inf }
 0x669   : > { %5115 = vmax.xlane.f32.xlu0 %v5114_v5  ;;  %v13364_v5 = vpop.permute.xlu2 %5338 }
 0x66c   : > { %5112 = vmax.xlane.f32.xlu2 %v5111_v34  ;;  %v5388_v34 = vsel %vm5370_vm3, %v5361_v45, %v5379_v11 }
 0x66d   : > { %4823 = vmax.xlane.f32.xlu1 %v4822_v26  ;;  %v4510_v26 = vadd.f32 %v13219_v58, %v13229_v30  ;;  %v13378_v7 = vadd.f32 %v5388_v34, %v13297_v13 }
 0x66f   : > { %vm4519_vm5 = vcmp.gt.f32.partialorder %v4510_v26, 0.0 }
 0x671   : > { %5121 = vmax.xlane.f32.xlu0 %v5120_v37  ;;  %v4528_v37 = vmul.f32 0.2, %v4510_v26  ;;  %v5351_v3 = vpop.permute.xlu2 %5350 }
 0x673   : > { %v4537_v38 = vsel %vm4519_vm5, %v4510_v26, %v4528_v37  ;;  %v13417_v37 = vld [vmem:[%s15268_s28 + $0x38] sm:$0xff] }
 0x674   : > { %5410 = vmax.xlane.f32.xlu2 %v5409_v55  ;;  %v13392_v45 = vadd.f32 %v4537_v38, %v13297_v13 }
 0x675   : > { %5419 = vmax.xlane.f32.xlu1 %v5418_v20  ;;  %v5412_v20 = vsel %vm4552_vm10, %v13378_v7, -inf }
 0x676   : > { %v4562_v34 = vsel %vm4552_vm10, %v13392_v45, -inf }
 0x679   : > { %4569 = vmax.xlane.f32.xlu0 %v4568_v12 }
 0x67b   : > { %v5347_v61 = vpop.permute.xlu1 %5346  ;;  %v13350_v47 = vpop.permute.xlu0 %4750 }
 0x67c   : > { %v5364_v2 = vadd.f32 %v13243_v54, %v5347_v61  ;;  %4560 = vmax.xlane.f32.xlu2 %v4559_v46  ;;  %v5365_v61 = vadd.f32 %v13243_v54, %v5351_v3 }
 0x67e   : > { %v5382_v40 = vmul.f32 0.2, %v5364_v2  ;;  %vm5373_vm2 = vcmp.gt.f32.partialorder %v5364_v2, 0.0  ;;  %v5383_v33 = vmul.f32 0.2, %v5365_v61  ;;  %vm5374_vm0 = vcmp.gt.f32.partialorder %v5365_v61, 0.0 }
 0x680   : > { %v5391_v51 = vsel %vm5373_vm2, %v5364_v2, %v5382_v40  ;;  %v5392_v3 = vsel %vm5374_vm0, %v5365_v61, %v5383_v33  ;;  %vm5310_vm0 = vcmask 392448  }
 0x681   : > { %v13367_v24 = vadd.f32 %v5391_v51, %v13359_v9  ;;  %v4784_v51 = vmul.f32 0.2, %v4766_v50 }
 0x683   : > { %v5421_v19 = vsel %vm4552_vm10, %v13367_v24, -inf  ;;  %v4793_v26 = vsel %vm4775_vm8, %v4766_v50, %v4784_v51  ;;  %vm5012_vm8 = vcmask 261248  }
 0x684   : > { %v4494_v23 = vpop.permute.xlu1 %4493  ;;  %4817 = vmax.xlane.f32.xlu2 %v4816_v32  ;;  %5422 = vmax.xlane.f32.xlu1 %v5421_v19  ;;  %v13400_v32 = vld [vmem:[%s15268_s28 + $0x40] sm:$0x1] }
 0x685   : > { %v5049_v43 = vpop.permute.xlu0 %5048  ;;  %v4513_v48 = vadd.f32 %v13219_v58, %v4494_v23  ;;  %v5057_v23 = vpop.permute.xlu2 %5056 }
 0x686   : > { %v5066_v56 = vadd.f32 %v13202_v60, %v5049_v43  ;;  %v5064_v43 = vadd.f32 %v13202_v60, %v13343_v21 }
 0x687   : > { %v4531_v6 = vmul.f32 0.2, %v4513_v48  ;;  %vm4522_vm6 = vcmp.gt.f32.partialorder %v4513_v48, 0.0 }
 0x688   : > { %v5084_v57 = vmul.f32 0.2, %v5066_v56  ;;  %vm5075_vm4 = vcmp.gt.f32.partialorder %v5066_v56, 0.0  ;;  %v5082_v21 = vmul.f32 0.2, %v5064_v43  ;;  %vm5073_vm12 = vcmp.gt.f32.partialorder %v5064_v43, 0.0 }
 0x689   : > { %v4540_v31 = vsel %vm4522_vm6, %v4513_v48, %v4531_v6 }
 0x68a   : > { %v5093_v55 = vsel %vm5075_vm4, %v5066_v56, %v5084_v57  ;;  %v13395_v11 = vadd.f32 %v4540_v31, %v13359_v9  ;;  %v5068_v57 = vadd.f32 %v13202_v60, %v5057_v23 }
 0x68b   : > { %v13383_v30 = vadd.f32 %v5093_v55, %v13359_v9  ;;  %v13420_v55 = vadd.f32 %v4793_v26, %v13286_v4 }
 0x68c   : > { %5413 = vmax.xlane.f32.xlu2 %v5412_v20  ;;  %v4571_v48 = vsel %vm4552_vm10, %v13395_v11, -inf  ;;  %v13423_v20 = vadd.f32 %v5392_v3, %v13417_v37  ;;  %v5086_v38 = vmul.f32 0.2, %v5068_v57  ;;  %vm5077_vm13 = vcmp.gt.f32.partialorder %v5068_v57, 0.0 }
 0x68d   : > { %v4759_v12 = vpop.permute.xlu1 %4758  ;;  %v5123_v52 = vsel %vm4552_vm10, %v13383_v30, -inf  ;;  %v4819_v50 = vsel %vm4552_vm10, %v13420_v55, -inf  ;;  %v4504_v26 = vpop.permute.xlu2 %4503 }
 0x68e   : > { %v4770_v46 = vadd.f32 %v13200_v39, %v4759_v12  ;;  %5124 = vmax.xlane.f32.xlu0 %v5123_v52  ;;  %v4755_v2 = vpop.permute.xlu0 %4754  ;;  %v5091_v12 = vsel %vm5073_vm12, %v5064_v43, %v5082_v21  ;;  %v5362_v52 = vadd.f32 %v13243_v54, %v13364_v5  ;;  %v5424_v61 = vsel %vm4552_vm10, %v13423_v20, -inf }
 0x68f   : > { %v13432_v31 = vadd.f32 %v5091_v12, %v13286_v4  ;;  %v4768_v5 = vadd.f32 %v13200_v39, %v13350_v47  ;;  %v4769_v21 = vadd.f32 %v13200_v39, %v4755_v2  ;;  %vm5608_vm12 = vcmask 523648  }
 0x690   : > { %v4788_v40 = vmul.f32 0.2, %v4770_v46  ;;  %vm4779_vm7 = vcmp.gt.f32.partialorder %v4770_v46, 0.0  ;;  %v5380_v51 = vmul.f32 0.2, %v5362_v52  ;;  %vm5371_vm14 = vcmp.gt.f32.partialorder %v5362_v52, 0.0 }
 0x691   : > { %vm4777_vm15 = vcmp.gt.f32.partialorder %v4768_v5, 0.0  ;;  %vm4778_vm4 = vcmp.gt.f32.partialorder %v4769_v21, 0.0 }
 0x692   : > { %v4797_v19 = vsel %vm4779_vm7, %v4770_v46, %v4788_v40  ;;  %v5095_v46 = vsel %vm5077_vm13, %v5068_v57, %v5086_v38  ;;  %v5389_v23 = vsel %vm5371_vm14, %v5362_v52, %v5380_v51  ;;  %v4515_v57 = vadd.f32 %v13219_v58, %v4504_v26 }
 0x693   : > { %v13405_v13 = vadd.f32 %v4797_v19, %v13400_v32  ;;  %v13435_v33 = vadd.f32 %v5095_v46, %v13400_v32  ;;  %v5117_v19 = vsel %vm4552_vm10, %v13432_v31, -inf  ;;  %v13444_v43 = vadd.f32 %v5389_v23, %v13286_v4 }
 0x694   : > { %4563 = vmax.xlane.f32.xlu2 %v4562_v34  ;;  %v4533_v12 = vmul.f32 0.2, %v4515_v57  ;;  %vm4524_vm3 = vcmp.gt.f32.partialorder %v4515_v57, 0.0  ;;  %v4787_v46 = vmul.f32 0.2, %v4769_v21  ;;  %vm4714_vm7 = vcmask 130048  }
 0x695   : > { %v4831_v56 = vsel %vm4577_vm11, %v13405_v13, -inf  ;;  %v5129_v34 = vsel %vm4577_vm11, %v13435_v33, -inf  ;;  %v5415_v47 = vsel %vm4552_vm10, %v13444_v43, -inf }
 0x696   : > { %4572 = vmax.xlane.f32.xlu0 %v4571_v48  ;;  %4832 = vmax.xlane.f32.xlu1 %v4831_v56  ;;  %v4786_v48 = vmul.f32 0.2, %v4768_v5  ;;  %v4542_v39 = vsel %vm4524_vm3, %v4515_v57, %v4533_v12 }
 0x697   : > { %v5053_v6 = vpop.permute.xlu0 %5052 }
 0x698   : > { %v5067_v51 = vadd.f32 %v13202_v60, %v5053_v6 }
 0x69a   : > { %v5085_v23 = vmul.f32 0.2, %v5067_v51  ;;  %vm5076_vm5 = vcmp.gt.f32.partialorder %v5067_v51, 0.0 }
 0x69c   : > { %4820 = vmax.xlane.f32.xlu2 %v4819_v50  ;;  %v4795_v50 = vsel %vm4777_vm15, %v4768_v5, %v4786_v48  ;;  %v13463_v5 = vadd.f32 %v4542_v39, %v13400_v32 }
 0x69e   : > { %5425 = vmax.xlane.f32.xlu0 %v5424_v61  ;;  %v13455_v61 = vadd.f32 %v4795_v50, %v13359_v9  ;;  %v4578_v48 = vsel %vm4577_vm11, %v13463_v5, -inf }
 0x6a0   : > { %v4499_v40 = vpop.permute.xlu0 %4498  ;;  %v4825_v2 = vsel %vm4552_vm10, %v13455_v61, -inf }
 0x6a1   : > { %v4514_v6 = vadd.f32 %v13219_v58, %v4499_v40 }
 0x6a3   : > { %vm4523_vm6 = vcmp.gt.f32.partialorder %v4514_v6, 0.0 }
 0x6a4   : > { %5118 = vmax.xlane.f32.xlu2 %v5117_v19  ;;  %v4796_v19 = vsel %vm4778_vm4, %v4769_v21, %v4787_v46 }
 0x6a5   : > { %v13466_v9 = vadd.f32 %v4796_v19, %v13417_v37 }
 0x6a6   : > { %5130 = vmax.xlane.f32.xlu0 %v5129_v34 }
 0x6a7   : > { %v4828_v60 = vsel %vm4552_vm10, %v13466_v9, -inf }
 0x6a9   : > { %v5355_v56 = vpop.permute.xlu0 %5354 }
 0x6aa   : > { %v5366_v3 = vadd.f32 %v13243_v54, %v5355_v56 }
 0x6ac   : > { %v5384_v38 = vmul.f32 0.2, %v5366_v3  ;;  %5416 = vmax.xlane.f32.xlu2 %v5415_v47  ;;  %vm5375_vm2 = vcmp.gt.f32.partialorder %v5366_v3, 0.0  ;;  %v4532_v47 = vmul.f32 0.2, %v4514_v6 }
 0x6ae   : > { %v5393_v52 = vsel %vm5375_vm2, %v5366_v3, %v5384_v38  ;;  %v4541_v46 = vsel %vm4523_vm6, %v4514_v6, %v4532_v47 }
 0x6af   : > { %v13452_v4 = vadd.f32 %v5393_v52, %v13400_v32  ;;  %v5094_v32 = vsel %vm5076_vm5, %v5067_v51, %v5085_v23 }
 0x6b0   : > { %v13475_v3 = vadd.f32 %v5094_v32, %v13417_v37 }
 0x6b1   : > { %v5427_v54 = vsel %vm4577_vm11, %v13452_v4, -inf }
 0x6b2   : > { %5428 = vmax.xlane.f32.xlu1 %v5427_v54  ;;  %v5126_v58 = vsel %vm4552_vm10, %v13475_v3, -inf }
 0x6b4   : > { %4826 = vmax.xlane.f32.xlu2 %v4825_v2 }
 0x6b8   : > { %v4812_v34 = vpop.xlane.xlu1 %4811 }
 0x6b9   : > { %v4835_v26 = vsub.f32 %v13217_v22, %v4812_v34 }
 0x6ba   : > { %4579 = vmax.xlane.f32.xlu1 %v4578_v48 }
 0x6bb   : > { %v4845_v56 = vmul.f32 1.442695, %v4835_v26 }
 0x6bc   : > { %4829 = vmax.xlane.f32.xlu2 %v4828_v60 }
 0x6bd   : > { %8910 = vpow2.f32 %v4845_v56 }
 0x6bf   : > { %v4809_v57 = vpop.xlane.xlu2 %4808 }
 0x6c0   : > { %v4834_v22 = vsub.f32 %v13231_v8, %v4809_v57  ;;  %v5110_v21 = vpop.xlane.xlu1 %5109  ;;  %v13483_v8 = vadd.f32 %v4541_v46, %v13417_v37 }
 0x6c1   : > { %v5133_v38 = vsub.f32 %v13236_v28, %v5110_v21 }
 0x6c2   : > { %v4843_v50 = vmul.f32 1.442695, %v4834_v22  ;;  %v4574_v48 = vsel %vm4552_vm10, %v13483_v8, -inf }
 0x6c3   : > { %v8911_v12 = vpop.eup %8910  ;;  %v5143_v52 = vmul.f32 1.442695, %v5133_v38 }
 0x6c4   : > { %8912 = vpow2.f32 %v4843_v50  ;;  %5127 = vmax.xlane.f32.xlu2 %v5126_v58  ;;  %v4864_v40 = vsel %vm4552_vm10, %v8911_v12, 0.0 }
 0x6c5   : > { %8914 = vpow2.f32 %v5143_v52  ;;  %4865 = vadd.xlane.f32.xlu1 %v4864_v40 }
 0x6c7   : > { %v5107_v54 = vpop.xlane.xlu2 %5106 }
 0x6c8   : > { %v5132_v28 = vsub.f32 %v13246_v59, %v5107_v54  ;;  %v4558_v39 = vpop.xlane.xlu1 %4557 }
 0x6c9   : > { %v4582_v34 = vsub.f32 %v13249_v29, %v4558_v39 }
 0x6ca   : > { %v8913_v2 = vpop.eup %8912  ;;  %v5141_v51 = vmul.f32 1.442695, %v5132_v28 }
 0x6cb   : > { %v8915_v19 = vpop.eup %8914  ;;  %v4897_v23 = vpack.c.bf16 %v8911_v12, %v8913_v2  ;;  %v4861_v26 = vsel %vm4552_vm10, %v8913_v2, 0.0  ;;  %v4592_v59 = vmul.f32 1.442695, %v4582_v34 }
 0x6cc   : > { %8916 = vpow2.f32 %v5141_v51  ;;  %4862 = vadd.xlane.f32.xlu0 %v4861_v26  ;;  %4575 = vmax.xlane.f32.xlu2 %v4574_v48  ;;  %v5162_v37 = vsel %vm4552_vm10, %v8915_v19, 0.0 }
 0x6cd   : > { %8400 = vmatmul.msk.bf16.vlgmr.msrb.gmra.mxu3 %vm4552_vm10, %v4897_v23  ;;  %5163 = vadd.xlane.f32.xlu1 %v5162_v37  ;;  %8918 = vpow2.f32 %v4592_v59 }
 0x6cf   : > { %v4555_v56 = vpop.xlane.xlu2 %4554 }
 0x6d0   : > { %v4581_v60 = vsub.f32 %v13265_v17, %v4555_v56  ;;  %v4815_v47 = vpop.xlane.xlu1 %4814 }
 0x6d1   : > { %v4836_v38 = vsub.f32 %v13268_v0, %v4815_v47 }
 0x6d2   : > { %v8917_v6 = vpop.eup %8916  ;;  %v4590_v32 = vmul.f32 1.442695, %v4581_v60 }
 0x6d3   : > { %v5195_v29 = vpack.c.bf16 %v8915_v19, %v8917_v6  ;;  %v5159_v57 = vsel %vm4552_vm10, %v8917_v6, 0.0  ;;  %v8919_v52 = vpop.eup %8918  ;;  %v4847_v54 = vmul.f32 1.442695, %v4836_v38 }
 0x6d4   : > { %8920 = vpow2.f32 %v4590_v32  ;;  %v5405_v22 = vpop.xlane.xlu0 %5404  ;;  %5160 = vadd.xlane.f32.xlu0 %v5159_v57  ;;  %v4611_v32 = vsel %vm4552_vm10, %v8919_v52, 0.0 }
 0x6d5   : > { %v5430_v21 = vsub.f32 %v13275_v14, %v5405_v22  ;;  %8405 = vmatmul.msk.bf16.vlgmr.msrb.gmra.mxu1 %vm4552_vm10, %v5195_v29 }
 0x6d7   : > { %v5439_v50 = vmul.f32 1.442695, %v5430_v21  ;;  %v5408_v12 = vpop.xlane.xlu2 %5407 }
 0x6d8   : > { %v5431_v17 = vsub.f32 %v13281_v63, %v5408_v12 }
 0x6d9   : > { %8922 = vpow2.f32 %v5439_v50 }
 0x6da   : > { %v8921_v58 = vpop.eup %8920  ;;  %v5441_v40 = vmul.f32 1.442695, %v5431_v17 }
 0x6db   : > { %v4644_v46 = vpack.c.bf16 %v8919_v52, %v8921_v58  ;;  %v4608_v28 = vsel %vm4552_vm10, %v8921_v58, 0.0 }
 0x6dc   : > { %8924 = vpow2.f32 %v5441_v40  ;;  %v5116_v39 = vpop.xlane.xlu0 %5115  ;;  %4609 = vadd.xlane.f32.xlu2 %v4608_v28  ;;  %v4567_v40 = vpop.xlane.xlu1 %4566 }
 0x6dd   : > { %v5135_v14 = vsub.f32 %v13304_v41, %v5116_v39  ;;  %8395 = vmatmul.msk.bf16.vlgmr.msra.gmra.mxu2 %vm4552_vm10, %v4644_v46  ;;  %8926 = vpow2.f32 %v4847_v54 }
 0x6df   : > { %v8923_v0 = vpop.eup %8922  ;;  %v5147_v2 = vmul.f32 1.442695, %v5135_v14  ;;  %v5113_v51 = vpop.xlane.xlu2 %5112 }
 0x6e0   : > { %v5134_v63 = vsub.f32 %v13310_v15, %v5113_v51  ;;  %v5457_v19 = vsel %vm4552_vm10, %v8923_v0, 0.0 }
 0x6e1   : > { %5458 = vadd.xlane.f32.xlu0 %v5457_v19  ;;  %8928 = vpow2.f32 %v5147_v2 }
 0x6e2   : > { %v8925_v23 = vpop.eup %8924  ;;  %v5145_v34 = vmul.f32 1.442695, %v5134_v63 }
 0x6e3   : > { %v5493_v26 = vpack.c.bf16 %v8925_v23, %v8923_v0  ;;  %v5460_v48 = vsel %vm4552_vm10, %v8925_v23, 0.0  ;;  %v8927_v41 = vpop.eup %8926 }
 0x6e4   : > { %8930 = vpow2.f32 %v5145_v34  ;;  %5461 = vadd.xlane.f32.xlu1 %v5460_v48  ;;  %v4867_v56 = vsel %vm4552_vm10, %v8927_v41, 0.0  ;;  %v5122_v54 = vpop.xlane.xlu0 %5121  ;;  %v4824_v51 = vpop.xlane.xlu1 %4823 }
 0x6e5   : > { %8410 = vmatmul.msk.bf16.vlgmr.msra.gmra.mxu0 %vm4552_vm10, %v5493_v26 }
 0x6e7   : > { %v5411_v37 = vpop.xlane.xlu2 %5410  ;;  %v8929_v15 = vpop.eup %8928 }
 0x6e8   : > { %v5432_v59 = vsub.f32 %v13329_v62, %v5411_v37  ;;  %v5168_v0 = vsel %vm4552_vm10, %v8929_v15, 0.0 }
 0x6e9   : > { %4868 = vadd.xlane.f32.xlu0 %v4867_v56  ;;  %v5137_v56 = vsub.f32 %v13324_v25, %v5122_v54 }
 0x6ea   : > { %v8931_v60 = vpop.eup %8930  ;;  %v5443_v6 = vmul.f32 1.442695, %v5432_v59 }
 0x6eb   : > { %v5196_v29 = vpack.c.bf16 %v8929_v15, %v8931_v60  ;;  %v5165_v22 = vsel %vm4552_vm10, %v8931_v60, 0.0 }
 0x6ec   : > { %8932 = vpow2.f32 %v5443_v6  ;;  %4612 = vadd.xlane.f32.xlu1 %v4611_v32  ;;  %v4570_v34 = vpop.xlane.xlu0 %4569 }
 0x6ed   : > { %8406 = vmatmul.msk.bf16.gmra.mxu1 %vm4552_vm10, %v5196_v29 }
 0x6ef   : > { %v4561_v57 = vpop.xlane.xlu2 %4560 }
 0x6f0   : > { %v4583_v47 = vsub.f32 %v13346_v35, %v4561_v57  ;;  %v5151_v57 = vmul.f32 1.442695, %v5137_v56 }
 0x6f1   : > { %5166 = vadd.xlane.f32.xlu0 %v5165_v22  ;;  %v5420_v22 = vpop.xlane.xlu1 %5419 }
 0x6f2   : > { %v8933_v62 = vpop.eup %8932  ;;  %v4594_v21 = vmul.f32 1.442695, %v4583_v47 }
 0x6f3   : > { %v5463_v38 = vsel %vm4552_vm10, %v8933_v62, 0.0 }
 0x6f4   : > { %8934 = vpow2.f32 %v4594_v21  ;;  %5464 = vadd.xlane.f32.xlu1 %v5463_v38  ;;  %v5435_v21 = vsub.f32 %v13333_v16, %v5420_v22 }
 0x6f7   : > { %v4818_v50 = vpop.xlane.xlu2 %4817 }
 0x6f8   : > { %v4837_v12 = vsub.f32 %v13362_v44, %v4818_v50 }
 0x6fa   : > { %v8935_v17 = vpop.eup %8934  ;;  %v4849_v52 = vmul.f32 1.442695, %v4837_v12 }
 0x6fb   : > { %v4614_v58 = vsel %vm4552_vm10, %v8935_v17, 0.0 }
 0x6fc   : > { %8936 = vpow2.f32 %v4849_v52  ;;  %4615 = vadd.xlane.f32.xlu2 %v4614_v58 }
 0x6ff   : > { %v5414_v35 = vpop.xlane.xlu2 %5413 }
 0x700   : > { %v5433_v46 = vsub.f32 %v13378_v7, %v5414_v35  ;;  %v4839_v7 = vsub.f32 %v13317_v18, %v4824_v51  ;;  %v4585_v18 = vsub.f32 %v13291_v1, %v4567_v40 }
 0x701   : > { %v5125_v6 = vpop.xlane.xlu0 %5124 }
 0x702   : > { %v8937_v28 = vpop.eup %8936  ;;  %v5445_v39 = vmul.f32 1.442695, %v5433_v46  ;;  %v5138_v54 = vsub.f32 %v13383_v30, %v5125_v6 }
 0x703   : > { %v4870_v14 = vsel %vm4552_vm10, %v8937_v28, 0.0  ;;  %v4898_v2 = vpack.c.bf16 %v8937_v28, %v8927_v41  ;;  %v4853_v41 = vmul.f32 1.442695, %v4839_v7 }
 0x704   : > { %8938 = vpow2.f32 %v5445_v39  ;;  %4871 = vadd.xlane.f32.xlu1 %v4870_v14  ;;  %5169 = vadd.xlane.f32.xlu2 %v5168_v0 }
 0x705   : > { %8401 = vmatmul.msk.bf16.gmra.mxu3 %vm4552_vm10, %v4898_v2 }
 0x707   : > { %v4564_v44 = vpop.xlane.xlu2 %4563 }
 0x708   : > { %v4584_v63 = vsub.f32 %v13392_v45, %v4564_v44  ;;  %v4586_v45 = vsub.f32 %v13339_v10, %v4570_v34  ;;  %v5153_v44 = vmul.f32 1.442695, %v5138_v54 }
 0x70a   : > { %v8939_v19 = vpop.eup %8938  ;;  %v4596_v23 = vmul.f32 1.442695, %v4584_v63  ;;  %v4600_v47 = vmul.f32 1.442695, %v4586_v45 }
 0x70b   : > { %v5466_v26 = vsel %vm4552_vm10, %v8939_v19, 0.0  ;;  %v5494_v48 = vpack.c.bf16 %v8939_v19, %v8933_v62 }
 0x70c   : > { %8940 = vpow2.f32 %v4596_v23  ;;  %5467 = vadd.xlane.f32.xlu0 %v5466_v26 }
 0x70d   : > { %8411 = vmatmul.msk.bf16.gmra.mxu0 %vm4552_vm10, %v5494_v48  ;;  %8942 = vpow2.f32 %v4853_v41 }
 0x70f   : > { %v4821_v37 = vpop.xlane.xlu2 %4820 }
 0x710   : > { %v4838_v59 = vsub.f32 %v13420_v55, %v4821_v37  ;;  %v4598_v55 = vmul.f32 1.442695, %v4585_v18 }
 0x712   : > { %v8941_v15 = vpop.eup %8940  ;;  %v4851_v60 = vmul.f32 1.442695, %v4838_v59 }
 0x713   : > { %v4617_v32 = vsel %vm4552_vm10, %v8941_v15, 0.0  ;;  %v4645_v29 = vpack.c.bf16 %v8941_v15, %v8935_v17  ;;  %v13529_v10 = vpop.eup %8942  ;;  %v13534_v17 = vpop.xlane.xlu0 %4572 }
 0x714   : > { %8944 = vpow2.f32 %v4851_v60  ;;  %4618 = vadd.xlane.f32.xlu1 %v4617_v32 }
 0x715   : > { %8396 = vmatmul.msk.bf16.gmra.mxu2 %vm4552_vm10, %v4645_v29  ;;  %8946 = vpow2.f32 %v5151_v57 }
 0x716   : > { %8948 = vpow2.f32 %v4600_v47 }
 0x717   : > { %v5119_v25 = vpop.xlane.xlu2 %5118  ;;  %8950 = vpow2.f32 %v4598_v55 }
 0x718   : > { %v5136_v62 = vsub.f32 %v13432_v31, %v5119_v25  ;;  %v5449_v31 = vmul.f32 1.442695, %v5435_v21 }
 0x71a   : > { %v8945_v1 = vpop.eup %8944  ;;  %v5149_v38 = vmul.f32 1.442695, %v5136_v62 }
 0x71b   : > { %v4873_v50 = vsel %vm4552_vm10, %v8945_v1, 0.0  ;;  %v4899_v12 = vpack.c.bf16 %v13529_v10, %v8945_v1  ;;  %v8947_v52 = vpop.eup %8946  ;;  %v5426_v51 = vpop.xlane.xlu0 %5425 }
 0x71c   : > { %8952 = vpow2.f32 %v5149_v38  ;;  %4874 = vadd.xlane.f32.xlu2 %v4873_v50  ;;  %v8949_v40 = vpop.eup %8948  ;;  %v5174_v14 = vsel %vm4552_vm10, %v8947_v52, 0.0  ;;  %v5437_v7 = vsub.f32 %v13423_v20, %v5426_v51 }
 0x71d   : > { %8402 = vmatmul.msk.bf16.gmra.mxu3 %vm4552_vm10, %v4899_v12  ;;  %v8951_v16 = vpop.eup %8950  ;;  %8954 = vpow2.f32 %v5449_v31  ;;  %v4623_v37 = vsel %vm4552_vm10, %v8949_v40, 0.0  ;;  %v4876_v31 = vsel %vm4552_vm10, %v13529_v10, 0.0 }
 0x71e   : > { %v4646_v0 = vpack.c.bf16 %v8949_v40, %v8951_v16  ;;  %v4620_v29 = vsel %vm4552_vm10, %v8951_v16, 0.0 }
 0x71f   : > { %v5417_v58 = vpop.xlane.xlu2 %5416 }
 0x720   : > { %v5434_v35 = vsub.f32 %v13444_v43, %v5417_v58  ;;  %v5423_v43 = vpop.xlane.xlu1 %5422 }
 0x721   : > { %v5436_v59 = vsub.f32 %v13367_v24, %v5423_v43 }
 0x722   : > { %v8953_v46 = vpop.eup %8952  ;;  %v5447_v28 = vmul.f32 1.442695, %v5434_v35 }
 0x723   : > { %v5171_v39 = vsel %vm4552_vm10, %v8953_v46, 0.0  ;;  %v5197_v2 = vpack.c.bf16 %v8947_v52, %v8953_v46  ;;  %v8955_v19 = vpop.eup %8954  ;;  %v5451_v60 = vmul.f32 1.442695, %v5436_v59 }
 0x724   : > { %8956 = vpow2.f32 %v5447_v28  ;;  %5172 = vadd.xlane.f32.xlu0 %v5171_v39  ;;  %5175 = vadd.xlane.f32.xlu2 %v5174_v14  ;;  %v5472_v48 = vsel %vm4552_vm10, %v8955_v19, 0.0 }
 0x725   : > { %8397 = vmatmul.msk.bf16.gmra.mxu2 %vm4552_vm10, %v4646_v0  ;;  %8407 = vmatmul.msk.bf16.gmra.mxu1 %vm4552_vm10, %v5197_v2  ;;  %8958 = vpow2.f32 %v5153_v44 }
 0x727   : > { %v4827_v63 = vpop.xlane.xlu2 %4826 }
 0x728   : > { %v4840_v30 = vsub.f32 %v13455_v61, %v4827_v63  ;;  %v5453_v61 = vmul.f32 1.442695, %v5437_v7  ;;  %v4833_v56 = vpop.xlane.xlu1 %4832 }
 0x729   : > { %v4842_v6 = vsub.f32 %v13405_v13, %v4833_v56  ;;  %v4587_v13 = vsub.f32 %v13395_v11, %v13534_v17 }
 0x72a   : > { %v8957_v23 = vpop.eup %8956  ;;  %v4855_v34 = vmul.f32 1.442695, %v4840_v30 }
 0x72b   : > { %v5469_v26 = vsel %vm4552_vm10, %v8957_v23, 0.0  ;;  %v5495_v41 = vpack.c.bf16 %v8955_v19, %v8957_v23  ;;  %v8959_v45 = vpop.eup %8958  ;;  %v4859_v47 = vmul.f32 1.442695, %v4842_v6  ;;  %v4602_v35 = vmul.f32 1.442695, %v4587_v13 }
 0x72c   : > { %8960 = vpow2.f32 %v4855_v34  ;;  %5470 = vadd.xlane.f32.xlu1 %v5469_v26  ;;  %5473 = vadd.xlane.f32.xlu0 %v5472_v48  ;;  %v5177_v24 = vsel %vm4552_vm10, %v8959_v45, 0.0 }
 0x72d   : > { %4624 = vadd.xlane.f32.xlu2 %v4623_v37  ;;  %8412 = vmatmul.msk.bf16.gmra.mxu0 %vm4552_vm10, %v5495_v41  ;;  %8962 = vpow2.f32 %v5453_v61 }
 0x72f   : > { %v4830_v20 = vpop.xlane.xlu2 %4829 }
 0x730   : > { %v4841_v15 = vsub.f32 %v13466_v9, %v4830_v20  ;;  %v5131_v9 = vpop.xlane.xlu0 %5130  ;;  %v5429_v55 = vpop.xlane.xlu1 %5428 }
 0x731   : > { %v5140_v1 = vsub.f32 %v13435_v33, %v5131_v9  ;;  %v5438_v38 = vsub.f32 %v13452_v4, %v5429_v55 }
 0x732   : > { %v8961_v18 = vpop.eup %8960  ;;  %v4857_v32 = vmul.f32 1.442695, %v4841_v15 }
 0x733   : > { %v4879_v57 = vsel %vm4552_vm10, %v8961_v18, 0.0  ;;  %v8963_v25 = vpop.eup %8962  ;;  %v5157_v33 = vmul.f32 1.442695, %v5140_v1  ;;  %v5455_v4 = vmul.f32 1.442695, %v5438_v38 }
 0x734   : > { %8964 = vpow2.f32 %v4857_v32  ;;  %4621 = vadd.xlane.f32.xlu1 %v4620_v29  ;;  %4880 = vadd.xlane.f32.xlu0 %v4879_v57  ;;  %v5478_v58 = vsel %vm4552_vm10, %v8963_v25, 0.0 }
 0x735   : > { %8966 = vpow2.f32 %v5451_v60  ;;  %5178 = vadd.xlane.f32.xlu2 %v5177_v24 }
 0x736   : > { %8968 = vpow2.f32 %v4859_v47 }
 0x737   : > { %v5128_v22 = vpop.xlane.xlu2 %5127 }
 0x738   : > { %v5139_v62 = vsub.f32 %v13475_v3, %v5128_v22  ;;  %v4580_v46 = vpop.xlane.xlu1 %4579 }
 0x739   : > { %v4589_v63 = vsub.f32 %v13463_v5, %v4580_v46 }
 0x73a   : > { %v8965_v21 = vpop.eup %8964  ;;  %v5155_v50 = vmul.f32 1.442695, %v5139_v62 }
 0x73b   : > { %v8967_v12 = vpop.eup %8966  ;;  %v4882_v52 = vsel %vm4552_vm10, %v8965_v21, 0.0  ;;  %v4900_v40 = vpack.c.bf16 %v8965_v21, %v8961_v18  ;;  %v4606_v41 = vmul.f32 1.442695, %v4589_v63 }
 0x73c   : > { %8970 = vpow2.f32 %v5155_v50  ;;  %4877 = vadd.xlane.f32.xlu1 %v4876_v31  ;;  %5479 = vadd.xlane.f32.xlu0 %v5478_v58  ;;  %v5496_v11 = vpack.c.bf16 %v8963_v25, %v8967_v12  ;;  %v8969_v17 = vpop.eup %8968  ;;  %v5475_v39 = vsel %vm4552_vm10, %v8967_v12, 0.0 }
 0x73d   : > { %4883 = vadd.xlane.f32.xlu2 %v4882_v52  ;;  %8403 = vmatmul.msk.bf16.gmra.mxu3 %vm4552_vm10, %v4900_v40  ;;  %8972 = vpow2.f32 %v4602_v35  ;;  %v4885_v0 = vsel %vm4577_vm11, %v8969_v17, 0.0  ;;  %v4901_v34 = vpack.c.bf16 %v8969_v17, %v8969_v17 }
 0x73e   : > { %8413 = vmatmul.msk.bf16.gmra.mxu0 %vm4552_vm10, %v5496_v11  ;;  %8974 = vpow2.f32 %v5157_v33 }
 0x73f   : > { %v4576_v3 = vpop.xlane.xlu2 %4575  ;;  %8976 = vpow2.f32 %v5455_v4  ;;  %v4863_v28 = vpop.xlane.xlu0 %4862 }
 0x740   : > { %v4588_v10 = vsub.f32 %v13483_v8, %v4576_v3  ;;  %v4866_v19 = vpop.xlane.xlu1 %4865 }
 0x742   : > { %v8971_v16 = vpop.eup %8970  ;;  %v4604_v54 = vmul.f32 1.442695, %v4588_v10 }
 0x743   : > { %v5180_v14 = vsel %vm4552_vm10, %v8971_v16, 0.0  ;;  %v5198_v2 = vpack.c.bf16 %v8971_v16, %v8959_v45  ;;  %v13571_v8 = vpop.eup %8972 }
 0x744   : > { %8978 = vpow2.f32 %v4604_v54  ;;  %5476 = vadd.xlane.f32.xlu1 %v5475_v39  ;;  %4886 = vadd.xlane.f32.xlu0 %v4885_v0  ;;  %v8975_v43 = vpop.eup %8974 }
 0x745   : > { %5181 = vadd.xlane.f32.xlu2 %v5180_v14  ;;  %8408 = vmatmul.msk.bf16.gmra.mxu1 %vm4552_vm10, %v5198_v2  ;;  %v8977_v44 = vpop.eup %8976  ;;  %v5183_v23 = vsel %vm4577_vm11, %v8975_v43, 0.0  ;;  %8980 = vpow2.f32 %v4606_v41  ;;  %v5199_v37 = vpack.c.bf16 %v8975_v43, %v8975_v43 }
 0x746   : > { %v5481_v30 = vsel %vm4577_vm11, %v8977_v44, 0.0  ;;  %v5497_v48 = vpack.c.bf16 %v8977_v44, %v8977_v44 }
 0x747   : > { %v5161_v26 = vpop.xlane.xlu0 %5160 }
 0x748   : > { %v5164_v59 = vpop.xlane.xlu1 %5163  ;;  %8982 = vrcp.f32 %v5161_v26 }
 0x749   : > { %8984 = vrcp.f32 %v5164_v59 }
 0x74a   : > { %v13573_v51 = vpop.eup %8978  ;;  %8986 = vrcp.f32 %v4863_v28 }
 0x74b   : > { %v4647_v7 = vpack.c.bf16 %v13573_v51, %v13571_v8  ;;  %v13584_v56 = vpop.eup %8980 }
 0x74c   : > { %5482 = vadd.xlane.f32.xlu0 %v5481_v30  ;;  %5184 = vadd.xlane.f32.xlu1 %v5183_v23  ;;  %v4648_v18 = vpack.c.bf16 %v13584_v56, %v13584_v56 }
 0x74d   : > { %8398 = vmatmul.msk.bf16.gmra.mxu2 %vm4552_vm10, %v4647_v7  ;;  %8404 = vmatmul.msk.bf16.gmra.mxu3 %vm4552_vm10, %v4901_v34 }
 0x74e   : > { %8414 = vmatmul.msk.bf16.gmra.mxu0 %vm4552_vm10, %v5497_v48  ;;  %v8983_v15 = vpop.eup %8982 }
 0x74f   : > { %v8985_v32 = vpop.eup %8984  ;;  %v4610_v40 = vpop.xlane.xlu2 %4609 }
 0x750   : > { %v4943_v20 = vpop.f32.mrf.mxu3  ;;  %v8987_v57 = vpop.eup %8986 }
 0x751   : > { %v4967_v55 = vmul.f32 %v8987_v57, %v4943_v20 }
 0x752   : > { %v5241_v5 = vpop.f32.mrf.mxu1 }
 0x753   : > { %v5265_v45 = vmul.f32 %v8983_v15, %v5241_v5 }
 0x754   : > { %v5459_v61 = vpop.xlane.xlu0 %5458 }
 0x755   : > { %8409 = vmatmul.msk.bf16.gmra.mxu1 %vm4552_vm10, %v5199_v37  ;;  %8988 = vrcp.f32 %v5459_v61 }
 0x756   : > { %8990 = vrcp.f32 %v4866_v19 }
 0x757   : > { %v5462_v24 = vpop.xlane.xlu1 %5461 }
 0x758   : > { %v4945_v22 = vpop.f32.mrf.mxu3  ;;  %8992 = vrcp.f32 %v5462_v24 }
 0x75a   : > { %v5243_v60 = vpop.f32.mrf.mxu1 }
 0x75b   : > { %v5266_v29 = vmul.f32 %v8985_v32, %v5243_v60  ;;  %v8989_v47 = vpop.eup %8988 }
 0x75c   : > { %v4869_v6 = vpop.xlane.xlu0 %4868  ;;  %v8991_v62 = vpop.eup %8990 }
 0x75d   : > { %5283 = vrot.lane.b32.xlu2 %v5265_v45, %s14778_s26  ;;  %8399 = vmatmul.msk.bf16.gmra.mxu2 %vm4552_vm10, %v4648_v18  ;;  %v4968_v1 = vmul.f32 %v8991_v62, %v4945_v22 }
 0x75e   : > { %v8993_v21 = vpop.eup %8992 }
 0x75f   : > { %v4613_v58 = vpop.xlane.xlu1 %4612 }
 0x760   : > { %5285 = vrot.lane.b32.xlu0 %v5266_v29, %s14778_s26  ;;  %v13596_v33 = vpop.f32.mrf.mxu2 }
 0x762   : > { %v5539_v9 = vpop.f32.mrf.mxu0 }
 0x763   : > { %v5563_v25 = vmul.f32 %v8989_v47, %v5539_v9 }
 0x764   : > { %v5167_v13 = vpop.xlane.xlu0 %5166 }
 0x765   : > { %8994 = vrcp.f32 %v5167_v13  ;;  %4985 = vrot.lane.b32.xlu1 %v4967_v55, %s9390_s29  ;;  %5581 = vrot.lane.b32.xlu2 %v5563_v25, %s14780_s22 }
 0x766   : > { %8996 = vrcp.f32 %v4869_v6 }
 0x767   : > { %v5465_v11 = vpop.xlane.xlu1 %5464 }
 0x768   : > { %4987 = vrot.lane.b32.xlu0 %v4968_v1, %s9390_s29  ;;  %8998 = vrcp.f32 %v5465_v11  ;;  %v13600_v14 = vpop.f32.mrf.mxu2 }
 0x76a   : > { %v5541_v38 = vpop.f32.mrf.mxu0  ;;  %v5246_v12 = vpop.f32.mrf.mxu1 }
 0x76b   : > { %v8995_v50 = vpop.eup %8994  ;;  %v5564_v31 = vmul.f32 %v8993_v21, %v5541_v38 }
 0x76c   : > { %v5267_v52 = vmul.f32 %v8995_v50, %v5246_v12  ;;  %v8997_v17 = vpop.eup %8996 }
 0x76d   : > { %5583 = vrot.lane.b32.xlu2 %v5564_v31, %s14780_s22 }
 0x76e   : > { %v8999_v46 = vpop.eup %8998 }
 0x76f   : > { %v4616_v35 = vpop.xlane.xlu2 %4615 }
 0x770   : > { %5287 = vrot.lane.b32.xlu0 %v5267_v52, %s14778_s26 }
 0x772   : > { %v5248_v19 = vpop.f32.mrf.mxu1 }
 0x777   : > { %v4872_v4 = vpop.xlane.xlu1 %4871  ;;  %v5170_v3 = vpop.xlane.xlu2 %5169 }
 0x778   : > { %9000 = vrcp.f32 %v4872_v4 }
 0x779   : > { %9002 = vrcp.f32 %v5170_v3 }
 0x77e   : > { %v9001_v39 = vpop.eup %9000 }
 0x77f   : > { %v9003_v2 = vpop.eup %9002  ;;  %v5468_v43 = vpop.xlane.xlu0 %5467 }
 0x780   : > { %v5268_v30 = vmul.f32 %v9003_v2, %v5248_v19  ;;  %9004 = vrcp.f32 %v5468_v43 }
 0x786   : > { %v9005_v41 = vpop.eup %9004 }
 0x787   : > { %v4619_v23 = vpop.xlane.xlu1 %4618 }
 0x788   : > { %v4948_v10 = vpop.f32.mrf.mxu3 }
 0x789   : > { %v4969_v16 = vmul.f32 %v8997_v17, %v4948_v10 }
 0x78a   : > { %v5544_v54 = vpop.f32.mrf.mxu0 }
 0x78b   : > { %v5565_v28 = vmul.f32 %v8999_v46, %v5544_v54  ;;  %4989 = vrot.lane.b32.xlu1 %v4969_v16, %s9390_s29 }
 0x78d   : > { %5585 = vrot.lane.b32.xlu2 %v5565_v28, %s14780_s22 }
 0x78f   : > { %v4875_v0 = vpop.xlane.xlu2 %4874 }
 0x790   : > { %v4950_v44 = vpop.f32.mrf.mxu3  ;;  %9006 = vrcp.f32 %v4875_v0 }
 0x791   : > { %v4970_v63 = vmul.f32 %v9001_v39, %v4950_v44 }
 0x792   : > { %v5546_v7 = vpop.f32.mrf.mxu0 }
 0x793   : > { %4991 = vrot.lane.b32.xlu0 %v4970_v63, %s9390_s29  ;;  %v5566_v5 = vmul.f32 %v9005_v41, %v5546_v7 }
 0x795   : > { %5289 = vrot.lane.b32.xlu2 %v5268_v30, %s14778_s26 }
 0x796   : > { %v9007_v20 = vpop.eup %9006 }
 0x797   : > { %v5176_v34 = vpop.xlane.xlu2 %5175  ;;  %v5173_v26 = vpop.xlane.xlu0 %5172 }
 0x798   : > { %v4686_v48 = vpop.f32.mrf.mxu2  ;;  %9008 = vrcp.f32 %v5173_v26 }
 0x799   : > { %9010 = vrcp.f32 %v5176_v34  ;;  %v4626_v34 = vsel %vm4552_vm10, %v13571_v8, 0.0  ;;  %v8722_v8 = vld [vmem:[%s14535_s13 + $0x38] sm:$0xff] }
 0x79a   : > { %5760 = vmatpush.bf16.msrb.mxu2 %v8722_v8 }
 0x79d   : > { %5587 = vrot.lane.b32.xlu2 %v5566_v5, %s14780_s22 }
 0x79e   : > { %v9009_v45 = vpop.eup %9008 }
 0x79f   : > { %v5471_v37 = vpop.xlane.xlu1 %5470  ;;  %v5474_v60 = vpop.xlane.xlu0 %5473 }
 0x7a0   : > { %v4625_v59 = vpop.xlane.xlu2 %4624  ;;  %v4688_v61 = vpop.f32.mrf.mxu2  ;;  %9012 = vrcp.f32 %v5471_v37 }
 0x7a1   : > { %v4953_v15 = vpop.f32.mrf.mxu3  ;;  %v9011_v57 = vpop.eup %9010  ;;  %9014 = vrcp.f32 %v4610_v40 }
 0x7a2   : > { %v4971_v18 = vmul.f32 %v9007_v20, %v4953_v15  ;;  %v5251_v6 = vpop.f32.mrf.mxu1  ;;  %9016 = vrcp.f32 %v4613_v58 }
 0x7a3   : > { %v5269_v32 = vmul.f32 %v9009_v45, %v5251_v6  ;;  %9018 = vrcp.f32 %v4616_v35 }
 0x7a4   : > { %4993 = vrot.lane.b32.xlu1 %v4971_v18, %s9390_s29  ;;  %9020 = vrcp.f32 %v5474_v60 }
 0x7a5   : > { %5291 = vrot.lane.b32.xlu0 %v5269_v32, %s14778_s26 }
 0x7a6   : > { %v9013_v9 = vpop.eup %9012 }
 0x7a7   : > { %v4622_v29 = vpop.xlane.xlu1 %4621  ;;  %v4881_v62 = vpop.xlane.xlu0 %4880 }
 0x7a8   : > { %v5179_v24 = vpop.xlane.xlu2 %5178  ;;  %v4691_v47 = vpop.f32.mrf.mxu2  ;;  %9022 = vrcp.f32 %v4622_v29  ;;  %v8721_v29 = vld [vmem:[%s14535_s13 + $0x30] sm:$0xff] }
 0x7a9   : > { %9024 = vrcp.f32 %v4619_v23  ;;  %v9015_v1 = vpop.eup %9014  ;;  %v4955_v28 = vpop.f32.mrf.mxu3  ;;  %5761 = vmatpush.bf16.msrb.mxu2 %v8721_v29 }
 0x7aa   : > { %v5253_v55 = vpop.f32.mrf.mxu1  ;;  %v5549_v22 = vpop.f32.mrf.mxu0  ;;  %9026 = vrcp.f32 %v4625_v59  ;;  %v4705_v31 = vmul.f32 %v9015_v1, %v13596_v33  ;;  %v8719_v1 = vld [vmem:[%s14535_s13 + $0x20] sm:$0xff] }
 0x7ab   : > { %v5270_v25 = vmul.f32 %v9011_v57, %v5253_v55  ;;  %v5567_v13 = vmul.f32 %v9013_v9, %v5549_v22  ;;  %v9017_v38 = vpop.eup %9016 }
 0x7ac   : > { %v9019_v50 = vpop.eup %9018  ;;  %v4706_v40 = vmul.f32 %v9017_v38, %v13600_v14  ;;  %4715 = vst.msk [vmem:[#allocation2] sm:$0xff] %vm4714_vm7, %v4705_v31  ;;  %v8718_v31 = vld [vmem:[%s14535_s13 + $0x18] sm:$0xff] }
 0x7ad   : > { %5293 = vrot.lane.b32.xlu1 %v5270_v25, %s14778_s26  ;;  %5589 = vrot.lane.b32.xlu0 %v5567_v13, %s14780_s22  ;;  %v9021_v12 = vpop.eup %9020  ;;  %v4707_v3 = vmul.f32 %v9019_v50, %v4686_v48 }
 0x7ae   : > { %v9023_v58 = vpop.eup %9022  ;;  %4716 = vst.msk [vmem:[#allocation2 + $0x8] sm:$0xff] %vm4714_vm7, %v4706_v40 }
 0x7af   : > { %v4878_v21 = vpop.xlane.xlu1 %4877  ;;  %v9025_v4 = vpop.eup %9024  ;;  %v4709_v54 = vmul.f32 %v9023_v58, %v4691_v47  ;;  %4717 = vst.msk [vmem:[#allocation2 + $0x10] sm:$0xff] %vm4714_vm7, %v4707_v3  ;;  %v8720_v47 = vld [vmem:[%s14535_s13 + $0x28] sm:$0xff] }
 0x7b0   : > { %9028 = vrcp.f32 %v4878_v21  ;;  %v4884_v35 = vpop.xlane.xlu2 %4883  ;;  %v4693_v17 = vpop.f32.mrf.mxu2  ;;  %v4708_v16 = vmul.f32 %v9025_v4, %v4688_v61  ;;  %5762 = vmatpush.bf16.msrb.mxu2 %v8720_v47  ;;  %v13675_v4 = vld [vmem:[#allocation2 + $0x30] sm:$0xff] }
 0x7b1   : > { %v9027_v10 = vpop.eup %9026  ;;  %v13612_v39 = vpop.xlane.xlu0 %5479  ;;  %4719 = vst.msk [vmem:[#allocation2 + $0x20] sm:$0xff] %vm4714_vm7, %v4709_v54  ;;  %9030 = vrcp.f32 %v5179_v24 }
 0x7b2   : > { %v5551_v52 = vpop.f32.mrf.mxu0  ;;  %v4710_v33 = vmul.f32 %v9027_v10, %v4693_v17  ;;  %4718 = vst.msk [vmem:[#allocation2 + $0x18] sm:$0xff] %vm4714_vm7, %v4708_v16 }
 0x7b3   : > { %v5568_v11 = vmul.f32 %v9021_v12, %v5551_v52 }
 0x7b4   : > { %4720 = vst.msk [vmem:[#allocation2 + $0x28] sm:$0xff] %vm4714_vm7, %v4710_v33  ;;  %5763 = vmatpush.bf16.msrb.mxu2 %v8719_v1 }
 0x7b5   : > { %5591 = vrot.lane.b32.xlu1 %v5568_v11, %s14780_s22  ;;  %v8717_v11 = vld [vmem:[%s14535_s13 + $0x10] sm:$0xff] }
 0x7b6   : > { %v9029_v46 = vpop.eup %9028 }
 0x7b7   : > { %v4972_v0 = vmul.f32 %v9029_v46, %v4955_v28  ;;  %v5477_v43 = vpop.xlane.xlu1 %5476  ;;  %v9031_v19 = vpop.eup %9030  ;;  %v8715_v28 = vld [vmem:[%s14535_s13] sm:$0xff] }
 0x7b8   : > { %v5182_v2 = vpop.xlane.xlu2 %5181  ;;  %9032 = vrcp.f32 %v5477_v43  ;;  %5764 = vmatpush.bf16.msrb.mxu2 %v8718_v31 }
 0x7b9   : > { %4995 = vrot.lane.b32.xlu0 %v4972_v0, %s9390_s29  ;;  %v13621_v44 = vpop.xlane.xlu0 %4886  ;;  %9034 = vrcp.f32 %v4881_v62 }
 0x7ba   : > { %9036 = vrcp.f32 %v5182_v2 }
 0x7bb   : > { %v5554_v14 = vpop.f32.mrf.mxu0  ;;  %9038 = vrcp.f32 %v4884_v35  ;;  %v4629_v35 = vsel %vm4552_vm10, %v13573_v51, 0.0  ;;  %v8716_v51 = vld [vmem:[%s14535_s13 + $0x8] sm:$0xff] }
 0x7bc   : > { %9040 = vrcp.f32 %v13612_v39  ;;  %5765 = vmatpush.bf16.msrb.mxu2 %v8717_v11 }
 0x7be   : > { %v9033_v48 = vpop.eup %9032 }
 0x7bf   : > { %v5569_v59 = vmul.f32 %v9033_v48, %v5554_v14  ;;  %v13633_v20 = vpop.xlane.xlu1 %5184  ;;  %v9035_v18 = vpop.eup %9034 }
 0x7c0   : > { %v4958_v63 = vpop.f32.mrf.mxu3  ;;  %v5284_v26 = vpop.permute.xlu2 %5283  ;;  %5766 = vmatpush.bf16.msrb.mxu2 %v8716_v51 }
 0x7c1   : > { %v13628_v5 = vpop.xlane.xlu0 %5482  ;;  %v4973_v57 = vmul.f32 %v9035_v18, %v4958_v63  ;;  %v9037_v25 = vpop.eup %9036 }
 0x7c2   : > { %v5256_v30 = vpop.f32.mrf.mxu1  ;;  %v9039_v21 = vpop.eup %9038 }
 0x7c3   : > { %v5271_v23 = vmul.f32 %v9031_v19, %v5256_v30  ;;  %v13623_v7 = vpop.f32.mrf.mxu0  ;;  %v9041_v3 = vpop.eup %9040 }
 0x7c4   : > { %v5570_v17 = vmul.f32 %v9041_v3, %v13623_v7  ;;  %5767 = vmatpush.bf16.msrb.mxu2 %v8715_v28 }
 0x7c5   : > { %5295 = vrot.lane.b32.xlu1 %v5271_v23, %s14778_s26 }
 0x7c6   : > { %4627 = vadd.xlane.f32.xlu2 %v4626_v34 }
 0x7c8   : > { %v4960_v41 = vpop.f32.mrf.mxu3  ;;  %v5582_v45 = vpop.permute.xlu2 %5581 }
 0x7c9   : > { %v4974_v50 = vmul.f32 %v9039_v21, %v4960_v41 }
 0x7ca   : > { %v5258_v37 = vpop.f32.mrf.mxu1 }
 0x7cb   : > { %v13630_v61 = vpop.f32.mrf.mxu0  ;;  %v5272_v38 = vmul.f32 %v9037_v25, %v5258_v37  ;;  %v4632_v37 = vsel %vm4577_vm11, %v13584_v56, 0.0 }
 0x7cd   : > { %5593 = vrot.lane.b32.xlu1 %v5569_v59, %s14780_s22 }
 0x7d0   : > { %v13635_v15 = vpop.f32.mrf.mxu2  ;;  %v13640_v60 = vpop.f32.mrf.mxu3 }
 0x7d1   : > { %v5584_v12 = vpop.permute.xlu2 %5583 }
 0x7d2   : > { %v13642_v6 = vpop.f32.mrf.mxu1  ;;  %v5286_v32 = vpop.permute.xlu0 %5285 }
 0x7d3   : > { %v5561_v24 = vpop.f32.mrf.mxu0 }
 0x7d5   : > { %4997 = vrot.lane.b32.xlu1 %v4973_v57, %s9390_s29 }
 0x7d7   : > { %v4986_v9 = vpop.permute.xlu1 %4985 }
 0x7d8   : > { %5013 = vst.msk [vmem:[#allocation2] sm:$0xff] %vm5012_vm8, %v4986_v9  ;;  %v13652_v55 = vpop.f32.mrf.mxu2  ;;  %v4965_v22 = vpop.f32.mrf.mxu3 }
 0x7d9   : > { %5311 = vst.msk [vmem:[#allocation2] sm:$0xff] %vm5310_vm0, %v5284_v26 }
 0x7da   : > { %5609 = vst.msk [vmem:[#allocation2] sm:$0xff] %vm5608_vm12, %v5582_v45  ;;  %v5263_v13 = vpop.f32.mrf.mxu1  ;;  %v4988_v62 = vpop.permute.xlu0 %4987 }
 0x7db   : > { %5014 = vst.msk [vmem:[#allocation2 + $0x8] sm:$0xff] %vm5012_vm8, %v4988_v62 }
 0x7dc   : > { %5312 = vst.msk [vmem:[#allocation2 + $0x8] sm:$0xff] %vm5310_vm0, %v5286_v32 }
 0x7dd   : > { %5610 = vst.msk [vmem:[#allocation2 + $0x8] sm:$0xff] %vm5608_vm12, %v5584_v12  ;;  %5297 = vrot.lane.b32.xlu1 %v5272_v38, %s14778_s26 }
 0x7de   : > { %4999 = vrot.lane.b32.xlu2 %v4974_v50, %s9390_s29 }
 0x7e0   : > { %v13668_v52 = vpop.f32.mrf.mxu2 }
 0x7e1   : > { %v5619_v58 = vld [vmem:[#allocation2] sm:$0xff] }
 0x7e2   : > { %v5637_v40 = vmul.f32 1.442695, %v5619_v58  ;;  %5922 = vst [vmem:[#allocation2] sm:$0xff] %v13675_v4  ;;  %vm5628_vm13 = vcmp.gt.f32.partialorder %v5619_v58, 0.0  ;;  %v5288_v26 = vpop.permute.xlu0 %5287 }
 0x7e3   : > { %4630 = vadd.xlane.f32.xlu0 %v4629_v35 }
 0x7e4   : > { %9042 = vpow2.f32 %v5637_v40  ;;  %v5620_v10 = vld [vmem:[#allocation2 + $0x8] sm:$0xff] }
 0x7e5   : > { %9044 = vrcp.f32 %v13621_v44  ;;  %v5639_v16 = vmul.f32 1.442695, %v5620_v10  ;;  %5923 = vst [vmem:[#allocation2 + $0x8] sm:$0xff] %v13675_v4  ;;  %vm5629_vm14 = vcmp.gt.f32.partialorder %v5620_v10, 0.0 }
 0x7e6   : > { %5595 = vrot.lane.b32.xlu2 %v5570_v17, %s14780_s22 }
 0x7e7   : > { %9046 = vpow2.f32 %v5639_v16  ;;  %v5586_v30 = vpop.permute.xlu2 %5585 }
 0x7e8   : > { %v4703_v46 = vpop.f32.mrf.mxu2  ;;  %9048 = vrcp.f32 %v13628_v5 }
 0x7e9   : > { %9050 = vrcp.f32 %v13633_v20 }
 0x7ea   : > { %v9043_v54 = vpop.eup %9042 }
 0x7eb   : > { %v9045_v39 = vpop.eup %9044  ;;  %v8415_v0 = vadd.f32 -1.0, %v9043_v54 }
 0x7ec   : > { %v4975_v33 = vmul.f32 %v9045_v39, %v13640_v60 }
 0x7ed   : > { %v9047_v14 = vpop.eup %9046  ;;  %v5664_v43 = vsel %vm5628_vm13, %v5619_v58, %v8415_v0  ;;  %vm4723_vm13 = vcmask 122880  }
 0x7ee   : > { %v8416_v2 = vadd.f32 -1.0, %v9047_v14  ;;  %5001 = vrot.lane.b32.xlu2 %v4975_v33, %s9390_s29  ;;  %v9049_v19 = vpop.eup %9048 }
 0x7ef   : > { %v9051_v23 = vpop.eup %9050  ;;  %v5571_v7 = vmul.f32 %v9049_v19, %v13630_v61  ;;  %v5290_v48 = vpop.permute.xlu2 %5289 }
 0x7f0   : > { %v5665_v44 = vsel %vm5629_vm14, %v5620_v10, %v8416_v2  ;;  %v5273_v34 = vmul.f32 %v9051_v23, %v13642_v6  ;;  %vm5021_vm14 = vcmask 254080  }
 0x7f1   : > { %v5691_v63 = vpack.c.bf16 %v5665_v44, %v5664_v43 }
 0x7f3   : > { %5768 = vmatmul.bf16.vlgmr.msrb.gmra.mxu2 %v5691_v63 }
 0x7f6   : > { %5597 = vrot.lane.b32.xlu2 %v5571_v7, %s14780_s22  ;;  %s15270_s22 = smov 96  }
 0x7f7   : > { %5299 = vrot.lane.b32.xlu0 %v5273_v34, %s14778_s26  ;;  %v5588_v59 = vpop.permute.xlu2 %5587  ;;  %s15269_s26 = smov 112  }
 0x7fd   : > { %v4990_v41 = vpop.permute.xlu1 %4989 }
 0x7fe   : > { %5015 = vst.msk [vmem:[#allocation2 + $0x10] sm:$0xff] %vm5012_vm8, %v4990_v41 }
 0x7ff   : > { %5313 = vst.msk [vmem:[#allocation2 + $0x10] sm:$0xff] %vm5310_vm0, %v5288_v26 }
 0x800   : > { %5611 = vst.msk [vmem:[#allocation2 + $0x10] sm:$0xff] %vm5608_vm12, %v5586_v30 }
 0x805   : > { %v4992_v5 = vpop.permute.xlu0 %4991 }
 0x806   : > { %5016 = vst.msk [vmem:[#allocation2 + $0x18] sm:$0xff] %vm5012_vm8, %v4992_v5 }
 0x807   : > { %v5621_v61 = vld [vmem:[#allocation2 + $0x10] sm:$0xff]  ;;  %5314 = vst.msk [vmem:[#allocation2 + $0x18] sm:$0xff] %vm5310_vm0, %v5290_v48  ;;  %4633 = vadd.xlane.f32.xlu1 %v4632_v37  ;;  %v8726_v48 = vld [vmem:[%s14536_s14 + $0x18] sm:$0xff] }
 0x808   : > { %5612 = vst.msk [vmem:[#allocation2 + $0x18] sm:$0xff] %vm5608_vm12, %v5588_v59  ;;  %v5641_v20 = vmul.f32 1.442695, %v5621_v61  ;;  %vm5630_vm15 = vcmp.gt.f32.partialorder %v5621_v61, 0.0  ;;  %5876 = vmatpush.bf16.msra.mxu3 %v8726_v48  ;;  %v8725_v37 = vld [vmem:[%s14536_s14 + $0x10] sm:$0xff] }
 0x809   : > { %5924 = vst [vmem:[#allocation2 + $0x10] sm:$0xff] %v13675_v4 }
 0x80a   : > { %9052 = vpow2.f32 %v5641_v20 }
 0x80c   : > { %5877 = vmatpush.bf16.msra.mxu3 %v8725_v37 }
 0x80f   : > { %v5622_v8 = vld [vmem:[#allocation2 + $0x18] sm:$0xff] }
 0x810   : > { %v5643_v45 = vmul.f32 1.442695, %v5622_v8  ;;  %5925 = vst [vmem:[#allocation2 + $0x18] sm:$0xff] %v13675_v4  ;;  %v9053_v60 = vpop.eup %9052  ;;  %vm5631_vm2 = vcmp.gt.f32.partialorder %v5622_v8, 0.0 }
 0x811   : > { %v8417_v6 = vadd.f32 -1.0, %v9053_v60 }
 0x812   : > { %9054 = vpow2.f32 %v5643_v45 }
 0x813   : > { %v5666_v57 = vsel %vm5630_vm15, %v5621_v61, %v8417_v6  ;;  %v8724_v61 = vld [vmem:[%s14536_s14 + $0x8] sm:$0xff]  ;;  %vm5319_vm15 = vcmask 385280   ;;  %v8723_v6 = vld [vmem:[%s14536_s14] sm:$0xff] }
 0x814   : > { %5878 = vmatpush.bf16.msra.mxu3 %v8724_v61  ;;  %v5905_v61 = vld [vmem:[%s14537_s15] sm:$0x3] }
 0x816   : > { %v4994_v18 = vpop.permute.xlu1 %4993 }
 0x817   : > { %5017 = vst.msk [vmem:[#allocation2 + $0x20] sm:$0xff] %vm5012_vm8, %v4994_v18  ;;  %v5292_v56 = vpop.permute.xlu0 %5291 }
 0x818   : > { %v9055_v32 = vpop.eup %9054  ;;  %5315 = vst.msk [vmem:[#allocation2 + $0x20] sm:$0xff] %vm5310_vm0, %v5292_v56  ;;  %5879 = vmatpush.bf16.msra.mxu3 %v8723_v6 }
 0x819   : > { %v8418_v29 = vadd.f32 -1.0, %v9055_v32 }
 0x81b   : > { %v5667_v24 = vsel %vm5631_vm2, %v5622_v8, %v8418_v29  ;;  %vm5617_vm2 = vcmask 516480  }
 0x81c   : > { %v5692_v47 = vpack.c.bf16 %v5667_v24, %v5666_v57 }
 0x81e   : > { %5773 = vmatmul.bf16.gmra.mxu2 %v5692_v47 }
 0x81f   : > { %v5590_v9 = vpop.permute.xlu0 %5589  ;;  %v5294_v22 = vpop.permute.xlu1 %5293 }
 0x820   : > { %5613 = vst.msk [vmem:[#allocation2 + $0x20] sm:$0xff] %vm5608_vm12, %v5590_v9 }
 0x827   : > { %v5623_v25 = vld [vmem:[#allocation2 + $0x20] sm:$0xff]  ;;  %v5592_v62 = vpop.permute.xlu1 %5591 }
 0x828   : > { %5926 = vst [vmem:[#allocation2 + $0x20] sm:$0xff] %v13675_v4  ;;  %v5645_v1 = vmul.f32 1.442695, %v5623_v25  ;;  %vm5632_vm3 = vcmp.gt.f32.partialorder %v5623_v25, 0.0 }
 0x82a   : > { %9056 = vpow2.f32 %v5645_v1 }
 0x82b   : > { %v4996_v13 = vpop.permute.xlu0 %4995 }
 0x82c   : > { %5018 = vst.msk [vmem:[#allocation2 + $0x28] sm:$0xff] %vm5012_vm8, %v4996_v13 }
 0x82d   : > { %5316 = vst.msk [vmem:[#allocation2 + $0x28] sm:$0xff] %vm5310_vm0, %v5294_v22 }
 0x82e   : > { %5614 = vst.msk [vmem:[#allocation2 + $0x28] sm:$0xff] %vm5608_vm12, %v5592_v62 }
 0x830   : > { %v9057_v31 = vpop.eup %9056 }
 0x831   : > { %v8419_v58 = vadd.f32 -1.0, %v9057_v31 }
 0x833   : > { %v5668_v17 = vsel %vm5632_vm3, %v5623_v25, %v8419_v58 }
 0x835   : > { %v5624_v21 = vld [vmem:[#allocation2 + $0x28] sm:$0xff] }
 0x836   : > { %v5647_v38 = vmul.f32 1.442695, %v5624_v21  ;;  %5927 = vst [vmem:[#allocation2 + $0x28] sm:$0xff] %v13675_v4  ;;  %vm5633_vm4 = vcmp.gt.f32.partialorder %v5624_v21, 0.0 }
 0x837   : > { %v5296_v50 = vpop.permute.xlu1 %5295 }
 0x838   : > { %9058 = vpow2.f32 %v5647_v38 }
 0x839   : > { %v4628_v12 = vpop.xlane.xlu2 %4627 }
 0x83a   : > { %9060 = vrcp.f32 %v4628_v12 }
 0x83e   : > { %v9059_v40 = vpop.eup %9058 }
 0x83f   : > { %v8420_v35 = vadd.f32 -1.0, %v9059_v40  ;;  %v5594_v11 = vpop.permute.xlu1 %5593 }
 0x840   : > { %v9061_v3 = vpop.eup %9060 }
 0x841   : > { %v5669_v10 = vsel %vm5633_vm4, %v5624_v21, %v8420_v35  ;;  %v4711_v16 = vmul.f32 %v9061_v3, %v13635_v15  ;;  %v5000_v39 = vpop.permute.xlu2 %4999 }
 0x842   : > { %v5693_v51 = vpack.c.bf16 %v5669_v10, %v5668_v17 }
 0x843   : > { %4721 = vst.msk [vmem:[#allocation2 + $0x30] sm:$0xff] %vm4714_vm7, %v4711_v16 }
 0x844   : > { %5778 = vmatmul.bf16.gmra.mxu2 %v5693_v51 }
 0x847   : > { %v4998_v46 = vpop.permute.xlu1 %4997 }
 0x848   : > { %5019 = vst.msk [vmem:[#allocation2 + $0x30] sm:$0xff] %vm5012_vm8, %v4998_v46 }
 0x849   : > { %5317 = vst.msk [vmem:[#allocation2 + $0x30] sm:$0xff] %vm5310_vm0, %v5296_v50  ;;  %v5596_v14 = vpop.permute.xlu2 %5595 }
 0x84a   : > { %5615 = vst.msk [vmem:[#allocation2 + $0x30] sm:$0xff] %vm5608_vm12, %v5594_v11 }
 0x84f   : > { %v5298_v0 = vpop.permute.xlu1 %5297 }
 0x851   : > { %v5625_v54 = vld [vmem:[#allocation2 + $0x30] sm:$0xff]  ;;  %v5002_v5 = vpop.permute.xlu2 %5001 }
 0x852   : > { %5928 = vst [vmem:[#allocation2 + $0x30] sm:$0xff] %v13675_v4  ;;  %v5649_v2 = vmul.f32 1.442695, %v5625_v54  ;;  %vm5634_vm6 = vcmp.gt.f32.partialorder %v5625_v54, 0.0 }
 0x856   : > { %v4631_v28 = vpop.xlane.xlu0 %4630 }
 0x857   : > { %9062 = vrcp.f32 %v4631_v28 }
 0x858   : > { %9064 = vpow2.f32 %v5649_v2 }
 0x859   : > { %v5598_v56 = vpop.permute.xlu2 %5597 }
 0x85d   : > { %v9063_v33 = vpop.eup %9062 }
 0x85e   : > { %v4712_v15 = vmul.f32 %v9063_v33, %v13652_v55  ;;  %v9065_v63 = vpop.eup %9064 }
 0x85f   : > { %v8421_v30 = vadd.f32 -1.0, %v9065_v63 }
 0x860   : > { %4722 = vst.msk [vmem:[#allocation2 + $0x38] sm:$0xff] %vm4714_vm7, %v4712_v15 }
 0x861   : > { %5020 = vst.msk [vmem:[#allocation2 + $0x38] sm:$0xff] %vm5012_vm8, %v5000_v39  ;;  %v5670_v7 = vsel %vm5634_vm6, %v5625_v54, %v8421_v30 }
 0x862   : > { %5318 = vst.msk [vmem:[#allocation2 + $0x38] sm:$0xff] %vm5310_vm0, %v5298_v0 }
 0x863   : > { %5616 = vst.msk [vmem:[#allocation2 + $0x38] sm:$0xff] %vm5608_vm12, %v5596_v14 }
 0x869   : > { %v5300_v18 = vpop.permute.xlu0 %5299 }
 0x86a   : > { %v5626_v43 = vld [vmem:[#allocation2 + $0x38] sm:$0xff] }
 0x86b   : > { %v5651_v44 = vmul.f32 1.442695, %v5626_v43  ;;  %5929 = vst [vmem:[#allocation2 + $0x38] sm:$0xff] %v13675_v4  ;;  %vm5635_vm5 = vcmp.gt.f32.partialorder %v5626_v43, 0.0 }
 0x86d   : > { %9066 = vpow2.f32 %v5651_v44 }
 0x873   : > { %v9067_v19 = vpop.eup %9066 }
 0x874   : > { %v8422_v55 = vadd.f32 -1.0, %v9067_v19 }
 0x876   : > { %v5671_v23 = vsel %vm5635_vm5, %v5626_v43, %v8422_v55  ;;  %v5769_v26 = vpop.f32.mrf.mxu2 }
 0x877   : > { %v5694_v41 = vpack.c.bf16 %v5671_v23, %v5670_v7  ;;  %v5793_v8 = vpack.c.bf16 %v5769_v26, %v5769_v26 }
 0x879   : > { %5783 = vmatmul.bf16.gmra.mxu2 %v5694_v41  ;;  %v5819_v32 = vunpack.c.l.b16 %v5793_v8 }
 0x87a   : > { %v4634_v34 = vpop.xlane.xlu1 %4633 }
 0x87b   : > { %9068 = vrcp.f32 %v4634_v34 }
 0x87e   : > { %v5771_v45 = vpop.f32.mrf.mxu2 }
 0x87f   : > { %v5794_v60 = vpack.c.bf16 %v5771_v45, %v5771_v45 }
 0x881   : > { %v9069_v59 = vpop.eup %9068 }
 0x882   : > { %v4713_v20 = vmul.f32 %v9069_v59, %v13668_v52  ;;  %v5820_v52 = vunpack.c.l.b16 %v5794_v60 }
 0x884   : > { %4724 = vst.msk [vmem:[#allocation2 + $0x40] sm:$0x1] %vm4723_vm13, %v4713_v20  ;;  %v13743_v29 = vpack.c.b16 %v5820_v52, %v5819_v32 }
 0x885   : > { %5022 = vst.msk [vmem:[#allocation2 + $0x40] sm:$0x1] %vm5021_vm14, %v5002_v5 }
 0x886   : > { %5320 = vst.msk [vmem:[#allocation2 + $0x40] sm:$0x1] %vm5319_vm15, %v5300_v18  ;;  %6366 = vrot.lane.b32.xlu0 %v13743_v29, %s15269_s26  ;;  %6662 = vrot.lane.b32.xlu2 %v13743_v29, %s15270_s22  ;;  %v5858_v5 = vsel %vm4386_vm9, %v13743_v29, 0 }
 0x887   : > { %5618 = vst.msk [vmem:[#allocation2 + $0x40] sm:$0x1] %vm5617_vm2, %v5598_v56  ;;  %8472 = vmatmul.msk.bf16.vlgmr.msra.gmra.mxu3 %vm4386_vm9, %v13743_v29 }
 0x88e   : > { %v5627_v57 = vld [vmem:[#allocation2 + $0x40] sm:$0x1]  ;;  %6958 = vrot.lane.b32.xlu2 %v13743_v29, %s15271_s0 }
 0x88f   : > { %v5653_v24 = vmul.f32 1.442695, %v5627_v57  ;;  %vm5636_vm3 = vcmp.gt.f32.partialorder %v5627_v57, 0.0 }
 0x891   : > { %9070 = vpow2.f32 %v5653_v24 }
 0x897   : > { %v9071_v47 = vpop.eup %9070 }
 0x898   : > { %v8423_v9 = vadd.f32 -1.0, %v9071_v47 }
 0x89a   : > { %v5672_v22 = vsel %vm5636_vm3, %v5627_v57, %v8423_v9 }
 0x89b   : > { %5681 = vst [vmem:[#allocation2 + $0x40] sm:$0x1] %v5672_v22 }
 0x8a1   : > { %v5774_v25 = vpop.f32.mrf.mxu2 }
 0x8a2   : > { %v5690_v13 = vld [vmem:[#allocation2 + $0x40] sm:$0x1]  ;;  %v5795_v1 = vpack.c.bf16 %v5774_v25, %v5774_v25 }
 0x8a3   : > { %v5695_v62 = vpack.c.bf16 %v5690_v13, %v5690_v13  ;;  %5930 = vst [vmem:[#allocation2 + $0x40] sm:$0x1] %v13675_v4 }
 0x8a4   : > { %v5821_v50 = vunpack.c.l.b16 %v5795_v1 }
 0x8a5   : > { %5788 = vmatmul.bf16.gmra.mxu2 %v5695_v62 }
 0x8a9   : > { %v5776_v21 = vpop.f32.mrf.mxu2 }
 0x8aa   : > { %v5796_v38 = vpack.c.bf16 %v5776_v21, %v5776_v21 }
 0x8ac   : > { %v5822_v12 = vunpack.c.l.b16 %v5796_v38 }
 0x8ae   : > { %v13754_v31 = vpack.c.b16 %v5822_v12, %v5821_v50 }
 0x8b0   : > { %6368 = vrot.lane.b32.xlu0 %v13754_v31, %s15269_s26  ;;  %6664 = vrot.lane.b32.xlu2 %v13754_v31, %s15270_s22  ;;  %v5861_v26 = vsel %vm4386_vm9, %v13754_v31, 0 }
 0x8b1   : > { %8473 = vmatmul.msk.bf16.gmra.mxu3 %vm4386_vm9, %v13754_v31 }
 0x8b8   : > { %6960 = vrot.lane.b32.xlu2 %v13754_v31, %s15271_s0 }
 0x8c7   : > { %v5779_v58 = vpop.f32.mrf.mxu2 }
 0x8c8   : > { %v5797_v40 = vpack.c.bf16 %v5779_v58, %v5779_v58 }
 0x8ca   : > { %v5823_v3 = vunpack.c.l.b16 %v5797_v40 }
 0x8cf   : > { %v5781_v35 = vpop.f32.mrf.mxu2 }
 0x8d0   : > { %v5798_v11 = vpack.c.bf16 %v5781_v35, %v5781_v35 }
 0x8d2   : > { %v5824_v17 = vunpack.c.l.b16 %v5798_v11 }
 0x8d4   : > { %v13764_v10 = vpack.c.b16 %v5824_v17, %v5823_v3 }
 0x8d6   : > { %6666 = vrot.lane.b32.xlu2 %v13764_v10, %s15270_s22  ;;  %8474 = vmatmul.msk.bf16.gmra.mxu3 %vm4386_vm9, %v13764_v10  ;;  %v5864_v7 = vsel %vm4386_vm9, %v13764_v10, 0 }
 0x8de   : > { %6962 = vrot.lane.b32.xlu2 %v13764_v10, %s15271_s0 }
 0x8e0   : > { %v13787_v30 = vpop.permute.xlu2 %6662 }
 0x8e6   : > { %6370 = vrot.lane.b32.xlu2 %v13764_v10, %s15269_s26 }
 0x8e8   : > { %v13793_v34 = vpop.permute.xlu2 %6958 }
 0x8f8   : > { %v6367_v32 = vpop.permute.xlu0 %6366 }
 0x8fc   : > { %v5784_v16 = vpop.f32.mrf.mxu2 }
 0x8fd   : > { %v5799_v51 = vpack.c.bf16 %v5784_v16, %v5784_v16 }
 0x8ff   : > { %v5825_v28 = vunpack.c.l.b16 %v5799_v51 }
 0x904   : > { %v5786_v46 = vpop.f32.mrf.mxu2 }
 0x905   : > { %v5800_v54 = vpack.c.bf16 %v5786_v46, %v5786_v46 }
 0x907   : > { %v5826_v39 = vunpack.c.l.b16 %v5800_v54 }
 0x909   : > { %v5831_v33 = vpack.c.b16 %v5826_v39, %v5825_v28 }
 0x90a   : > { %v5881_v15 = vpop.f32.mrf.mxu3  ;;  %v13799_v48 = vpop.permute.xlu2 %6664 }
 0x90b   : > { %6372 = vrot.lane.b32.xlu1 %v5831_v33, %s15269_s26  ;;  %6964 = vrot.lane.b32.xlu0 %v5831_v33, %s15271_s0  ;;  %v5867_v55 = vsel %vm4386_vm9, %v5831_v33, 0 }
 0x90c   : > { %6668 = vrot.lane.b32.xlu2 %v5831_v33, %s15270_s22  ;;  %8475 = vmatmul.msk.bf16.gmra.mxu3 %vm4386_vm9, %v5831_v33 }
 0x912   : > { %v5883_v19 = vpop.f32.mrf.mxu3  ;;  %v13807_v59 = vpop.permute.xlu2 %6960 }
 0x914   : > { %6486 = vperm.xlu2 %8838, %v5881_v15  }
 0x91c   : > { %8839 = vset.pattern.permute.xlu2 %v9386_v53 }
 0x91d   : > { %6190 = vperm.xlu2 %8839, %v5881_v15  }
 0x925   : > { %8840 = vset.pattern.permute.xlu2 %v9387_v49 }
 0x926   : > { %5933 = vperm.xlu2 %8840, %v5881_v15  }
 0x928   : > { %v5789_v0 = vpop.f32.mrf.mxu2 }
 0x929   : > { %v5801_v14 = vpack.c.bf16 %v5789_v0, %v5789_v0 }
 0x92b   : > { %v5827_v2 = vunpack.c.l.b16 %v5801_v14 }
 0x92d   : > { %v5832_v43 = vpack.c.b16 %v5827_v2, %v5827_v2 }
 0x92e   : > { %8841 = vset.pattern.permute.xlu2 %v9385_v42 }
 0x92f   : > { %6966 = vrot.lane.b32.xlu1 %v5832_v43, %s15271_s0  ;;  %6670 = vrot.lane.b32.xlu0 %v5832_v43, %s15270_s22  ;;  %v5870_v44 = vsel %vm4386_vm9, %v5832_v43, 0  ;;  %v6136_v37 = vand.u32 %v5832_v43, %v13129_v36  ;;  %s647_s0 = sand.u32 1, %s9369_s25   ;;  %s9331_s22 = scalar_lea.hbm %s9330_s4, 1 }
 0x930   : > { %8476 = vmatmul.msk.bf16.gmra.mxu3 %vm4386_vm9, %v5832_v43  ;;  %v5791_v63 = vpop.f32.mrf.mxu2  ;;  %5912 = vmatpush.bf16.xpose.msra.mxu1 %v5870_v44  ;;  %v6667_v8 = vpop.permute.xlu2 %6666  ;;  %v9296_v44 = vld [vmem:[%s15268_s28] sm:$0xff]  ;;  %p9332_p11 = scmp.ne.s32.totalorder %s9330_s4, %s9331_s22  ;;  %p9337_p1 = scmp.lt.s32.totalorder %s9335_s6, %s9331_s22 }
 0x931   : > { %6490 = vperm.xlu2 %8841, %v5883_v19  }
 0x932   : > { %p9333_p12 = pnand %p9332_p11, %p9541_p5  ;;  %p9338_p2 = por %p9337_p1, %p9336_p0 }
 0x934   : > { %v5886_v23 = vpop.f32.mrf.mxu3  ;;  %p9334_p13 = pneg %p9333_p12 }
 0x936   : > { %p9339_p3 = pnand %p9338_p2, %p9334_p13 }
 0x937   : > { %6374 = vrot.lane.b32.xlu1 %v5832_v43, %s15269_s26  ;;  %6782 = vperm.xlu0 %8836, %v5881_v15   ;;  %s15273_s26 = smov 32  }
 0x938   : > { %5913 = vmatpush.bf16.xpose.msra.mxu1 %v5867_v55  ;;  %v6963_v60 = vpop.permute.xlu2 %6962 }
 0x939   : > { %8842 = vset.pattern.permute.xlu2 %v9388_v27 }
 0x93a   : > { %6786 = vperm.xlu2 %8842, %v5883_v19  }
 0x93c   : > { %v5888_v41 = vpop.f32.mrf.mxu3 }
 0x93f   : > { %6494 = vperm.xlu1 %8845, %v5886_v23   ;;  %8843 = vset.pattern.permute.xlu0 %v9386_v53 }
 0x940   : > { %6194 = vperm.xlu0 %8843, %v5883_v19   ;;  %5914 = vmatpush.bf16.xpose.msra.mxu1 %v5864_v7  ;;  %v6371_v18 = vpop.permute.xlu2 %6370 }
 0x942   : > { %6790 = vperm.xlu2 %8842, %v5886_v23  }
 0x947   : > { %8847 = vset.pattern.permute.xlu1 %v9387_v49 }
 0x948   : > { %5943 = vperm.xlu1 %8847, %v5886_v23   ;;  %8844 = vset.pattern.permute.xlu0 %v9387_v49 }
 0x949   : > { %5915 = vmatpush.bf16.xpose.msra.mxu1 %v5861_v26  ;;  %5938 = vperm.xlu0 %8844, %v5883_v19  }
 0x94a   : > { %8846 = vset.pattern.permute.xlu2 %v9386_v53 }
 0x94b   : > { %6198 = vperm.xlu2 %8846, %v5886_v23  }
 0x950   : > { %8850 = vset.pattern.permute.xlu1 %v9386_v53 }
 0x951   : > { %5916 = vmatpush.bf16.xpose.msra.mxu1 %v5858_v5  ;;  %6202 = vperm.xlu1 %8850, %v5888_v41  }
 0x952   : > { %8849 = vset.pattern.permute.xlu0 %v9388_v27 }
 0x953   : > { %6794 = vperm.xlu0 %8849, %v5888_v41   ;;  %8848 = vset.pattern.permute.xlu2 %v9385_v42 }
 0x954   : > { %6498 = vperm.xlu2 %8848, %v5888_v41  }
 0x958   : > { %8477 = vmatmul.msk.bf16.vlgmr.msra.gmra.mxu1 %vm4386_vm9, %v5905_v61  ;;  %v9297_v61 = vld [vmem:[%s15268_s28 + $0x8] sm:$0xff] }
 0x959   : > { %6141 = vmatpush.bf16.msrb.mxu1 %v6136_v37  ;;  %v5891_v20 = vpop.f32.mrf.mxu3  ;;  %8853 = vset.pattern.permute.xlu1 %v9388_v27 }
 0x95a   : > { %6798 = vperm.xlu1 %8853, %v5891_v20  }
 0x95b   : > { %8856 = vset.pattern.permute.xlu0 %v9385_v42 }
 0x95c   : > { %8851 = vset.pattern.permute.xlu2 %v9387_v49 }
 0x95d   : > { %6142 = vmatpush.bf16.msrb.mxu1 %v5831_v33  ;;  %5948 = vperm.xlu2 %8851, %v5888_v41  }
 0x961   : > { %6143 = vmatpush.bf16.msrb.mxu1 %v13764_v10  ;;  %v5893_v45 = vpop.f32.mrf.mxu3 }
 0x962   : > { %8854 = vset.pattern.permute.xlu1 %v9386_v53  ;;  %6506 = vperm.xlu0 %8856, %v5893_v45  }
 0x963   : > { %6206 = vperm.xlu1 %8854, %v5891_v20  }
 0x965   : > { %6144 = vmatpush.bf16.msrb.mxu1 %v13754_v31  ;;  %8852 = vset.pattern.permute.xlu2 %v9385_v42 }
 0x966   : > { %6502 = vperm.xlu2 %8852, %v5891_v20   ;;  %v6669_v6 = vpop.permute.xlu2 %6668 }
 0x969   : > { %6145 = vmatpush.bf16.msrb.mxu1 %v13743_v29  ;;  %v6369_v29 = vpop.permute.xlu0 %6368 }
 0x96b   : > { %8855 = vset.pattern.permute.xlu1 %v9387_v49 }
 0x96c   : > { %5953 = vperm.xlu1 %8855, %v5891_v20  }
 0x96e   : > { %8857 = vset.pattern.permute.xlu2 %v9388_v27  ;;  %v13825_v56 = vpop.permute.xlu2 %6486 }
 0x96f   : > { %6802 = vperm.xlu2 %8857, %v5893_v45  }
 0x977   : > { %8858 = vset.pattern.permute.xlu2 %v9386_v53  ;;  %v13829_v52 = vpop.permute.xlu2 %6190 }
 0x978   : > { %6210 = vperm.xlu2 %8858, %v5893_v45  }
 0x97d   : > { %v6373_v47 = vpop.permute.xlu1 %6372  ;;  %v6965_v9 = vpop.permute.xlu0 %6964 }
 0x980   : > { %8859 = vset.pattern.permute.xlu2 %v9387_v49  ;;  %v13831_v24 = vpop.permute.xlu2 %5933 }
 0x981   : > { %5958 = vperm.xlu2 %8859, %v5893_v45  }
 0x989   : > { %8860 = vset.pattern.permute.xlu2 %v9388_v27 }
 0x98b   : > { %v13835_v25 = vpop.permute.xlu2 %6490 }
 0x98f   : > { %v5896_v57 = vpop.f32.mrf.mxu3 }
 0x990   : > { %6806 = vperm.xlu2 %8860, %v5896_v57   ;;  %5963 = vperm.xlu1 %8855, %v5896_v57  }
 0x991   : > { %6510 = vperm.xlu0 %8856, %v5896_v57  }
 0x994   : > { %v6787_v12 = vpop.permute.xlu2 %6786 }
 0x997   : > { %v5898_v22 = vpop.f32.mrf.mxu3 }
 0x998   : > { %8861 = vset.pattern.permute.xlu2 %v9386_v53  ;;  %8862 = vset.pattern.permute.xlu1 %v9388_v27 }
 0x999   : > { %6514 = vperm.xlu0 %8856, %v5898_v22   ;;  %6214 = vperm.xlu2 %8861, %v5896_v57  }
 0x99a   : > { %6810 = vperm.xlu1 %8862, %v5898_v22  }
 0x99c   : > { %v13846_v31 = vpop.permute.xlu2 %6790 }
 0x9a1   : > { %v6967_v13 = vpop.permute.xlu1 %6966  ;;  %v6671_v62 = vpop.permute.xlu0 %6670  ;;  %8863 = vset.pattern.permute.xlu0 %v9386_v53  ;;  %8865 = vset.pattern.permute.xlu2 %v9385_v42 }
 0x9a2   : > { %v6988_v1 = vand.u32 %v6967_v13, %v13129_v36  ;;  %v6692_v21 = vand.u32 %v6671_v62, %v13129_v36  ;;  %6218 = vperm.xlu0 %8863, %v5898_v22   ;;  %8870 = vset.pattern.permute.xlu1 %v9387_v49 }
 0x9a4   : > { %6697 = vmatpush.bf16.msra.mxu2 %v6692_v21  ;;  %6993 = vmatpush.bf16.msrb.mxu3 %v6988_v1 }
 0x9a5   : > { %v13852_v40 = vpop.permute.xlu2 %6198 }
 0x9a8   : > { %6698 = vmatpush.bf16.msra.mxu2 %v6669_v6  ;;  %6994 = vmatpush.bf16.msrb.mxu3 %v6965_v9 }
 0x9a9   : > { %v6375_v38 = vpop.permute.xlu1 %6374  ;;  %v6783_v11 = vpop.permute.xlu0 %6782 }
 0x9aa   : > { %v6396_v50 = vand.u32 %v6375_v38, %v13129_v36  ;;  %8864 = vset.pattern.permute.xlu0 %v9387_v49 }
 0x9ab   : > { %5968 = vperm.xlu0 %8864, %v5898_v22  }
 0x9ac   : > { %6401 = vmatpush.bf16.msrb.mxu0 %v6396_v50  ;;  %6699 = vmatpush.bf16.msra.mxu2 %v6667_v8 }
 0x9ad   : > { %6995 = vmatpush.bf16.msrb.mxu3 %v6963_v60 }
 0x9ae   : > { %v13856_v35 = vpop.permute.xlu2 %6498 }
 0x9b0   : > { %6402 = vmatpush.bf16.msrb.mxu0 %v6373_v47  ;;  %6700 = vmatpush.bf16.msra.mxu2 %v13799_v48 }
 0x9b1   : > { %6996 = vmatpush.bf16.msrb.mxu3 %v13807_v59  ;;  %v13870_v46 = vpop.permute.xlu1 %6494 }
 0x9b2   : > { %v6195_v39 = vpop.permute.xlu0 %6194 }
 0x9b3   : > { %v5901_v42 = vpop.f32.mrf.mxu3  ;;  %8866 = vset.pattern.permute.xlu0 %v9388_v27 }
 0x9b4   : > { %6518 = vperm.xlu2 %8865, %v5901_v42   ;;  %6403 = vmatpush.bf16.msrb.mxu0 %v6371_v18 }
 0x9b5   : > { %6701 = vmatpush.bf16.msra.mxu2 %v13787_v30  ;;  %6997 = vmatpush.bf16.msrb.mxu3 %v13793_v34 }
 0x9b6   : > { %6814 = vperm.xlu0 %8866, %v5901_v42  }
 0x9b7   : > { %v13858_v3 = vpop.permute.xlu2 %5948 }
 0x9b8   : > { %6404 = vmatpush.bf16.msrb.mxu0 %v6369_v29 }
 0x9ba   : > { %v5944_v59 = vpop.permute.xlu1 %5943 }
 0x9bb   : > { %v5903_v58 = vpop.f32.mrf.mxu3  ;;  %v5939_v60 = vpop.permute.xlu0 %5938 }
 0x9bc   : > { %8867 = vset.pattern.permute.xlu2 %v9386_v53  ;;  %6405 = vmatpush.bf16.msrb.mxu0 %v6367_v32 }
 0x9bd   : > { %6222 = vperm.xlu2 %8867, %v5901_v42  }
 0x9be   : > { %8869 = vset.pattern.permute.xlu0 %v9387_v49 }
 0x9c0   : > { %v13874_v15 = vpop.permute.xlu2 %6502 }
 0x9c3   : > { %v6203_v21 = vpop.permute.xlu1 %6202 }
 0x9c5   : > { %8868 = vset.pattern.permute.xlu2 %v9387_v49 }
 0x9c6   : > { %5973 = vperm.xlu2 %8868, %v5901_v42  }
 0x9c9   : > { %v13901_v6 = vpop.permute.xlu2 %6802 }
 0x9d2   : > { %v13924_v58 = vpop.permute.xlu2 %6210 }
 0x9d5   : > { %v5918_v27 = vpop.f32.mrf.mxu1 }
 0x9d6   : > { %v13860_v17 = vperm.slane %v5918_v27, 1  ;;  %v13862_v10 = vperm.slane %v5918_v27, 2  ;;  %v13864_v53 = vperm.slane %v5918_v27, 3  ;;  %v13876_v0 = vperm.slane %v5918_v27, 0 }
 0x9d8   : > { %v6522_v16 = vadd.f32 %v13862_v10, %v13825_v56  ;;  %v6818_v51 = vadd.f32 %v13864_v53, %v6783_v11  ;;  %v6819_v49 = vadd.f32 %v13864_v53, %v6787_v12  ;;  %v6226_v54 = vadd.f32 %v13860_v17, %v13829_v52 }
 0x9d9   : > { %v6523_v23 = vadd.f32 %v13862_v10, %v13835_v25  ;;  %v6227_v41 = vadd.f32 %v13860_v17, %v6195_v39  ;;  %v5977_v5 = vadd.f32 %v13876_v0, %v13831_v24  ;;  %v5978_v32 = vadd.f32 %v13876_v0, %v5939_v60 }
 0x9da   : > { %vm6531_vm9 = vcmp.gt.f32.partialorder %v6522_v16, 0.0  ;;  %v6540_v28 = vmul.f32 0.2, %v6522_v16  ;;  %vm6827_vm4 = vcmp.gt.f32.partialorder %v6818_v51, 0.0  ;;  %v6836_v33 = vmul.f32 0.2, %v6818_v51 }
 0x9db   : > { %v6837_v43 = vmul.f32 0.2, %v6819_v49  ;;  %vm6828_vm5 = vcmp.gt.f32.partialorder %v6819_v49, 0.0  ;;  %v6244_v55 = vmul.f32 0.2, %v6226_v54  ;;  %vm6235_vm6 = vcmp.gt.f32.partialorder %v6226_v54, 0.0 }
 0x9dc   : > { %v6549_v2 = vsel %vm6531_vm9, %v6522_v16, %v6540_v28  ;;  %v6845_v19 = vsel %vm6827_vm4, %v6818_v51, %v6836_v33  ;;  %v6541_v37 = vmul.f32 0.2, %v6523_v23  ;;  %vm6532_vm3 = vcmp.gt.f32.partialorder %v6523_v23, 0.0 }
 0x9dd   : > { %v5920_v14 = vpop.f32.mrf.mxu1  ;;  %v13881_v63 = vadd.f32 %v9296_v44, %v6549_v2  ;;  %v13883_v30 = vadd.f32 %v9296_v44, %v6845_v19  ;;  %v6846_v26 = vsel %vm6828_vm5, %v6819_v49, %v6837_v43  ;;  %v6253_v48 = vsel %vm6235_vm6, %v6226_v54, %v6244_v55  ;;  %v6799_v55 = vpop.permute.xlu1 %6798 }
 0x9de   : > { %v13897_v20 = vadd.f32 %v9297_v61, %v6846_v26  ;;  %v13899_v8 = vadd.f32 %v9296_v44, %v6253_v48  ;;  %v6245_v45 = vmul.f32 0.2, %v6227_v41  ;;  %vm6236_vm9 = vcmp.gt.f32.partialorder %v6227_v41, 0.0  ;;  %v6795_v14 = vpop.permute.xlu0 %6794 }
 0x9df   : > { %v6567_v7 = vsel %vm4552_vm10, %v13881_v63, -inf  ;;  %v6863_v34 = vsel %vm4552_vm10, %v13883_v30, -inf  ;;  %v5995_v18 = vmul.f32 0.2, %v5977_v5  ;;  %v6550_v56 = vsel %vm6532_vm3, %v6523_v23, %v6541_v37  ;;  %v13952_v37 = vpop.permute.xlu2 %5958 }
 0x9e0   : > { %6568 = vmax.xlane.f32.xlu1 %v6567_v7  ;;  %6864 = vmax.xlane.f32.xlu0 %v6863_v34  ;;  %vm5986_vm4 = vcmp.gt.f32.partialorder %v5977_v5, 0.0  ;;  %v6866_v52 = vsel %vm4552_vm10, %v13897_v20, -inf  ;;  %v6271_v29 = vsel %vm4552_vm10, %v13899_v8, -inf  ;;  %v6254_v57 = vsel %vm6236_vm9, %v6227_v41, %v6245_v45 }
 0x9e1   : > { %v6820_v24 = vadd.f32 %v13864_v53, %v13846_v31  ;;  %v13910_v47 = vadd.f32 %v9297_v61, %v6550_v56  ;;  %v6004_v9 = vsel %vm5986_vm4, %v5977_v5, %v5995_v18  ;;  %v6228_v22 = vadd.f32 %v13860_v17, %v13852_v40 }
 0x9e2   : > { %v5996_v25 = vmul.f32 0.2, %v5978_v32  ;;  %v13914_v13 = vadd.f32 %v9297_v61, %v6254_v57  ;;  %vm5987_vm5 = vcmp.gt.f32.partialorder %v5978_v32, 0.0  ;;  %v13916_v62 = vadd.f32 %v9296_v44, %v6004_v9 }
 0x9e3   : > { %v6838_v1 = vmul.f32 0.2, %v6820_v24  ;;  %v6570_v38 = vsel %vm4552_vm10, %v13910_v47, -inf  ;;  %vm6829_vm6 = vcmp.gt.f32.partialorder %v6820_v24, 0.0  ;;  %v6246_v50 = vmul.f32 0.2, %v6228_v22 }
 0x9e4   : > { %v6005_v12 = vsel %vm5987_vm5, %v5978_v32, %v5996_v25  ;;  %vm6237_vm3 = vcmp.gt.f32.partialorder %v6228_v22, 0.0  ;;  %v6524_v42 = vadd.f32 %v13862_v10, %v13870_v46  ;;  %v6274_v31 = vsel %vm4552_vm10, %v13914_v13, -inf  ;;  %v9298_v46 = vld [vmem:[%s15268_s28 + $0x10] sm:$0xff] }
 0x9e5   : > { %v6022_v40 = vsel %vm4552_vm10, %v13916_v62, -inf  ;;  %v6847_v11 = vsel %vm6829_vm6, %v6820_v24, %v6838_v1  ;;  %v6229_v27 = vadd.f32 %v13860_v17, %v6203_v21  ;;  %v13929_v16 = vadd.f32 %v9297_v61, %v6005_v12  ;;  %v9299_v61 = vld [vmem:[%s15268_s28 + $0x18] sm:$0xff] }
 0x9e6   : > { %v6255_v51 = vsel %vm6237_vm3, %v6228_v22, %v6246_v50  ;;  %v5979_v49 = vadd.f32 %v13876_v0, %v5944_v59  ;;  %v6542_v54 = vmul.f32 0.2, %v6524_v42  ;;  %v13935_v28 = vadd.f32 %v9298_v46, %v6847_v11  ;;  %v13963_v32 = vpop.permute.xlu0 %6506  ;;  %v6207_v22 = vpop.permute.xlu1 %6206  ;;  %v9300_v50 = vld [vmem:[%s15268_s28 + $0x20] sm:$0xff] }
 0x9e7   : > { %vm6533_vm9 = vcmp.gt.f32.partialorder %v6524_v42, 0.0  ;;  %v13937_v39 = vadd.f32 %v9298_v46, %v6255_v51  ;;  %v6247_v33 = vmul.f32 0.2, %v6229_v27  ;;  %v6025_v2 = vsel %vm4552_vm10, %v13929_v16, -inf }
 0x9e8   : > { %6867 = vmax.xlane.f32.xlu1 %v6866_v52  ;;  %6272 = vmax.xlane.f32.xlu0 %v6271_v29  ;;  %vm6238_vm4 = vcmp.gt.f32.partialorder %v6229_v27, 0.0  ;;  %v5997_v43 = vmul.f32 0.2, %v5979_v49  ;;  %v6551_v44 = vsel %vm6533_vm9, %v6524_v42, %v6542_v54  ;;  %vm5988_vm5 = vcmp.gt.f32.partialorder %v5979_v49, 0.0 }
 0x9e9   : > { %v6821_v19 = vadd.f32 %v13864_v53, %v6795_v14  ;;  %v6869_v23 = vsel %vm4552_vm10, %v13935_v28, -inf  ;;  %v6277_v7 = vsel %vm4552_vm10, %v13937_v39, -inf  ;;  %v6256_v34 = vsel %vm6238_vm4, %v6229_v27, %v6247_v33 }
 0x9ea   : > { %v6526_v26 = vadd.f32 %v13862_v10, %v13874_v15  ;;  %v13948_v48 = vadd.f32 %v9298_v46, %v6551_v44  ;;  %v6006_v41 = vsel %vm5988_vm5, %v5979_v49, %v5997_v43  ;;  %v6525_v5 = vadd.f32 %v13862_v10, %v13856_v35 }
 0x9eb   : > { %v6839_v59 = vmul.f32 0.2, %v6821_v19  ;;  %v13957_v45 = vadd.f32 %v9299_v61, %v6256_v34  ;;  %vm6830_vm6 = vcmp.gt.f32.partialorder %v6821_v19, 0.0  ;;  %v13959_v60 = vadd.f32 %v9298_v46, %v6006_v41 }
 0x9ec   : > { %v6544_v15 = vmul.f32 0.2, %v6526_v26  ;;  %v6573_v18 = vsel %vm4552_vm10, %v13948_v48, -inf  ;;  %vm6535_vm3 = vcmp.gt.f32.partialorder %v6526_v26, 0.0  ;;  %v6543_v56 = vmul.f32 0.2, %v6525_v5 }
 0x9ed   : > { %v6848_v35 = vsel %vm6830_vm6, %v6821_v19, %v6839_v59  ;;  %vm6534_vm9 = vcmp.gt.f32.partialorder %v6525_v5, 0.0  ;;  %v5980_v52 = vadd.f32 %v13876_v0, %v13858_v3  ;;  %v6280_v29 = vsel %vm4552_vm10, %v13957_v45, -inf  ;;  %v9301_v19 = vld [vmem:[%s15268_s28 + $0x28] sm:$0xff] }
 0x9ee   : > { %v6028_v57 = vsel %vm4552_vm10, %v13959_v60, -inf  ;;  %v6553_v24 = vsel %vm6535_vm3, %v6526_v26, %v6544_v15  ;;  %v6823_v9 = vadd.f32 %v13864_v53, %v13901_v6  ;;  %v13973_v25 = vadd.f32 %v9299_v61, %v6848_v35  ;;  %v5954_v44 = vpop.permute.xlu1 %5953 }
 0x9ef   : > { %6571 = vmax.xlane.f32.xlu2 %v6570_v38  ;;  %v6552_v1 = vsel %vm6534_vm9, %v6525_v5, %v6543_v56  ;;  %v6822_v21 = vadd.f32 %v13864_v53, %v6799_v55  ;;  %v13976_v38 = vpop.permute.xlu2 %6806  ;;  %v5998_v3 = vmul.f32 0.2, %v5980_v52  ;;  %v13981_v12 = vadd.f32 %v9300_v50, %v6553_v24 }
 0x9f0   : > { %6275 = vmax.xlane.f32.xlu1 %v6274_v31  ;;  %6023 = vmax.xlane.f32.xlu0 %v6022_v40  ;;  %vm5989_vm4 = vcmp.gt.f32.partialorder %v5980_v52, 0.0  ;;  %v13983_v42 = vadd.f32 %v9299_v61, %v6552_v1  ;;  %v6841_v6 = vmul.f32 0.2, %v6823_v9  ;;  %v6872_v31 = vsel %vm4552_vm10, %v13973_v25, -inf }
 0x9f1   : > { %vm6832_vm5 = vcmp.gt.f32.partialorder %v6823_v9, 0.0  ;;  %v6840_v40 = vmul.f32 0.2, %v6822_v21  ;;  %v6230_v11 = vadd.f32 %v13860_v17, %v6207_v22  ;;  %v6007_v51 = vsel %vm5989_vm4, %v5980_v52, %v5998_v3 }
 0x9f2   : > { %vm6831_vm6 = vcmp.gt.f32.partialorder %v6822_v21, 0.0  ;;  %v6579_v49 = vsel %vm4552_vm10, %v13981_v12, -inf  ;;  %v6231_v54 = vadd.f32 %v13860_v17, %v13924_v58  ;;  %v6576_v46 = vsel %vm4552_vm10, %v13983_v42, -inf }
 0x9f3   : > { %v6850_v33 = vsel %vm6832_vm5, %v6823_v9, %v6841_v6  ;;  %v13994_v14 = vadd.f32 %v9299_v61, %v6007_v51  ;;  %v6248_v43 = vmul.f32 0.2, %v6230_v11  ;;  %vm6239_vm3 = vcmp.gt.f32.partialorder %v6230_v11, 0.0 }
 0x9f4   : > { %v13999_v55 = vadd.f32 %v9301_v19, %v6850_v33  ;;  %vm6240_vm9 = vcmp.gt.f32.partialorder %v6231_v54, 0.0  ;;  %v5981_v26 = vadd.f32 %v13876_v0, %v5954_v44  ;;  %v5982_v61 = vadd.f32 %v13876_v0, %v13952_v37 }
 0x9f5   : > { %v6031_v34 = vsel %vm4552_vm10, %v13994_v14, -inf  ;;  %v6257_v5 = vsel %vm6239_vm3, %v6230_v11, %v6248_v43  ;;  %v6527_v37 = vadd.f32 %v13862_v10, %v13963_v32 }
 0x9f6   : > { %v6878_v59 = vsel %vm4552_vm10, %v13999_v55, -inf  ;;  %v14016_v56 = vadd.f32 %v9300_v50, %v6257_v5  ;;  %v5999_v35 = vmul.f32 0.2, %v5981_v26  ;;  %vm5990_vm4 = vcmp.gt.f32.partialorder %v5981_v26, 0.0 }
 0x9f7   : > { %6026 = vmax.xlane.f32.xlu2 %v6025_v2  ;;  %v6849_v2 = vsel %vm6831_vm6, %v6822_v21, %v6840_v40  ;;  %v14001_v58 = vpop.permute.xlu2 %6214  ;;  %vm5991_vm5 = vcmp.gt.f32.partialorder %v5982_v61, 0.0  ;;  %v6545_v40 = vmul.f32 0.2, %v6527_v37  ;;  %vm6536_vm6 = vcmp.gt.f32.partialorder %v6527_v37, 0.0 }
 0x9f8   : > { %6870 = vmax.xlane.f32.xlu1 %v6869_v23  ;;  %6278 = vmax.xlane.f32.xlu0 %v6277_v7  ;;  %v6249_v23 = vmul.f32 0.2, %v6231_v54  ;;  %v14003_v7 = vadd.f32 %v9300_v50, %v6849_v2  ;;  %v6283_v9 = vsel %vm4552_vm10, %v14016_v56, -inf  ;;  %v6008_v22 = vsel %vm5990_vm4, %v5981_v26, %v5999_v35 }
 0x9f9   : > { %v6554_v33 = vsel %vm6536_vm6, %v6527_v37, %v6545_v40 }
 0x9fa   : > { %v6875_v15 = vsel %vm4552_vm10, %v14003_v7, -inf  ;;  %v14041_v26 = vadd.f32 %v9301_v19, %v6554_v33 }
 0x9fc   : > { %v6582_v35 = vsel %vm4552_vm10, %v14041_v26, -inf }
 0x9ff   : > { %6574 = vmax.xlane.f32.xlu2 %v6573_v18  ;;  %v6258_v18 = vsel %vm6240_vm9, %v6231_v54, %v6249_v23 }
 0xa00   : > { %6281 = vmax.xlane.f32.xlu1 %v6280_v29  ;;  %6029 = vmax.xlane.f32.xlu0 %v6028_v57  ;;  %v14018_v29 = vadd.f32 %v9301_v19, %v6258_v18  ;;  %v6000_v57 = vmul.f32 0.2, %v5982_v61 }
 0xa02   : > { %v5964_v52 = vpop.permute.xlu1 %5963  ;;  %v6286_v1 = vsel %vm4552_vm10, %v14018_v29, -inf  ;;  %v6009_v6 = vsel %vm5991_vm5, %v5982_v61, %v6000_v57  ;;  %v14055_v57 = vld [vmem:[%s15268_s28 + $0x38] sm:$0xff] }
 0xa03   : > { %v6511_v27 = vpop.permute.xlu0 %6510  ;;  %v5983_v3 = vadd.f32 %v13876_v0, %v5964_v52  ;;  %v14031_v11 = vadd.f32 %v9301_v19, %v6009_v6  ;;  %v6824_v19 = vadd.f32 %v13864_v53, %v13976_v38 }
 0xa04   : > { %v6528_v54 = vadd.f32 %v13862_v10, %v6511_v27 }
 0xa05   : > { %v6001_v51 = vmul.f32 0.2, %v5983_v3  ;;  %vm5992_vm3 = vcmp.gt.f32.partialorder %v5983_v3, 0.0  ;;  %v6037_v2 = vsel %vm4552_vm10, %v14031_v11, -inf }
 0xa06   : > { %v6546_v5 = vmul.f32 0.2, %v6528_v54  ;;  %vm6537_vm9 = vcmp.gt.f32.partialorder %v6528_v54, 0.0 }
 0xa07   : > { %6873 = vmax.xlane.f32.xlu2 %v6872_v31  ;;  %v14029_v31 = vadd.f32 %v9300_v50, %v6008_v22  ;;  %v6010_v44 = vsel %vm5992_vm3, %v5983_v3, %v6001_v51  ;;  %v6842_v51 = vmul.f32 0.2, %v6824_v19  ;;  %vm6833_vm3 = vcmp.gt.f32.partialorder %v6824_v19, 0.0 }
 0xa08   : > { %6580 = vmax.xlane.f32.xlu1 %v6579_v49  ;;  %6577 = vmax.xlane.f32.xlu0 %v6576_v46  ;;  %v6555_v37 = vsel %vm6537_vm9, %v6528_v54, %v6546_v5  ;;  %v9304_v54 = vld [vmem:[%s15268_s28 + $0x40] sm:$0x1] }
 0xa09   : > { %v6034_v49 = vsel %vm4552_vm10, %v14029_v31, -inf }
 0xa0b   : > { %v14008_v41 = vpop.permute.xlu0 %6514 }
 0xa0c   : > { %v6811_v32 = vpop.permute.xlu1 %6810 }
 0xa0d   : > { %v6825_v50 = vadd.f32 %v13864_v53, %v6811_v32 }
 0xa0e   : > { %v6519_v24 = vpop.permute.xlu2 %6518 }
 0xa0f   : > { %6032 = vmax.xlane.f32.xlu2 %v6031_v34  ;;  %vm6834_vm5 = vcmp.gt.f32.partialorder %v6825_v50, 0.0 }
 0xa10   : > { %6879 = vmax.xlane.f32.xlu1 %v6878_v59  ;;  %6876 = vmax.xlane.f32.xlu0 %v6875_v15  ;;  %v9302_v59 = vld [vmem:[%s15268_s28 + $0x30] sm:$0xff]  ;;  %v6843_v15 = vmul.f32 0.2, %v6825_v50 }
 0xa11   : > { %v14046_v61 = vadd.f32 %v9302_v59, %v6010_v44  ;;  %v14065_v6 = vadd.f32 %v9302_v59, %v6555_v37 }
 0xa12   : > { %v6852_v3 = vsel %vm6834_vm5, %v6825_v50, %v6843_v15  ;;  %v6851_v50 = vsel %vm6833_vm3, %v6824_v19, %v6842_v51 }
 0xa13   : > { %v6040_v22 = vsel %vm4552_vm10, %v14046_v61, -inf  ;;  %v14068_v32 = vadd.f32 %v14055_v57, %v6852_v3  ;;  %v6585_v33 = vsel %vm4552_vm10, %v14065_v6, -inf  ;;  %v14084_v5 = vadd.f32 %v9302_v59, %v6851_v50 }
 0xa14   : > { %v14026_v21 = vpop.permute.xlu0 %6218 }
 0xa17   : > { %6284 = vmax.xlane.f32.xlu2 %v6283_v9  ;;  %v6223_v46 = vpop.permute.xlu2 %6222 }
 0xa18   : > { %6287 = vmax.xlane.f32.xlu1 %v6286_v1  ;;  %v6234_v23 = vadd.f32 %v13860_v17, %v6223_v46  ;;  %v6530_v1 = vadd.f32 %v13862_v10, %v6519_v24 }
 0xa1a   : > { %v6252_v18 = vmul.f32 0.2, %v6234_v23  ;;  %vm6243_vm6 = vcmp.gt.f32.partialorder %v6234_v23, 0.0  ;;  %vm6539_vm9 = vcmp.gt.f32.partialorder %v6530_v1, 0.0 }
 0xa1c   : > { %v6261_v40 = vsel %vm6243_vm6, %v6234_v23, %v6252_v18 }
 0xa1d   : > { %v5969_v43 = vpop.permute.xlu0 %5968  ;;  %v14073_v24 = vadd.f32 %v9304_v54, %v6261_v40 }
 0xa1e   : > { %v5984_v34 = vadd.f32 %v13876_v0, %v5969_v43  ;;  %v6884_v43 = vsel %vm4552_vm10, %v14068_v32, -inf }
 0xa1f   : > { %6035 = vmax.xlane.f32.xlu2 %v6034_v49  ;;  %v6548_v49 = vmul.f32 0.2, %v6530_v1  ;;  %v6295_v23 = vsel %vm4577_vm11, %v14073_v24, -inf }
 0xa20   : > { %6038 = vmax.xlane.f32.xlu1 %v6037_v2  ;;  %vm5993_vm4 = vcmp.gt.f32.partialorder %v5984_v34, 0.0  ;;  %v6002_v27 = vmul.f32 0.2, %v5984_v34  ;;  %v6232_v2 = vadd.f32 %v13860_v17, %v14001_v58  ;;  %v5974_v18 = vpop.permute.xlu2 %5973 }
 0xa21   : > { %v5985_v37 = vadd.f32 %v13876_v0, %v5974_v18 }
 0xa22   : > { %v6011_v52 = vsel %vm5993_vm4, %v5984_v34, %v6002_v27  ;;  %v6557_v34 = vsel %vm6539_vm9, %v6530_v1, %v6548_v49  ;;  %v6250_v27 = vmul.f32 0.2, %v6232_v2  ;;  %vm6241_vm4 = vcmp.gt.f32.partialorder %v6232_v2, 0.0 }
 0xa23   : > { %v14058_v9 = vadd.f32 %v14055_v57, %v6011_v52  ;;  %v14086_v15 = vadd.f32 %v9304_v54, %v6557_v34  ;;  %v6003_v40 = vmul.f32 0.2, %v5985_v37  ;;  %vm5994_vm3 = vcmp.gt.f32.partialorder %v5985_v37, 0.0 }
 0xa24   : > { %v6259_v52 = vsel %vm6241_vm4, %v6232_v2, %v6250_v27 }
 0xa25   : > { %v6043_v38 = vsel %vm4552_vm10, %v14058_v9, -inf  ;;  %v6591_v19 = vsel %vm4577_vm11, %v14086_v15, -inf  ;;  %v14095_v1 = vadd.f32 %v9302_v59, %v6259_v52  ;;  %v6012_v59 = vsel %vm5994_vm3, %v5985_v37, %v6003_v40 }
 0xa26   : > { %6044 = vmax.xlane.f32.xlu0 %v6043_v38 }
 0xa27   : > { %6583 = vmax.xlane.f32.xlu2 %v6582_v35  ;;  %v6881_v35 = vsel %vm4552_vm10, %v14084_v5, -inf }
 0xa28   : > { %6041 = vmax.xlane.f32.xlu1 %v6040_v22  ;;  %v6815_v46 = vpop.permute.xlu0 %6814 }
 0xa29   : > { %v6826_v44 = vadd.f32 %v13864_v53, %v6815_v46  ;;  %v6529_v53 = vadd.f32 %v13862_v10, %v14008_v41  ;;  %v6289_v10 = vsel %vm4552_vm10, %v14095_v1, -inf  ;;  %v6233_v41 = vadd.f32 %v13860_v17, %v14026_v21 }
 0xa2b   : > { %v6844_v58 = vmul.f32 0.2, %v6826_v44  ;;  %vm6835_vm5 = vcmp.gt.f32.partialorder %v6826_v44, 0.0  ;;  %v6547_v38 = vmul.f32 0.2, %v6529_v53  ;;  %vm6538_vm6 = vcmp.gt.f32.partialorder %v6529_v53, 0.0 }
 0xa2c   : > { %v6251_v46 = vmul.f32 0.2, %v6233_v41  ;;  %vm6242_vm9 = vcmp.gt.f32.partialorder %v6233_v41, 0.0 }
 0xa2d   : > { %v6853_v22 = vsel %vm6835_vm5, %v6826_v44, %v6844_v58  ;;  %v6556_v51 = vsel %vm6538_vm6, %v6529_v53, %v6547_v38 }
 0xa2e   : > { %6296 = vmax.xlane.f32.xlu0 %v6295_v23  ;;  %v14097_v3 = vadd.f32 %v9304_v54, %v6853_v22  ;;  %v14106_v49 = vadd.f32 %v14055_v57, %v6556_v51  ;;  %v6260_v50 = vsel %vm6242_vm9, %v6233_v41, %v6251_v46 }
 0xa2f   : > { %6586 = vmax.xlane.f32.xlu2 %v6585_v33  ;;  %v14108_v33 = vadd.f32 %v9304_v54, %v6012_v59  ;;  %v14115_v21 = vadd.f32 %v14055_v57, %v6260_v50 }
 0xa30   : > { %6885 = vmax.xlane.f32.xlu1 %v6884_v43  ;;  %v6887_v0 = vsel %vm4577_vm11, %v14097_v3, -inf  ;;  %v6588_v2 = vsel %vm4552_vm10, %v14106_v49, -inf }
 0xa31   : > { %v6046_v17 = vsel %vm4577_vm11, %v14108_v33, -inf  ;;  %v6292_v43 = vsel %vm4552_vm10, %v14115_v21, -inf }
 0xa37   : > { %6882 = vmax.xlane.f32.xlu2 %v6881_v35 }
 0xa38   : > { %6592 = vmax.xlane.f32.xlu1 %v6591_v19 }
 0xa3f   : > { %6290 = vmax.xlane.f32.xlu2 %v6289_v10 }
 0xa40   : > { %6888 = vmax.xlane.f32.xlu1 %v6887_v0 }
 0xa47   : > { %6589 = vmax.xlane.f32.xlu2 %v6588_v2 }
 0xa48   : > { %6047 = vmax.xlane.f32.xlu1 %v6046_v17 }
 0xa4f   : > { %6293 = vmax.xlane.f32.xlu2 %v6292_v43 }
 0xa53   : > { %v6569_v44 = vpop.xlane.xlu1 %6568  ;;  %v6865_v23 = vpop.xlane.xlu0 %6864 }
 0xa54   : > { %v6890_v54 = vsub.f32 %v13883_v30, %v6865_v23  ;;  %v6594_v35 = vsub.f32 %v13881_v63, %v6569_v44 }
 0xa56   : > { %v6899_v34 = vmul.f32 1.442695, %v6890_v54  ;;  %v6603_v19 = vmul.f32 1.442695, %v6594_v35 }
 0xa58   : > { %9072 = vpow2.f32 %v6899_v34 }
 0xa5b   : > { %v6868_v27 = vpop.xlane.xlu1 %6867  ;;  %v6273_v18 = vpop.xlane.xlu0 %6272 }
 0xa5c   : > { %v6891_v58 = vsub.f32 %v13897_v20, %v6868_v27  ;;  %v6298_v53 = vsub.f32 %v13899_v8, %v6273_v18 }
 0xa5e   : > { %v6901_v52 = vmul.f32 1.442695, %v6891_v58  ;;  %v6307_v57 = vmul.f32 1.442695, %v6298_v53  ;;  %v9073_v20 = vpop.eup %9072 }
 0xa60   : > { %9074 = vpow2.f32 %v6901_v52 }
 0xa61   : > { %9076 = vpow2.f32 %v6307_v57 }
 0xa62   : > { %v6572_v37 = vpop.xlane.xlu2 %6571  ;;  %9078 = vpow2.f32 %v6603_v19 }
 0xa63   : > { %v6595_v22 = vsub.f32 %v13910_v47, %v6572_v37  ;;  %v6276_v38 = vpop.xlane.xlu1 %6275  ;;  %v6024_v10 = vpop.xlane.xlu0 %6023 }
 0xa64   : > { %v6299_v40 = vsub.f32 %v13914_v13, %v6276_v38  ;;  %v6049_v63 = vsub.f32 %v13916_v62, %v6024_v10  ;;  %v6917_v10 = vsel %vm4552_vm10, %v9073_v20, 0.0 }
 0xa65   : > { %v6605_v30 = vmul.f32 1.442695, %v6595_v22 }
 0xa66   : > { %v9075_v41 = vpop.eup %9074  ;;  %v6309_v8 = vmul.f32 1.442695, %v6299_v40  ;;  %v6058_v46 = vmul.f32 1.442695, %v6049_v63 }
 0xa67   : > { %9080 = vpow2.f32 %v6605_v30  ;;  %v9077_v51 = vpop.eup %9076  ;;  %v6953_v0 = vpack.c.bf16 %v9075_v41, %v9073_v20  ;;  %v6920_v59 = vsel %vm4552_vm10, %v9075_v41, 0.0 }
 0xa68   : > { %9082 = vpow2.f32 %v6309_v8  ;;  %6921 = vadd.xlane.f32.xlu2 %v6920_v59  ;;  %v6325_v47 = vsel %vm4552_vm10, %v9077_v51, 0.0  ;;  %v9079_v62 = vpop.eup %9078 }
 0xa69   : > { %9084 = vpow2.f32 %v6058_v46  ;;  %8493 = vmatmul.msk.bf16.vlgmr.msrb.gmra.mxu3 %vm4552_vm10, %v6953_v0  ;;  %6326 = vadd.xlane.f32.xlu0 %v6325_v47  ;;  %v6621_v18 = vsel %vm4552_vm10, %v9079_v62, 0.0 }
 0xa6a   : > { %v6027_v13 = vpop.xlane.xlu2 %6026 }
 0xa6b   : > { %v6050_v2 = vsub.f32 %v13929_v16, %v6027_v13  ;;  %v6871_v50 = vpop.xlane.xlu1 %6870  ;;  %v6279_v44 = vpop.xlane.xlu0 %6278 }
 0xa6c   : > { %v6300_v58 = vsub.f32 %v13937_v39, %v6279_v44  ;;  %v6892_v39 = vsub.f32 %v13935_v28, %v6871_v50 }
 0xa6d   : > { %v9081_v17 = vpop.eup %9080  ;;  %v6060_v43 = vmul.f32 1.442695, %v6050_v2 }
 0xa6e   : > { %v6657_v23 = vpack.c.bf16 %v9081_v17, %v9079_v62  ;;  %v9083_v54 = vpop.eup %9082  ;;  %v6311_v52 = vmul.f32 1.442695, %v6300_v58  ;;  %v6624_v44 = vsel %vm4552_vm10, %v9081_v17, 0.0 }
 0xa6f   : > { %9086 = vpow2.f32 %v6060_v43  ;;  %v9085_v34 = vpop.eup %9084  ;;  %v6361_v27 = vpack.c.bf16 %v9083_v54, %v9077_v51  ;;  %v6328_v41 = vsel %vm4552_vm10, %v9083_v54, 0.0 }
 0xa70   : > { %8488 = vmatmul.msk.bf16.vlgmr.msra.gmra.mxu2 %vm4552_vm10, %v6657_v23  ;;  %v6076_v35 = vsel %vm4552_vm10, %v9085_v34, 0.0 }
 0xa71   : > { %8483 = vmatmul.msk.bf16.vlgmr.msrb.gmra.mxu0 %vm4552_vm10, %v6361_v27  ;;  %6622 = vadd.xlane.f32.xlu0 %v6621_v18 }
 0xa72   : > { %v6575_v16 = vpop.xlane.xlu2 %6574  ;;  %6077 = vadd.xlane.f32.xlu1 %v6076_v35 }
 0xa73   : > { %v6596_v53 = vsub.f32 %v13948_v48, %v6575_v16  ;;  %v6282_v57 = vpop.xlane.xlu1 %6281  ;;  %v6030_v38 = vpop.xlane.xlu0 %6029  ;;  %v6903_v48 = vmul.f32 1.442695, %v6892_v39 }
 0xa74   : > { %v6301_v22 = vsub.f32 %v13957_v45, %v6282_v57  ;;  %v6051_v46 = vsub.f32 %v13959_v60, %v6030_v38 }
 0xa75   : > { %v9087_v19 = vpop.eup %9086  ;;  %v6607_v37 = vmul.f32 1.442695, %v6596_v53 }
 0xa76   : > { %v6112_v30 = vpack.c.bf16 %v9087_v19, %v9085_v34  ;;  %v6313_v40 = vmul.f32 1.442695, %v6301_v22  ;;  %v6062_v50 = vmul.f32 1.442695, %v6051_v46 }
 0xa77   : > { %9088 = vpow2.f32 %v6607_v37 }
 0xa78   : > { %9090 = vpow2.f32 %v6311_v52  ;;  %8478 = vmatmul.msk.bf16.vlgmr.msrb.gmra.mxu1 %vm4552_vm10, %v6112_v30 }
 0xa79   : > { %9092 = vpow2.f32 %v6313_v40  ;;  %6918 = vadd.xlane.f32.xlu0 %v6917_v10 }
 0xa7a   : > { %v6874_v63 = vpop.xlane.xlu2 %6873  ;;  %6329 = vadd.xlane.f32.xlu1 %v6328_v41  ;;  %9094 = vpow2.f32 %v6903_v48 }
 0xa7b   : > { %v6893_v8 = vsub.f32 %v13973_v25, %v6874_v63  ;;  %v6581_v45 = vpop.xlane.xlu1 %6580  ;;  %v6578_v28 = vpop.xlane.xlu0 %6577  ;;  %v6079_v25 = vsel %vm4552_vm10, %v9087_v19, 0.0 }
 0xa7c   : > { %v6597_v20 = vsub.f32 %v13983_v42, %v6578_v28  ;;  %v6598_v60 = vsub.f32 %v13981_v12, %v6581_v45 }
 0xa7d   : > { %v9089_v51 = vpop.eup %9088  ;;  %v6905_v0 = vmul.f32 1.442695, %v6893_v8 }
 0xa7e   : > { %v9091_v59 = vpop.eup %9090  ;;  %v6627_v47 = vsel %vm4552_vm10, %v9089_v51, 0.0  ;;  %v6609_v2 = vmul.f32 1.442695, %v6597_v20  ;;  %v6611_v52 = vmul.f32 1.442695, %v6598_v60 }
 0xa7f   : > { %v9093_v13 = vpop.eup %9092  ;;  %9096 = vpow2.f32 %v6905_v0  ;;  %6628 = vadd.xlane.f32.xlu2 %v6627_v47 }
 0xa80   : > { %v6362_v62 = vpack.c.bf16 %v9093_v13, %v9091_v59  ;;  %9098 = vpow2.f32 %v6609_v2  ;;  %v9095_v42 = vpop.eup %9094  ;;  %v6334_v41 = vsel %vm4552_vm10, %v9093_v13, 0.0 }
 0xa81   : > { %6080 = vadd.xlane.f32.xlu0 %v6079_v25  ;;  %9100 = vpow2.f32 %v6062_v50  ;;  %v6923_v57 = vsel %vm4552_vm10, %v9095_v42, 0.0 }
 0xa82   : > { %8484 = vmatmul.msk.bf16.gmra.mxu0 %vm4552_vm10, %v6362_v62  ;;  %v6033_v43 = vpop.xlane.xlu2 %6032  ;;  %6625 = vadd.xlane.f32.xlu1 %v6624_v44 }
 0xa83   : > { %v6052_v23 = vsub.f32 %v13994_v14, %v6033_v43  ;;  %v6880_v54 = vpop.xlane.xlu1 %6879  ;;  %v6877_v18 = vpop.xlane.xlu0 %6876 }
 0xa84   : > { %v6895_v58 = vsub.f32 %v13999_v55, %v6880_v54  ;;  %v6894_v53 = vsub.f32 %v14003_v7, %v6877_v18  ;;  %v6331_v55 = vsel %vm4552_vm10, %v9091_v59, 0.0 }
 0xa85   : > { %v9097_v34 = vpop.eup %9096  ;;  %v6064_v27 = vmul.f32 1.442695, %v6052_v23 }
 0xa86   : > { %v6926_v35 = vsel %vm4552_vm10, %v9097_v34, 0.0  ;;  %v6954_v16 = vpack.c.bf16 %v9097_v34, %v9095_v42  ;;  %v9099_v12 = vpop.eup %9098  ;;  %v6909_v17 = vmul.f32 1.442695, %v6895_v58  ;;  %v6907_v14 = vmul.f32 1.442695, %v6894_v53 }
 0xa87   : > { %9102 = vpow2.f32 %v6064_v27  ;;  %6927 = vadd.xlane.f32.xlu2 %v6926_v35  ;;  %v6658_v19 = vpack.c.bf16 %v9099_v12, %v9089_v51  ;;  %v9101_v7 = vpop.eup %9100  ;;  %v6630_v43 = vsel %vm4552_vm10, %v9099_v12, 0.0 }
 0xa88   : > { %8494 = vmatmul.msk.bf16.gmra.mxu3 %vm4552_vm10, %v6954_v16  ;;  %9104 = vpow2.f32 %v6611_v52  ;;  %v6082_v51 = vsel %vm4552_vm10, %v9101_v7, 0.0 }
 0xa89   : > { %6924 = vadd.xlane.f32.xlu0 %v6923_v57  ;;  %8489 = vmatmul.msk.bf16.gmra.mxu2 %vm4552_vm10, %v6658_v19  ;;  %9106 = vpow2.f32 %v6909_v17 }
 0xa8a   : > { %v6285_v37 = vpop.xlane.xlu2 %6284  ;;  %6332 = vadd.xlane.f32.xlu1 %v6331_v55  ;;  %9108 = vpow2.f32 %v6907_v14 }
 0xa8b   : > { %v6302_v22 = vsub.f32 %v14016_v56, %v6285_v37  ;;  %v6288_v38 = vpop.xlane.xlu1 %6287 }
 0xa8c   : > { %v6303_v40 = vsub.f32 %v14018_v29, %v6288_v38 }
 0xa8d   : > { %v9103_v30 = vpop.eup %9102  ;;  %v6315_v39 = vmul.f32 1.442695, %v6302_v22 }
 0xa8e   : > { %v6085_v10 = vsel %vm4552_vm10, %v9103_v30, 0.0  ;;  %v6113_v48 = vpack.c.bf16 %v9103_v30, %v9101_v7  ;;  %v6317_v63 = vmul.f32 1.442695, %v6303_v40  ;;  %v9105_v56 = vpop.eup %9104 }
 0xa8f   : > { %9110 = vpow2.f32 %v6315_v39  ;;  %6086 = vadd.xlane.f32.xlu2 %v6085_v10  ;;  %v9107_v8 = vpop.eup %9106  ;;  %v6633_v20 = vsel %vm4552_vm10, %v9105_v56, 0.0 }
 0xa90   : > { %8479 = vmatmul.msk.bf16.gmra.mxu1 %vm4552_vm10, %v6113_v48  ;;  %9112 = vpow2.f32 %v6317_v63  ;;  %v9109_v0 = vpop.eup %9108  ;;  %v6932_v54 = vsel %vm4552_vm10, %v9107_v8, 0.0 }
 0xa91   : > { %6335 = vadd.xlane.f32.xlu0 %v6334_v41  ;;  %v6955_v2 = vpack.c.bf16 %v9107_v8, %v9109_v0  ;;  %v6929_v50 = vsel %vm4552_vm10, %v9109_v0, 0.0 }
 0xa92   : > { %v6036_v45 = vpop.xlane.xlu2 %6035  ;;  %6083 = vadd.xlane.f32.xlu1 %v6082_v51 }
 0xa93   : > { %v6053_v29 = vsub.f32 %v14029_v31, %v6036_v45  ;;  %v6039_v28 = vpop.xlane.xlu1 %6038 }
 0xa94   : > { %v6054_v47 = vsub.f32 %v14031_v11, %v6039_v28 }
 0xa95   : > { %v9111_v59 = vpop.eup %9110  ;;  %v6066_v46 = vmul.f32 1.442695, %v6053_v29 }
 0xa96   : > { %v9113_v62 = vpop.eup %9112  ;;  %v6068_v13 = vmul.f32 1.442695, %v6054_v47  ;;  %v6337_v16 = vsel %vm4552_vm10, %v9111_v59, 0.0 }
 0xa97   : > { %9114 = vpow2.f32 %v6066_v46  ;;  %6634 = vadd.xlane.f32.xlu2 %v6633_v20  ;;  %v6363_v25 = vpack.c.bf16 %v9113_v62, %v9111_v59  ;;  %v6340_v22 = vsel %vm4552_vm10, %v9113_v62, 0.0 }
 0xa98   : > { %8495 = vmatmul.msk.bf16.gmra.mxu3 %vm4552_vm10, %v6955_v2  ;;  %9116 = vpow2.f32 %v6068_v13 }
 0xa99   : > { %8485 = vmatmul.msk.bf16.gmra.mxu0 %vm4552_vm10, %v6363_v25  ;;  %6930 = vadd.xlane.f32.xlu0 %v6929_v50  ;;  %v6045_v42 = vpop.xlane.xlu0 %6044 }
 0xa9a   : > { %v6584_v31 = vpop.xlane.xlu2 %6583  ;;  %6631 = vadd.xlane.f32.xlu1 %v6630_v43  ;;  %v6056_v18 = vsub.f32 %v14058_v9, %v6045_v42 }
 0xa9b   : > { %v6599_v11 = vsub.f32 %v14041_v26, %v6584_v31  ;;  %v6042_v44 = vpop.xlane.xlu1 %6041 }
 0xa9c   : > { %v6055_v27 = vsub.f32 %v14046_v61, %v6042_v44  ;;  %v6072_v52 = vmul.f32 1.442695, %v6056_v18 }
 0xa9d   : > { %v9115_v60 = vpop.eup %9114  ;;  %v6613_v23 = vmul.f32 1.442695, %v6599_v11 }
 0xa9e   : > { %v9117_v34 = vpop.eup %9116  ;;  %v6088_v58 = vsel %vm4552_vm10, %v9115_v60, 0.0  ;;  %v6070_v53 = vmul.f32 1.442695, %v6055_v27 }
 0xa9f   : > { %9118 = vpow2.f32 %v6613_v23  ;;  %6933 = vadd.xlane.f32.xlu2 %v6932_v54  ;;  %v6114_v35 = vpack.c.bf16 %v9117_v34, %v9115_v60  ;;  %v6091_v41 = vsel %vm4552_vm10, %v9117_v34, 0.0 }
 0xaa0   : > { %9120 = vpow2.f32 %v6070_v53 }
 0xaa1   : > { %8480 = vmatmul.msk.bf16.gmra.mxu1 %vm4552_vm10, %v6114_v35  ;;  %6089 = vadd.xlane.f32.xlu0 %v6088_v58  ;;  %v6297_v61 = vpop.xlane.xlu0 %6296  ;;  %9122 = vpow2.f32 %v6072_v52 }
 0xaa2   : > { %v6587_v26 = vpop.xlane.xlu2 %6586  ;;  %6338 = vadd.xlane.f32.xlu1 %v6337_v16  ;;  %v6306_v9 = vsub.f32 %v14073_v24, %v6297_v61 }
 0xaa3   : > { %v6886_v12 = vpop.xlane.xlu1 %6885  ;;  %v6600_v55 = vsub.f32 %v14065_v6, %v6587_v26 }
 0xaa4   : > { %v6897_v14 = vsub.f32 %v14068_v32, %v6886_v12  ;;  %v6323_v38 = vmul.f32 1.442695, %v6306_v9 }
 0xaa5   : > { %v9119_v17 = vpop.eup %9118  ;;  %v6615_v40 = vmul.f32 1.442695, %v6600_v55 }
 0xaa6   : > { %v6659_v57 = vpack.c.bf16 %v9119_v17, %v9105_v56  ;;  %v6913_v19 = vmul.f32 1.442695, %v6897_v14  ;;  %v6636_v37 = vsel %vm4552_vm10, %v9119_v17, 0.0  ;;  %v14184_v39 = vpop.eup %9120 }
 0xaa7   : > { %v14186_v48 = vpop.eup %9122 }
 0xaa8   : > { %8490 = vmatmul.msk.bf16.gmra.mxu2 %vm4552_vm10, %v6659_v57  ;;  %9124 = vpow2.f32 %v6913_v19  ;;  %v6115_v63 = vpack.c.bf16 %v14186_v48, %v14184_v39 }
 0xaa9   : > { %6341 = vadd.xlane.f32.xlu0 %v6340_v22 }
 0xaaa   : > { %v6883_v7 = vpop.xlane.xlu2 %6882  ;;  %6637 = vadd.xlane.f32.xlu1 %v6636_v37 }
 0xaab   : > { %v6896_v32 = vsub.f32 %v14084_v5, %v6883_v7  ;;  %v6593_v30 = vpop.xlane.xlu1 %6592 }
 0xaac   : > { %v6602_v6 = vsub.f32 %v14086_v15, %v6593_v30 }
 0xaad   : > { %v6911_v10 = vmul.f32 1.442695, %v6896_v32 }
 0xaae   : > { %v9125_v24 = vpop.eup %9124  ;;  %v6619_v45 = vmul.f32 1.442695, %v6602_v6 }
 0xaaf   : > { %9126 = vpow2.f32 %v6911_v10  ;;  %v6938_v56 = vsel %vm4552_vm10, %v9125_v24, 0.0 }
 0xab0   : > { %9128 = vpow2.f32 %v6323_v38 }
 0xab1   : > { %9130 = vpow2.f32 %v6615_v40  ;;  %8481 = vmatmul.msk.bf16.gmra.mxu1 %vm4552_vm10, %v6115_v63  ;;  %6939 = vadd.xlane.f32.xlu0 %v6938_v56 }
 0xab2   : > { %v6291_v5 = vpop.xlane.xlu2 %6290  ;;  %6092 = vadd.xlane.f32.xlu1 %v6091_v41 }
 0xab3   : > { %v6304_v8 = vsub.f32 %v14095_v1, %v6291_v5  ;;  %v6889_v51 = vpop.xlane.xlu1 %6888 }
 0xab4   : > { %v6898_v15 = vsub.f32 %v14097_v3, %v6889_v51 }
 0xab5   : > { %v9127_v0 = vpop.eup %9126  ;;  %v6319_v29 = vmul.f32 1.442695, %v6304_v8 }
 0xab6   : > { %v9129_v28 = vpop.eup %9128  ;;  %v6956_v59 = vpack.c.bf16 %v9125_v24, %v9127_v0  ;;  %v6915_v47 = vmul.f32 1.442695, %v6898_v15  ;;  %v6935_v34 = vsel %vm4552_vm10, %v9127_v0, 0.0 }
 0xab7   : > { %v9131_v46 = vpop.eup %9130  ;;  %9132 = vpow2.f32 %v6319_v29  ;;  %v6349_v20 = vsel %vm4577_vm11, %v9129_v28, 0.0  ;;  %v6365_v17 = vpack.c.bf16 %v9129_v28, %v9129_v28 }
 0xab8   : > { %9134 = vpow2.f32 %v6619_v45  ;;  %8496 = vmatmul.msk.bf16.gmra.mxu3 %vm4552_vm10, %v6956_v59  ;;  %v6639_v1 = vsel %vm4552_vm10, %v9131_v46, 0.0 }
 0xab9   : > { %6350 = vadd.xlane.f32.xlu0 %v6349_v20  ;;  %9136 = vpow2.f32 %v6915_v47 }
 0xaba   : > { %v6590_v2 = vpop.xlane.xlu2 %6589  ;;  %6640 = vadd.xlane.f32.xlu1 %v6639_v1 }
 0xabb   : > { %v6601_v62 = vsub.f32 %v14106_v49, %v6590_v2  ;;  %v6048_v13 = vpop.xlane.xlu1 %6047 }
 0xabc   : > { %v6057_v50 = vsub.f32 %v14108_v33, %v6048_v13 }
 0xabd   : > { %v9133_v25 = vpop.eup %9132  ;;  %v6617_v3 = vmul.f32 1.442695, %v6601_v62 }
 0xabe   : > { %v9135_v31 = vpop.eup %9134  ;;  %v6343_v43 = vsel %vm4552_vm10, %v9133_v25, 0.0  ;;  %v6074_v11 = vmul.f32 1.442695, %v6057_v50 }
 0xabf   : > { %9138 = vpow2.f32 %v6617_v3  ;;  %6344 = vadd.xlane.f32.xlu2 %v6343_v43  ;;  %v6645_v44 = vsel %vm4577_vm11, %v9135_v31, 0.0  ;;  %v9137_v23 = vpop.eup %9136  ;;  %v6661_v52 = vpack.c.bf16 %v9135_v31, %v9135_v31 }
 0xac0   : > { %9140 = vpow2.f32 %v6074_v11  ;;  %v6957_v33 = vpack.c.bf16 %v9137_v23, %v9137_v23  ;;  %v6941_v35 = vsel %vm4577_vm11, %v9137_v23, 0.0 }
 0xac1   : > { %6646 = vadd.xlane.f32.xlu0 %v6645_v44 }
 0xac2   : > { %v6294_v60 = vpop.xlane.xlu2 %6293 }
 0xac3   : > { %v6305_v49 = vsub.f32 %v14115_v21, %v6294_v60 }
 0xac5   : > { %v9139_v42 = vpop.eup %9138  ;;  %v6321_v54 = vmul.f32 1.442695, %v6305_v49 }
 0xac6   : > { %v6660_v27 = vpack.c.bf16 %v9139_v42, %v9131_v46  ;;  %v14205_v58 = vpop.eup %9140  ;;  %v6642_v53 = vsel %vm4552_vm10, %v9139_v42, 0.0 }
 0xac7   : > { %9142 = vpow2.f32 %v6321_v54  ;;  %6936 = vadd.xlane.f32.xlu2 %v6935_v34  ;;  %v6116_v18 = vpack.c.bf16 %v14205_v58, %v14205_v58 }
 0xac8   : > { %8491 = vmatmul.msk.bf16.gmra.mxu2 %vm4552_vm10, %v6660_v27  ;;  %8497 = vmatmul.msk.bf16.gmra.mxu3 %vm4552_vm10, %v6957_v33 }
 0xac9   : > { %8482 = vmatmul.msk.bf16.gmra.mxu1 %vm4552_vm10, %v6116_v18 }
 0xacd   : > { %v9143_v21 = vpop.eup %9142 }
 0xace   : > { %v6346_v26 = vsel %vm4552_vm10, %v9143_v21, 0.0  ;;  %v6364_v16 = vpack.c.bf16 %v9143_v21, %v9133_v25 }
 0xacf   : > { %6942 = vadd.xlane.f32.xlu2 %v6941_v35  ;;  %6347 = vadd.xlane.f32.xlu1 %v6346_v26 }
 0xad0   : > { %8486 = vmatmul.msk.bf16.gmra.mxu0 %vm4552_vm10, %v6364_v16 }
 0xad7   : > { %6643 = vadd.xlane.f32.xlu1 %v6642_v53 }
 0xad8   : > { %8492 = vmatmul.msk.bf16.gmra.mxu2 %vm4552_vm10, %v6661_v52 }
 0xadb   : > { %v6922_v55 = vpop.xlane.xlu2 %6921 }
 0xadc   : > { %v6327_v12 = vpop.xlane.xlu0 %6326 }
 0xadd   : > { %9144 = vrcp.f32 %v6327_v12 }
 0xae0   : > { %8487 = vmatmul.msk.bf16.gmra.mxu0 %vm4552_vm10, %v6365_v17 }
 0xae3   : > { %v9145_v9 = vpop.eup %9144 }
 0xae4   : > { %v6623_v14 = vpop.xlane.xlu0 %6622 }
 0xae5   : > { %v6078_v61 = vpop.xlane.xlu1 %6077 }
 0xaec   : > { %v6919_v57 = vpop.xlane.xlu0 %6918  ;;  %v6999_v38 = vpop.f32.mrf.mxu3 }
 0xaed   : > { %v6330_v19 = vpop.xlane.xlu1 %6329  ;;  %9146 = vrcp.f32 %v6919_v57 }
 0xaee   : > { %9148 = vrcp.f32 %v6078_v61  ;;  %v6407_v37 = vpop.f32.mrf.mxu0 }
 0xaef   : > { %9150 = vrcp.f32 %v6623_v14  ;;  %v6431_v22 = vmul.f32 %v9145_v9, %v6407_v37 }
 0xaf0   : > { %9152 = vrcp.f32 %v6330_v19 }
 0xaf1   : > { %6449 = vrot.lane.b32.xlu0 %v6431_v22, %s9390_s29 }
 0xaf2   : > { %v6629_v8 = vpop.xlane.xlu2 %6628 }
 0xaf3   : > { %v6703_v7 = vpop.f32.mrf.mxu2  ;;  %v9147_v32 = vpop.eup %9146 }
 0xaf4   : > { %v9149_v30 = vpop.eup %9148  ;;  %v7023_v10 = vmul.f32 %v9147_v32, %v6999_v38  ;;  %v6081_v56 = vpop.xlane.xlu0 %6080 }
 0xaf5   : > { %v6147_v40 = vpop.f32.mrf.mxu1  ;;  %v9151_v24 = vpop.eup %9150 }
 0xaf6   : > { %v6171_v6 = vmul.f32 %v9149_v30, %v6147_v40  ;;  %v6626_v63 = vpop.xlane.xlu1 %6625  ;;  %v9153_v5 = vpop.eup %9152  ;;  %7041 = vrot.lane.b32.xlu1 %v7023_v10, %s15272_s23  ;;  %v6727_v45 = vmul.f32 %v9151_v24, %v6703_v7 }
 0xaf7   : > { %v6409_v41 = vpop.f32.mrf.mxu0  ;;  %9154 = vrcp.f32 %v6626_v63  ;;  %v7001_v1 = vpop.f32.mrf.mxu3 }
 0xaf8   : > { %6180 = vst.msk [vmem:[#allocation2] sm:$0xff] %vm4714_vm7, %v6171_v6  ;;  %v6432_v51 = vmul.f32 %v9153_v5, %v6409_v41  ;;  %9156 = vrcp.f32 %v6081_v56 }
 0xaf9   : > { %6745 = vrot.lane.b32.xlu0 %v6727_v45, %s15273_s26  ;;  %9158 = vrcp.f32 %v6922_v55 }
 0xafa   : > { %6451 = vrot.lane.b32.xlu2 %v6432_v51, %s9390_s29  ;;  %v6928_v2 = vpop.xlane.xlu2 %6927 }
 0xafb   : > { %v6705_v0 = vpop.f32.mrf.mxu2 }
 0xafc   : > { %v6925_v47 = vpop.xlane.xlu0 %6924 }
 0xafd   : > { %v9155_v29 = vpop.eup %9154  ;;  %v6149_v15 = vpop.f32.mrf.mxu1 }
 0xafe   : > { %v9157_v28 = vpop.eup %9156  ;;  %v6728_v59 = vmul.f32 %v9155_v29, %v6705_v0  ;;  %v6333_v46 = vpop.xlane.xlu1 %6332 }
 0xaff   : > { %v6172_v20 = vmul.f32 %v9157_v28, %v6149_v15  ;;  %9160 = vrcp.f32 %v6333_v46  ;;  %v6412_v62 = vpop.f32.mrf.mxu0  ;;  %v9159_v13 = vpop.eup %9158 }
 0xb00   : > { %6747 = vrot.lane.b32.xlu1 %v6728_v59, %s15273_s26  ;;  %9162 = vrcp.f32 %v6925_v47  ;;  %v7024_v3 = vmul.f32 %v9159_v13, %v7001_v1 }
 0xb01   : > { %6181 = vst.msk [vmem:[#allocation2 + $0x8] sm:$0xff] %vm4714_vm7, %v6172_v20 }
 0xb02   : > { %v6087_v60 = vpop.xlane.xlu2 %6086 }
 0xb04   : > { %v6336_v31 = vpop.xlane.xlu0 %6335 }
 0xb05   : > { %v9161_v25 = vpop.eup %9160 }
 0xb06   : > { %v6084_v50 = vpop.xlane.xlu1 %6083  ;;  %v6433_v43 = vmul.f32 %v9161_v25, %v6412_v62  ;;  %v9163_v11 = vpop.eup %9162 }
 0xb07   : > { %9164 = vrcp.f32 %v6084_v50  ;;  %v6414_v42 = vpop.f32.mrf.mxu0 }
 0xb08   : > { %9166 = vrcp.f32 %v6336_v31  ;;  %6453 = vrot.lane.b32.xlu2 %v6433_v43, %s9390_s29  ;;  %7043 = vrot.lane.b32.xlu1 %v7024_v3, %s15272_s23 }
 0xb09   : > { %9168 = vrcp.f32 %v6629_v8 }
 0xb0a   : > { %9170 = vrcp.f32 %v6087_v60  ;;  %v6635_v6 = vpop.xlane.xlu2 %6634 }
 0xb0b   : > { %v7004_v44 = vpop.f32.mrf.mxu3 }
 0xb0c   : > { %v7025_v23 = vmul.f32 %v9163_v11, %v7004_v44  ;;  %v6931_v18 = vpop.xlane.xlu0 %6930  ;;  %v6708_v35 = vpop.f32.mrf.mxu2 }
 0xb0d   : > { %v9165_v49 = vpop.eup %9164  ;;  %v6152_v54 = vpop.f32.mrf.mxu1 }
 0xb0e   : > { %v9167_v34 = vpop.eup %9166  ;;  %v6173_v27 = vmul.f32 %v9165_v49, %v6152_v54  ;;  %v6632_v33 = vpop.xlane.xlu1 %6631 }
 0xb0f   : > { %v9169_v21 = vpop.eup %9168  ;;  %v6434_v26 = vmul.f32 %v9167_v34, %v6414_v42  ;;  %9172 = vrcp.f32 %v6632_v33  ;;  %v6097_v34 = vsel %vm4552_vm10, %v14186_v48, 0.0 }
 0xb10   : > { %6182 = vst.msk [vmem:[#allocation2 + $0x10] sm:$0xff] %vm4714_vm7, %v6173_v27  ;;  %v6729_v16 = vmul.f32 %v9169_v21, %v6708_v35  ;;  %7045 = vrot.lane.b32.xlu1 %v7025_v23, %s15272_s23  ;;  %v9171_v53 = vpop.eup %9170 }
 0xb11   : > { %6455 = vrot.lane.b32.xlu0 %v6434_v26, %s9390_s29 }
 0xb12   : > { %6749 = vrot.lane.b32.xlu2 %v6729_v16, %s15273_s26  ;;  %v6934_v59 = vpop.xlane.xlu2 %6933 }
 0xb13   : > { %v7006_v55 = vpop.f32.mrf.mxu3 }
 0xb14   : > { %v6090_v14 = vpop.xlane.xlu0 %6089  ;;  %v6710_v57 = vpop.f32.mrf.mxu2 }
 0xb15   : > { %v6154_v52 = vpop.f32.mrf.mxu1  ;;  %v9173_v61 = vpop.eup %9172 }
 0xb16   : > { %v6174_v12 = vmul.f32 %v9171_v53, %v6154_v52  ;;  %v6339_v17 = vpop.xlane.xlu1 %6338  ;;  %v6730_v19 = vmul.f32 %v9173_v61, %v6710_v57  ;;  %v6417_v9 = vpop.f32.mrf.mxu0 }
 0xb17   : > { %9174 = vrcp.f32 %v6339_v17 }
 0xb18   : > { %9176 = vrcp.f32 %v6928_v2  ;;  %6183 = vst.msk [vmem:[#allocation2 + $0x18] sm:$0xff] %vm4714_vm7, %v6174_v12  ;;  %6751 = vrot.lane.b32.xlu1 %v6730_v19, %s15273_s26 }
 0xb19   : > { %9178 = vrcp.f32 %v6090_v14 }
 0xb1b   : > { %v7009_v8 = vpop.f32.mrf.mxu3 }
 0xb1c   : > { %v6342_v32 = vpop.xlane.xlu0 %6341 }
 0xb1d   : > { %v9175_v37 = vpop.eup %9174  ;;  %9180 = vrcp.f32 %v6342_v32 }
 0xb1e   : > { %v9177_v22 = vpop.eup %9176  ;;  %v6638_v7 = vpop.xlane.xlu1 %6637  ;;  %v6435_v38 = vmul.f32 %v9175_v37, %v6417_v9  ;;  %9182 = vrcp.f32 %v6635_v6 }
 0xb1f   : > { %v9179_v30 = vpop.eup %9178  ;;  %v6157_v40 = vpop.f32.mrf.mxu1  ;;  %v7026_v10 = vmul.f32 %v9177_v22, %v7006_v55  ;;  %v6094_v22 = vsel %vm4552_vm10, %v14184_v39, 0.0 }
 0xb20   : > { %v6175_v24 = vmul.f32 %v9179_v30, %v6157_v40  ;;  %6457 = vrot.lane.b32.xlu0 %v6435_v38, %s9390_s29  ;;  %v6419_v56 = vpop.f32.mrf.mxu0 }
 0xb21   : > { %7047 = vrot.lane.b32.xlu1 %v7026_v10, %s15272_s23 }
 0xb22   : > { %6184 = vst.msk [vmem:[#allocation2 + $0x20] sm:$0xff] %vm4714_vm7, %v6175_v24 }
 0xb23   : > { %v9181_v63 = vpop.eup %9180  ;;  %v7011_v20 = vpop.f32.mrf.mxu3 }
 0xb24   : > { %v6436_v41 = vmul.f32 %v9181_v63, %v6419_v56  ;;  %v9183_v45 = vpop.eup %9182  ;;  %v6940_v23 = vpop.xlane.xlu0 %6939 }
 0xb26   : > { %v6093_v5 = vpop.xlane.xlu1 %6092  ;;  %6459 = vrot.lane.b32.xlu2 %v6436_v41, %s9390_s29 }
 0xb27   : > { %9184 = vrcp.f32 %v6093_v5  ;;  %v6159_v51 = vpop.f32.mrf.mxu1 }
 0xb28   : > { %9186 = vrcp.f32 %v6931_v18 }
 0xb29   : > { %9188 = vrcp.f32 %v6638_v7  ;;  %v8734_v7 = vld [vmem:[%s14538_s16 + $0x38] sm:$0xff] }
 0xb2a   : > { %9190 = vrcp.f32 %v6934_v59  ;;  %7218 = vmatpush.bf16.msra.mxu1 %v8734_v7 }
 0xb2b   : > { %v6713_v0 = vpop.f32.mrf.mxu2 }
 0xb2c   : > { %v6731_v29 = vmul.f32 %v9183_v45, %v6713_v0  ;;  %v6351_v26 = vpop.xlane.xlu0 %6350  ;;  %v8733_v45 = vld [vmem:[%s14538_s16 + $0x30] sm:$0xff]  ;;  %v8732_v0 = vld [vmem:[%s14538_s16 + $0x28] sm:$0xff] }
 0xb2d   : > { %v9185_v15 = vpop.eup %9184 }
 0xb2e   : > { %v6176_v28 = vmul.f32 %v9185_v15, %v6159_v51  ;;  %6753 = vrot.lane.b32.xlu0 %v6731_v29, %s15273_s26  ;;  %v9187_v46 = vpop.eup %9186  ;;  %v6641_v49 = vpop.xlane.xlu1 %6640  ;;  %7219 = vmatpush.bf16.msra.mxu1 %v8733_v45 }
 0xb2f   : > { %v9189_v47 = vpop.eup %9188  ;;  %v7027_v1 = vmul.f32 %v9187_v46, %v7009_v8  ;;  %v14239_v13 = vpop.f32.mrf.mxu1 }
 0xb30   : > { %6185 = vst.msk [vmem:[#allocation2 + $0x28] sm:$0xff] %vm4714_vm7, %v6176_v28  ;;  %v9191_v3 = vpop.eup %9190 }
 0xb31   : > { %v7028_v31 = vmul.f32 %v9191_v3, %v7011_v20  ;;  %v8730_v20 = vld [vmem:[%s14538_s16 + $0x18] sm:$0xff] }
 0xb32   : > { %v6345_v25 = vpop.xlane.xlu2 %6344  ;;  %7220 = vmatpush.bf16.msra.mxu1 %v8732_v0 }
 0xb33   : > { %v6715_v2 = vpop.f32.mrf.mxu2  ;;  %9192 = vrcp.f32 %v6345_v25  ;;  %v8729_v25 = vld [vmem:[%s14538_s16 + $0x10] sm:$0xff] }
 0xb34   : > { %v6732_v62 = vmul.f32 %v9189_v47, %v6715_v2  ;;  %9194 = vrcp.f32 %v6641_v49  ;;  %v6647_v19 = vpop.xlane.xlu0 %6646  ;;  %v8731_v47 = vld [vmem:[%s14538_s16 + $0x20] sm:$0xff] }
 0xb36   : > { %7049 = vrot.lane.b32.xlu0 %v7027_v1, %s15272_s23  ;;  %6755 = vrot.lane.b32.xlu2 %v6732_v62, %s15273_s26 }
 0xb37   : > { %v14244_v43 = vpop.f32.mrf.mxu1  ;;  %7221 = vmatpush.bf16.msra.mxu1 %v8731_v47 }
 0xb39   : > { %v9193_v33 = vpop.eup %9192 }
 0xb3a   : > { %v6937_v11 = vpop.xlane.xlu2 %6936  ;;  %v9195_v17 = vpop.eup %9194 }
 0xb3b   : > { %v7014_v50 = vpop.f32.mrf.mxu3  ;;  %9196 = vrcp.f32 %v6937_v11  ;;  %7222 = vmatpush.bf16.msra.mxu1 %v8730_v20 }
 0xb3e   : > { %7051 = vrot.lane.b32.xlu2 %v7028_v31, %s15272_s23 }
 0xb3f   : > { %7223 = vmatpush.bf16.msra.mxu1 %v8729_v25 }
 0xb41   : > { %v9197_v61 = vpop.eup %9196 }
 0xb42   : > { %v14252_v27 = vpop.xlane.xlu2 %6942  ;;  %v6348_v16 = vpop.xlane.xlu1 %6347  ;;  %v7029_v55 = vmul.f32 %v9197_v61, %v7014_v50  ;;  %v8728_v50 = vld [vmem:[%s14538_s16 + $0x8] sm:$0xff] }
 0xb43   : > { %v7016_v44 = vpop.f32.mrf.mxu3  ;;  %9198 = vrcp.f32 %v6348_v16  ;;  %7224 = vmatpush.bf16.msra.mxu1 %v8728_v50  ;;  %v6100_v16 = vsel %vm4577_vm11, %v14205_v58, 0.0 }
 0xb46   : > { %v14246_v60 = vpop.f32.mrf.mxu1 }
 0xb49   : > { %v9199_v32 = vpop.eup %9198 }
 0xb4a   : > { %v6644_v9 = vpop.xlane.xlu1 %6643 }
 0xb4b   : > { %v6718_v42 = vpop.f32.mrf.mxu2  ;;  %v14248_v54 = vpop.f32.mrf.mxu3  ;;  %6098 = vadd.xlane.f32.xlu1 %v6097_v34  ;;  %9200 = vrcp.f32 %v6644_v9 }
 0xb4c   : > { %v6733_v14 = vmul.f32 %v9195_v17, %v6718_v42  ;;  %9202 = vrcp.f32 %v6940_v23 }
 0xb4d   : > { %v6422_v18 = vpop.f32.mrf.mxu0  ;;  %9204 = vrcp.f32 %v6351_v26 }
 0xb4e   : > { %v6437_v21 = vmul.f32 %v9193_v33, %v6422_v18  ;;  %v6169_v35 = vpop.f32.mrf.mxu1  ;;  %9206 = vrcp.f32 %v6647_v19 }
 0xb4f   : > { %9208 = vrcp.f32 %v14252_v27 }
 0xb50   : > { %6461 = vrot.lane.b32.xlu2 %v6437_v21, %s9390_s29 }
 0xb51   : > { %v9201_v24 = vpop.eup %9200 }
 0xb52   : > { %v9203_v41 = vpop.eup %9202 }
 0xb53   : > { %v6720_v53 = vpop.f32.mrf.mxu2  ;;  %v7021_v52 = vpop.f32.mrf.mxu3  ;;  %v7030_v8 = vmul.f32 %v9203_v41, %v7016_v44 }
 0xb54   : > { %v6452_v12 = vpop.permute.xlu2 %6451  ;;  %v6734_v39 = vmul.f32 %v9201_v24, %v6720_v53  ;;  %v9205_v51 = vpop.eup %9204 }
 0xb55   : > { %6477 = vst.msk [vmem:[#allocation2 + $0x8] sm:$0xff] %vm5012_vm8, %v6452_v12  ;;  %v6424_v48 = vpop.f32.mrf.mxu0  ;;  %v9207_v28 = vpop.eup %9206 }
 0xb56   : > { %v6438_v30 = vmul.f32 %v9199_v32, %v6424_v48  ;;  %v9209_v1 = vpop.eup %9208 }
 0xb57   : > { %v7031_v3 = vmul.f32 %v9209_v1, %v14248_v54  ;;  %v8727_v54 = vld [vmem:[%s14538_s16] sm:$0xff] }
 0xb58   : > { %6757 = vrot.lane.b32.xlu2 %v6733_v14, %s15273_s26  ;;  %7225 = vmatpush.bf16.msra.mxu1 %v8727_v54 }
 0xb5b   : > { %v6723_v57 = vpop.f32.mrf.mxu2 }
 0xb5c   : > { %v6735_v46 = vmul.f32 %v9207_v28, %v6723_v57 }
 0xb5d   : > { %v6427_v37 = vpop.f32.mrf.mxu0 }
 0xb5e   : > { %v6439_v29 = vmul.f32 %v9205_v51, %v6427_v37 }
 0xb60   : > { %6095 = vadd.xlane.f32.xlu0 %v6094_v22  ;;  %7053 = vrot.lane.b32.xlu2 %v7029_v55, %s15272_s23 }
 0xb62   : > { %v6454_v38 = vpop.permute.xlu2 %6453 }
 0xb63   : > { %v6725_v40 = vpop.f32.mrf.mxu2  ;;  %6478 = vst.msk [vmem:[#allocation2 + $0x10] sm:$0xff] %vm5012_vm8, %v6454_v38  ;;  %v6450_v10 = vpop.permute.xlu0 %6449 }
 0xb64   : > { %6476 = vst.msk [vmem:[#allocation2] sm:$0xff] %vm5012_vm8, %v6450_v10  ;;  %6463 = vrot.lane.b32.xlu1 %v6438_v30, %s9390_s29 }
 0xb65   : > { %v6429_v6 = vpop.f32.mrf.mxu0 }
 0xb68   : > { %6759 = vrot.lane.b32.xlu2 %v6734_v39, %s15273_s26  ;;  %v7042_v63 = vpop.permute.xlu1 %7041 }
 0xb6b   : > { %v6746_v56 = vpop.permute.xlu0 %6745 }
 0xb6c   : > { %v6750_v5 = vpop.permute.xlu2 %6749  ;;  %6772 = vst.msk [vmem:[#allocation2] sm:$0xff] %vm5310_vm0, %v6746_v56 }
 0xb6d   : > { %7068 = vst.msk [vmem:[#allocation2] sm:$0xff] %vm5608_vm12, %v7042_v63 }
 0xb6e   : > { %6774 = vst.msk [vmem:[#allocation2 + $0x10] sm:$0xff] %vm5310_vm0, %v6750_v5 }
 0xb70   : > { %7055 = vrot.lane.b32.xlu2 %v7030_v8, %s15272_s23 }
 0xb72   : > { %v6748_v15 = vpop.permute.xlu1 %6747 }
 0xb73   : > { %6773 = vst.msk [vmem:[#allocation2 + $0x8] sm:$0xff] %vm5310_vm0, %v6748_v15 }
 0xb74   : > { %6465 = vrot.lane.b32.xlu0 %v6439_v29, %s9390_s29  ;;  %v7077_v59 = vld [vmem:[#allocation2] sm:$0xff] }
 0xb75   : > { %7329 = vst [vmem:[#allocation2] sm:$0xff] %v13675_v4  ;;  %v7095_v62 = vmul.f32 1.442695, %v7077_v59  ;;  %vm7086_vm4 = vcmp.gt.f32.partialorder %v7077_v59, 0.0 }
 0xb77   : > { %9210 = vpow2.f32 %v7095_v62 }
 0xb78   : > { %6761 = vrot.lane.b32.xlu2 %v6735_v46, %s15273_s26  ;;  %s648_s26 = scalar_lea.vmem [#allocation3], %s647_s0 }
 0xb79   : > { %s7687_s2 = sshll.u32 %s648_s26, 4  ;;  %s7688_s2 = int_to_ptr.vmem [resolvable:$true] %s7687_s2 }
 0xb7a   : > { %v7044_v2 = vpop.permute.xlu1 %7043 }
 0xb7b   : > { %7069 = vst.msk [vmem:[#allocation2 + $0x8] sm:$0xff] %vm5608_vm12, %v7044_v2 }
 0xb7d   : > { %v9211_v42 = vpop.eup %9210 }
 0xb7e   : > { %v8498_v34 = vadd.f32 -1.0, %v9211_v42  ;;  %v8735_v42 = vld [vmem:[%s14539_s17] sm:$0xff] }
 0xb7f   : > { %7286 = vmatpush.bf16.msra.mxu0 %v8735_v42 }
 0xb80   : > { %7057 = vrot.lane.b32.xlu2 %v7031_v3, %s15272_s23  ;;  %v6460_v23 = vpop.permute.xlu2 %6459  ;;  %v7122_v35 = vsel %vm7086_vm4, %v7077_v59, %v8498_v34  ;;  %s7677_s23 = scalar_lea.sflag [#allocation4], %s647_s0 }
 0xb81   : > { %6481 = vst.msk [vmem:[#allocation2 + $0x28] sm:$0xff] %vm5012_vm8, %v6460_v23 }
 0xb82   : > { %v7078_v31 = vld [vmem:[#allocation2 + $0x8] sm:$0xff]  ;;  %v7046_v11 = vpop.permute.xlu1 %7045 }
 0xb83   : > { %v7097_v44 = vmul.f32 1.442695, %v7078_v31  ;;  %7330 = vst [vmem:[#allocation2 + $0x8] sm:$0xff] %v13675_v4  ;;  %v6456_v49 = vpop.permute.xlu0 %6455  ;;  %vm7087_vm5 = vcmp.gt.f32.partialorder %v7078_v31, 0.0 }
 0xb84   : > { %7070 = vst.msk [vmem:[#allocation2 + $0x10] sm:$0xff] %vm5608_vm12, %v7046_v11 }
 0xb85   : > { %9212 = vpow2.f32 %v7097_v44  ;;  %6479 = vst.msk [vmem:[#allocation2 + $0x18] sm:$0xff] %vm5012_vm8, %v6456_v49 }
 0xb8a   : > { %v6752_v21 = vpop.permute.xlu1 %6751 }
 0xb8b   : > { %v9213_v27 = vpop.eup %9212  ;;  %v7079_v33 = vld [vmem:[#allocation2 + $0x10] sm:$0xff]  ;;  %6775 = vst.msk [vmem:[#allocation2 + $0x18] sm:$0xff] %vm5310_vm0, %v6752_v21 }
 0xb8c   : > { %v8499_v18 = vadd.f32 -1.0, %v9213_v27  ;;  %7331 = vst [vmem:[#allocation2 + $0x10] sm:$0xff] %v13675_v4  ;;  %v7099_v48 = vmul.f32 1.442695, %v7079_v33  ;;  %vm7088_vm6 = vcmp.gt.f32.partialorder %v7079_v33, 0.0 }
 0xb8e   : > { %v7123_v26 = vsel %vm7087_vm5, %v7078_v31, %v8499_v18  ;;  %6101 = vadd.xlane.f32.xlu1 %v6100_v16  ;;  %9214 = vpow2.f32 %v7099_v48 }
 0xb8f   : > { %v7149_v53 = vpack.c.bf16 %v7123_v26, %v7122_v35 }
 0xb90   : > { %v6756_v52 = vpop.permute.xlu2 %6755 }
 0xb91   : > { %6777 = vst.msk [vmem:[#allocation2 + $0x28] sm:$0xff] %vm5310_vm0, %v6756_v52  ;;  %7226 = vmatmul.bf16.vlgmr.msra.gmra.mxu1 %v7149_v53 }
 0xb92   : > { %v6458_v12 = vpop.permute.xlu0 %6457 }
 0xb93   : > { %6480 = vst.msk [vmem:[#allocation2 + $0x20] sm:$0xff] %vm5012_vm8, %v6458_v12  ;;  %v7048_v17 = vpop.permute.xlu1 %7047 }
 0xb94   : > { %7071 = vst.msk [vmem:[#allocation2 + $0x18] sm:$0xff] %vm5608_vm12, %v7048_v17  ;;  %v9215_v19 = vpop.eup %9214 }
 0xb95   : > { %v8500_v37 = vadd.f32 -1.0, %v9215_v19 }
 0xb97   : > { %v7124_v7 = vsel %vm7088_vm6, %v7079_v33, %v8500_v37 }
 0xb98   : > { %v7052_v14 = vpop.permute.xlu2 %7051 }
 0xb99   : > { %7073 = vst.msk [vmem:[#allocation2 + $0x28] sm:$0xff] %vm5608_vm12, %v7052_v14 }
 0xb9b   : > { %v7080_v61 = vld [vmem:[#allocation2 + $0x18] sm:$0xff] }
 0xb9c   : > { %v7101_v57 = vmul.f32 1.442695, %v7080_v61  ;;  %7332 = vst [vmem:[#allocation2 + $0x18] sm:$0xff] %v13675_v4  ;;  %vm7089_vm3 = vcmp.gt.f32.partialorder %v7080_v61, 0.0 }
 0xb9e   : > { %9216 = vpow2.f32 %v7101_v57 }
 0xba0   : > { %v6754_v58 = vpop.permute.xlu0 %6753  ;;  %v7082_v9 = vld [vmem:[#allocation2 + $0x28] sm:$0xff] }
 0xba1   : > { %6776 = vst.msk [vmem:[#allocation2 + $0x20] sm:$0xff] %vm5310_vm0, %v6754_v58  ;;  %v7105_v40 = vmul.f32 1.442695, %v7082_v9  ;;  %vm7091_vm9 = vcmp.gt.f32.partialorder %v7082_v9, 0.0 }
 0xba2   : > { %7334 = vst [vmem:[#allocation2 + $0x28] sm:$0xff] %v13675_v4 }
 0xba3   : > { %9218 = vpow2.f32 %v7105_v40 }
 0xba4   : > { %v9217_v55 = vpop.eup %9216 }
 0xba5   : > { %v8501_v22 = vadd.f32 -1.0, %v9217_v55 }
 0xba7   : > { %v7125_v32 = vsel %vm7089_vm3, %v7080_v61, %v8501_v22 }
 0xba8   : > { %v7050_v38 = vpop.permute.xlu0 %7049  ;;  %v7150_v30 = vpack.c.bf16 %v7125_v32, %v7124_v7 }
 0xba9   : > { %7072 = vst.msk [vmem:[#allocation2 + $0x20] sm:$0xff] %vm5608_vm12, %v7050_v38  ;;  %v9219_v39 = vpop.eup %9218 }
 0xbaa   : > { %7231 = vmatmul.bf16.gmra.mxu1 %v7150_v30  ;;  %v6462_v6 = vpop.permute.xlu2 %6461  ;;  %v8503_v63 = vadd.f32 -1.0, %v9219_v39 }
 0xbac   : > { %v7127_v8 = vsel %vm7091_vm9, %v7082_v9, %v8503_v63 }
 0xbb0   : > { %v7081_v10 = vld [vmem:[#allocation2 + $0x20] sm:$0xff] }
 0xbb1   : > { %v7103_v24 = vmul.f32 1.442695, %v7081_v10  ;;  %7333 = vst [vmem:[#allocation2 + $0x20] sm:$0xff] %v13675_v4  ;;  %vm7090_vm4 = vcmp.gt.f32.partialorder %v7081_v10, 0.0 }
 0xbb2   : > { %v6758_v41 = vpop.permute.xlu2 %6757 }
 0xbb3   : > { %9220 = vpow2.f32 %v7103_v24 }
 0xbb9   : > { %v9221_v56 = vpop.eup %9220 }
 0xbba   : > { %v8502_v5 = vadd.f32 -1.0, %v9221_v56  ;;  %v7054_v29 = vpop.permute.xlu2 %7053 }
 0xbbc   : > { %v7126_v45 = vsel %vm7090_vm4, %v7081_v10, %v8502_v5 }
 0xbbd   : > { %v7151_v51 = vpack.c.bf16 %v7127_v8, %v7126_v45  ;;  %v7312_v45 = vld [vmem:[%s14540_s18] sm:$0x1] }
 0xbbe   : > { %v6099_v0 = vpop.xlane.xlu1 %6098 }
 0xbbf   : > { %7236 = vmatmul.bf16.gmra.mxu1 %v7151_v51  ;;  %9222 = vrcp.f32 %v6099_v0 }
 0xbc2   : > { %v6760_v59 = vpop.permute.xlu2 %6759 }
 0xbc5   : > { %v9223_v15 = vpop.eup %9222 }
 0xbc6   : > { %v6178_v28 = vmul.f32 %v9223_v15, %v14244_v43 }
 0xbc8   : > { %6187 = vst.msk [vmem:[#allocation2 + $0x38] sm:$0xff] %vm4714_vm7, %v6178_v28 }
 0xbca   : > { %v7056_v20 = vpop.permute.xlu2 %7055 }
 0xbd2   : > { %v6762_v34 = vpop.permute.xlu2 %6761 }
 0xbd3   : > { %v6096_v46 = vpop.xlane.xlu0 %6095 }
 0xbd4   : > { %9224 = vrcp.f32 %v6096_v46 }
 0xbd6   : > { %v6464_v47 = vpop.permute.xlu1 %6463 }
 0xbd7   : > { %6483 = vst.msk [vmem:[#allocation2 + $0x38] sm:$0xff] %vm5012_vm8, %v6464_v47 }
 0xbd8   : > { %6779 = vst.msk [vmem:[#allocation2 + $0x38] sm:$0xff] %vm5310_vm0, %v6760_v59 }
 0xbd9   : > { %7075 = vst.msk [vmem:[#allocation2 + $0x38] sm:$0xff] %vm5608_vm12, %v7056_v20 }
 0xbda   : > { %v9225_v2 = vpop.eup %9224  ;;  %v7058_v21 = vpop.permute.xlu2 %7057 }
 0xbdb   : > { %v6177_v1 = vmul.f32 %v9225_v2, %v14239_v13 }
 0xbdd   : > { %6186 = vst.msk [vmem:[#allocation2 + $0x30] sm:$0xff] %vm4714_vm7, %v6177_v1 }
 0xbde   : > { %6482 = vst.msk [vmem:[#allocation2 + $0x30] sm:$0xff] %vm5012_vm8, %v6462_v6 }
 0xbdf   : > { %6778 = vst.msk [vmem:[#allocation2 + $0x30] sm:$0xff] %vm5310_vm0, %v6758_v41 }
 0xbe0   : > { %7074 = vst.msk [vmem:[#allocation2 + $0x30] sm:$0xff] %vm5608_vm12, %v7054_v29  ;;  %v7084_v43 = vld [vmem:[#allocation2 + $0x38] sm:$0xff] }
 0xbe1   : > { %v7109_v62 = vmul.f32 1.442695, %v7084_v43  ;;  %7336 = vst [vmem:[#allocation2 + $0x38] sm:$0xff] %v13675_v4  ;;  %vm7093_vm8 = vcmp.gt.f32.partialorder %v7084_v43, 0.0 }
 0xbe3   : > { %9226 = vpow2.f32 %v7109_v62 }
 0xbe6   : > { %v6466_v18 = vpop.permute.xlu0 %6465 }
 0xbe7   : > { %v7083_v25 = vld [vmem:[#allocation2 + $0x30] sm:$0xff] }
 0xbe8   : > { %v7107_v3 = vmul.f32 1.442695, %v7083_v25  ;;  %7335 = vst [vmem:[#allocation2 + $0x30] sm:$0xff] %v13675_v4  ;;  %vm7092_vm5 = vcmp.gt.f32.partialorder %v7083_v25, 0.0 }
 0xbe9   : > { %v9227_v50 = vpop.eup %9226 }
 0xbea   : > { %9228 = vpow2.f32 %v7107_v3  ;;  %v8505_v13 = vadd.f32 -1.0, %v9227_v50 }
 0xbec   : > { %v7129_v23 = vsel %vm7093_vm8, %v7084_v43, %v8505_v13 }
 0xbf0   : > { %v9229_v31 = vpop.eup %9228 }
 0xbf1   : > { %v8504_v11 = vadd.f32 -1.0, %v9229_v31 }
 0xbf3   : > { %v7128_v44 = vsel %vm7092_vm5, %v7083_v25, %v8504_v11 }
 0xbf4   : > { %v7152_v49 = vpack.c.bf16 %v7129_v23, %v7128_v44 }
 0xbf6   : > { %7241 = vmatmul.bf16.gmra.mxu1 %v7152_v49  ;;  %v9306_v49 = vld [vmem:[%s15268_s28 + $0x10] sm:$0xff] }
 0xc01   : > { %v6102_v54 = vpop.xlane.xlu1 %6101 }
 0xc02   : > { %9230 = vrcp.f32 %v6102_v54  ;;  %v9307_v54 = vld [vmem:[%s15268_s28] sm:$0xff] }
 0xc08   : > { %v9231_v27 = vpop.eup %9230 }
 0xc09   : > { %v6179_v33 = vmul.f32 %v9231_v27, %v14246_v60 }
 0xc0b   : > { %6188 = vst.msk [vmem:[#allocation2 + $0x40] sm:$0x1] %vm4723_vm13, %v6179_v33 }
 0xc0c   : > { %6484 = vst.msk [vmem:[#allocation2 + $0x40] sm:$0x1] %vm5021_vm14, %v6466_v18  ;;  %v9308_v18 = vld [vmem:[%s15268_s28 + $0x8] sm:$0xff] }
 0xc0d   : > { %6780 = vst.msk [vmem:[#allocation2 + $0x40] sm:$0x1] %vm5319_vm15, %v6762_v34 }
 0xc0e   : > { %v7227_v35 = vpop.f32.mrf.mxu1  ;;  %7076 = vst.msk [vmem:[#allocation2 + $0x40] sm:$0x1] %vm5617_vm2, %v7058_v21 }
 0xc15   : > { %v7085_v16 = vld [vmem:[#allocation2 + $0x40] sm:$0x1] }
 0xc16   : > { %v7229_v26 = vpop.f32.mrf.mxu1  ;;  %v7111_v52 = vmul.f32 1.442695, %v7085_v16  ;;  %vm7094_vm0 = vcmp.gt.f32.partialorder %v7085_v16, 0.0 }
 0xc17   : > { %v7251_v53 = vpack.c.bf16 %v7229_v26, %v7227_v35 }
 0xc18   : > { %9232 = vpow2.f32 %v7111_v52 }
 0xc19   : > { %8543 = vmatmul.msk.bf16.vlgmr.msra.gmra.mxu0 %vm4714_vm7, %v7251_v53  ;;  %v7265_v8 = vsel %vm4714_vm7, %v7251_v53, 0 }
 0xc1e   : > { %v9233_v12 = vpop.eup %9232 }
 0xc1f   : > { %v8506_v60 = vadd.f32 -1.0, %v9233_v12 }
 0xc21   : > { %v7130_v17 = vsel %vm7094_vm0, %v7085_v16, %v8506_v60  ;;  %v9309_v60 = vld [vmem:[%s15268_s28 + $0x20] sm:$0xff] }
 0xc22   : > { %7139 = vst [vmem:[#allocation2 + $0x40] sm:$0x1] %v7130_v17 }
 0xc27   : > { %v7232_v48 = vpop.f32.mrf.mxu1 }
 0xc29   : > { %v7148_v14 = vld [vmem:[#allocation2 + $0x40] sm:$0x1] }
 0xc2a   : > { %v7153_v61 = vpack.c.bf16 %v7148_v14, %v7148_v14  ;;  %7337 = vst [vmem:[#allocation2 + $0x40] sm:$0x1] %v13675_v4 }
 0xc2c   : > { %7246 = vmatmul.bf16.gmra.mxu1 %v7153_v61 }
 0xc2f   : > { %v7234_v57 = vpop.f32.mrf.mxu1 }
 0xc30   : > { %v7252_v58 = vpack.c.bf16 %v7234_v57, %v7232_v48  ;;  %v9310_v57 = vld [vmem:[%s15268_s28 + $0x28] sm:$0xff] }
 0xc32   : > { %8544 = vmatmul.msk.bf16.gmra.mxu0 %vm4714_vm7, %v7252_v58  ;;  %v7268_v5 = vsel %vm4714_vm7, %v7252_v58, 0 }
 0xc3c   : > { %v7237_v19 = vpop.f32.mrf.mxu1 }
 0xc44   : > { %v7239_v9 = vpop.f32.mrf.mxu1 }
 0xc45   : > { %v7253_v37 = vpack.c.bf16 %v7239_v9, %v7237_v19 }
 0xc47   : > { %8545 = vmatmul.msk.bf16.gmra.mxu0 %vm4714_vm7, %v7253_v37  ;;  %v7271_v56 = vsel %vm4714_vm7, %v7253_v37, 0 }
 0xc73   : > { %v7242_v55 = vpop.f32.mrf.mxu1 }
 0xc7b   : > { %v7244_v22 = vpop.f32.mrf.mxu1 }
 0xc7c   : > { %v7254_v7 = vpack.c.bf16 %v7244_v22, %v7242_v55 }
 0xc7e   : > { %8546 = vmatmul.msk.bf16.gmra.mxu0 %vm4714_vm7, %v7254_v7  ;;  %v7274_v39 = vsel %vm4714_vm7, %v7254_v7, 0 }
 0xc96   : > { %v7288_v32 = vpop.f32.mrf.mxu0 }
 0xc97   : > { %7340 = vperm.xlu2 %8868, %v7288_v32  }
 0xc9e   : > { %v7290_v38 = vpop.f32.mrf.mxu0 }
 0xc9f   : > { %7345 = vperm.xlu0 %8869, %v7290_v38  }
 0xca9   : > { %v7247_v4 = vpop.f32.mrf.mxu1 }
 0xcaa   : > { %v7255_v30 = vpack.c.bf16 %v7247_v4, %v7247_v4  ;;  %v9311_v4 = vld [vmem:[%s15268_s28 + $0x30] sm:$0xff] }
 0xcac   : > { %v7539_v40 = vand.u32 %v7255_v30, %v13129_v36  ;;  %8547 = vmatmul.msk.bf16.gmra.mxu0 %vm4714_vm7, %v7255_v30  ;;  %v7277_v10 = vsel %vm4714_vm7, %v7255_v30, 0 }
 0xcad   : > { %7319 = vmatpush.bf16.xpose.msrb.mxu2 %v7277_v10 }
 0xcae   : > { %7544 = vmatpush.bf16.msra.mxu3 %v7539_v40  ;;  %v9312_v40 = vld [vmem:[%s15268_s28 + $0x18] sm:$0xff] }
 0xcaf   : > { %v7293_v24 = vpop.f32.mrf.mxu0 }
 0xcb0   : > { %7350 = vperm.xlu2 %8868, %v7293_v24  }
 0xcb1   : > { %v7249_v6 = vpop.f32.mrf.mxu1 }
 0xcb2   : > { %7545 = vmatpush.bf16.msra.mxu3 %v7254_v7 }
 0xcb5   : > { %7320 = vmatpush.bf16.xpose.msrb.mxu2 %v7274_v39 }
 0xcb6   : > { %7546 = vmatpush.bf16.msra.mxu3 %v7253_v37 }
 0xcb7   : > { %v7295_v63 = vpop.f32.mrf.mxu0 }
 0xcb8   : > { %7355 = vperm.xlu0 %8869, %v7295_v63  }
 0xcba   : > { %7547 = vmatpush.bf16.msra.mxu3 %v7252_v58 }
 0xcbd   : > { %7321 = vmatpush.bf16.xpose.msrb.mxu2 %v7271_v56 }
 0xcbe   : > { %7548 = vmatpush.bf16.msra.mxu3 %v7251_v53 }
 0xcc4   : > { %v7298_v36 = vpop.f32.mrf.mxu0 }
 0xcc5   : > { %7360 = vperm.xlu2 %8868, %v7298_v36   ;;  %7322 = vmatpush.bf16.xpose.msrb.mxu2 %v7268_v5 }
 0xccc   : > { %v7300_v41 = vpop.f32.mrf.mxu0 }
 0xccd   : > { %7365 = vperm.xlu0 %8869, %v7300_v41   ;;  %7323 = vmatpush.bf16.xpose.msrb.mxu2 %v7265_v8 }
 0xcd4   : > { %8548 = vmatmul.msk.bf16.vlgmr.msrb.gmra.mxu2 %vm4714_vm7, %v7312_v45 }
 0xcf1   : > { %v7341_v28 = vpop.permute.xlu2 %7340 }
 0xcfb   : > { %v7303_v51 = vpop.f32.mrf.mxu0 }
 0xcfc   : > { %7370 = vperm.xlu0 %8869, %v7303_v51  }
 0xd03   : > { %v7305_v0 = vpop.f32.mrf.mxu0 }
 0xd0a   : > { %v7351_v59 = vpop.permute.xlu2 %7350 }
 0xd11   : > { %v7346_v46 = vpop.permute.xlu0 %7345 }
 0xd1f   : > { %v7361_v2 = vpop.permute.xlu2 %7360 }
 0xd29   : > { %v7308_v29 = vpop.f32.mrf.mxu0 }
 0xd2a   : > { %v7356_v1 = vpop.permute.xlu0 %7355 }
 0xd31   : > { %v7310_v15 = vpop.f32.mrf.mxu0 }
 0xd3f   : > { %v7366_v35 = vpop.permute.xlu0 %7365 }
 0xd57   : > { %v7325_v47 = vpop.f32.mrf.mxu2 }
 0xd58   : > { %v14353_v20 = vperm.slane %v7325_v47, 0 }
 0xd5a   : > { %v7386_v43 = vadd.f32 %v14353_v20, %v7351_v59  ;;  %v7384_v62 = vadd.f32 %v14353_v20, %v7341_v28  ;;  %v7385_v25 = vadd.f32 %v14353_v20, %v7346_v46  ;;  %v7388_v3 = vadd.f32 %v14353_v20, %v7361_v2  ;;  %v9313_v59 = vld [vmem:[%s15268_s28 + $0x40] sm:$0x1] }
 0xd5b   : > { %v7389_v12 = vadd.f32 %v14353_v20, %v7366_v35  ;;  %v7387_v55 = vadd.f32 %v14353_v20, %v7356_v1 }
 0xd5c   : > { %vm7395_vm12 = vcmp.gt.f32.partialorder %v7386_v43, 0.0  ;;  %v7404_v50 = vmul.f32 0.2, %v7386_v43  ;;  %vm7393_vm14 = vcmp.gt.f32.partialorder %v7384_v62, 0.0  ;;  %v7402_v13 = vmul.f32 0.2, %v7384_v62 }
 0xd5d   : > { %vm7394_vm15 = vcmp.gt.f32.partialorder %v7385_v25, 0.0  ;;  %v7403_v31 = vmul.f32 0.2, %v7385_v25  ;;  %v7406_v23 = vmul.f32 0.2, %v7388_v3  ;;  %vm7397_vm2 = vcmp.gt.f32.partialorder %v7388_v3, 0.0 }
 0xd5e   : > { %v7413_v11 = vsel %vm7395_vm12, %v7386_v43, %v7404_v50  ;;  %v7411_v44 = vsel %vm7393_vm14, %v7384_v62, %v7402_v13  ;;  %v7407_v48 = vmul.f32 0.2, %v7389_v12  ;;  %vm7398_vm6 = vcmp.gt.f32.partialorder %v7389_v12, 0.0  ;;  %v9314_v50 = vld [vmem:[%s15268_s28 + $0x38] sm:$0xff] }
 0xd5f   : > { %v14362_v42 = vadd.f32 %v9306_v49, %v7413_v11  ;;  %v7420_v34 = vadd.f32 %v9307_v54, %v7411_v44  ;;  %v7412_v27 = vsel %vm7394_vm15, %v7385_v25, %v7403_v31  ;;  %v7327_v33 = vpop.f32.mrf.mxu2  ;;  %v7415_v52 = vsel %vm7397_vm2, %v7388_v3, %v7406_v23 }
 0xd60   : > { %v7421_v21 = vadd.f32 %v9308_v18, %v7412_v27  ;;  %v14378_v17 = vadd.f32 %v9309_v60, %v7415_v52  ;;  %v7416_v61 = vsel %vm7398_vm6, %v7389_v12, %v7407_v48  ;;  %v7405_v7 = vmul.f32 0.2, %v7387_v55 }
 0xd61   : > { %v7435_v26 = vsel %vm4552_vm10, %v14362_v42, -inf  ;;  %v7429_v16 = vsel %vm4552_vm10, %v7420_v34, -inf  ;;  %v14385_v58 = vadd.f32 %v9310_v57, %v7416_v61  ;;  %vm7396_vm9 = vcmp.gt.f32.partialorder %v7387_v55, 0.0 }
 0xd62   : > { %7436 = vmax.xlane.f32.xlu0 %v7435_v26  ;;  %7430 = vmax.xlane.f32.xlu1 %v7429_v16  ;;  %v7432_v53 = vsel %vm4552_vm10, %v7421_v21, -inf  ;;  %v7441_v14 = vsel %vm4552_vm10, %v14378_v17, -inf  ;;  %v7414_v38 = vsel %vm7396_vm9, %v7387_v55, %v7405_v7 }
 0xd63   : > { %7433 = vmax.xlane.f32.xlu2 %v7432_v53  ;;  %v7444_v19 = vsel %vm4552_vm10, %v14385_v58, -inf  ;;  %v7423_v10 = vadd.f32 %v9312_v40, %v7414_v38 }
 0xd65   : > { %v7438_v6 = vsel %vm4552_vm10, %v7423_v10, -inf }
 0xd6a   : > { %7442 = vmax.xlane.f32.xlu0 %v7441_v14 }
 0xd6e   : > { %v7371_v9 = vpop.permute.xlu0 %7370 }
 0xd6f   : > { %v7390_v37 = vadd.f32 %v14353_v20, %v7371_v9 }
 0xd71   : > { %v7408_v22 = vmul.f32 0.2, %v7390_v37  ;;  %vm7399_vm3 = vcmp.gt.f32.partialorder %v7390_v37, 0.0 }
 0xd72   : > { %7445 = vmax.xlane.f32.xlu0 %v7444_v19 }
 0xd73   : > { %v7417_v32 = vsel %vm7399_vm3, %v7390_v37, %v7408_v22 }
 0xd74   : > { %v7426_v30 = vadd.f32 %v9311_v4, %v7417_v32 }
 0xd76   : > { %v7447_v24 = vsel %vm4552_vm10, %v7426_v30, -inf }
 0xd7b   : > { %7380 = vperm.xlu2 %8868, %v7308_v29   ;;  %7375 = vperm.xlu1 %8870, %v7305_v0  }
 0xda4   : > { %7448 = vmax.xlane.f32.xlu2 %v7447_v24 }
 0xda5   : > { %7439 = vmax.xlane.f32.xlu1 %v7438_v6 }
 0xdd5   : > { %v7431_v39 = vpop.xlane.xlu1 %7430  ;;  %v7437_v62 = vpop.xlane.xlu0 %7436 }
 0xdd6   : > { %v7456_v63 = vsub.f32 %v7420_v34, %v7431_v39  ;;  %v7434_v56 = vpop.xlane.xlu2 %7433  ;;  %v7458_v31 = vsub.f32 %v14362_v42, %v7437_v62 }
 0xdd7   : > { %v7457_v36 = vsub.f32 %v7421_v21, %v7434_v56 }
 0xdd8   : > { %v7465_v5 = vmul.f32 1.442695, %v7456_v63  ;;  %v7469_v44 = vmul.f32 1.442695, %v7458_v31  ;;  %v7639_v31 = vld [vmem:[%s14541_s19 + $0x78] sm:$0xff] }
 0xdd9   : > { %v7467_v41 = vmul.f32 1.442695, %v7457_v36  ;;  %7641 = vmatpush.msra.mxu2 %v7639_v31 }
 0xdda   : > { %9234 = vpow2.f32 %v7465_v5 }
 0xddb   : > { %9236 = vpow2.f32 %v7467_v41 }
 0xddc   : > { %9238 = vpow2.f32 %v7469_v44  ;;  %v7637_v44 = vld [vmem:[%s14541_s19 + $0x68] sm:$0xff] }
 0xddd   : > { %v7443_v23 = vpop.xlane.xlu0 %7442 }
 0xdde   : > { %v7381_v8 = vpop.permute.xlu2 %7380 }
 0xddf   : > { %v7392_v45 = vadd.f32 %v14353_v20, %v7381_v8 }
 0xde0   : > { %v9235_v51 = vpop.eup %9234 }
 0xde1   : > { %v9237_v0 = vpop.eup %9236  ;;  %vm7401_vm4 = vcmp.gt.f32.partialorder %v7392_v45, 0.0  ;;  %v7410_v29 = vmul.f32 0.2, %v7392_v45  ;;  %v7483_v49 = vsel %vm4552_vm10, %v9235_v51, 0.0 }
 0xde2   : > { %v7519_v15 = vpack.c.bf16 %v9237_v0, %v9235_v51  ;;  %v7486_v43 = vsel %vm4552_vm10, %v9237_v0, 0.0  ;;  %v9239_v34 = vpop.eup %9238 }
 0xde3   : > { %v7419_v28 = vsel %vm7401_vm4, %v7392_v45, %v7410_v29  ;;  %v7489_v27 = vsel %vm4552_vm10, %v9239_v34, 0.0 }
 0xde4   : > { %8549 = vmatmul.msk.bf16.vlgmr.msra.gmra.mxu3 %vm4552_vm10, %v7519_v15  ;;  %v7428_v46 = vadd.f32 %v9313_v59, %v7419_v28 }
 0xde5   : > { %v7446_v21 = vpop.xlane.xlu0 %7445 }
 0xde6   : > { %v7453_v47 = vsel %vm4577_vm11, %v7428_v46, -inf  ;;  %v7461_v52 = vsub.f32 %v14385_v58, %v7446_v21 }
 0xde7   : > { %7454 = vmax.xlane.f32.xlu1 %v7453_v47 }
 0xde8   : > { %v7475_v60 = vmul.f32 1.442695, %v7461_v52  ;;  %v7627_v52 = vld [vmem:[%s14541_s19 + $0x18] sm:$0xff] }
 0xded   : > { %v7376_v2 = vpop.permute.xlu1 %7375 }
 0xdee   : > { %v7391_v1 = vadd.f32 %v14353_v20, %v7376_v2  ;;  %v7460_v20 = vsub.f32 %v14378_v17, %v7443_v23  ;;  %v7636_v23 = vld [vmem:[%s14541_s19 + $0x60] sm:$0xff] }
 0xdef   : > { %7487 = vadd.xlane.f32.xlu1 %v7486_v43 }
 0xdf0   : > { %vm7400_vm5 = vcmp.gt.f32.partialorder %v7391_v1, 0.0  ;;  %v7409_v25 = vmul.f32 0.2, %v7391_v1  ;;  %v7473_v54 = vmul.f32 1.442695, %v7460_v20  ;;  %v7635_v20 = vld [vmem:[%s14541_s19 + $0x58] sm:$0xff] }
 0xdf2   : > { %v7418_v3 = vsel %vm7400_vm5, %v7391_v1, %v7409_v25  ;;  %9240 = vpow2.f32 %v7473_v54  ;;  %v7634_v54 = vld [vmem:[%s14541_s19 + $0x50] sm:$0xff] }
 0xdf3   : > { %v7427_v13 = vadd.f32 %v9314_v50, %v7418_v3 }
 0xdf5   : > { %v7450_v11 = vsel %vm4552_vm10, %v7427_v13, -inf }
 0xdf6   : > { %7451 = vmax.xlane.f32.xlu0 %v7450_v11  ;;  %v7638_v11 = vld [vmem:[%s14541_s19 + $0x70] sm:$0xff] }
 0xdf7   : > { %7642 = vmatpush.msra.mxu2 %v7638_v11 }
 0xdf8   : > { %v9241_v33 = vpop.eup %9240 }
 0xdf9   : > { %v7495_v42 = vsel %vm4552_vm10, %v9241_v33, 0.0  ;;  %7643 = vmatpush.msra.mxu2 %v7637_v44 }
 0xdfb   : > { %7644 = vmatpush.msra.mxu2 %v7636_v23 }
 0xdfd   : > { %7645 = vmatpush.msra.mxu2 %v7635_v20 }
 0xdfe   : > { %7484 = vadd.xlane.f32.xlu0 %v7483_v49 }
 0xdff   : > { %7646 = vmatpush.msra.mxu2 %v7634_v54 }
 0xe06   : > { %7490 = vadd.xlane.f32.xlu0 %v7489_v27  ;;  %v7632_v27 = vld [vmem:[%s14541_s19 + $0x40] sm:$0xff] }
 0xe0e   : > { %7496 = vadd.xlane.f32.xlu0 %v7495_v42 }
 0xe17   : > { %v7449_v18 = vpop.xlane.xlu2 %7448 }
 0xe18   : > { %v7462_v35 = vsub.f32 %v7426_v30, %v7449_v18  ;;  %v7440_v26 = vpop.xlane.xlu1 %7439  ;;  %v7630_v18 = vld [vmem:[%s14541_s19 + $0x30] sm:$0xff] }
 0xe19   : > { %v7459_v16 = vsub.f32 %v7423_v10, %v7440_v26 }
 0xe1a   : > { %v7477_v53 = vmul.f32 1.442695, %v7462_v35 }
 0xe1b   : > { %v7471_v12 = vmul.f32 1.442695, %v7459_v16  ;;  %v7629_v16 = vld [vmem:[%s14541_s19 + $0x28] sm:$0xff] }
 0xe1c   : > { %9242 = vpow2.f32 %v7477_v53  ;;  %v7628_v53 = vld [vmem:[%s14541_s19 + $0x20] sm:$0xff] }
 0xe1d   : > { %9244 = vpow2.f32 %v7471_v12 }
 0xe1e   : > { %9246 = vpow2.f32 %v7475_v60  ;;  %v7626_v60 = vld [vmem:[%s14541_s19 + $0x10] sm:$0xff] }
 0xe22   : > { %v9243_v17 = vpop.eup %9242 }
 0xe23   : > { %v9245_v48 = vpop.eup %9244  ;;  %v7501_v14 = vsel %vm4552_vm10, %v9243_v17, 0.0 }
 0xe24   : > { %7502 = vadd.xlane.f32.xlu0 %v7501_v14  ;;  %v7492_v61 = vsel %vm4552_vm10, %v9245_v48, 0.0  ;;  %v7520_v57 = vpack.c.bf16 %v9245_v48, %v9239_v34  ;;  %v9247_v19 = vpop.eup %9246  ;;  %v7633_v34 = vld [vmem:[%s14541_s19 + $0x48] sm:$0xff] }
 0xe25   : > { %7493 = vadd.xlane.f32.xlu1 %v7492_v61  ;;  %v7498_v9 = vsel %vm4552_vm10, %v9247_v19, 0.0  ;;  %v7521_v58 = vpack.c.bf16 %v9247_v19, %v9241_v33  ;;  %7647 = vmatpush.msra.mxu2 %v7633_v34  ;;  %v7631_v33 = vld [vmem:[%s14541_s19 + $0x38] sm:$0xff]  ;;  %v7625_v61 = vld [vmem:[%s14541_s19 + $0x8] sm:$0xff] }
 0xe26   : > { %8550 = vmatmul.msk.bf16.gmra.mxu3 %vm4552_vm10, %v7520_v57  ;;  %v7624_v57 = vld [vmem:[%s14541_s19] sm:$0xff] }
 0xe27   : > { %7648 = vmatpush.msra.mxu2 %v7632_v27 }
 0xe29   : > { %7649 = vmatpush.msra.mxu2 %v7631_v33 }
 0xe2b   : > { %7650 = vmatpush.msra.mxu2 %v7630_v18 }
 0xe2d   : > { %7499 = vadd.xlane.f32.xlu1 %v7498_v9  ;;  %7651 = vmatpush.msra.mxu2 %v7629_v16 }
 0xe2f   : > { %7652 = vmatpush.msra.mxu2 %v7628_v53 }
 0xe31   : > { %7653 = vmatpush.msra.mxu2 %v7627_v52 }
 0xe33   : > { %7654 = vmatpush.msra.mxu2 %v7626_v60 }
 0xe35   : > { %7655 = vmatpush.msra.mxu2 %v7625_v61 }
 0xe36   : > { %8551 = vmatmul.msk.bf16.gmra.mxu3 %vm4552_vm10, %v7521_v58 }
 0xe37   : > { %7656 = vmatpush.msra.mxu2 %v7624_v57 }
 0xe5a   : > { %v7455_v37 = vpop.xlane.xlu1 %7454 }
 0xe5b   : > { %v7464_v55 = vsub.f32 %v7428_v46, %v7455_v37 }
 0xe5d   : > { %v7481_v22 = vmul.f32 1.442695, %v7464_v55  ;;  %v9392_v55 = vmov 65.0  }
 0xe5f   : > { %9248 = vpow2.f32 %v7481_v22 }
 0xe62   : > { %v7488_v32 = vpop.xlane.xlu1 %7487 }
 0xe63   : > { %9250 = vrcp.f32 %v7488_v32 }
 0xe65   : > { %v9249_v7 = vpop.eup %9248 }
 0xe66   : > { %v7507_v38 = vsel %vm4577_vm11, %v9249_v7, 0.0  ;;  %v7523_v45 = vpack.c.bf16 %v9249_v7, %v9249_v7 }
 0xe67   : > { %v7550_v4 = vpop.f32.mrf.mxu3  ;;  %7508 = vadd.xlane.f32.xlu2 %v7507_v38 }
 0xe69   : > { %v7452_v30 = vpop.xlane.xlu0 %7451  ;;  %v9251_v24 = vpop.eup %9250 }
 0xe6a   : > { %v7463_v40 = vsub.f32 %v7427_v13, %v7452_v30 }
 0xe6c   : > { %v7479_v10 = vmul.f32 1.442695, %v7463_v40 }
 0xe6e   : > { %9252 = vpow2.f32 %v7479_v10 }
 0xe6f   : > { %v7552_v6 = vpop.f32.mrf.mxu3 }
 0xe70   : > { %v7575_v39 = vmul.f32 %v9251_v24, %v7552_v6 }
 0xe71   : > { %v7485_v63 = vpop.xlane.xlu0 %7484 }
 0xe72   : > { %7584 = vst.msk [vmem:[#allocation2 + $0x8] sm:$0xff] %vm4714_vm7, %v7575_v39  ;;  %9254 = vrcp.f32 %v7485_v63 }
 0xe74   : > { %v9253_v56 = vpop.eup %9252 }
 0xe75   : > { %v7504_v36 = vsel %vm4552_vm10, %v9253_v56, 0.0  ;;  %v7522_v5 = vpack.c.bf16 %v9253_v56, %v9243_v17 }
 0xe76   : > { %7505 = vadd.xlane.f32.xlu1 %v7504_v36 }
 0xe77   : > { %8552 = vmatmul.msk.bf16.gmra.mxu3 %vm4552_vm10, %v7522_v5 }
 0xe78   : > { %v9255_v41 = vpop.eup %9254 }
 0xe79   : > { %v7574_v8 = vmul.f32 %v9255_v41, %v7550_v4  ;;  %v7491_v51 = vpop.xlane.xlu0 %7490  ;;  %v7593_v9 = vld [vmem:[#allocation2 + $0x8] sm:$0xff] }
 0xe7a   : > { %9256 = vrcp.f32 %v7491_v51 }
 0xe7b   : > { %7583 = vst.msk [vmem:[#allocation2] sm:$0xff] %vm4714_vm7, %v7574_v8 }
 0xe80   : > { %v9257_v29 = vpop.eup %9256 }
 0xe81   : > { %v7497_v59 = vpop.xlane.xlu0 %7496 }
 0xe82   : > { %v7592_v19 = vld [vmem:[#allocation2] sm:$0xff] }
 0xe83   : > { %v7601_v37 = vadd.f32 %v7593_v9, %v7592_v19 }
 0xe87   : > { %8553 = vmatmul.msk.bf16.gmra.mxu3 %vm4552_vm10, %v7523_v45 }
 0xe97   : > { %v7503_v49 = vpop.xlane.xlu0 %7502 }
 0xe98   : > { %v7494_v0 = vpop.xlane.xlu1 %7493 }
 0xe99   : > { %9258 = vrcp.f32 %v7494_v0 }
 0xe9a   : > { %9260 = vrcp.f32 %v7497_v59 }
 0xe9f   : > { %v9259_v46 = vpop.eup %9258 }
 0xea0   : > { %v7500_v1 = vpop.xlane.xlu1 %7499  ;;  %v9261_v43 = vpop.eup %9260 }
 0xea1   : > { %9262 = vrcp.f32 %v7500_v1 }
 0xea2   : > { %9264 = vrcp.f32 %v7503_v49 }
 0xea7   : > { %v9263_v3 = vpop.eup %9262 }
 0xea8   : > { %v9265_v21 = vpop.eup %9264 }
 0xea9   : > { %v7555_v15 = vpop.f32.mrf.mxu3 }
 0xeaa   : > { %v7576_v28 = vmul.f32 %v9257_v29, %v7555_v15 }
 0xeac   : > { %7585 = vst.msk [vmem:[#allocation2 + $0x10] sm:$0xff] %vm4714_vm7, %v7576_v28 }
 0xeb1   : > { %v7557_v47 = vpop.f32.mrf.mxu3 }
 0xeb2   : > { %v7577_v2 = vmul.f32 %v9259_v46, %v7557_v47 }
 0xeb3   : > { %v7594_v58 = vld [vmem:[#allocation2 + $0x10] sm:$0xff] }
 0xeb4   : > { %7586 = vst.msk [vmem:[#allocation2 + $0x18] sm:$0xff] %vm4714_vm7, %v7577_v2  ;;  %v7602_v38 = vadd.f32 %v7601_v37, %v7594_v58 }
 0xeb9   : > { %v7560_v62 = vpop.f32.mrf.mxu3 }
 0xeba   : > { %v7578_v25 = vmul.f32 %v9261_v43, %v7560_v62 }
 0xebb   : > { %v7595_v22 = vld [vmem:[#allocation2 + $0x18] sm:$0xff] }
 0xebc   : > { %7587 = vst.msk [vmem:[#allocation2 + $0x20] sm:$0xff] %vm4714_vm7, %v7578_v25  ;;  %v7603_v40 = vadd.f32 %v7602_v38, %v7595_v22 }
 0xec1   : > { %v7562_v50 = vpop.f32.mrf.mxu3 }
 0xec2   : > { %v7579_v13 = vmul.f32 %v9263_v3, %v7562_v50  ;;  %v7640_v3 = vld [vmem:[%s14542_s20] sm:$0x1] }
 0xec3   : > { %v7596_v30 = vld [vmem:[#allocation2 + $0x20] sm:$0xff] }
 0xec4   : > { %7588 = vst.msk [vmem:[#allocation2 + $0x28] sm:$0xff] %vm4714_vm7, %v7579_v13  ;;  %v7604_v6 = vadd.f32 %v7603_v40, %v7596_v30 }
 0xecb   : > { %v7597_v10 = vld [vmem:[#allocation2 + $0x28] sm:$0xff] }
 0xecc   : > { %v7605_v63 = vadd.f32 %v7604_v6, %v7597_v10 }
 0xeda   : > { %v7509_v12 = vpop.xlane.xlu2 %7508 }
 0xee9   : > { %v7506_v42 = vpop.xlane.xlu1 %7505 }
 0xeea   : > { %9266 = vrcp.f32 %v7506_v42 }
 0xeeb   : > { %9268 = vrcp.f32 %v7509_v12 }
 0xeec   : > { %9270 = vrcp.f32 %v9392_v55 }
 0xef0   : > { %v9267_v17 = vpop.eup %9266 }
 0xef1   : > { %v9269_v7 = vpop.eup %9268 }
 0xef2   : > { %v9271_v24 = vpop.eup %9270 }
 0xef3   : > { %v7617_v36 = vmul.f32 65.0, %v9271_v24  ;;  %vm7621_vm10 = vweird.f32 %v9271_v24 }
 0xef5   : > { %v7618_v0 = vsub.f32 1.0, %v7617_v36 }
 0xef7   : > { %v7619_v28 = vmul.f32 %v9271_v24, %v7618_v0 }
 0xef9   : > { %v7620_v47 = vadd.f32 %v9271_v24, %v7619_v28 }
 0xefa   : > { %v7565_v35 = vpop.f32.mrf.mxu3 }
 0xefb   : > { %v7580_v26 = vmul.f32 %v9265_v21, %v7565_v35  ;;  %v7622_v43 = vsel %vm7621_vm10, %v9271_v24, %v7620_v47 }
 0xefd   : > { %7589 = vst.msk [vmem:[#allocation2 + $0x30] sm:$0xff] %vm4714_vm7, %v7580_v26 }
 0xf02   : > { %v7567_v48 = vpop.f32.mrf.mxu3 }
 0xf03   : > { %v7581_v14 = vmul.f32 %v9267_v17, %v7567_v48 }
 0xf04   : > { %v7598_v39 = vld [vmem:[#allocation2 + $0x30] sm:$0xff] }
 0xf05   : > { %7590 = vst.msk [vmem:[#allocation2 + $0x38] sm:$0xff] %vm4714_vm7, %v7581_v14  ;;  %v7606_v41 = vadd.f32 %v7605_v63, %v7598_v39 }
 0xf0a   : > { %v7570_v32 = vpop.f32.mrf.mxu3 }
 0xf0b   : > { %v7582_v4 = vmul.f32 %v9269_v7, %v7570_v32 }
 0xf0c   : > { %v7599_v56 = vld [vmem:[#allocation2 + $0x38] sm:$0xff] }
 0xf0d   : > { %7591 = vst.msk [vmem:[#allocation2 + $0x40] sm:$0x1] %vm4723_vm13, %v7582_v4  ;;  %v7607_v45 = vadd.f32 %v7606_v41, %v7599_v56 }
 0xf12   : > { %v7572_v5 = vpop.f32.mrf.mxu3 }
 0xf14   : > { %v7600_v8 = vld [vmem:[#allocation2 + $0x40] sm:$0x1] }
 0xf15   : > { %v7608_v51 = vsel %vm4139_vm1, %v7600_v8, 0.0  ;;  %vm7661_vm1 = vcmask 73728  }
 0xf16   : > { %v7609_v29 = vadd.f32 %v7608_v51, %v7607_v45 }
 0xf18   : > { %v7610_v15 = vrot.slane %v7609_v29, 4 }
 0xf1a   : > { %v7611_v59 = vadd.f32 %v7610_v15, %v7609_v29 }
 0xf1c   : > { %v7612_v46 = vrot.slane %v7611_v59, 2 }
 0xf1e   : > { %v7613_v2 = vadd.f32 %v7612_v46, %v7611_v59 }
 0xf20   : > { %v7614_v1 = vrot.slane %v7613_v2, 1 }
 0xf22   : > { %v7615_v62 = vadd.f32 %v7614_v1, %v7613_v2 }
 0xf24   : > { %v7623_v25 = vmul.f32 %v7622_v43, %v7615_v62 }
 0xf26   : > { %7657 = vmatmul.f32.vlgmr.msra.gmra.mxu2 %v7623_v25 }
 0xfa9   : > { %v7658_v50 = vpop.f32.mrf.mxu2 }
 0xfaa   : > { %v7659_v13 = vadd.f32 %v7658_v50, %v7640_v3 }
 0xfac   : > { %v7662_v31 = vsel %vm7661_vm1, %v7659_v13, -inf }
 0xfad   : > { %7663 = vmax.xlane.f32.xlu0 %v7662_v31 }
0x1020   : > { %v7664_v11 = vpop.xlane.xlu0 %7663 }
0x1021   : > { %v7665_v44 = vsub.f32 %v7659_v13, %v7664_v11 }
0x1023   : > { %v7666_v23 = vmul.f32 1.442695, %v7665_v44 }
0x1025   : > { %9272 = vpow2.f32 %v7666_v23 }
0x102b   : > { %v9273_v20 = vpop.eup %9272 }
0x102c   : > { %v7668_v49 = vsel %vm7661_vm1, %v9273_v20, 0.0 }
0x102d   : > { %7669 = vadd.xlane.f32.xlu1 %v7668_v49 }
0x10a0   : > { %v7670_v54 = vpop.xlane.xlu1 %7669 }
0x10a1   : > { %9274 = vlog2.f32 %v7670_v54 }
0x10a7   : > { %v9275_v34 = vpop.eup %9274 }
0x10a8   : > { %v7672_v27 = vmul.f32 0.6931472, %v9275_v34 }
0x10aa   : > { %v7673_v33 = vadd.f32 %v7672_v27, %v7664_v11 }
0x10ac   : > { %v7674_v42 = vsub.f32 %v7659_v13, %v7673_v33 }
0x10ae   : > { %7675 = vst.msk [vmem:[%s648_s26] sm:$0x1] %vm7661_vm1, %v7674_v42 }
0x10af   : > { %9342 = shalt.err (!%p9339_p3)
}
0x10b0   : > { %8753 = dma.vmem_to_hbm [thread:$0]  (%p9541_p5), %s7688_s2, 16, %s7690_s1, %s7677_s23  }
0x10b1 PF: > { %s15274_s0 = sld [smem:[#allocation6_spill]]  ;;  %p8759_p4 = scmp.ge.s32.totalorder %s9377_s27, 2 }
0x10b3   : > { %p8756_p7 = pnand %p8759_p4, %p9545_p6 }
0x10b5   : > { %p8757_p8 = pneg %p8756_p7 }
0x10b7   : > { %s7701_s9 = sand.u32 1, %s15274_s0  }
0x10b8   : > { %s7702_s3 = scalar_lea.sflag [#allocation4], %s7701_s9 }
0x10b9   : > { %9360 = dma.done.wait (%p8757_p8), %s7702_s3, 16  }
0x10ba   : > { %9362 = vsyncadd (%p8757_p8), %s7702_s3, 4294967280  ;;  %s15276_s27 = sld [smem:[#allocation8_spill]]  ;;  %s15279_s2 = smov %s9369_s25 }
0x10bb   : > { %s15277_s8 = sld [smem:[#allocation7_spill]] }
0x10bc   : > { %s15278_s26 = sld [smem:[#allocation9_spill]] }
0x10c0   : > { %p31_p9 = scmp.ge.s32.totalorder %s15276_s27, 4  }
0x10c1   : > { %s15280_s25 = smov %s15277_s8 }
0x10c2   :  { %33 = sbr.rel (!%p31_p9) target bundleno = 14 (0xe), region = 139 }
0x10c7   :  { %7707 = vsyncpa [#allocation4], 1 }
0x10c8   :  { %7709 = vsyncpa [#allocation4 + $0x1], 1 }

</bundles_post_ra>
